<compile_context>
chip_gen: v7x
topology: tpu7x:2x2x1
jax: 0.10.0
libtpu: 0.0.40
codegen_flags: <defaults>
</compile_context>

<pallas_src>
import functools

import jax
import jax.numpy as jnp
import numpy as np
from jax.experimental import pallas as pl
from jax.experimental.pallas import tpu as pltpu

_VMEM_LIMIT_BYTES = 48 * 1024 * 1024   # healthy headroom under v7x's 64 MiB VMEM
_TILE_VMEM_BUDGET = 8 * 1024 * 1024    # per-call tile budget used to size block-M


def _round_up(x, m):
    return (x + m - 1) // m * m


def _pick_rows(m, target):
    """Row-block size <= target that is a multiple of 8 (or the full extent)
    and divides m when possible, so no padding copy is required."""
    if m <= target:
        return m
    d = target - (target % 8)
    while d >= 8:
        if m % d == 0:
            return d
        d -= 8
    return max(8, target - (target % 8))   # caller pads m up to a multiple


# ----------------------------------------------------------------------------
# Fused matmul + bias (+ ReLU): the MXU hot path for conv (via im2col) and FC.
# ----------------------------------------------------------------------------
def _matmul_bias_act_kernel(x_ref, w_ref, b_ref, o_ref, *, relu):
    acc = jnp.dot(x_ref[...], w_ref[...], preferred_element_type=jnp.float32)
    acc = acc + b_ref[...]                       # (1, N) f32 broadcasts over rows
    if relu:
        acc = jnp.maximum(acc, 0.0)              # epilogue kept in f32 (v5e-safe)
    o_ref[...] = acc.astype(o_ref.dtype)


def matmul_bias_act(x, w, b, *, relu, out_dtype):
    """act(x @ w + b), tiled over M with a double-buffered Pallas pipeline.
    x:(M,K) bf16, w:(K,N) bf16 (resident across M tiles), b:(N,) f32."""
    M, K = x.shape
    K2, N = w.shape
    assert K == K2, (K, K2)

    # Size block-M from a per-tile VMEM budget: large enough for DMA/roofline
    # efficiency, small enough for every generation (incl. v7x's 64 MiB VMEM).
    target = _TILE_VMEM_BUDGET // (2 * 2 * (K + N))      # bf16, x2 buffers
    target = max(128, min(1024, target))
    tm = _pick_rows(M, target)
    Mp = _round_up(M, tm)
    if Mp != M:
        x = jnp.pad(x, ((0, Mp - M), (0, 0)))

    out = pl.pallas_call(
        functools.partial(_matmul_bias_act_kernel, relu=relu),
        out_shape=jax.ShapeDtypeStruct((Mp, N), out_dtype),
        grid=(Mp // tm,),
        in_specs=[
            pl.BlockSpec((tm, K), lambda i: (i, 0)),     # activation tile (pipelined)
            pl.BlockSpec((K, N), lambda i: (0, 0)),      # weights: resident
            pl.BlockSpec((1, N), lambda i: (0, 0)),      # bias:    resident
        ],
        out_specs=pl.BlockSpec((tm, N), lambda i: (i, 0)),
        compiler_params=pltpu.CompilerParams(
            dimension_semantics=("parallel",),
            vmem_limit_bytes=_VMEM_LIMIT_BYTES),
    )(x, w, b.reshape(1, N).astype(jnp.float32))
    return out if Mp == M else out[:M]


# ----------------------------------------------------------------------------
# 2x2 / stride-2 max pooling as two lane-pairing max kernels.
# ----------------------------------------------------------------------------
def _pair_max_kernel(x_ref, o_ref):
    x = x_ref[...]                               # (rows, 2*half)
    half = o_ref.shape[-1]
    o_ref[...] = jnp.maximum(x[:, :half], x[:, half:])


def _pair_max_lanes(x2d):
    """Rowwise max of the two contiguous halves of the lane dim: (R, 2H)->(R, H)."""
    R, W2 = x2d.shape
    half = W2 // 2
    br = _pick_rows(R, 512)
    Rp = _round_up(R, br)
    if Rp != R:
        x2d = jnp.pad(x2d, ((0, Rp - R), (0, 0)))
    out = pl.pallas_call(
        _pair_max_kernel,
        out_shape=jax.ShapeDtypeStruct((Rp, half), x2d.dtype),
        grid=(Rp // br,),
        in_specs=[pl.BlockSpec((br, W2), lambda i: (i, 0))],
        out_specs=pl.BlockSpec((br, half), lambda i: (i, 0)),
        compiler_params=pltpu.CompilerParams(
            dimension_semantics=("parallel",),
            vmem_limit_bytes=_VMEM_LIMIT_BYTES),
    )(x2d)
    return out if Rp == R else out[:R]


def maxpool2x2_rows(y, n, h, w, c):
    """2x2/stride-2 max pool.  `y` is the conv output as (n*h*w, c) rows in
    (n, h, w) order.  Each stage pairs elements that are adjacent in row-major
    order, so a metadata-only reshape exposes the pair on the lane dimension."""
    ho, wo = h // 2, w // 2
    y = _pair_max_lanes(y.reshape(n * ho, 2 * w * c))    # vertical: image-row pairs
    y = _pair_max_lanes(y.reshape(n * ho * wo, 2 * c))   # horizontal: pixel pairs
    return y                                             # (n*ho*wo, c), NHWC order


# ----------------------------------------------------------------------------
# Plain-JAX glue: im2col (bf16) feeding the Pallas matmul.
# ----------------------------------------------------------------------------
def _im2col(x_nhwc, ksize, pad):
    """(N,H,W,C) -> (N*H*W, ksize*ksize*C) patches, tap order (kh, kw, cin)."""
    N, H, W, C = x_nhwc.shape
    xp = jnp.pad(x_nhwc, ((0, 0), (pad, pad), (pad, pad), (0, 0)))
    cols = [xp[:, kh:kh + H, kw:kw + W, :]
            for kh in range(ksize) for kw in range(ksize)]
    patches = jnp.concatenate(cols, axis=-1)             # (N, H, W, k*k*C)
    return patches.reshape(N * H * W, ksize * ksize * C)
# TODO(synk): build the conv2 patches inside the Pallas kernel (overlapping row
# windows) to avoid materializing the 25x-expanded patch matrix in HBM.


# ----------------------------------------------------------------------------
# Parameters
# ----------------------------------------------------------------------------
def init_params(key):
    """PyTorch-layout, PyTorch-default-like U(-1/sqrt(fan_in), 1/sqrt(fan_in))."""
    ks = jax.random.split(key, 8)

    def u(k, shape, fan_in):
        bound = fan_in ** -0.5
        return jax.random.uniform(k, shape, jnp.float32, -bound, bound)

    return {
        "w1": u(ks[0], (5, 5, 1, 32), 25),               # HWIO
        "b1": u(ks[1], (32,), 25),
        "w2": u(ks[2], (5, 5, 32, 64), 25 * 32),         # HWIO
        "b2": u(ks[3], (64,), 25 * 32),
        # fc1: (in, out) with input features in PyTorch's NCHW flatten order.
        "wf1": u(ks[4], (7 * 7 * 64, 512), 7 * 7 * 64),
        "bf1": u(ks[5], (512,), 7 * 7 * 64),
        "wf2": u(ks[6], (512, 10), 512),
        "bf2": u(ks[7], (10,), 512),
    }


def prepare_params(p):
    """One-time weight massaging (outside the hot path):
       * conv weights -> 2-D (kh*kw*cin, cout) bf16 matmul operands,
       * wf1 rows permuted from NCHW- to NHWC-flatten order (kills the runtime
         transpose before fc1; numerics unchanged),
       * fc2 zero-padded from 10 to 128 output lanes (lane-dense stores)."""
    # NCHW-flatten index for every NHWC-flatten position (h, w, c).
    perm = np.arange(7 * 7 * 64).reshape(64, 7, 7).transpose(1, 2, 0).reshape(-1)
    return {
        "w1": p["w1"].reshape(25 * 1, 32).astype(jnp.bfloat16),
        "b1": p["b1"],
        "w2": p["w2"].reshape(25 * 32, 64).astype(jnp.bfloat16),
        "b2": p["b2"],
        "wf1": p["wf1"][perm, :].astype(jnp.bfloat16),
        "bf1": p["bf1"],
        "wf2": jnp.pad(p["wf2"], ((0, 0), (0, 128 - 10))).astype(jnp.bfloat16),
        "bf2": jnp.pad(p["bf2"], ((0, 128 - 10),)),
    }


# ----------------------------------------------------------------------------
# Model forward (matches Mnist_CNN.forward)
# ----------------------------------------------------------------------------
def mnist_cnn_forward(params, inputs):
    # inputs.view(-1, 1, 28, 28); with a single channel, NCHW and NHWC share
    # the same memory layout, so this is a pure reshape (no data movement).
    x = inputs.reshape(-1, 28, 28, 1).astype(jnp.bfloat16)
    n = x.shape[0]

    # conv1 (5x5, pad 2) + bias + ReLU, then 2x2 max pool.
    y = matmul_bias_act(_im2col(x, 5, 2), params["w1"], params["b1"],
                        relu=True, out_dtype=jnp.bfloat16)         # (n*784, 32)
    y = maxpool2x2_rows(y, n, 28, 28, 32)                           # (n*196, 32)

    # conv2 (5x5, pad 2) + bias + ReLU, then 2x2 max pool.
    x2 = y.reshape(n, 14, 14, 32)
    y = matmul_bias_act(_im2col(x2, 5, 2), params["w2"], params["b2"],
                        relu=True, out_dtype=jnp.bfloat16)          # (n*196, 64)
    y = maxpool2x2_rows(y, n, 14, 14, 64)                           # (n*49, 64)

    # Flatten: rows are already (n, h, w, c); wf1 rows were pre-permuted to
    # NHWC order, so no NCHW transpose is needed (same numerics as .view()).
    xf = y.reshape(n, 7 * 7 * 64)

    h = matmul_bias_act(xf, params["wf1"], params["bf1"],
                        relu=True, out_dtype=jnp.bfloat16)          # (n, 512)
    logits = matmul_bias_act(h, params["wf2"], params["bf2"],
                             relu=False, out_dtype=jnp.float32)     # (n, 128)
    return logits[:, :10]


if __name__ == "__main__":
    key = jax.random.PRNGKey(0)
    pkey, xkey = jax.random.split(key)
    params = prepare_params(init_params(pkey))

    # MNIST-style deterministic example input: batch=2, 1 channel, 28x28.
    x = jax.random.normal(xkey, (2, 1, 28, 28), dtype=jnp.float32)

    out = jax.jit(mnist_cnn_forward)(params, x)
    out = jax.block_until_ready(out)
    assert out.shape == (2, 10) and out.dtype == jnp.float32
    print("KERNEL_OK")
</pallas_src>

<mosaic_0001>
module attributes {stable_mosaic.version = 11 : i64} {
  func.func @_matmul_bias_act_kernel(%arg0: i32, %arg1: memref<784x25xbf16, #tpu.memory_space<vmem>>, %arg2: memref<25x32xbf16, #tpu.memory_space<vmem>>, %arg3: memref<1x32xf32, #tpu.memory_space<vmem>>, %arg4: memref<784x32xbf16, #tpu.memory_space<vmem>>) attributes {dimension_semantics = [#tpu.dimension_semantics<parallel>], iteration_bounds = array<i64: 2>, scalar_prefetch = 0 : i64, scratch_operands = 0 : i64, tpu.core_type = #tpu.core_type<tc>, window_params = [{transform_indices = @transform_0, window_bounds = array<i64: 784, 25>}, {pipeline_mode = #tpu.pipeline_mode<synchronous>, transform_indices = @transform_1, window_bounds = array<i64: 25, 32>}, {pipeline_mode = #tpu.pipeline_mode<synchronous>, transform_indices = @transform_2, window_bounds = array<i64: 1, 32>}, {transform_indices = @transform_3, window_bounds = array<i64: 784, 32>}]} {
    %c0 = arith.constant 0 : index
    %c0_0 = arith.constant 0 : index
    %0 = vector.load %arg1[%c0, %c0_0] : memref<784x25xbf16, #tpu.memory_space<vmem>>, vector<784x25xbf16>
    %c0_1 = arith.constant 0 : index
    %c0_2 = arith.constant 0 : index
    %1 = vector.load %arg2[%c0_1, %c0_2] : memref<25x32xbf16, #tpu.memory_space<vmem>>, vector<25x32xbf16>
    %cst = arith.constant dense<0.000000e+00> : vector<784x32xf32>
    %2 = tpu.matmul %0, %1, %cst {dimension_numbers = #tpu.dot_dimension_numbers<[1], [0], [0], [1], [0, 0, 1, 1], [], []>} : vector<784x25xbf16>, vector<25x32xbf16>, vector<784x32xf32> -> vector<784x32xf32>
    %c0_3 = arith.constant 0 : index
    %c0_4 = arith.constant 0 : index
    %3 = vector.load %arg3[%c0_3, %c0_4] : memref<1x32xf32, #tpu.memory_space<vmem>>, vector<1x32xf32>
    %4 = vector.broadcast %3 : vector<1x32xf32> to vector<784x32xf32>
    %5 = arith.addf %2, %4 : vector<784x32xf32>
    %cst_5 = arith.constant 0.000000e+00 : f32
    %6 = vector.broadcast %cst_5 : f32 to vector<784x32xf32>
    %7 = arith.maximumf %5, %6 : vector<784x32xf32>
    %8 = arith.truncf %7 : vector<784x32xf32> to vector<784x32xbf16>
    %c0_6 = arith.constant 0 : index
    %c0_7 = arith.constant 0 : index
    %9 = vector.load %arg4[%c0_6, %c0_7] : memref<784x32xbf16, #tpu.memory_space<vmem>>, vector<784x32xbf16>
    tpu.vector_store %arg4[%c0_6, %c0_7], %8 {strides = array<i32>} : memref<784x32xbf16, #tpu.memory_space<vmem>>, vector<784x32xbf16>,
    return
  }
  func.func @transform_0(%arg0: i32) -> (i32, i32) {
    %c0_i32 = arith.constant 0 : i32
    %c0_i32_0 = arith.constant 0 : i32
    return %arg0, %c0_i32 : i32, i32
  }
  func.func @transform_1(%arg0: i32) -> (i32, i32) {
    %c0_i32 = arith.constant 0 : i32
    %c0_i32_0 = arith.constant 0 : i32
    %c0_i32_1 = arith.constant 0 : i32
    return %c0_i32, %c0_i32_0 : i32, i32
  }
  func.func @transform_2(%arg0: i32) -> (i32, i32) {
    %c0_i32 = arith.constant 0 : i32
    %c0_i32_0 = arith.constant 0 : i32
    %c0_i32_1 = arith.constant 0 : i32
    return %c0_i32, %c0_i32_0 : i32, i32
  }
  func.func @transform_3(%arg0: i32) -> (i32, i32) {
    %c0_i32 = arith.constant 0 : i32
    %c0_i32_0 = arith.constant 0 : i32
    return %arg0, %c0_i32 : i32, i32
  }
}

module attributes {stable_mosaic.version = 11 : i64} {
  func.func @_pair_max_kernel(%arg0: i32, %arg1: memref<28x1792xbf16, #tpu.memory_space<vmem>>, %arg2: memref<28x896xbf16, #tpu.memory_space<vmem>>) attributes {dimension_semantics = [#tpu.dimension_semantics<parallel>], iteration_bounds = array<i64: 1>, scalar_prefetch = 0 : i64, scratch_operands = 0 : i64, tpu.core_type = #tpu.core_type<tc>, window_params = [{transform_indices = @transform_0, window_bounds = array<i64: 28, 1792>}, {transform_indices = @transform_1, window_bounds = array<i64: 28, 896>}]} {
    %c0 = arith.constant 0 : index
    %c0_0 = arith.constant 0 : index
    %0 = vector.load %arg1[%c0, %c0_0] : memref<28x1792xbf16, #tpu.memory_space<vmem>>, vector<28x1792xbf16>
    %1 = vector.extract_strided_slice %0 {offsets = [0, 0], sizes = [28, 896], strides = [1, 1]} : vector<28x1792xbf16> to vector<28x896xbf16>
    %2 = vector.extract_strided_slice %0 {offsets = [0, 896], sizes = [28, 896], strides = [1, 1]} : vector<28x1792xbf16> to vector<28x896xbf16>
    %3 = arith.maximumf %1, %2 : vector<28x896xbf16>
    %c0_1 = arith.constant 0 : index
    %c0_2 = arith.constant 0 : index
    %4 = vector.load %arg2[%c0_1, %c0_2] : memref<28x896xbf16, #tpu.memory_space<vmem>>, vector<28x896xbf16>
    tpu.vector_store %arg2[%c0_1, %c0_2], %3 {strides = array<i32>} : memref<28x896xbf16, #tpu.memory_space<vmem>>, vector<28x896xbf16>,
    return
  }
  func.func @transform_0(%arg0: i32) -> (i32, i32) {
    %c0_i32 = arith.constant 0 : i32
    %c0_i32_0 = arith.constant 0 : i32
    return %arg0, %c0_i32 : i32, i32
  }
  func.func @transform_1(%arg0: i32) -> (i32, i32) {
    %c0_i32 = arith.constant 0 : i32
    %c0_i32_0 = arith.constant 0 : i32
    return %arg0, %c0_i32 : i32, i32
  }
}

module attributes {stable_mosaic.version = 11 : i64} {
  func.func @_pair_max_kernel(%arg0: i32, %arg1: memref<392x64xbf16, #tpu.memory_space<vmem>>, %arg2: memref<392x32xbf16, #tpu.memory_space<vmem>>) attributes {dimension_semantics = [#tpu.dimension_semantics<parallel>], iteration_bounds = array<i64: 1>, scalar_prefetch = 0 : i64, scratch_operands = 0 : i64, tpu.core_type = #tpu.core_type<tc>, window_params = [{transform_indices = @transform_0, window_bounds = array<i64: 392, 64>}, {transform_indices = @transform_1, window_bounds = array<i64: 392, 32>}]} {
    %c0 = arith.constant 0 : index
    %c0_0 = arith.constant 0 : index
    %0 = vector.load %arg1[%c0, %c0_0] : memref<392x64xbf16, #tpu.memory_space<vmem>>, vector<392x64xbf16>
    %1 = vector.extract_strided_slice %0 {offsets = [0, 0], sizes = [392, 32], strides = [1, 1]} : vector<392x64xbf16> to vector<392x32xbf16>
    %2 = vector.extract_strided_slice %0 {offsets = [0, 32], sizes = [392, 32], strides = [1, 1]} : vector<392x64xbf16> to vector<392x32xbf16>
    %3 = arith.maximumf %1, %2 : vector<392x32xbf16>
    %c0_1 = arith.constant 0 : index
    %c0_2 = arith.constant 0 : index
    %4 = vector.load %arg2[%c0_1, %c0_2] : memref<392x32xbf16, #tpu.memory_space<vmem>>, vector<392x32xbf16>
    tpu.vector_store %arg2[%c0_1, %c0_2], %3 {strides = array<i32>} : memref<392x32xbf16, #tpu.memory_space<vmem>>, vector<392x32xbf16>,
    return
  }
  func.func @transform_0(%arg0: i32) -> (i32, i32) {
    %c0_i32 = arith.constant 0 : i32
    %c0_i32_0 = arith.constant 0 : i32
    return %arg0, %c0_i32 : i32, i32
  }
  func.func @transform_1(%arg0: i32) -> (i32, i32) {
    %c0_i32 = arith.constant 0 : i32
    %c0_i32_0 = arith.constant 0 : i32
    return %arg0, %c0_i32 : i32, i32
  }
}

module attributes {stable_mosaic.version = 11 : i64} {
  func.func @_matmul_bias_act_kernel(%arg0: i32, %arg1: memref<392x800xbf16, #tpu.memory_space<vmem>>, %arg2: memref<800x64xbf16, #tpu.memory_space<vmem>>, %arg3: memref<1x64xf32, #tpu.memory_space<vmem>>, %arg4: memref<392x64xbf16, #tpu.memory_space<vmem>>) attributes {dimension_semantics = [#tpu.dimension_semantics<parallel>], iteration_bounds = array<i64: 1>, scalar_prefetch = 0 : i64, scratch_operands = 0 : i64, tpu.core_type = #tpu.core_type<tc>, window_params = [{transform_indices = @transform_0, window_bounds = array<i64: 392, 800>}, {pipeline_mode = #tpu.pipeline_mode<synchronous>, transform_indices = @transform_1, window_bounds = array<i64: 800, 64>}, {pipeline_mode = #tpu.pipeline_mode<synchronous>, transform_indices = @transform_2, window_bounds = array<i64: 1, 64>}, {transform_indices = @transform_3, window_bounds = array<i64: 392, 64>}]} {
    %c0 = arith.constant 0 : index
    %c0_0 = arith.constant 0 : index
    %0 = vector.load %arg1[%c0, %c0_0] : memref<392x800xbf16, #tpu.memory_space<vmem>>, vector<392x800xbf16>
    %c0_1 = arith.constant 0 : index
    %c0_2 = arith.constant 0 : index
    %1 = vector.load %arg2[%c0_1, %c0_2] : memref<800x64xbf16, #tpu.memory_space<vmem>>, vector<800x64xbf16>
    %cst = arith.constant dense<0.000000e+00> : vector<392x64xf32>
    %2 = tpu.matmul %0, %1, %cst {dimension_numbers = #tpu.dot_dimension_numbers<[1], [0], [0], [1], [0, 0, 1, 1], [], []>} : vector<392x800xbf16>, vector<800x64xbf16>, vector<392x64xf32> -> vector<392x64xf32>
    %c0_3 = arith.constant 0 : index
    %c0_4 = arith.constant 0 : index
    %3 = vector.load %arg3[%c0_3, %c0_4] : memref<1x64xf32, #tpu.memory_space<vmem>>, vector<1x64xf32>
    %4 = vector.broadcast %3 : vector<1x64xf32> to vector<392x64xf32>
    %5 = arith.addf %2, %4 : vector<392x64xf32>
    %cst_5 = arith.constant 0.000000e+00 : f32
    %6 = vector.broadcast %cst_5 : f32 to vector<392x64xf32>
    %7 = arith.maximumf %5, %6 : vector<392x64xf32>
    %8 = arith.truncf %7 : vector<392x64xf32> to vector<392x64xbf16>
    %c0_6 = arith.constant 0 : index
    %c0_7 = arith.constant 0 : index
    %9 = vector.load %arg4[%c0_6, %c0_7] : memref<392x64xbf16, #tpu.memory_space<vmem>>, vector<392x64xbf16>
    tpu.vector_store %arg4[%c0_6, %c0_7], %8 {strides = array<i32>} : memref<392x64xbf16, #tpu.memory_space<vmem>>, vector<392x64xbf16>,
    return
  }
  func.func @transform_0(%arg0: i32) -> (i32, i32) {
    %c0_i32 = arith.constant 0 : i32
    %c0_i32_0 = arith.constant 0 : i32
    return %arg0, %c0_i32 : i32, i32
  }
  func.func @transform_1(%arg0: i32) -> (i32, i32) {
    %c0_i32 = arith.constant 0 : i32
    %c0_i32_0 = arith.constant 0 : i32
    %c0_i32_1 = arith.constant 0 : i32
    return %c0_i32, %c0_i32_0 : i32, i32
  }
  func.func @transform_2(%arg0: i32) -> (i32, i32) {
    %c0_i32 = arith.constant 0 : i32
    %c0_i32_0 = arith.constant 0 : i32
    %c0_i32_1 = arith.constant 0 : i32
    return %c0_i32, %c0_i32_0 : i32, i32
  }
  func.func @transform_3(%arg0: i32) -> (i32, i32) {
    %c0_i32 = arith.constant 0 : i32
    %c0_i32_0 = arith.constant 0 : i32
    return %arg0, %c0_i32 : i32, i32
  }
}

module attributes {stable_mosaic.version = 11 : i64} {
  func.func @_pair_max_kernel(%arg0: i32, %arg1: memref<14x1792xbf16, #tpu.memory_space<vmem>>, %arg2: memref<14x896xbf16, #tpu.memory_space<vmem>>) attributes {dimension_semantics = [#tpu.dimension_semantics<parallel>], iteration_bounds = array<i64: 1>, scalar_prefetch = 0 : i64, scratch_operands = 0 : i64, tpu.core_type = #tpu.core_type<tc>, window_params = [{transform_indices = @transform_0, window_bounds = array<i64: 14, 1792>}, {transform_indices = @transform_1, window_bounds = array<i64: 14, 896>}]} {
    %c0 = arith.constant 0 : index
    %c0_0 = arith.constant 0 : index
    %0 = vector.load %arg1[%c0, %c0_0] : memref<14x1792xbf16, #tpu.memory_space<vmem>>, vector<14x1792xbf16>
    %1 = vector.extract_strided_slice %0 {offsets = [0, 0], sizes = [14, 896], strides = [1, 1]} : vector<14x1792xbf16> to vector<14x896xbf16>
    %2 = vector.extract_strided_slice %0 {offsets = [0, 896], sizes = [14, 896], strides = [1, 1]} : vector<14x1792xbf16> to vector<14x896xbf16>
    %3 = arith.maximumf %1, %2 : vector<14x896xbf16>
    %c0_1 = arith.constant 0 : index
    %c0_2 = arith.constant 0 : index
    %4 = vector.load %arg2[%c0_1, %c0_2] : memref<14x896xbf16, #tpu.memory_space<vmem>>, vector<14x896xbf16>
    tpu.vector_store %arg2[%c0_1, %c0_2], %3 {strides = array<i32>} : memref<14x896xbf16, #tpu.memory_space<vmem>>, vector<14x896xbf16>,
    return
  }
  func.func @transform_0(%arg0: i32) -> (i32, i32) {
    %c0_i32 = arith.constant 0 : i32
    %c0_i32_0 = arith.constant 0 : i32
    return %arg0, %c0_i32 : i32, i32
  }
  func.func @transform_1(%arg0: i32) -> (i32, i32) {
    %c0_i32 = arith.constant 0 : i32
    %c0_i32_0 = arith.constant 0 : i32
    return %arg0, %c0_i32 : i32, i32
  }
}

module attributes {stable_mosaic.version = 11 : i64} {
  func.func @_pair_max_kernel(%arg0: i32, %arg1: memref<98x128xbf16, #tpu.memory_space<vmem>>, %arg2: memref<98x64xbf16, #tpu.memory_space<vmem>>) attributes {dimension_semantics = [#tpu.dimension_semantics<parallel>], iteration_bounds = array<i64: 1>, scalar_prefetch = 0 : i64, scratch_operands = 0 : i64, tpu.core_type = #tpu.core_type<tc>, window_params = [{transform_indices = @transform_0, window_bounds = array<i64: 98, 128>}, {transform_indices = @transform_1, window_bounds = array<i64: 98, 64>}]} {
    %c0 = arith.constant 0 : index
    %c0_0 = arith.constant 0 : index
    %0 = vector.load %arg1[%c0, %c0_0] : memref<98x128xbf16, #tpu.memory_space<vmem>>, vector<98x128xbf16>
    %1 = vector.extract_strided_slice %0 {offsets = [0, 0], sizes = [98, 64], strides = [1, 1]} : vector<98x128xbf16> to vector<98x64xbf16>
    %2 = vector.extract_strided_slice %0 {offsets = [0, 64], sizes = [98, 64], strides = [1, 1]} : vector<98x128xbf16> to vector<98x64xbf16>
    %3 = arith.maximumf %1, %2 : vector<98x64xbf16>
    %c0_1 = arith.constant 0 : index
    %c0_2 = arith.constant 0 : index
    %4 = vector.load %arg2[%c0_1, %c0_2] : memref<98x64xbf16, #tpu.memory_space<vmem>>, vector<98x64xbf16>
    tpu.vector_store %arg2[%c0_1, %c0_2], %3 {strides = array<i32>} : memref<98x64xbf16, #tpu.memory_space<vmem>>, vector<98x64xbf16>,
    return
  }
  func.func @transform_0(%arg0: i32) -> (i32, i32) {
    %c0_i32 = arith.constant 0 : i32
    %c0_i32_0 = arith.constant 0 : i32
    return %arg0, %c0_i32 : i32, i32
  }
  func.func @transform_1(%arg0: i32) -> (i32, i32) {
    %c0_i32 = arith.constant 0 : i32
    %c0_i32_0 = arith.constant 0 : i32
    return %arg0, %c0_i32 : i32, i32
  }
}

module attributes {stable_mosaic.version = 11 : i64} {
  func.func @_matmul_bias_act_kernel(%arg0: i32, %arg1: memref<2x3136xbf16, #tpu.memory_space<vmem>>, %arg2: memref<3136x512xbf16, #tpu.memory_space<vmem>>, %arg3: memref<1x512xf32, #tpu.memory_space<vmem>>, %arg4: memref<2x512xbf16, #tpu.memory_space<vmem>>) attributes {dimension_semantics = [#tpu.dimension_semantics<parallel>], iteration_bounds = array<i64: 1>, scalar_prefetch = 0 : i64, scratch_operands = 0 : i64, tpu.core_type = #tpu.core_type<tc>, window_params = [{transform_indices = @transform_0, window_bounds = array<i64: 2, 3136>}, {pipeline_mode = #tpu.pipeline_mode<synchronous>, transform_indices = @transform_1, window_bounds = array<i64: 3136, 512>}, {pipeline_mode = #tpu.pipeline_mode<synchronous>, transform_indices = @transform_2, window_bounds = array<i64: 1, 512>}, {transform_indices = @transform_3, window_bounds = array<i64: 2, 512>}]} {
    %c0 = arith.constant 0 : index
    %c0_0 = arith.constant 0 : index
    %0 = vector.load %arg1[%c0, %c0_0] : memref<2x3136xbf16, #tpu.memory_space<vmem>>, vector<2x3136xbf16>
    %c0_1 = arith.constant 0 : index
    %c0_2 = arith.constant 0 : index
    %1 = vector.load %arg2[%c0_1, %c0_2] : memref<3136x512xbf16, #tpu.memory_space<vmem>>, vector<3136x512xbf16>
    %cst = arith.constant dense<0.000000e+00> : vector<2x512xf32>
    %2 = tpu.matmul %0, %1, %cst {dimension_numbers = #tpu.dot_dimension_numbers<[1], [0], [0], [1], [0, 0, 1, 1], [], []>} : vector<2x3136xbf16>, vector<3136x512xbf16>, vector<2x512xf32> -> vector<2x512xf32>
    %c0_3 = arith.constant 0 : index
    %c0_4 = arith.constant 0 : index
    %3 = vector.load %arg3[%c0_3, %c0_4] : memref<1x512xf32, #tpu.memory_space<vmem>>, vector<1x512xf32>
    %4 = vector.broadcast %3 : vector<1x512xf32> to vector<2x512xf32>
    %5 = arith.addf %2, %4 : vector<2x512xf32>
    %cst_5 = arith.constant 0.000000e+00 : f32
    %6 = vector.broadcast %cst_5 : f32 to vector<2x512xf32>
    %7 = arith.maximumf %5, %6 : vector<2x512xf32>
    %8 = arith.truncf %7 : vector<2x512xf32> to vector<2x512xbf16>
    %c0_6 = arith.constant 0 : index
    %c0_7 = arith.constant 0 : index
    %9 = vector.load %arg4[%c0_6, %c0_7] : memref<2x512xbf16, #tpu.memory_space<vmem>>, vector<2x512xbf16>
    tpu.vector_store %arg4[%c0_6, %c0_7], %8 {strides = array<i32>} : memref<2x512xbf16, #tpu.memory_space<vmem>>, vector<2x512xbf16>,
    return
  }
  func.func @transform_0(%arg0: i32) -> (i32, i32) {
    %c0_i32 = arith.constant 0 : i32
    %c0_i32_0 = arith.constant 0 : i32
    return %arg0, %c0_i32 : i32, i32
  }
  func.func @transform_1(%arg0: i32) -> (i32, i32) {
    %c0_i32 = arith.constant 0 : i32
    %c0_i32_0 = arith.constant 0 : i32
    %c0_i32_1 = arith.constant 0 : i32
    return %c0_i32, %c0_i32_0 : i32, i32
  }
  func.func @transform_2(%arg0: i32) -> (i32, i32) {
    %c0_i32 = arith.constant 0 : i32
    %c0_i32_0 = arith.constant 0 : i32
    %c0_i32_1 = arith.constant 0 : i32
    return %c0_i32, %c0_i32_0 : i32, i32
  }
  func.func @transform_3(%arg0: i32) -> (i32, i32) {
    %c0_i32 = arith.constant 0 : i32
    %c0_i32_0 = arith.constant 0 : i32
    return %arg0, %c0_i32 : i32, i32
  }
}

module attributes {stable_mosaic.version = 11 : i64} {
  func.func @_matmul_bias_act_kernel(%arg0: i32, %arg1: memref<2x512xbf16, #tpu.memory_space<vmem>>, %arg2: memref<512x128xbf16, #tpu.memory_space<vmem>>, %arg3: memref<1x128xf32, #tpu.memory_space<vmem>>, %arg4: memref<2x128xf32, #tpu.memory_space<vmem>>) attributes {dimension_semantics = [#tpu.dimension_semantics<parallel>], iteration_bounds = array<i64: 1>, scalar_prefetch = 0 : i64, scratch_operands = 0 : i64, tpu.core_type = #tpu.core_type<tc>, window_params = [{transform_indices = @transform_0, window_bounds = array<i64: 2, 512>}, {pipeline_mode = #tpu.pipeline_mode<synchronous>, transform_indices = @transform_1, window_bounds = array<i64: 512, 128>}, {pipeline_mode = #tpu.pipeline_mode<synchronous>, transform_indices = @transform_2, window_bounds = array<i64: 1, 128>}, {transform_indices = @transform_3, window_bounds = array<i64: 2, 128>}]} {
    %c0 = arith.constant 0 : index
    %c0_0 = arith.constant 0 : index
    %0 = vector.load %arg1[%c0, %c0_0] : memref<2x512xbf16, #tpu.memory_space<vmem>>, vector<2x512xbf16>
    %c0_1 = arith.constant 0 : index
    %c0_2 = arith.constant 0 : index
    %1 = vector.load %arg2[%c0_1, %c0_2] : memref<512x128xbf16, #tpu.memory_space<vmem>>, vector<512x128xbf16>
    %cst = arith.constant dense<0.000000e+00> : vector<2x128xf32>
    %2 = tpu.matmul %0, %1, %cst {dimension_numbers = #tpu.dot_dimension_numbers<[1], [0], [0], [1], [0, 0, 1, 1], [], []>} : vector<2x512xbf16>, vector<512x128xbf16>, vector<2x128xf32> -> vector<2x128xf32>
    %c0_3 = arith.constant 0 : index
    %c0_4 = arith.constant 0 : index
    %3 = vector.load %arg3[%c0_3, %c0_4] : memref<1x128xf32, #tpu.memory_space<vmem>>, vector<1x128xf32>
    %4 = vector.broadcast %3 : vector<1x128xf32> to vector<2x128xf32>
    %5 = arith.addf %2, %4 : vector<2x128xf32>
    %c0_5 = arith.constant 0 : index
    %c0_6 = arith.constant 0 : index
    %6 = vector.load %arg4[%c0_5, %c0_6] : memref<2x128xf32, #tpu.memory_space<vmem>>, vector<2x128xf32>
    tpu.vector_store %arg4[%c0_5, %c0_6], %5 {strides = array<i32>} : memref<2x128xf32, #tpu.memory_space<vmem>>, vector<2x128xf32>,
    return
  }
  func.func @transform_0(%arg0: i32) -> (i32, i32) {
    %c0_i32 = arith.constant 0 : i32
    %c0_i32_0 = arith.constant 0 : i32
    return %arg0, %c0_i32 : i32, i32
  }
  func.func @transform_1(%arg0: i32) -> (i32, i32) {
    %c0_i32 = arith.constant 0 : i32
    %c0_i32_0 = arith.constant 0 : i32
    %c0_i32_1 = arith.constant 0 : i32
    return %c0_i32, %c0_i32_0 : i32, i32
  }
  func.func @transform_2(%arg0: i32) -> (i32, i32) {
    %c0_i32 = arith.constant 0 : i32
    %c0_i32_0 = arith.constant 0 : i32
    %c0_i32_1 = arith.constant 0 : i32
    return %c0_i32, %c0_i32_0 : i32, i32
  }
  func.func @transform_3(%arg0: i32) -> (i32, i32) {
    %c0_i32 = arith.constant 0 : i32
    %c0_i32_0 = arith.constant 0 : i32
    return %arg0, %c0_i32 : i32, i32
  }
}

</mosaic_0001>

<bundles_post_ra>
// kernel: mnist_cnn_forward.9
= control target key start
LH: loop header
LB: loop body
LE: loop exit
PB: predicated region body
PF: predicated region fallthrough
CT: control target
= control target key end

     0   :  { %vm68_vm0 = vcmask 1043456   ;;  %s287_s0 = inlined_call_operand.vmem [shape: bf16[28,1792], index: 0, kind: input, shape index: {}]   ;;  %s288_s1 = inlined_call_operand.vmem [shape: bf16[28,896], index: 1, kind: output, shape index: {}]  }
   0x1   :  { %v11_v0 = vld [vmem:[%s287_s0 + $0x18] sm:$0xff]  ;;  %v12_v1 = vld [vmem:[%s287_s0 + $0x20] sm:$0xff]  ;;  %v13_v5 = vld [vmem:[%s287_s0 + $0x28] sm:$0xff] }
   0x2   :  { %v8_v2 = vld [vmem:[%s287_s0] sm:$0xff]  ;;  %v52_v3 = vrot.slane %v11_v0, 4  ;;  %v53_v4 = vrot.slane %v12_v1, 4  ;;  %v9_v6 = vld [vmem:[%s287_s0 + $0x8] sm:$0xff]  ;;  %v54_v7 = vrot.slane %v13_v5, 4  ;;  %v14_v8 = vld [vmem:[%s287_s0 + $0x30] sm:$0xff] }
   0x3   :  { %v18_v9 = vld [vmem:[%s287_s0 + $0x50] sm:$0xff]  ;;  %v55_v12 = vrot.slane %v14_v8, 4  ;;  %v19_v13 = vld [vmem:[%s287_s0 + $0x58] sm:$0xff]  ;;  %v20_v15 = vld [vmem:[%s287_s0 + $0x60] sm:$0xff] }
   0x4   :  { %v69_v10 = vsel %vm68_vm0, %v52_v3, %v53_v4  ;;  %v10_v11 = vld [vmem:[%s287_s0 + $0x10] sm:$0xff]  ;;  %v56_v14 = vrot.slane %v18_v9, 4  ;;  %v70_v17 = vsel %vm68_vm0, %v53_v4, %v54_v7  ;;  %v15_v18 = vld [vmem:[%s287_s0 + $0x38] sm:$0xff]  ;;  %v57_v19 = vrot.slane %v19_v13, 4  ;;  %v16_v20 = vld [vmem:[%s287_s0 + $0x40] sm:$0xff] }
   0x5   :  { %v97_v16 = vmax.bf16 %v69_v10, %v8_v2  ;;  %v58_v21 = vrot.slane %v20_v15, 4  ;;  %v21_v22 = vld [vmem:[%s287_s0 + $0x68] sm:$0xff]  ;;  %v98_v23 = vmax.bf16 %v70_v17, %v9_v6  ;;  %v71_v24 = vsel %vm68_vm0, %v54_v7, %v55_v12  ;;  %v26_v29 = vld [vmem:[%s287_s0 + $0x90] sm:$0xff]  ;;  %v27_v34 = vld [vmem:[%s287_s0 + $0x98] sm:$0xff] }
   0x6   :  { %v100_v25 = vmax.bf16 %v55_v12, %v11_v0  ;;  %v17_v26 = vld [vmem:[%s287_s0 + $0x48] sm:$0xff]  ;;  %v59_v27 = vrot.slane %v21_v22, 4  ;;  %v99_v30 = vmax.bf16 %v71_v24, %v10_v11  ;;  %v72_v31 = vsel %vm68_vm0, %v56_v14, %v57_v19  ;;  %v28_v35 = vld [vmem:[%s287_s0 + $0xa0] sm:$0xff]  ;;  %v22_v43 = vld [vmem:[%s287_s0 + $0x70] sm:$0xff] }
   0x7   :  { %v25_v28 = vld [vmem:[%s287_s0 + $0x88] sm:$0xff]  ;;  %113 = vst [vmem:[%s288_s1] sm:$0xff] %v97_v16  ;;  %v73_v32 = vsel %vm68_vm0, %v57_v19, %v58_v21  ;;  %114 = vst [vmem:[%s288_s1 + $0x8] sm:$0xff] %v98_v23  ;;  %v101_v36 = vmax.bf16 %v72_v31, %v15_v18  ;;  %v32_v40 = vld [vmem:[%s287_s0 + $0xc0] sm:$0x33]  ;;  %v61_v44 = vrot.slane %v26_v29, 4  ;;  %v62_v46 = vrot.slane %v27_v34, 4 }
   0x8   :  { %v60_v33 = vrot.slane %v25_v28, 4  ;;  %116 = vst [vmem:[%s288_s1 + $0x18] sm:$0xf] %v100_v25  ;;  %v102_v37 = vmax.bf16 %v73_v32, %v16_v20  ;;  %v74_v38 = vsel %vm68_vm0, %v58_v21, %v59_v27  ;;  %v104_v39 = vmax.bf16 %v59_v27, %v18_v9  ;;  %v33_v41 = vld [vmem:[%s287_s0 + $0xc8] sm:$0x33]  ;;  %115 = vst [vmem:[%s288_s1 + $0x10] sm:$0xff] %v99_v30 }
   0x9   :  { %v103_v42 = vmax.bf16 %v74_v38, %v17_v26  ;;  %v23_v45 = vld [vmem:[%s287_s0 + $0x78] sm:$0xff]  ;;  %v24_v47 = vld [vmem:[%s287_s0 + $0x80] sm:$0xff]  ;;  %v63_v48 = vrot.slane %v28_v35, 4  ;;  %117 = vst [vmem:[%s288_s1 + $0x1c] sm:$0xff] %v101_v36  ;;  %v29_v49 = vld [vmem:[%s287_s0 + $0xa8] sm:$0x33]  ;;  %v76_v54 = vsel %vm68_vm0, %v61_v44, %v62_v46 }
   0xa   :  { %118 = vst [vmem:[%s288_s1 + $0x24] sm:$0xff] %v102_v37  ;;  %120 = vst [vmem:[%s288_s1 + $0x34] sm:$0xf] %v104_v39  ;;  %v64_v50 = vrot.slane %v32_v40, 4  ;;  %v65_v51 = vrot.slane %v33_v41, 4  ;;  %v75_v53 = vsel %vm68_vm0, %v60_v33, %v61_v44  ;;  %v106_v59 = vmax.bf16 %v76_v54, %v23_v45 }
   0xb   :  { %v34_v52 = vld [vmem:[%s287_s0 + $0xd0] sm:$0x33]  ;;  %119 = vst [vmem:[%s288_s1 + $0x2c] sm:$0xff] %v103_v42  ;;  %v77_v55 = vsel %vm68_vm0, %v62_v46, %v63_v48  ;;  %v108_v56 = vmax.bf16 %v63_v48, %v25_v28  ;;  %v35_v57 = vld [vmem:[%s287_s0 + $0xd8] sm:$0x33]  ;;  %v105_v58 = vmax.bf16 %v75_v53, %v22_v43 }
   0xc   :  { %v107_v60 = vmax.bf16 %v77_v55, %v24_v47  ;;  %v78_v61 = vsel %vm68_vm0, %v64_v50, %v65_v51  ;;  %v30_v63 = vld [vmem:[%s287_s0 + $0xb0] sm:$0x33]  ;;  %v66_v0 = vrot.slane %v34_v52, 4  ;;  %v31_v1 = vld [vmem:[%s287_s0 + $0xb8] sm:$0x33]  ;;  %v67_v2 = vrot.slane %v35_v57, 4 }
   0xd   :  { %124 = vst [vmem:[%s288_s1 + $0x50] sm:$0xf] %v108_v56  ;;  %v109_v62 = vmax.bf16 %v78_v61, %v29_v49  ;;  %121 = vst [vmem:[%s288_s1 + $0x38] sm:$0xff] %v105_v58 }
   0xe   :  { %122 = vst [vmem:[%s288_s1 + $0x40] sm:$0xff] %v106_v59  ;;  %123 = vst [vmem:[%s288_s1 + $0x48] sm:$0xff] %v107_v60  ;;  %v79_v3 = vsel %vm68_vm0, %v65_v51, %v66_v0  ;;  %v80_v4 = vsel %vm68_vm0, %v66_v0, %v67_v2  ;;  %v112_v5 = vmax.bf16 %v67_v2, %v32_v40 }
   0xf   :  { %125 = vst [vmem:[%s288_s1 + $0x54] sm:$0x33] %v109_v62  ;;  %v110_v6 = vmax.bf16 %v79_v3, %v30_v63  ;;  %v111_v7 = vmax.bf16 %v80_v4, %v31_v1 }
  0x10   :  { %128 = vst [vmem:[%s288_s1 + $0x6c] sm:$0x3] %v112_v5 }
  0x11   :  { %126 = vst [vmem:[%s288_s1 + $0x5c] sm:$0x33] %v110_v6  ;;  %127 = vst [vmem:[%s288_s1 + $0x64] sm:$0x33] %v111_v7 }

// kernel: mnist_cnn_forward.8
= control target key start
LH: loop header
LB: loop body
LE: loop exit
PB: predicated region body
PF: predicated region fallthrough
CT: control target
= control target key end

     0   :  { %8 = vsyncpa [#allocation3], 0  ;;  %s3171_s0 = inlined_call_operand.vmem [shape: bf16[1568,25], index: 0, kind: input, shape index: {}]   ;;  %s3172_s1 = inlined_call_operand.hbm [shape: bf16[25,32], index: 1, kind: input, shape index: {}]   ;;  %s3173_s2 = inlined_call_operand.hbm [shape: f32[1,32], index: 2, kind: input, shape index: {}]   ;;  %s3174_s3 = inlined_call_operand.vmem [shape: bf16[1568,32], index: 3, kind: output, shape index: {}]  }
   0x1   :  { %9 = vsyncpa [#allocation5], 0  ;;  %s2565_s12 = smov 0  }
   0x2 LB: > { %s1815_s13 = sadd.s32 4294967295, %s2536_s12   ;;  %p1817_p0 = scmp.ge.s32.totalorder %s2536_s12, 1  ;;  %s2536_s12 = sphi %s2565_s12, %s15_s12  }
   0x3   : > { %p114_p1 = scmp.lt.s32.totalorder %s2536_s12, 3  ;;  %s2538_s14 = smov [#allocation2]  }
   0x4   : > { %s126_s15 = sshll.u32 %s2538_s14, 4  ;;  %p2579_p3 = scmp.eq.s32.totalorder %s1815_s13, 0  ;;  %s127_s15 = int_to_ptr.vmem [resolvable:$true] %s126_s15 }
   0x5   : > { %p2573_p2 = pnand %p1817_p0, %p114_p1  ;;  %s2539_s18 = smov [#allocation4]  }
   0x6   : > { %s3179_s17 = scalar_select %p2579_p3, 1, 0 }
   0x7   : > { %s3178_s16 = scalar_select %p2573_p2, 1, 0 }
   0x8   : > { %p2388_p4 = pneg %p2573_p2  ;;  %s140_s19 = sshll.u32 %s2539_s18, 4  ;;  %s2591_s19 = int_to_ptr.vmem [resolvable:$true] %s140_s19 }
   0x9   : > { %s2466_s23 = scalar_lea.hbm %s3172_s1, 256 }
   0xa   : > { %p2587_p5 = pnand %p2579_p3, %p2388_p4  ;;  %p2467_p6 = scmp.ne.s32.totalorder %s3172_s1, %s2466_s23 }
   0xb   : > { %p2473_p10 = scmp.lt.u32.totalorder %s2466_s23, %s3172_s1 }
   0xc   : > { %p2468_p7 = pneg %p2587_p5 }
   0xe   : > { %p2469_p8 = pnand %p2468_p7, %p2467_p6 }
  0x10   : > { %p2470_p9 = pneg %p2469_p8 }
  0x12   : > { %p2475_p11 = pnand %p2473_p10, %p2470_p9 }
  0x14   : > { %2478 = shalt.err (!%p2475_p11)
}
  0x15   : > { %s2479_s28 = scalar_lea.vmem %s127_s15, 256  ;;  %p2487_p1 = scmp.lt.s32.totalorder %s127_s15, %s127_s15 }
  0x16   : > { %p2480_p12 = scmp.ne.s32.totalorder %s127_s15, %s2479_s28  ;;  %p2488_p4 = scmp.lt.s32.totalorder %s2479_s28, %s2479_s28 }
  0x18   : > { %p2482_p13 = pnand %p2480_p12, %p2468_p7  ;;  %p2489_p3 = por %p2488_p4, %p2487_p1 }
  0x1a   : > { %p2483_p0 = pneg %p2482_p13 }
  0x1c   : > { %p2490_p2 = pnand %p2489_p3, %p2483_p0 }
  0x1e   : > { %2493 = shalt.err (!%p2490_p2)
}
  0x1f   : > { %s2540_s29 = smov 64   ;;  %s2541_s30 = smov 4  }
  0x20   : > { %2391 = dma.hbm_to_vmem [thread:$0]  (!%p2587_p5), %s3172_s1, 256, %s127_s15, [#allocation3], %s2540_s29, %s2540_s29, %s2541_s30  }
  0x21   : > { %s2494_s8 = scalar_lea.hbm %s3173_s2, 16 }
  0x22   : > { %p2495_p6 = scmp.ne.s32.totalorder %s3173_s2, %s2494_s8  ;;  %p2501_p8 = scmp.lt.u32.totalorder %s2494_s8, %s3173_s2 }
  0x24   : > { %p2497_p2 = pnand %p2495_p6, %p2468_p7 }
  0x26   : > { %p2498_p3 = pneg %p2497_p2 }
  0x28   : > { %p2503_p9 = pnand %p2501_p8, %p2498_p3 }
  0x2a   : > { %2506 = shalt.err (!%p2503_p9)
}
  0x2b   : > { %s2507_s15 = scalar_lea.vmem %s2591_s19, 16  ;;  %s2514_s18 = scalar_lea.vmem %s2591_s19, 32 }
  0x2c   : > { %p2508_p10 = scmp.ne.s32.totalorder %s2591_s19, %s2507_s15  ;;  %p2515_p13 = scmp.lt.s32.totalorder %s2591_s19, %s2591_s19 }
  0x2d   : > { %p2516_p0 = scmp.lt.s32.totalorder %s2514_s18, %s2507_s15 }
  0x2e   : > { %p2510_p11 = pnand %p2508_p10, %p2468_p7 }
  0x2f   : > { %p2517_p1 = por %p2516_p0, %p2515_p13 }
  0x30   : > { %p2511_p12 = pneg %p2510_p11 }
  0x32   : > { %p2518_p4 = pnand %p2517_p1, %p2511_p12 }
  0x34   : > { %2521 = shalt.err (!%p2518_p4)
}
  0x35   : > { %2394 = dma.hbm_to_vmem [thread:$0]  (!%p2587_p5), %s3173_s2, 16, %s2591_s19, [#allocation5]  }
  0x36   : > { %p3181_p6 = scmp.ne.s32.totalorder %s3178_s16, 0 }
  0x37   : > { %p3182_p7 = scmp.ne.s32.totalorder (!%p3181_p6), %s3179_s17, 0 }
  0x38   : > { %162 = sbr.rel (%p3181_p6) target bundleno = 489 (0x1e9), region = 32 }
  0x3f   : > { %2527 = dma.done.wait (%p3182_p7), [#allocation3], 256  }
  0x40   : > { %2529 = vsyncadd (%p3182_p7), [#allocation3], 4294967040 }
  0x41   : > { %2531 = dma.done.wait (%p3182_p7), [#allocation5], 16  }
  0x42   : > { %2533 = vsyncadd (%p3182_p7), [#allocation5], 4294967280  ;;  %vm716_vm0 = vcmask 1043456   ;;  %v2542_v0 = vmov 0.0   ;;  %s190_s16 = smul.u32 98, %s1815_s13  ;;  %vm2543_vm1 = vmmov 0  }
  0x43   : > { %2176 = vmatprep.subr.bf16.mxu0 %v2542_v0  ;;  %2376 = vmatprep.subr.bf16.mxu1 %v2542_v0  ;;  %vm717_vm2 = vcmask 1044480   ;;  %v2544_v1 = vmov 65535   ;;  %v2414_v4 = vld [vmem:[#allocation2] sm:$0xff]   ;;  %v2415_v5 = vld [vmem:[#allocation2 + $0x8] sm:$0x1f]   ;;  %vm568_vm3 = vcmask 203776  }
  0x44   : > { %2180 = vmatprep.mubr.msk.bf16.mxu0 %vm2543_vm1, %v2542_v0  ;;  %2280 = vmatprep.mubr.msk.bf16.mxu1 %vm2543_vm1, %v2542_v0  ;;  %v718_v2 = vsel %vm716_vm0, 4294967295, %v2544_v1  ;;  %p191_p5 = scmp.lt.s32.totalorder %s190_s16, 195  ;;  %v2863_v56 = vld [vmem:[#allocation4] ss:$0 sm:$0xff]  ;;  %vm1638_vm4 = vcmask 257024  }
  0x45   : > { %v719_v3 = vsel %vm717_vm2, %v718_v2, 0  ;;  %2177 = vmatpush3.bf16.msra.mxu0 %v2414_v4  ;;  %2378 = vmatpush3.bf16.msra.mxu1 %v2414_v4 }
  0x46   : > { %s3184_s16 = smov (!%p191_p5, %s190_s16), 195  ;;  %2178 = vmatprep.subr.bf16.mxu0 %v2542_v0  ;;  %v721_v6 = vand.u32 %v2415_v5, %v719_v3  ;;  %2377 = vmatprep.subr.bf16.mxu1 %v2542_v0 }
  0x47   : > { %s1824_s17 = sshll.u32 %s3184_s16, 2 }
  0x48   : > { %s2667_s20 = scalar_lea.vmem %s3171_s0, %s1824_s17  ;;  %s2874_s25 = scalar_lea.vmem %s3174_s3, %s1824_s17 }
  0x49   : > { %v2416_v7 = vld [vmem:[%s2667_s20] sm:$0xff]   ;;  %v2417_v8 = vld [vmem:[%s2667_s20 + $0xc8] sm:$0xff]   ;;  %2179 = vmatpush3.bf16.msra.mxu0 %v721_v6  ;;  %2379 = vmatpush3.bf16.msra.mxu1 %v721_v6  ;;  %v2419_v10 = vld [vmem:[%s2667_s20 + $0xd0] sm:$0xff]  }
  0x4a   : > { %v2418_v9 = vld [vmem:[%s2667_s20 + $0x8] sm:$0xff]   ;;  %v2420_v11 = vld [vmem:[%s2667_s20 + $0x10] sm:$0xff]   ;;  %v2421_v12 = vld [vmem:[%s2667_s20 + $0xd8] sm:$0xff]  }
  0x4b   : > { %v2422_v13 = vld [vmem:[%s2667_s20 + $0x18] sm:$0xff]   ;;  %v2423_v14 = vld [vmem:[%s2667_s20 + $0xe0] sm:$0xff]   ;;  %v2425_v16 = vld [vmem:[%s2667_s20 + $0xe8] sm:$0xff]  }
  0x4c   : > { %2181 = vmatmul.mubr.msk.bf16.vlgmr.msra.gmra.mrb[0].mxu0 %vm568_vm3, %v2416_v7  ;;  %2281 = vmatmul.mubr.msk.bf16.vlgmr.msra.gmra.mrb[0].mxu1 %vm568_vm3, %v2417_v8  ;;  %v2424_v15 = vld [vmem:[%s2667_s20 + $0x20] sm:$0xff]   ;;  %v2426_v17 = vld [vmem:[%s2667_s20 + $0x28] sm:$0xff]   ;;  %v2427_v18 = vld [vmem:[%s2667_s20 + $0xf0] sm:$0xff]  }
  0x4d   : > { %2184 = vmatprep.mubr.msk.bf16.mxu0 %vm2543_vm1, %v2542_v0  ;;  %2284 = vmatprep.mubr.msk.bf16.mxu1 %vm2543_vm1, %v2542_v0  ;;  %v2428_v19 = vld [vmem:[%s2667_s20 + $0x30] sm:$0xff]   ;;  %v2429_v20 = vld [vmem:[%s2667_s20 + $0xf8] sm:$0xff]   ;;  %v2431_v22 = vld [vmem:[%s2667_s20 + $0x100] sm:$0xff]  }
  0x4e   : > { %v2430_v21 = vld [vmem:[%s2667_s20 + $0x38] sm:$0xff]   ;;  %v2432_v23 = vld [vmem:[%s2667_s20 + $0x40] sm:$0xff]   ;;  %v2433_v24 = vld [vmem:[%s2667_s20 + $0x108] sm:$0xff]  }
  0x4f   : > { %v2434_v25 = vld [vmem:[%s2667_s20 + $0x48] sm:$0xff]   ;;  %v2435_v26 = vld [vmem:[%s2667_s20 + $0x110] sm:$0xff]   ;;  %v2437_v28 = vld [vmem:[%s2667_s20 + $0x118] sm:$0xff]  }
  0x50   : > { %v2436_v27 = vld [vmem:[%s2667_s20 + $0x50] sm:$0xff]   ;;  %v2438_v29 = vld [vmem:[%s2667_s20 + $0x58] sm:$0xff]   ;;  %v2439_v30 = vld [vmem:[%s2667_s20 + $0x120] sm:$0xff]  }
  0x51   : > { %v2440_v31 = vld [vmem:[%s2667_s20 + $0x60] sm:$0xff]   ;;  %v2441_v32 = vld [vmem:[%s2667_s20 + $0x128] sm:$0xff]   ;;  %v2443_v34 = vld [vmem:[%s2667_s20 + $0x130] sm:$0xff]  }
  0x52   : > { %v2442_v33 = vld [vmem:[%s2667_s20 + $0x68] sm:$0xff]   ;;  %v2444_v35 = vld [vmem:[%s2667_s20 + $0x70] sm:$0xff]   ;;  %v2445_v36 = vld [vmem:[%s2667_s20 + $0x138] sm:$0xff]  }
  0x53   : > { %v2446_v37 = vld [vmem:[%s2667_s20 + $0x78] sm:$0xff]   ;;  %v2447_v38 = vld [vmem:[%s2667_s20 + $0x140] sm:$0xff]   ;;  %v2449_v40 = vld [vmem:[%s2667_s20 + $0x148] sm:$0xff]  }
  0x54   : > { %2185 = vmatmul.mubr.msk.bf16.gmra.mrb[4].mxu0 %vm568_vm3, %v2418_v9  ;;  %2285 = vmatmul.mubr.msk.bf16.gmra.mrb[4].mxu1 %vm568_vm3, %v2419_v10  ;;  %v2448_v39 = vld [vmem:[%s2667_s20 + $0x80] sm:$0xff]   ;;  %v2450_v41 = vld [vmem:[%s2667_s20 + $0x88] sm:$0xff]   ;;  %v2451_v42 = vld [vmem:[%s2667_s20 + $0x150] sm:$0xff]  }
  0x55   : > { %2188 = vmatprep.mubr.msk.bf16.mxu0 %vm2543_vm1, %v2542_v0  ;;  %2288 = vmatprep.mubr.msk.bf16.mxu1 %vm2543_vm1, %v2542_v0  ;;  %v2452_v43 = vld [vmem:[%s2667_s20 + $0x90] sm:$0xff]   ;;  %v2453_v44 = vld [vmem:[%s2667_s20 + $0x158] sm:$0xff]   ;;  %v2455_v46 = vld [vmem:[%s2667_s20 + $0x160] sm:$0xff]  }
  0x56   : > { %v2454_v45 = vld [vmem:[%s2667_s20 + $0x98] sm:$0xff]   ;;  %v2456_v47 = vld [vmem:[%s2667_s20 + $0xa0] sm:$0xff]   ;;  %v2457_v48 = vld [vmem:[%s2667_s20 + $0x168] sm:$0xff]  }
  0x57   : > { %v2458_v49 = vld [vmem:[%s2667_s20 + $0xa8] sm:$0xff]   ;;  %v2459_v50 = vld [vmem:[%s2667_s20 + $0x170] sm:$0xff]   ;;  %v2461_v52 = vld [vmem:[%s2667_s20 + $0x178] sm:$0xff]  }
  0x58   : > { %v2460_v51 = vld [vmem:[%s2667_s20 + $0xb0] sm:$0xff]   ;;  %v2462_v53 = vld [vmem:[%s2667_s20 + $0xb8] sm:$0xff]   ;;  %v2463_v54 = vld [vmem:[%s2667_s20 + $0x180] sm:$0xff]  }
  0x59   : > { %v2464_v55 = vld [vmem:[%s2667_s20 + $0xc0] sm:$0xff]  }
  0x5c   : > { %2189 = vmatmul.mubr.msk.bf16.gmra.mrb[8].mxu0 %vm568_vm3, %v2420_v11  ;;  %2289 = vmatmul.mubr.msk.bf16.gmra.mrb[8].mxu1 %vm568_vm3, %v2421_v12 }
  0x5d   : > { %2192 = vmatprep.mubr.msk.bf16.mxu0 %vm2543_vm1, %v2542_v0  ;;  %2292 = vmatprep.mubr.msk.bf16.mxu1 %vm2543_vm1, %v2542_v0 }
  0x64   : > { %2193 = vmatmul.mubr.msk.bf16.gmra.mrb[12].mxu0 %vm568_vm3, %v2422_v13  ;;  %2293 = vmatmul.mubr.msk.bf16.gmra.mrb[12].mxu1 %vm568_vm3, %v2423_v14 }
  0x65   : > { %2196 = vmatprep.mubr.msk.bf16.mxu0 %vm2543_vm1, %v2542_v0  ;;  %2296 = vmatprep.mubr.msk.bf16.mxu1 %vm2543_vm1, %v2542_v0 }
  0x6c   : > { %2197 = vmatmul.mubr.msk.bf16.gmra.mrb[16].mxu0 %vm568_vm3, %v2424_v15  ;;  %2297 = vmatmul.mubr.msk.bf16.gmra.mrb[16].mxu1 %vm568_vm3, %v2425_v16 }
  0x6d   : > { %2200 = vmatprep.mubr.msk.bf16.mxu0 %vm2543_vm1, %v2542_v0  ;;  %2300 = vmatprep.mubr.msk.bf16.mxu1 %vm2543_vm1, %v2542_v0 }
  0x74   : > { %2201 = vmatmul.mubr.msk.bf16.gmra.mrb[20].mxu0 %vm568_vm3, %v2426_v17  ;;  %2301 = vmatmul.mubr.msk.bf16.gmra.mrb[20].mxu1 %vm568_vm3, %v2427_v18 }
  0x75   : > { %2204 = vmatprep.mubr.msk.bf16.mxu0 %vm2543_vm1, %v2542_v0  ;;  %2304 = vmatprep.mubr.msk.bf16.mxu1 %vm2543_vm1, %v2542_v0 }
  0x7c   : > { %2205 = vmatmul.mubr.msk.bf16.gmra.mrb[24].mxu0 %vm568_vm3, %v2428_v19  ;;  %2305 = vmatmul.mubr.msk.bf16.gmra.mrb[24].mxu1 %vm568_vm3, %v2429_v20 }
  0x7d   : > { %2208 = vmatprep.mubr.msk.bf16.mxu0 %vm2543_vm1, %v2542_v0  ;;  %2308 = vmatprep.mubr.msk.bf16.mxu1 %vm2543_vm1, %v2542_v0 }
  0x84   : > { %2209 = vmatmul.mubr.msk.bf16.gmra.mrb[28].mxu0 %vm568_vm3, %v2430_v21  ;;  %2309 = vmatmul.mubr.msk.bf16.gmra.mrb[28].mxu1 %vm568_vm3, %v2431_v22 }
  0x85   : > { %2212 = vmatprep.mubr.msk.bf16.mxu0 %vm2543_vm1, %v2542_v0  ;;  %2312 = vmatprep.mubr.msk.bf16.mxu1 %vm2543_vm1, %v2542_v0 }
  0x8c   : > { %2213 = vmatmul.mubr.msk.bf16.gmra.mrb[32].mxu0 %vm568_vm3, %v2432_v23  ;;  %2313 = vmatmul.mubr.msk.bf16.gmra.mrb[32].mxu1 %vm568_vm3, %v2433_v24 }
  0x8d   : > { %2216 = vmatprep.mubr.msk.bf16.mxu0 %vm2543_vm1, %v2542_v0  ;;  %2316 = vmatprep.mubr.msk.bf16.mxu1 %vm2543_vm1, %v2542_v0 }
  0x94   : > { %2217 = vmatmul.mubr.msk.bf16.gmra.mrb[36].mxu0 %vm568_vm3, %v2434_v25  ;;  %2317 = vmatmul.mubr.msk.bf16.gmra.mrb[36].mxu1 %vm568_vm3, %v2435_v26 }
  0x95   : > { %2220 = vmatprep.mubr.msk.bf16.mxu0 %vm2543_vm1, %v2542_v0  ;;  %2320 = vmatprep.mubr.msk.bf16.mxu1 %vm2543_vm1, %v2542_v0 }
  0x9c   : > { %2221 = vmatmul.mubr.msk.bf16.gmra.mrb[40].mxu0 %vm568_vm3, %v2436_v27  ;;  %2321 = vmatmul.mubr.msk.bf16.gmra.mrb[40].mxu1 %vm568_vm3, %v2437_v28 }
  0x9d   : > { %2224 = vmatprep.mubr.msk.bf16.mxu0 %vm2543_vm1, %v2542_v0  ;;  %2324 = vmatprep.mubr.msk.bf16.mxu1 %vm2543_vm1, %v2542_v0 }
  0xa4   : > { %2225 = vmatmul.mubr.msk.bf16.gmra.mrb[44].mxu0 %vm568_vm3, %v2438_v29  ;;  %2325 = vmatmul.mubr.msk.bf16.gmra.mrb[44].mxu1 %vm568_vm3, %v2439_v30 }
  0xa5   : > { %2228 = vmatprep.mubr.msk.bf16.mxu0 %vm2543_vm1, %v2542_v0  ;;  %2328 = vmatprep.mubr.msk.bf16.mxu1 %vm2543_vm1, %v2542_v0 }
  0xac   : > { %2229 = vmatmul.mubr.msk.bf16.gmra.mrb[48].mxu0 %vm568_vm3, %v2440_v31  ;;  %2329 = vmatmul.mubr.msk.bf16.gmra.mrb[48].mxu1 %vm568_vm3, %v2441_v32 }
  0xad   : > { %2232 = vmatprep.mubr.msk.bf16.mxu0 %vm2543_vm1, %v2542_v0  ;;  %2332 = vmatprep.mubr.msk.bf16.mxu1 %vm2543_vm1, %v2542_v0 }
  0xb4   : > { %2233 = vmatmul.mubr.msk.bf16.gmra.mrb[52].mxu0 %vm568_vm3, %v2442_v33  ;;  %2333 = vmatmul.mubr.msk.bf16.gmra.mrb[52].mxu1 %vm568_vm3, %v2443_v34 }
  0xb5   : > { %2236 = vmatprep.mubr.msk.bf16.mxu0 %vm2543_vm1, %v2542_v0  ;;  %2336 = vmatprep.mubr.msk.bf16.mxu1 %vm2543_vm1, %v2542_v0 }
  0xbc   : > { %2237 = vmatmul.mubr.msk.bf16.gmra.mrb[56].mxu0 %vm568_vm3, %v2444_v35  ;;  %2337 = vmatmul.mubr.msk.bf16.gmra.mrb[56].mxu1 %vm568_vm3, %v2445_v36 }
  0xbd   : > { %2240 = vmatprep.mubr.msk.bf16.mxu0 %vm2543_vm1, %v2542_v0  ;;  %2340 = vmatprep.mubr.msk.bf16.mxu1 %vm2543_vm1, %v2542_v0 }
  0xc4   : > { %2241 = vmatmul.mubr.msk.bf16.gmra.mrb[60].mxu0 %vm568_vm3, %v2446_v37  ;;  %2341 = vmatmul.mubr.msk.bf16.gmra.mrb[60].mxu1 %vm568_vm3, %v2447_v38 }
  0xc5   : > { %2244 = vmatprep.mubr.msk.bf16.mxu0 %vm2543_vm1, %v2542_v0  ;;  %2344 = vmatprep.mubr.msk.bf16.mxu1 %vm2543_vm1, %v2542_v0 }
  0xcc   : > { %2245 = vmatmul.mubr.msk.bf16.gmra.mrb[64].mxu0 %vm568_vm3, %v2448_v39  ;;  %2345 = vmatmul.mubr.msk.bf16.gmra.mrb[64].mxu1 %vm568_vm3, %v2449_v40 }
  0xcd   : > { %2248 = vmatprep.mubr.msk.bf16.mxu0 %vm2543_vm1, %v2542_v0  ;;  %2348 = vmatprep.mubr.msk.bf16.mxu1 %vm2543_vm1, %v2542_v0 }
  0xd4   : > { %2249 = vmatmul.mubr.msk.bf16.gmra.mrb[68].mxu0 %vm568_vm3, %v2450_v41  ;;  %2349 = vmatmul.mubr.msk.bf16.gmra.mrb[68].mxu1 %vm568_vm3, %v2451_v42 }
  0xd5   : > { %2252 = vmatprep.mubr.msk.bf16.mxu0 %vm2543_vm1, %v2542_v0  ;;  %2352 = vmatprep.mubr.msk.bf16.mxu1 %vm2543_vm1, %v2542_v0 }
  0xdc   : > { %2253 = vmatmul.mubr.msk.bf16.gmra.mrb[72].mxu0 %vm568_vm3, %v2452_v43  ;;  %2353 = vmatmul.mubr.msk.bf16.gmra.mrb[72].mxu1 %vm568_vm3, %v2453_v44 }
  0xdd   : > { %2256 = vmatprep.mubr.msk.bf16.mxu0 %vm2543_vm1, %v2542_v0  ;;  %2356 = vmatprep.mubr.msk.bf16.mxu1 %vm2543_vm1, %v2542_v0 }
  0xe4   : > { %2257 = vmatmul.mubr.msk.bf16.gmra.mrb[76].mxu0 %vm568_vm3, %v2454_v45  ;;  %2357 = vmatmul.mubr.msk.bf16.gmra.mrb[76].mxu1 %vm568_vm3, %v2455_v46 }
  0xe5   : > { %2260 = vmatprep.mubr.msk.bf16.mxu0 %vm2543_vm1, %v2542_v0  ;;  %2360 = vmatprep.mubr.msk.bf16.mxu1 %vm2543_vm1, %v2542_v0 }
  0xec   : > { %2261 = vmatmul.mubr.msk.bf16.gmra.mrb[80].mxu0 %vm568_vm3, %v2456_v47  ;;  %2361 = vmatmul.mubr.msk.bf16.gmra.mrb[80].mxu1 %vm568_vm3, %v2457_v48 }
  0xed   : > { %2264 = vmatprep.mubr.msk.bf16.mxu0 %vm2543_vm1, %v2542_v0  ;;  %2364 = vmatprep.mubr.msk.bf16.mxu1 %vm2543_vm1, %v2542_v0 }
  0xf4   : > { %2265 = vmatmul.mubr.msk.bf16.gmra.mrb[84].mxu0 %vm568_vm3, %v2458_v49  ;;  %2365 = vmatmul.mubr.msk.bf16.gmra.mrb[84].mxu1 %vm568_vm3, %v2459_v50 }
  0xf5   : > { %2268 = vmatprep.mubr.msk.bf16.mxu0 %vm2543_vm1, %v2542_v0  ;;  %2368 = vmatprep.mubr.msk.bf16.mxu1 %vm2543_vm1, %v2542_v0 }
  0xfc   : > { %2269 = vmatmul.mubr.msk.bf16.gmra.mrb[88].mxu0 %vm568_vm3, %v2460_v51  ;;  %2369 = vmatmul.mubr.msk.bf16.gmra.mrb[88].mxu1 %vm568_vm3, %v2461_v52 }
  0xfd   : > { %2272 = vmatprep.mubr.msk.bf16.mxu0 %vm2543_vm1, %v2542_v0  ;;  %2372 = vmatprep.mubr.msk.bf16.mxu1 %vm2543_vm1, %v2542_v0 }
 0x104   : > { %2273 = vmatmul.mubr.msk.bf16.gmra.mrb[92].mxu0 %vm568_vm3, %v2462_v53  ;;  %2373 = vmatmul.mubr.msk.bf16.gmra.mrb[92].mxu1 %vm568_vm3, %v2463_v54 }
 0x105   : > { %2276 = vmatprep.mubr.msk.bf16.mxu0 %vm2543_vm1, %v2542_v0 }
 0x10c   : > { %2277 = vmatmul.mubr.msk.bf16.gmra.mrb[96].mxu0 %vm568_vm3, %v2464_v55 }
 0x11f   : > { %v757_v57 = vpop.f32.mrb[0].mxu0  ;;  %v957_v58 = vpop.f32.mrb[0].mxu1 }
 0x120   : > { %v758_v59 = vadd.f32 %v2863_v56, %v757_v57  ;;  %v2182_v60 = vpop.f32.mrb[1].mxu0  ;;  %v958_v61 = vadd.f32 %v2863_v56, %v957_v58  ;;  %v2282_v62 = vpop.f32.mrb[1].mxu1 }
 0x121   : > { %v760_v63 = vpop.f32.mrb[2].mxu0  ;;  %v960_v1 = vpop.f32.mrb[2].mxu1 }
 0x122   : > { %v1148_v2 = vmax.f32 %v758_v59, 0.0  ;;  %v761_v3 = vadd.f32 %v2863_v56, %v760_v63  ;;  %v2183_v0 = vpop.f32.mrb[3].mxu0  ;;  %v1198_v4 = vmax.f32 %v958_v61, 0.0  ;;  %v961_v5 = vadd.f32 %v2863_v56, %v960_v1  ;;  %v2283_v6 = vpop.f32.mrb[3].mxu1 }
 0x124   : > { %v2027_v7 = vpack.c.bf16 %v1148_v2, %v1148_v2  ;;  %v1149_v8 = vmax.f32 %v761_v3, 0.0  ;;  %v2077_v9 = vpack.c.bf16 %v1198_v4, %v1198_v4  ;;  %v1199_v10 = vmax.f32 %v961_v5, 0.0 }
 0x126   : > { %1639 = vst.msk [vmem:[%s2874_s25] sm:$0xf] %vm1638_vm4, %v2027_v7  ;;  %v2028_v11 = vpack.c.bf16 %v1149_v8, %v1149_v8  ;;  %1689 = vst.msk [vmem:[%s2874_s25 + $0xc8] sm:$0xf] %vm1638_vm4, %v2077_v9  ;;  %v2078_v12 = vpack.c.bf16 %v1199_v10, %v1199_v10 }
 0x127   : > { %v765_v13 = vpop.f32.mrb[4].mxu0  ;;  %v965_v14 = vpop.f32.mrb[4].mxu1 }
 0x128   : > { %1640 = vst.msk [vmem:[%s2874_s25 + $0x4] sm:$0xf] %vm1638_vm4, %v2028_v11  ;;  %1690 = vst.msk [vmem:[%s2874_s25 + $0xcc] sm:$0xf] %vm1638_vm4, %v2078_v12  ;;  %v766_v15 = vadd.f32 %v2863_v56, %v765_v13  ;;  %v2186_v16 = vpop.f32.mrb[5].mxu0  ;;  %v966_v17 = vadd.f32 %v2863_v56, %v965_v14  ;;  %v2286_v18 = vpop.f32.mrb[5].mxu1 }
 0x129   : > { %v768_v19 = vpop.f32.mrb[6].mxu0  ;;  %v968_v20 = vpop.f32.mrb[6].mxu1 }
 0x12a   : > { %v1150_v21 = vmax.f32 %v766_v15, 0.0  ;;  %v769_v22 = vadd.f32 %v2863_v56, %v768_v19  ;;  %v2187_v23 = vpop.f32.mrb[7].mxu0  ;;  %v1200_v24 = vmax.f32 %v966_v17, 0.0  ;;  %v969_v25 = vadd.f32 %v2863_v56, %v968_v20  ;;  %v2287_v26 = vpop.f32.mrb[7].mxu1 }
 0x12c   : > { %v2029_v27 = vpack.c.bf16 %v1150_v21, %v1150_v21  ;;  %v1151_v28 = vmax.f32 %v769_v22, 0.0  ;;  %v2079_v29 = vpack.c.bf16 %v1200_v24, %v1200_v24  ;;  %v1201_v30 = vmax.f32 %v969_v25, 0.0 }
 0x12e   : > { %1641 = vst.msk [vmem:[%s2874_s25 + $0x8] sm:$0xf] %vm1638_vm4, %v2029_v27  ;;  %v2030_v31 = vpack.c.bf16 %v1151_v28, %v1151_v28  ;;  %1691 = vst.msk [vmem:[%s2874_s25 + $0xd0] sm:$0xf] %vm1638_vm4, %v2079_v29  ;;  %v2080_v32 = vpack.c.bf16 %v1201_v30, %v1201_v30 }
 0x12f   : > { %v773_v33 = vpop.f32.mrb[8].mxu0  ;;  %v973_v34 = vpop.f32.mrb[8].mxu1 }
 0x130   : > { %1642 = vst.msk [vmem:[%s2874_s25 + $0xc] sm:$0xf] %vm1638_vm4, %v2030_v31  ;;  %1692 = vst.msk [vmem:[%s2874_s25 + $0xd4] sm:$0xf] %vm1638_vm4, %v2080_v32  ;;  %v774_v35 = vadd.f32 %v2863_v56, %v773_v33  ;;  %v2190_v36 = vpop.f32.mrb[9].mxu0  ;;  %v974_v37 = vadd.f32 %v2863_v56, %v973_v34  ;;  %v2290_v38 = vpop.f32.mrb[9].mxu1 }
 0x131   : > { %v776_v39 = vpop.f32.mrb[10].mxu0  ;;  %v976_v40 = vpop.f32.mrb[10].mxu1 }
 0x132   : > { %v1152_v41 = vmax.f32 %v774_v35, 0.0  ;;  %v777_v42 = vadd.f32 %v2863_v56, %v776_v39  ;;  %v2191_v43 = vpop.f32.mrb[11].mxu0  ;;  %v1202_v44 = vmax.f32 %v974_v37, 0.0  ;;  %v977_v45 = vadd.f32 %v2863_v56, %v976_v40  ;;  %v2291_v46 = vpop.f32.mrb[11].mxu1 }
 0x134   : > { %v2031_v47 = vpack.c.bf16 %v1152_v41, %v1152_v41  ;;  %v1153_v48 = vmax.f32 %v777_v42, 0.0  ;;  %v2081_v49 = vpack.c.bf16 %v1202_v44, %v1202_v44  ;;  %v1203_v50 = vmax.f32 %v977_v45, 0.0 }
 0x136   : > { %1643 = vst.msk [vmem:[%s2874_s25 + $0x10] sm:$0xf] %vm1638_vm4, %v2031_v47  ;;  %v2032_v51 = vpack.c.bf16 %v1153_v48, %v1153_v48  ;;  %1693 = vst.msk [vmem:[%s2874_s25 + $0xd8] sm:$0xf] %vm1638_vm4, %v2081_v49  ;;  %v2082_v52 = vpack.c.bf16 %v1203_v50, %v1203_v50 }
 0x137   : > { %v781_v53 = vpop.f32.mrb[12].mxu0  ;;  %v981_v54 = vpop.f32.mrb[12].mxu1 }
 0x138   : > { %1644 = vst.msk [vmem:[%s2874_s25 + $0x14] sm:$0xf] %vm1638_vm4, %v2032_v51  ;;  %1694 = vst.msk [vmem:[%s2874_s25 + $0xdc] sm:$0xf] %vm1638_vm4, %v2082_v52  ;;  %v782_v55 = vadd.f32 %v2863_v56, %v781_v53  ;;  %v2194_v57 = vpop.f32.mrb[13].mxu0  ;;  %v982_v58 = vadd.f32 %v2863_v56, %v981_v54  ;;  %v2294_v59 = vpop.f32.mrb[13].mxu1 }
 0x139   : > { %v784_v60 = vpop.f32.mrb[14].mxu0  ;;  %v984_v61 = vpop.f32.mrb[14].mxu1 }
 0x13a   : > { %v1154_v62 = vmax.f32 %v782_v55, 0.0  ;;  %v785_v63 = vadd.f32 %v2863_v56, %v784_v60  ;;  %v2195_v1 = vpop.f32.mrb[15].mxu0  ;;  %v1204_v2 = vmax.f32 %v982_v58, 0.0  ;;  %v985_v3 = vadd.f32 %v2863_v56, %v984_v61  ;;  %v2295_v0 = vpop.f32.mrb[15].mxu1 }
 0x13c   : > { %v2033_v4 = vpack.c.bf16 %v1154_v62, %v1154_v62  ;;  %v1155_v5 = vmax.f32 %v785_v63, 0.0  ;;  %v2083_v6 = vpack.c.bf16 %v1204_v2, %v1204_v2  ;;  %v1205_v7 = vmax.f32 %v985_v3, 0.0 }
 0x13e   : > { %1645 = vst.msk [vmem:[%s2874_s25 + $0x18] sm:$0xf] %vm1638_vm4, %v2033_v4  ;;  %v2034_v8 = vpack.c.bf16 %v1155_v5, %v1155_v5  ;;  %1695 = vst.msk [vmem:[%s2874_s25 + $0xe0] sm:$0xf] %vm1638_vm4, %v2083_v6  ;;  %v2084_v9 = vpack.c.bf16 %v1205_v7, %v1205_v7 }
 0x13f   : > { %v789_v10 = vpop.f32.mrb[16].mxu0  ;;  %v989_v11 = vpop.f32.mrb[16].mxu1 }
 0x140   : > { %1646 = vst.msk [vmem:[%s2874_s25 + $0x1c] sm:$0xf] %vm1638_vm4, %v2034_v8  ;;  %1696 = vst.msk [vmem:[%s2874_s25 + $0xe4] sm:$0xf] %vm1638_vm4, %v2084_v9  ;;  %v790_v12 = vadd.f32 %v2863_v56, %v789_v10  ;;  %v2198_v13 = vpop.f32.mrb[17].mxu0  ;;  %v990_v14 = vadd.f32 %v2863_v56, %v989_v11  ;;  %v2298_v15 = vpop.f32.mrb[17].mxu1 }
 0x141   : > { %v792_v16 = vpop.f32.mrb[18].mxu0  ;;  %v992_v17 = vpop.f32.mrb[18].mxu1 }
 0x142   : > { %v1156_v18 = vmax.f32 %v790_v12, 0.0  ;;  %v793_v19 = vadd.f32 %v2863_v56, %v792_v16  ;;  %v2199_v20 = vpop.f32.mrb[19].mxu0  ;;  %v1206_v21 = vmax.f32 %v990_v14, 0.0  ;;  %v993_v22 = vadd.f32 %v2863_v56, %v992_v17  ;;  %v2299_v23 = vpop.f32.mrb[19].mxu1 }
 0x144   : > { %v2035_v24 = vpack.c.bf16 %v1156_v18, %v1156_v18  ;;  %v1157_v25 = vmax.f32 %v793_v19, 0.0  ;;  %v2085_v26 = vpack.c.bf16 %v1206_v21, %v1206_v21  ;;  %v1207_v27 = vmax.f32 %v993_v22, 0.0 }
 0x146   : > { %1647 = vst.msk [vmem:[%s2874_s25 + $0x20] sm:$0xf] %vm1638_vm4, %v2035_v24  ;;  %v2036_v28 = vpack.c.bf16 %v1157_v25, %v1157_v25  ;;  %1697 = vst.msk [vmem:[%s2874_s25 + $0xe8] sm:$0xf] %vm1638_vm4, %v2085_v26  ;;  %v2086_v29 = vpack.c.bf16 %v1207_v27, %v1207_v27 }
 0x147   : > { %v797_v30 = vpop.f32.mrb[20].mxu0  ;;  %v997_v31 = vpop.f32.mrb[20].mxu1 }
 0x148   : > { %1648 = vst.msk [vmem:[%s2874_s25 + $0x24] sm:$0xf] %vm1638_vm4, %v2036_v28  ;;  %1698 = vst.msk [vmem:[%s2874_s25 + $0xec] sm:$0xf] %vm1638_vm4, %v2086_v29  ;;  %v798_v32 = vadd.f32 %v2863_v56, %v797_v30  ;;  %v2202_v33 = vpop.f32.mrb[21].mxu0  ;;  %v998_v34 = vadd.f32 %v2863_v56, %v997_v31  ;;  %v2302_v35 = vpop.f32.mrb[21].mxu1 }
 0x149   : > { %v800_v36 = vpop.f32.mrb[22].mxu0  ;;  %v1000_v37 = vpop.f32.mrb[22].mxu1 }
 0x14a   : > { %v1158_v38 = vmax.f32 %v798_v32, 0.0  ;;  %v801_v39 = vadd.f32 %v2863_v56, %v800_v36  ;;  %v2203_v40 = vpop.f32.mrb[23].mxu0  ;;  %v1208_v41 = vmax.f32 %v998_v34, 0.0  ;;  %v1001_v42 = vadd.f32 %v2863_v56, %v1000_v37  ;;  %v2303_v43 = vpop.f32.mrb[23].mxu1 }
 0x14c   : > { %v2037_v44 = vpack.c.bf16 %v1158_v38, %v1158_v38  ;;  %v1159_v45 = vmax.f32 %v801_v39, 0.0  ;;  %v2087_v46 = vpack.c.bf16 %v1208_v41, %v1208_v41  ;;  %v1209_v47 = vmax.f32 %v1001_v42, 0.0 }
 0x14e   : > { %1649 = vst.msk [vmem:[%s2874_s25 + $0x28] sm:$0xf] %vm1638_vm4, %v2037_v44  ;;  %v2038_v48 = vpack.c.bf16 %v1159_v45, %v1159_v45  ;;  %1699 = vst.msk [vmem:[%s2874_s25 + $0xf0] sm:$0xf] %vm1638_vm4, %v2087_v46  ;;  %v2088_v49 = vpack.c.bf16 %v1209_v47, %v1209_v47 }
 0x14f   : > { %v805_v50 = vpop.f32.mrb[24].mxu0  ;;  %v1005_v51 = vpop.f32.mrb[24].mxu1 }
 0x150   : > { %1650 = vst.msk [vmem:[%s2874_s25 + $0x2c] sm:$0xf] %vm1638_vm4, %v2038_v48  ;;  %1700 = vst.msk [vmem:[%s2874_s25 + $0xf4] sm:$0xf] %vm1638_vm4, %v2088_v49  ;;  %v806_v52 = vadd.f32 %v2863_v56, %v805_v50  ;;  %v2206_v53 = vpop.f32.mrb[25].mxu0  ;;  %v1006_v54 = vadd.f32 %v2863_v56, %v1005_v51  ;;  %v2306_v55 = vpop.f32.mrb[25].mxu1 }
 0x151   : > { %v808_v57 = vpop.f32.mrb[26].mxu0  ;;  %v1008_v58 = vpop.f32.mrb[26].mxu1 }
 0x152   : > { %v1160_v59 = vmax.f32 %v806_v52, 0.0  ;;  %v809_v60 = vadd.f32 %v2863_v56, %v808_v57  ;;  %v2207_v61 = vpop.f32.mrb[27].mxu0  ;;  %v1210_v62 = vmax.f32 %v1006_v54, 0.0  ;;  %v1009_v63 = vadd.f32 %v2863_v56, %v1008_v58  ;;  %v2307_v1 = vpop.f32.mrb[27].mxu1 }
 0x154   : > { %v2039_v2 = vpack.c.bf16 %v1160_v59, %v1160_v59  ;;  %v1161_v3 = vmax.f32 %v809_v60, 0.0  ;;  %v2089_v0 = vpack.c.bf16 %v1210_v62, %v1210_v62  ;;  %v1211_v4 = vmax.f32 %v1009_v63, 0.0 }
 0x156   : > { %1651 = vst.msk [vmem:[%s2874_s25 + $0x30] sm:$0xf] %vm1638_vm4, %v2039_v2  ;;  %v2040_v5 = vpack.c.bf16 %v1161_v3, %v1161_v3  ;;  %1701 = vst.msk [vmem:[%s2874_s25 + $0xf8] sm:$0xf] %vm1638_vm4, %v2089_v0  ;;  %v2090_v6 = vpack.c.bf16 %v1211_v4, %v1211_v4 }
 0x157   : > { %v813_v7 = vpop.f32.mrb[28].mxu0  ;;  %v1013_v8 = vpop.f32.mrb[28].mxu1 }
 0x158   : > { %1652 = vst.msk [vmem:[%s2874_s25 + $0x34] sm:$0xf] %vm1638_vm4, %v2040_v5  ;;  %1702 = vst.msk [vmem:[%s2874_s25 + $0xfc] sm:$0xf] %vm1638_vm4, %v2090_v6  ;;  %v814_v9 = vadd.f32 %v2863_v56, %v813_v7  ;;  %v2210_v10 = vpop.f32.mrb[29].mxu0  ;;  %v1014_v11 = vadd.f32 %v2863_v56, %v1013_v8  ;;  %v2310_v12 = vpop.f32.mrb[29].mxu1 }
 0x159   : > { %v816_v13 = vpop.f32.mrb[30].mxu0  ;;  %v1016_v14 = vpop.f32.mrb[30].mxu1 }
 0x15a   : > { %v1162_v15 = vmax.f32 %v814_v9, 0.0  ;;  %v817_v16 = vadd.f32 %v2863_v56, %v816_v13  ;;  %v2211_v17 = vpop.f32.mrb[31].mxu0  ;;  %v1212_v18 = vmax.f32 %v1014_v11, 0.0  ;;  %v1017_v19 = vadd.f32 %v2863_v56, %v1016_v14  ;;  %v2311_v20 = vpop.f32.mrb[31].mxu1 }
 0x15c   : > { %v2041_v21 = vpack.c.bf16 %v1162_v15, %v1162_v15  ;;  %v1163_v22 = vmax.f32 %v817_v16, 0.0  ;;  %v2091_v23 = vpack.c.bf16 %v1212_v18, %v1212_v18  ;;  %v1213_v24 = vmax.f32 %v1017_v19, 0.0 }
 0x15e   : > { %1653 = vst.msk [vmem:[%s2874_s25 + $0x38] sm:$0xf] %vm1638_vm4, %v2041_v21  ;;  %v2042_v25 = vpack.c.bf16 %v1163_v22, %v1163_v22  ;;  %1703 = vst.msk [vmem:[%s2874_s25 + $0x100] sm:$0xf] %vm1638_vm4, %v2091_v23  ;;  %v2092_v26 = vpack.c.bf16 %v1213_v24, %v1213_v24 }
 0x15f   : > { %v821_v27 = vpop.f32.mrb[32].mxu0  ;;  %v1021_v28 = vpop.f32.mrb[32].mxu1 }
 0x160   : > { %1654 = vst.msk [vmem:[%s2874_s25 + $0x3c] sm:$0xf] %vm1638_vm4, %v2042_v25  ;;  %1704 = vst.msk [vmem:[%s2874_s25 + $0x104] sm:$0xf] %vm1638_vm4, %v2092_v26  ;;  %v822_v29 = vadd.f32 %v2863_v56, %v821_v27  ;;  %v2214_v30 = vpop.f32.mrb[33].mxu0  ;;  %v1022_v31 = vadd.f32 %v2863_v56, %v1021_v28  ;;  %v2314_v32 = vpop.f32.mrb[33].mxu1 }
 0x161   : > { %v824_v33 = vpop.f32.mrb[34].mxu0  ;;  %v1024_v34 = vpop.f32.mrb[34].mxu1 }
 0x162   : > { %v1164_v35 = vmax.f32 %v822_v29, 0.0  ;;  %v825_v36 = vadd.f32 %v2863_v56, %v824_v33  ;;  %v2215_v37 = vpop.f32.mrb[35].mxu0  ;;  %v1214_v38 = vmax.f32 %v1022_v31, 0.0  ;;  %v1025_v39 = vadd.f32 %v2863_v56, %v1024_v34  ;;  %v2315_v40 = vpop.f32.mrb[35].mxu1 }
 0x164   : > { %v2043_v41 = vpack.c.bf16 %v1164_v35, %v1164_v35  ;;  %v1165_v42 = vmax.f32 %v825_v36, 0.0  ;;  %v2093_v43 = vpack.c.bf16 %v1214_v38, %v1214_v38  ;;  %v1215_v44 = vmax.f32 %v1025_v39, 0.0 }
 0x166   : > { %1655 = vst.msk [vmem:[%s2874_s25 + $0x40] sm:$0xf] %vm1638_vm4, %v2043_v41  ;;  %v2044_v45 = vpack.c.bf16 %v1165_v42, %v1165_v42  ;;  %1705 = vst.msk [vmem:[%s2874_s25 + $0x108] sm:$0xf] %vm1638_vm4, %v2093_v43  ;;  %v2094_v46 = vpack.c.bf16 %v1215_v44, %v1215_v44 }
 0x167   : > { %v829_v47 = vpop.f32.mrb[36].mxu0  ;;  %v1029_v48 = vpop.f32.mrb[36].mxu1 }
 0x168   : > { %1656 = vst.msk [vmem:[%s2874_s25 + $0x44] sm:$0xf] %vm1638_vm4, %v2044_v45  ;;  %1706 = vst.msk [vmem:[%s2874_s25 + $0x10c] sm:$0xf] %vm1638_vm4, %v2094_v46  ;;  %v830_v49 = vadd.f32 %v2863_v56, %v829_v47  ;;  %v2218_v50 = vpop.f32.mrb[37].mxu0  ;;  %v1030_v51 = vadd.f32 %v2863_v56, %v1029_v48  ;;  %v2318_v52 = vpop.f32.mrb[37].mxu1 }
 0x169   : > { %v832_v53 = vpop.f32.mrb[38].mxu0  ;;  %v1032_v54 = vpop.f32.mrb[38].mxu1 }
 0x16a   : > { %v1166_v55 = vmax.f32 %v830_v49, 0.0  ;;  %v833_v57 = vadd.f32 %v2863_v56, %v832_v53  ;;  %v2219_v58 = vpop.f32.mrb[39].mxu0  ;;  %v1216_v59 = vmax.f32 %v1030_v51, 0.0  ;;  %v1033_v60 = vadd.f32 %v2863_v56, %v1032_v54  ;;  %v2319_v61 = vpop.f32.mrb[39].mxu1 }
 0x16c   : > { %v2045_v62 = vpack.c.bf16 %v1166_v55, %v1166_v55  ;;  %v1167_v63 = vmax.f32 %v833_v57, 0.0  ;;  %v2095_v1 = vpack.c.bf16 %v1216_v59, %v1216_v59  ;;  %v1217_v2 = vmax.f32 %v1033_v60, 0.0 }
 0x16e   : > { %1657 = vst.msk [vmem:[%s2874_s25 + $0x48] sm:$0xf] %vm1638_vm4, %v2045_v62  ;;  %v2046_v3 = vpack.c.bf16 %v1167_v63, %v1167_v63  ;;  %1707 = vst.msk [vmem:[%s2874_s25 + $0x110] sm:$0xf] %vm1638_vm4, %v2095_v1  ;;  %v2096_v0 = vpack.c.bf16 %v1217_v2, %v1217_v2 }
 0x16f   : > { %v837_v4 = vpop.f32.mrb[40].mxu0  ;;  %v1037_v5 = vpop.f32.mrb[40].mxu1 }
 0x170   : > { %1658 = vst.msk [vmem:[%s2874_s25 + $0x4c] sm:$0xf] %vm1638_vm4, %v2046_v3  ;;  %1708 = vst.msk [vmem:[%s2874_s25 + $0x114] sm:$0xf] %vm1638_vm4, %v2096_v0  ;;  %v838_v6 = vadd.f32 %v2863_v56, %v837_v4  ;;  %v2222_v7 = vpop.f32.mrb[41].mxu0  ;;  %v1038_v8 = vadd.f32 %v2863_v56, %v1037_v5  ;;  %v2322_v9 = vpop.f32.mrb[41].mxu1 }
 0x171   : > { %v840_v10 = vpop.f32.mrb[42].mxu0  ;;  %v1040_v11 = vpop.f32.mrb[42].mxu1 }
 0x172   : > { %v1168_v12 = vmax.f32 %v838_v6, 0.0  ;;  %v841_v13 = vadd.f32 %v2863_v56, %v840_v10  ;;  %v2223_v14 = vpop.f32.mrb[43].mxu0  ;;  %v1218_v15 = vmax.f32 %v1038_v8, 0.0  ;;  %v1041_v16 = vadd.f32 %v2863_v56, %v1040_v11  ;;  %v2323_v17 = vpop.f32.mrb[43].mxu1 }
 0x174   : > { %v2047_v18 = vpack.c.bf16 %v1168_v12, %v1168_v12  ;;  %v1169_v19 = vmax.f32 %v841_v13, 0.0  ;;  %v2097_v20 = vpack.c.bf16 %v1218_v15, %v1218_v15  ;;  %v1219_v21 = vmax.f32 %v1041_v16, 0.0 }
 0x176   : > { %1659 = vst.msk [vmem:[%s2874_s25 + $0x50] sm:$0xf] %vm1638_vm4, %v2047_v18  ;;  %v2048_v22 = vpack.c.bf16 %v1169_v19, %v1169_v19  ;;  %1709 = vst.msk [vmem:[%s2874_s25 + $0x118] sm:$0xf] %vm1638_vm4, %v2097_v20  ;;  %v2098_v23 = vpack.c.bf16 %v1219_v21, %v1219_v21 }
 0x177   : > { %v845_v24 = vpop.f32.mrb[44].mxu0  ;;  %v1045_v25 = vpop.f32.mrb[44].mxu1 }
 0x178   : > { %1660 = vst.msk [vmem:[%s2874_s25 + $0x54] sm:$0xf] %vm1638_vm4, %v2048_v22  ;;  %1710 = vst.msk [vmem:[%s2874_s25 + $0x11c] sm:$0xf] %vm1638_vm4, %v2098_v23  ;;  %v846_v26 = vadd.f32 %v2863_v56, %v845_v24  ;;  %v2226_v27 = vpop.f32.mrb[45].mxu0  ;;  %v1046_v28 = vadd.f32 %v2863_v56, %v1045_v25  ;;  %v2326_v29 = vpop.f32.mrb[45].mxu1 }
 0x179   : > { %v848_v30 = vpop.f32.mrb[46].mxu0  ;;  %v1048_v31 = vpop.f32.mrb[46].mxu1 }
 0x17a   : > { %v1170_v32 = vmax.f32 %v846_v26, 0.0  ;;  %v849_v33 = vadd.f32 %v2863_v56, %v848_v30  ;;  %v2227_v34 = vpop.f32.mrb[47].mxu0  ;;  %v1220_v35 = vmax.f32 %v1046_v28, 0.0  ;;  %v1049_v36 = vadd.f32 %v2863_v56, %v1048_v31  ;;  %v2327_v37 = vpop.f32.mrb[47].mxu1 }
 0x17c   : > { %v2049_v38 = vpack.c.bf16 %v1170_v32, %v1170_v32  ;;  %v1171_v39 = vmax.f32 %v849_v33, 0.0  ;;  %v2099_v40 = vpack.c.bf16 %v1220_v35, %v1220_v35  ;;  %v1221_v41 = vmax.f32 %v1049_v36, 0.0 }
 0x17e   : > { %1661 = vst.msk [vmem:[%s2874_s25 + $0x58] sm:$0xf] %vm1638_vm4, %v2049_v38  ;;  %v2050_v42 = vpack.c.bf16 %v1171_v39, %v1171_v39  ;;  %1711 = vst.msk [vmem:[%s2874_s25 + $0x120] sm:$0xf] %vm1638_vm4, %v2099_v40  ;;  %v2100_v43 = vpack.c.bf16 %v1221_v41, %v1221_v41 }
 0x17f   : > { %v853_v44 = vpop.f32.mrb[48].mxu0  ;;  %v1053_v45 = vpop.f32.mrb[48].mxu1 }
 0x180   : > { %1662 = vst.msk [vmem:[%s2874_s25 + $0x5c] sm:$0xf] %vm1638_vm4, %v2050_v42  ;;  %1712 = vst.msk [vmem:[%s2874_s25 + $0x124] sm:$0xf] %vm1638_vm4, %v2100_v43  ;;  %v854_v46 = vadd.f32 %v2863_v56, %v853_v44  ;;  %v2230_v47 = vpop.f32.mrb[49].mxu0  ;;  %v1054_v48 = vadd.f32 %v2863_v56, %v1053_v45  ;;  %v2330_v49 = vpop.f32.mrb[49].mxu1 }
 0x181   : > { %v856_v50 = vpop.f32.mrb[50].mxu0  ;;  %v1056_v51 = vpop.f32.mrb[50].mxu1 }
 0x182   : > { %v1172_v52 = vmax.f32 %v854_v46, 0.0  ;;  %v857_v53 = vadd.f32 %v2863_v56, %v856_v50  ;;  %v2231_v54 = vpop.f32.mrb[51].mxu0  ;;  %v1222_v55 = vmax.f32 %v1054_v48, 0.0  ;;  %v1057_v57 = vadd.f32 %v2863_v56, %v1056_v51  ;;  %v2331_v58 = vpop.f32.mrb[51].mxu1 }
 0x184   : > { %v2051_v59 = vpack.c.bf16 %v1172_v52, %v1172_v52  ;;  %v1173_v60 = vmax.f32 %v857_v53, 0.0  ;;  %v2101_v61 = vpack.c.bf16 %v1222_v55, %v1222_v55  ;;  %v1223_v62 = vmax.f32 %v1057_v57, 0.0 }
 0x186   : > { %1663 = vst.msk [vmem:[%s2874_s25 + $0x60] sm:$0xf] %vm1638_vm4, %v2051_v59  ;;  %v2052_v63 = vpack.c.bf16 %v1173_v60, %v1173_v60  ;;  %1713 = vst.msk [vmem:[%s2874_s25 + $0x128] sm:$0xf] %vm1638_vm4, %v2101_v61  ;;  %v2102_v1 = vpack.c.bf16 %v1223_v62, %v1223_v62 }
 0x187   : > { %v861_v2 = vpop.f32.mrb[52].mxu0  ;;  %v1061_v3 = vpop.f32.mrb[52].mxu1 }
 0x188   : > { %1664 = vst.msk [vmem:[%s2874_s25 + $0x64] sm:$0xf] %vm1638_vm4, %v2052_v63  ;;  %1714 = vst.msk [vmem:[%s2874_s25 + $0x12c] sm:$0xf] %vm1638_vm4, %v2102_v1  ;;  %v862_v0 = vadd.f32 %v2863_v56, %v861_v2  ;;  %v2234_v4 = vpop.f32.mrb[53].mxu0  ;;  %v1062_v5 = vadd.f32 %v2863_v56, %v1061_v3  ;;  %v2334_v6 = vpop.f32.mrb[53].mxu1 }
 0x189   : > { %v864_v7 = vpop.f32.mrb[54].mxu0  ;;  %v1064_v8 = vpop.f32.mrb[54].mxu1 }
 0x18a   : > { %v1174_v9 = vmax.f32 %v862_v0, 0.0  ;;  %v865_v10 = vadd.f32 %v2863_v56, %v864_v7  ;;  %v2235_v11 = vpop.f32.mrb[55].mxu0  ;;  %v1224_v12 = vmax.f32 %v1062_v5, 0.0  ;;  %v1065_v13 = vadd.f32 %v2863_v56, %v1064_v8  ;;  %v2335_v14 = vpop.f32.mrb[55].mxu1 }
 0x18c   : > { %v2053_v15 = vpack.c.bf16 %v1174_v9, %v1174_v9  ;;  %v1175_v16 = vmax.f32 %v865_v10, 0.0  ;;  %v2103_v17 = vpack.c.bf16 %v1224_v12, %v1224_v12  ;;  %v1225_v18 = vmax.f32 %v1065_v13, 0.0 }
 0x18e   : > { %1665 = vst.msk [vmem:[%s2874_s25 + $0x68] sm:$0xf] %vm1638_vm4, %v2053_v15  ;;  %v2054_v19 = vpack.c.bf16 %v1175_v16, %v1175_v16  ;;  %1715 = vst.msk [vmem:[%s2874_s25 + $0x130] sm:$0xf] %vm1638_vm4, %v2103_v17  ;;  %v2104_v20 = vpack.c.bf16 %v1225_v18, %v1225_v18 }
 0x18f   : > { %v869_v21 = vpop.f32.mrb[56].mxu0  ;;  %v1069_v22 = vpop.f32.mrb[56].mxu1 }
 0x190   : > { %1666 = vst.msk [vmem:[%s2874_s25 + $0x6c] sm:$0xf] %vm1638_vm4, %v2054_v19  ;;  %1716 = vst.msk [vmem:[%s2874_s25 + $0x134] sm:$0xf] %vm1638_vm4, %v2104_v20  ;;  %v870_v23 = vadd.f32 %v2863_v56, %v869_v21  ;;  %v2238_v24 = vpop.f32.mrb[57].mxu0  ;;  %v1070_v25 = vadd.f32 %v2863_v56, %v1069_v22  ;;  %v2338_v26 = vpop.f32.mrb[57].mxu1 }
 0x191   : > { %v872_v27 = vpop.f32.mrb[58].mxu0  ;;  %v1072_v28 = vpop.f32.mrb[58].mxu1 }
 0x192   : > { %v1176_v29 = vmax.f32 %v870_v23, 0.0  ;;  %v873_v30 = vadd.f32 %v2863_v56, %v872_v27  ;;  %v2239_v31 = vpop.f32.mrb[59].mxu0  ;;  %v1226_v32 = vmax.f32 %v1070_v25, 0.0  ;;  %v1073_v33 = vadd.f32 %v2863_v56, %v1072_v28  ;;  %v2339_v34 = vpop.f32.mrb[59].mxu1 }
 0x194   : > { %v2055_v35 = vpack.c.bf16 %v1176_v29, %v1176_v29  ;;  %v1177_v36 = vmax.f32 %v873_v30, 0.0  ;;  %v2105_v37 = vpack.c.bf16 %v1226_v32, %v1226_v32  ;;  %v1227_v38 = vmax.f32 %v1073_v33, 0.0 }
 0x196   : > { %1667 = vst.msk [vmem:[%s2874_s25 + $0x70] sm:$0xf] %vm1638_vm4, %v2055_v35  ;;  %v2056_v39 = vpack.c.bf16 %v1177_v36, %v1177_v36  ;;  %1717 = vst.msk [vmem:[%s2874_s25 + $0x138] sm:$0xf] %vm1638_vm4, %v2105_v37  ;;  %v2106_v40 = vpack.c.bf16 %v1227_v38, %v1227_v38 }
 0x197   : > { %v877_v41 = vpop.f32.mrb[60].mxu0  ;;  %v1077_v42 = vpop.f32.mrb[60].mxu1 }
 0x198   : > { %1668 = vst.msk [vmem:[%s2874_s25 + $0x74] sm:$0xf] %vm1638_vm4, %v2056_v39  ;;  %1718 = vst.msk [vmem:[%s2874_s25 + $0x13c] sm:$0xf] %vm1638_vm4, %v2106_v40  ;;  %v878_v43 = vadd.f32 %v2863_v56, %v877_v41  ;;  %v2242_v44 = vpop.f32.mrb[61].mxu0  ;;  %v1078_v45 = vadd.f32 %v2863_v56, %v1077_v42  ;;  %v2342_v46 = vpop.f32.mrb[61].mxu1 }
 0x199   : > { %v880_v47 = vpop.f32.mrb[62].mxu0  ;;  %v1080_v48 = vpop.f32.mrb[62].mxu1 }
 0x19a   : > { %v1178_v49 = vmax.f32 %v878_v43, 0.0  ;;  %v881_v50 = vadd.f32 %v2863_v56, %v880_v47  ;;  %v2243_v51 = vpop.f32.mrb[63].mxu0  ;;  %v1228_v52 = vmax.f32 %v1078_v45, 0.0  ;;  %v1081_v53 = vadd.f32 %v2863_v56, %v1080_v48  ;;  %v2343_v54 = vpop.f32.mrb[63].mxu1 }
 0x19c   : > { %v2057_v55 = vpack.c.bf16 %v1178_v49, %v1178_v49  ;;  %v1179_v57 = vmax.f32 %v881_v50, 0.0  ;;  %v2107_v58 = vpack.c.bf16 %v1228_v52, %v1228_v52  ;;  %v1229_v59 = vmax.f32 %v1081_v53, 0.0 }
 0x19e   : > { %1669 = vst.msk [vmem:[%s2874_s25 + $0x78] sm:$0xf] %vm1638_vm4, %v2057_v55  ;;  %v2058_v60 = vpack.c.bf16 %v1179_v57, %v1179_v57  ;;  %1719 = vst.msk [vmem:[%s2874_s25 + $0x140] sm:$0xf] %vm1638_vm4, %v2107_v58  ;;  %v2108_v61 = vpack.c.bf16 %v1229_v59, %v1229_v59 }
 0x19f   : > { %v885_v62 = vpop.f32.mrb[64].mxu0  ;;  %v1085_v63 = vpop.f32.mrb[64].mxu1 }
 0x1a0   : > { %1670 = vst.msk [vmem:[%s2874_s25 + $0x7c] sm:$0xf] %vm1638_vm4, %v2058_v60  ;;  %1720 = vst.msk [vmem:[%s2874_s25 + $0x144] sm:$0xf] %vm1638_vm4, %v2108_v61  ;;  %v886_v1 = vadd.f32 %v2863_v56, %v885_v62  ;;  %v2246_v2 = vpop.f32.mrb[65].mxu0  ;;  %v1086_v3 = vadd.f32 %v2863_v56, %v1085_v63  ;;  %v2346_v0 = vpop.f32.mrb[65].mxu1 }
 0x1a1   : > { %v888_v4 = vpop.f32.mrb[66].mxu0  ;;  %v1088_v5 = vpop.f32.mrb[66].mxu1 }
 0x1a2   : > { %v1180_v6 = vmax.f32 %v886_v1, 0.0  ;;  %v889_v7 = vadd.f32 %v2863_v56, %v888_v4  ;;  %v2247_v8 = vpop.f32.mrb[67].mxu0  ;;  %v1230_v9 = vmax.f32 %v1086_v3, 0.0  ;;  %v1089_v10 = vadd.f32 %v2863_v56, %v1088_v5  ;;  %v2347_v11 = vpop.f32.mrb[67].mxu1 }
 0x1a4   : > { %v2059_v12 = vpack.c.bf16 %v1180_v6, %v1180_v6  ;;  %v1181_v13 = vmax.f32 %v889_v7, 0.0  ;;  %v2109_v14 = vpack.c.bf16 %v1230_v9, %v1230_v9  ;;  %v1231_v15 = vmax.f32 %v1089_v10, 0.0 }
 0x1a6   : > { %1671 = vst.msk [vmem:[%s2874_s25 + $0x80] sm:$0xf] %vm1638_vm4, %v2059_v12  ;;  %v2060_v16 = vpack.c.bf16 %v1181_v13, %v1181_v13  ;;  %1721 = vst.msk [vmem:[%s2874_s25 + $0x148] sm:$0xf] %vm1638_vm4, %v2109_v14  ;;  %v2110_v17 = vpack.c.bf16 %v1231_v15, %v1231_v15 }
 0x1a7   : > { %v893_v18 = vpop.f32.mrb[68].mxu0  ;;  %v1093_v19 = vpop.f32.mrb[68].mxu1 }
 0x1a8   : > { %1672 = vst.msk [vmem:[%s2874_s25 + $0x84] sm:$0xf] %vm1638_vm4, %v2060_v16  ;;  %1722 = vst.msk [vmem:[%s2874_s25 + $0x14c] sm:$0xf] %vm1638_vm4, %v2110_v17  ;;  %v894_v20 = vadd.f32 %v2863_v56, %v893_v18  ;;  %v2250_v21 = vpop.f32.mrb[69].mxu0  ;;  %v1094_v22 = vadd.f32 %v2863_v56, %v1093_v19  ;;  %v2350_v23 = vpop.f32.mrb[69].mxu1 }
 0x1a9   : > { %v896_v24 = vpop.f32.mrb[70].mxu0  ;;  %v1096_v25 = vpop.f32.mrb[70].mxu1 }
 0x1aa   : > { %v1182_v26 = vmax.f32 %v894_v20, 0.0  ;;  %v897_v27 = vadd.f32 %v2863_v56, %v896_v24  ;;  %v2251_v28 = vpop.f32.mrb[71].mxu0  ;;  %v1232_v29 = vmax.f32 %v1094_v22, 0.0  ;;  %v1097_v30 = vadd.f32 %v2863_v56, %v1096_v25  ;;  %v2351_v31 = vpop.f32.mrb[71].mxu1 }
 0x1ac   : > { %v2061_v32 = vpack.c.bf16 %v1182_v26, %v1182_v26  ;;  %v1183_v33 = vmax.f32 %v897_v27, 0.0  ;;  %v2111_v34 = vpack.c.bf16 %v1232_v29, %v1232_v29  ;;  %v1233_v35 = vmax.f32 %v1097_v30, 0.0 }
 0x1ae   : > { %1673 = vst.msk [vmem:[%s2874_s25 + $0x88] sm:$0xf] %vm1638_vm4, %v2061_v32  ;;  %v2062_v36 = vpack.c.bf16 %v1183_v33, %v1183_v33  ;;  %1723 = vst.msk [vmem:[%s2874_s25 + $0x150] sm:$0xf] %vm1638_vm4, %v2111_v34  ;;  %v2112_v37 = vpack.c.bf16 %v1233_v35, %v1233_v35 }
 0x1af   : > { %v901_v38 = vpop.f32.mrb[72].mxu0  ;;  %v1101_v39 = vpop.f32.mrb[72].mxu1 }
 0x1b0   : > { %1674 = vst.msk [vmem:[%s2874_s25 + $0x8c] sm:$0xf] %vm1638_vm4, %v2062_v36  ;;  %1724 = vst.msk [vmem:[%s2874_s25 + $0x154] sm:$0xf] %vm1638_vm4, %v2112_v37  ;;  %v902_v40 = vadd.f32 %v2863_v56, %v901_v38  ;;  %v2254_v41 = vpop.f32.mrb[73].mxu0  ;;  %v1102_v42 = vadd.f32 %v2863_v56, %v1101_v39  ;;  %v2354_v43 = vpop.f32.mrb[73].mxu1 }
 0x1b1   : > { %v904_v44 = vpop.f32.mrb[74].mxu0  ;;  %v1104_v45 = vpop.f32.mrb[74].mxu1 }
 0x1b2   : > { %v1184_v46 = vmax.f32 %v902_v40, 0.0  ;;  %v905_v47 = vadd.f32 %v2863_v56, %v904_v44  ;;  %v2255_v48 = vpop.f32.mrb[75].mxu0  ;;  %v1234_v49 = vmax.f32 %v1102_v42, 0.0  ;;  %v1105_v50 = vadd.f32 %v2863_v56, %v1104_v45  ;;  %v2355_v51 = vpop.f32.mrb[75].mxu1  ;;  %v3126_v44 = vld [vmem:[#allocation4] ss:$0 sm:$0xff] }
 0x1b4   : > { %v2063_v52 = vpack.c.bf16 %v1184_v46, %v1184_v46  ;;  %v1185_v53 = vmax.f32 %v905_v47, 0.0  ;;  %v2113_v54 = vpack.c.bf16 %v1234_v49, %v1234_v49  ;;  %v1235_v55 = vmax.f32 %v1105_v50, 0.0 }
 0x1b6   : > { %1675 = vst.msk [vmem:[%s2874_s25 + $0x90] sm:$0xf] %vm1638_vm4, %v2063_v52  ;;  %v2064_v57 = vpack.c.bf16 %v1185_v53, %v1185_v53  ;;  %1725 = vst.msk [vmem:[%s2874_s25 + $0x158] sm:$0xf] %vm1638_vm4, %v2113_v54  ;;  %v2114_v58 = vpack.c.bf16 %v1235_v55, %v1235_v55 }
 0x1b7   : > { %v909_v59 = vpop.f32.mrb[76].mxu0  ;;  %v1109_v60 = vpop.f32.mrb[76].mxu1 }
 0x1b8   : > { %1676 = vst.msk [vmem:[%s2874_s25 + $0x94] sm:$0xf] %vm1638_vm4, %v2064_v57  ;;  %1726 = vst.msk [vmem:[%s2874_s25 + $0x15c] sm:$0xf] %vm1638_vm4, %v2114_v58  ;;  %v910_v61 = vadd.f32 %v2863_v56, %v909_v59  ;;  %v2258_v62 = vpop.f32.mrb[77].mxu0  ;;  %v1110_v63 = vadd.f32 %v2863_v56, %v1109_v60  ;;  %v2358_v1 = vpop.f32.mrb[77].mxu1 }
 0x1b9   : > { %v912_v2 = vpop.f32.mrb[78].mxu0  ;;  %v1112_v3 = vpop.f32.mrb[78].mxu1 }
 0x1ba   : > { %v1186_v0 = vmax.f32 %v910_v61, 0.0  ;;  %v913_v4 = vadd.f32 %v2863_v56, %v912_v2  ;;  %v2259_v5 = vpop.f32.mrb[79].mxu0  ;;  %v1236_v6 = vmax.f32 %v1110_v63, 0.0  ;;  %v1113_v7 = vadd.f32 %v2863_v56, %v1112_v3  ;;  %v2359_v8 = vpop.f32.mrb[79].mxu1 }
 0x1bc   : > { %v2065_v9 = vpack.c.bf16 %v1186_v0, %v1186_v0  ;;  %v1187_v10 = vmax.f32 %v913_v4, 0.0  ;;  %v2115_v11 = vpack.c.bf16 %v1236_v6, %v1236_v6  ;;  %v1237_v12 = vmax.f32 %v1113_v7, 0.0 }
 0x1be   : > { %1677 = vst.msk [vmem:[%s2874_s25 + $0x98] sm:$0xf] %vm1638_vm4, %v2065_v9  ;;  %v2066_v13 = vpack.c.bf16 %v1187_v10, %v1187_v10  ;;  %1727 = vst.msk [vmem:[%s2874_s25 + $0x160] sm:$0xf] %vm1638_vm4, %v2115_v11  ;;  %v2116_v14 = vpack.c.bf16 %v1237_v12, %v1237_v12 }
 0x1bf   : > { %v917_v15 = vpop.f32.mrb[80].mxu0  ;;  %v1117_v16 = vpop.f32.mrb[80].mxu1 }
 0x1c0   : > { %1678 = vst.msk [vmem:[%s2874_s25 + $0x9c] sm:$0xf] %vm1638_vm4, %v2066_v13  ;;  %1728 = vst.msk [vmem:[%s2874_s25 + $0x164] sm:$0xf] %vm1638_vm4, %v2116_v14  ;;  %v918_v17 = vadd.f32 %v2863_v56, %v917_v15  ;;  %v2262_v18 = vpop.f32.mrb[81].mxu0  ;;  %v1118_v19 = vadd.f32 %v2863_v56, %v1117_v16  ;;  %v2362_v20 = vpop.f32.mrb[81].mxu1 }
 0x1c1   : > { %v920_v21 = vpop.f32.mrb[82].mxu0  ;;  %v1120_v22 = vpop.f32.mrb[82].mxu1 }
 0x1c2   : > { %v1188_v23 = vmax.f32 %v918_v17, 0.0  ;;  %v921_v24 = vadd.f32 %v2863_v56, %v920_v21  ;;  %v2263_v25 = vpop.f32.mrb[83].mxu0  ;;  %v1238_v26 = vmax.f32 %v1118_v19, 0.0  ;;  %v1121_v27 = vadd.f32 %v2863_v56, %v1120_v22  ;;  %v2363_v28 = vpop.f32.mrb[83].mxu1 }
 0x1c4   : > { %v2067_v29 = vpack.c.bf16 %v1188_v23, %v1188_v23  ;;  %v1189_v30 = vmax.f32 %v921_v24, 0.0  ;;  %v2117_v31 = vpack.c.bf16 %v1238_v26, %v1238_v26  ;;  %v1239_v32 = vmax.f32 %v1121_v27, 0.0 }
 0x1c6   : > { %1679 = vst.msk [vmem:[%s2874_s25 + $0xa0] sm:$0xf] %vm1638_vm4, %v2067_v29  ;;  %v2068_v33 = vpack.c.bf16 %v1189_v30, %v1189_v30  ;;  %1729 = vst.msk [vmem:[%s2874_s25 + $0x168] sm:$0xf] %vm1638_vm4, %v2117_v31  ;;  %v2118_v34 = vpack.c.bf16 %v1239_v32, %v1239_v32 }
 0x1c7   : > { %v925_v35 = vpop.f32.mrb[84].mxu0  ;;  %v1125_v36 = vpop.f32.mrb[84].mxu1 }
 0x1c8   : > { %1680 = vst.msk [vmem:[%s2874_s25 + $0xa4] sm:$0xf] %vm1638_vm4, %v2068_v33  ;;  %1730 = vst.msk [vmem:[%s2874_s25 + $0x16c] sm:$0xf] %vm1638_vm4, %v2118_v34  ;;  %v926_v37 = vadd.f32 %v2863_v56, %v925_v35  ;;  %v2266_v38 = vpop.f32.mrb[85].mxu0  ;;  %v1126_v39 = vadd.f32 %v2863_v56, %v1125_v36  ;;  %v2366_v40 = vpop.f32.mrb[85].mxu1 }
 0x1c9   : > { %v928_v41 = vpop.f32.mrb[86].mxu0  ;;  %v1128_v42 = vpop.f32.mrb[86].mxu1 }
 0x1ca   : > { %v1190_v43 = vmax.f32 %v926_v37, 0.0  ;;  %v929_v45 = vadd.f32 %v3126_v44, %v928_v41  ;;  %v2267_v46 = vpop.f32.mrb[87].mxu0  ;;  %v1240_v47 = vmax.f32 %v1126_v39, 0.0  ;;  %v1129_v48 = vadd.f32 %v3126_v44, %v1128_v42  ;;  %v2367_v49 = vpop.f32.mrb[87].mxu1 }
 0x1cc   : > { %v2069_v50 = vpack.c.bf16 %v1190_v43, %v1190_v43  ;;  %v1191_v51 = vmax.f32 %v929_v45, 0.0  ;;  %v2119_v52 = vpack.c.bf16 %v1240_v47, %v1240_v47  ;;  %v1241_v56 = vmax.f32 %v1129_v48, 0.0 }
 0x1ce   : > { %1681 = vst.msk [vmem:[%s2874_s25 + $0xa8] sm:$0xf] %vm1638_vm4, %v2069_v50  ;;  %v2070_v53 = vpack.c.bf16 %v1191_v51, %v1191_v51  ;;  %1731 = vst.msk [vmem:[%s2874_s25 + $0x170] sm:$0xf] %vm1638_vm4, %v2119_v52  ;;  %v2120_v54 = vpack.c.bf16 %v1241_v56, %v1241_v56 }
 0x1cf   : > { %v933_v55 = vpop.f32.mrb[88].mxu0  ;;  %v1133_v57 = vpop.f32.mrb[88].mxu1 }
 0x1d0   : > { %1682 = vst.msk [vmem:[%s2874_s25 + $0xac] sm:$0xf] %vm1638_vm4, %v2070_v53  ;;  %1732 = vst.msk [vmem:[%s2874_s25 + $0x174] sm:$0xf] %vm1638_vm4, %v2120_v54  ;;  %v934_v58 = vadd.f32 %v3126_v44, %v933_v55  ;;  %v2270_v59 = vpop.f32.mrb[89].mxu0  ;;  %v1134_v60 = vadd.f32 %v3126_v44, %v1133_v57  ;;  %v2370_v61 = vpop.f32.mrb[89].mxu1 }
 0x1d1   : > { %v936_v62 = vpop.f32.mrb[90].mxu0  ;;  %v1136_v63 = vpop.f32.mrb[90].mxu1 }
 0x1d2   : > { %v1192_v1 = vmax.f32 %v934_v58, 0.0  ;;  %v937_v2 = vadd.f32 %v3126_v44, %v936_v62  ;;  %v2271_v3 = vpop.f32.mrb[91].mxu0  ;;  %v1242_v0 = vmax.f32 %v1134_v60, 0.0  ;;  %v1137_v4 = vadd.f32 %v3126_v44, %v1136_v63  ;;  %v2371_v5 = vpop.f32.mrb[91].mxu1 }
 0x1d4   : > { %v2071_v6 = vpack.c.bf16 %v1192_v1, %v1192_v1  ;;  %v1193_v7 = vmax.f32 %v937_v2, 0.0  ;;  %v2121_v8 = vpack.c.bf16 %v1242_v0, %v1242_v0  ;;  %v1243_v9 = vmax.f32 %v1137_v4, 0.0 }
 0x1d6   : > { %1683 = vst.msk [vmem:[%s2874_s25 + $0xb0] sm:$0xf] %vm1638_vm4, %v2071_v6  ;;  %v2072_v10 = vpack.c.bf16 %v1193_v7, %v1193_v7  ;;  %1733 = vst.msk [vmem:[%s2874_s25 + $0x178] sm:$0xf] %vm1638_vm4, %v2121_v8  ;;  %v2122_v11 = vpack.c.bf16 %v1243_v9, %v1243_v9 }
 0x1d7   : > { %v941_v12 = vpop.f32.mrb[92].mxu0  ;;  %v1141_v13 = vpop.f32.mrb[92].mxu1 }
 0x1d8   : > { %1684 = vst.msk [vmem:[%s2874_s25 + $0xb4] sm:$0xf] %vm1638_vm4, %v2072_v10  ;;  %1734 = vst.msk [vmem:[%s2874_s25 + $0x17c] sm:$0xf] %vm1638_vm4, %v2122_v11  ;;  %v942_v14 = vadd.f32 %v3126_v44, %v941_v12  ;;  %v2274_v15 = vpop.f32.mrb[93].mxu0  ;;  %v1142_v16 = vadd.f32 %v3126_v44, %v1141_v13  ;;  %v2374_v17 = vpop.f32.mrb[93].mxu1 }
 0x1d9   : > { %v944_v18 = vpop.f32.mrb[94].mxu0  ;;  %v1144_v19 = vpop.f32.mrb[94].mxu1 }
 0x1da   : > { %v1194_v20 = vmax.f32 %v942_v14, 0.0  ;;  %v945_v21 = vadd.f32 %v3126_v44, %v944_v18  ;;  %v2275_v22 = vpop.f32.mrb[95].mxu0  ;;  %v1244_v23 = vmax.f32 %v1142_v16, 0.0  ;;  %v1145_v24 = vadd.f32 %v3126_v44, %v1144_v19  ;;  %v2375_v25 = vpop.f32.mrb[95].mxu1 }
 0x1dc   : > { %v2073_v26 = vpack.c.bf16 %v1194_v20, %v1194_v20  ;;  %v1195_v27 = vmax.f32 %v945_v21, 0.0  ;;  %v2123_v28 = vpack.c.bf16 %v1244_v23, %v1244_v23  ;;  %v1245_v29 = vmax.f32 %v1145_v24, 0.0 }
 0x1de   : > { %1685 = vst.msk [vmem:[%s2874_s25 + $0xb8] sm:$0xf] %vm1638_vm4, %v2073_v26  ;;  %v2074_v30 = vpack.c.bf16 %v1195_v27, %v1195_v27  ;;  %1735 = vst.msk [vmem:[%s2874_s25 + $0x180] sm:$0xf] %vm1638_vm4, %v2123_v28  ;;  %v2124_v31 = vpack.c.bf16 %v1245_v29, %v1245_v29 }
 0x1df   : > { %v949_v32 = vpop.f32.mrb[96].mxu0 }
 0x1e0   : > { %1686 = vst.msk [vmem:[%s2874_s25 + $0xbc] sm:$0xf] %vm1638_vm4, %v2074_v30  ;;  %1736 = vst.msk [vmem:[%s2874_s25 + $0x184] sm:$0xf] %vm1638_vm4, %v2124_v31  ;;  %v950_v33 = vadd.f32 %v3126_v44, %v949_v32  ;;  %v2278_v34 = vpop.f32.mrb[97].mxu0 }
 0x1e1   : > { %v952_v35 = vpop.f32.mrb[98].mxu0 }
 0x1e2   : > { %v1196_v36 = vmax.f32 %v950_v33, 0.0  ;;  %v953_v37 = vadd.f32 %v3126_v44, %v952_v35  ;;  %v2279_v38 = vpop.f32.mrb[99].mxu0 }
 0x1e4   : > { %v2075_v39 = vpack.c.bf16 %v1196_v36, %v1196_v36  ;;  %v1197_v40 = vmax.f32 %v953_v37, 0.0 }
 0x1e6   : > { %1687 = vst.msk [vmem:[%s2874_s25 + $0xc0] sm:$0xf] %vm1638_vm4, %v2075_v39  ;;  %v2076_v41 = vpack.c.bf16 %v1197_v40, %v1197_v40 }
 0x1e8   : > { %1688 = vst.msk [vmem:[%s2874_s25 + $0xc4] sm:$0xf] %vm1638_vm4, %v2076_v41 }
 0x1e9 PF: > { %s15_s12 = sadd.s32 1, %s2536_s12  }
 0x1ea   : > { %p12_p2 = scmp.ge.s32.totalorder %s15_s12, 4  }
 0x1ec   :  { %14 = sbr.rel (!%p12_p2) target bundleno = 2 (0x2), region = 71 }
 0x1f3   :  { %1759 = vsyncpa [#allocation3], 1 }
 0x1f4   :  { %1761 = vsyncpa [#allocation3 + $0x1], 1 }
 0x1f5   :  { %1762 = vsyncpa [#allocation5], 1 }

// kernel: mnist_cnn_forward.10
= control target key start
LH: loop header
LB: loop body
LE: loop exit
PB: predicated region body
PF: predicated region fallthrough
CT: control target
= control target key end

     0   :  { %s357_s10 = smov 96   ;;  %vm302_vm0 = vcmask 257024   ;;  %s956_s0 = inlined_call_operand.vmem [shape: bf16[392,64], index: 0, kind: input, shape index: {}]   ;;  %s957_s1 = inlined_call_operand.vmem [shape: bf16[392,32], index: 1, kind: output, shape index: {}]  }
   0x1   :  { %v371_v0 = vld [vmem:[%s956_s0] sm:$0xf]  ;;  %v376_v1 = vld [vmem:[%s956_s0 + $0x8] sm:$0xf]  ;;  %v385_v2 = vld [vmem:[%s956_s0 + $0x4] sm:$0xf] }
   0x2   :  { %106 = vrot.lane.b32.xlu0 %v371_v0, %s357_s10  ;;  %110 = vrot.lane.b32.xlu1 %v376_v1, %s357_s10  ;;  %v390_v3 = vld [vmem:[%s956_s0 + $0xc] sm:$0xf]  ;;  %v399_v4 = vld [vmem:[%s956_s0 + $0x10] sm:$0xf] }
   0x3   :  { %v404_v5 = vld [vmem:[%s956_s0 + $0x14] sm:$0xf]  ;;  %v413_v6 = vld [vmem:[%s956_s0 + $0x18] sm:$0xf]  ;;  %v418_v7 = vld [vmem:[%s956_s0 + $0x1c] sm:$0xf] }
   0x4   :  { %v427_v8 = vld [vmem:[%s956_s0 + $0x20] sm:$0xf]  ;;  %v432_v9 = vld [vmem:[%s956_s0 + $0x24] sm:$0xf]  ;;  %v441_v10 = vld [vmem:[%s956_s0 + $0x28] sm:$0xf] }
   0x5   :  { %v446_v11 = vld [vmem:[%s956_s0 + $0x2c] sm:$0xf]  ;;  %v455_v12 = vld [vmem:[%s956_s0 + $0x30] sm:$0xf]  ;;  %v460_v13 = vld [vmem:[%s956_s0 + $0x34] sm:$0xf] }
   0x6   :  { %108 = vrot.lane.b32.xlu0 %v385_v2, %s357_s10  ;;  %112 = vrot.lane.b32.xlu1 %v390_v3, %s357_s10  ;;  %v469_v14 = vld [vmem:[%s956_s0 + $0x38] sm:$0xf]  ;;  %v474_v15 = vld [vmem:[%s956_s0 + $0x3c] sm:$0xf] }
   0x7   :  { %v483_v16 = vld [vmem:[%s956_s0 + $0x40] sm:$0xf]  ;;  %v488_v17 = vld [vmem:[%s956_s0 + $0x44] sm:$0xf]  ;;  %v497_v18 = vld [vmem:[%s956_s0 + $0x48] sm:$0xf] }
   0x8   :  { %v502_v19 = vld [vmem:[%s956_s0 + $0x4c] sm:$0xf]  ;;  %v511_v20 = vld [vmem:[%s956_s0 + $0x50] sm:$0xf]  ;;  %v516_v21 = vld [vmem:[%s956_s0 + $0x54] sm:$0xf] }
   0x9   :  { %v525_v22 = vld [vmem:[%s956_s0 + $0x58] sm:$0xf]  ;;  %v530_v23 = vld [vmem:[%s956_s0 + $0x5c] sm:$0xf]  ;;  %v539_v24 = vld [vmem:[%s956_s0 + $0x60] sm:$0xf] }
   0xa   :  { %114 = vrot.lane.b32.xlu0 %v399_v4, %s357_s10  ;;  %116 = vrot.lane.b32.xlu1 %v404_v5, %s357_s10  ;;  %v544_v25 = vld [vmem:[%s956_s0 + $0x64] sm:$0xf]  ;;  %v553_v26 = vld [vmem:[%s956_s0 + $0x68] sm:$0xf] }
   0xb   :  { %v558_v27 = vld [vmem:[%s956_s0 + $0x6c] sm:$0xf]  ;;  %v567_v28 = vld [vmem:[%s956_s0 + $0x70] sm:$0xf]  ;;  %v572_v29 = vld [vmem:[%s956_s0 + $0x74] sm:$0xf] }
   0xc   :  { %v581_v30 = vld [vmem:[%s956_s0 + $0x78] sm:$0xf]  ;;  %v586_v31 = vld [vmem:[%s956_s0 + $0x7c] sm:$0xf]  ;;  %v595_v32 = vld [vmem:[%s956_s0 + $0x80] sm:$0xf] }
   0xd   :  { %v600_v33 = vld [vmem:[%s956_s0 + $0x84] sm:$0xf]  ;;  %v609_v34 = vld [vmem:[%s956_s0 + $0x88] sm:$0xf]  ;;  %v614_v35 = vld [vmem:[%s956_s0 + $0x8c] sm:$0xf] }
   0xe   :  { %118 = vrot.lane.b32.xlu0 %v413_v6, %s357_s10  ;;  %120 = vrot.lane.b32.xlu1 %v418_v7, %s357_s10  ;;  %v623_v36 = vld [vmem:[%s956_s0 + $0x90] sm:$0xf]  ;;  %v628_v37 = vld [vmem:[%s956_s0 + $0x94] sm:$0xf] }
   0xf   :  { %v637_v38 = vld [vmem:[%s956_s0 + $0x98] sm:$0xf]  ;;  %v642_v39 = vld [vmem:[%s956_s0 + $0x9c] sm:$0xf]  ;;  %v651_v40 = vld [vmem:[%s956_s0 + $0xa0] sm:$0xf] }
  0x10   :  { %v656_v41 = vld [vmem:[%s956_s0 + $0xa4] sm:$0xf]  ;;  %v665_v42 = vld [vmem:[%s956_s0 + $0xa8] sm:$0xf]  ;;  %v670_v43 = vld [vmem:[%s956_s0 + $0xac] sm:$0xf] }
  0x11   :  { %v679_v44 = vld [vmem:[%s956_s0 + $0xb0] sm:$0xf]  ;;  %v684_v45 = vld [vmem:[%s956_s0 + $0xb4] sm:$0xf]  ;;  %v693_v46 = vld [vmem:[%s956_s0 + $0xb8] sm:$0xf] }
  0x12   :  { %122 = vrot.lane.b32.xlu0 %v427_v8, %s357_s10  ;;  %124 = vrot.lane.b32.xlu1 %v432_v9, %s357_s10  ;;  %v698_v47 = vld [vmem:[%s956_s0 + $0xbc] sm:$0xf]  ;;  %v707_v48 = vld [vmem:[%s956_s0 + $0xc0] sm:$0xf] }
  0x16   :  { %126 = vrot.lane.b32.xlu0 %v441_v10, %s357_s10  ;;  %128 = vrot.lane.b32.xlu1 %v446_v11, %s357_s10 }
  0x1a   :  { %130 = vrot.lane.b32.xlu0 %v455_v12, %s357_s10  ;;  %132 = vrot.lane.b32.xlu1 %v460_v13, %s357_s10 }
  0x1e   :  { %134 = vrot.lane.b32.xlu0 %v469_v14, %s357_s10  ;;  %136 = vrot.lane.b32.xlu1 %v474_v15, %s357_s10 }
  0x22   :  { %138 = vrot.lane.b32.xlu0 %v483_v16, %s357_s10  ;;  %140 = vrot.lane.b32.xlu1 %v488_v17, %s357_s10 }
  0x26   :  { %142 = vrot.lane.b32.xlu0 %v497_v18, %s357_s10  ;;  %144 = vrot.lane.b32.xlu1 %v502_v19, %s357_s10 }
  0x2a   :  { %146 = vrot.lane.b32.xlu0 %v511_v20, %s357_s10  ;;  %148 = vrot.lane.b32.xlu1 %v516_v21, %s357_s10 }
  0x2e   :  { %150 = vrot.lane.b32.xlu0 %v525_v22, %s357_s10  ;;  %152 = vrot.lane.b32.xlu1 %v530_v23, %s357_s10 }
  0x32   :  { %154 = vrot.lane.b32.xlu0 %v539_v24, %s357_s10  ;;  %156 = vrot.lane.b32.xlu1 %v544_v25, %s357_s10 }
  0x36   :  { %158 = vrot.lane.b32.xlu0 %v553_v26, %s357_s10  ;;  %160 = vrot.lane.b32.xlu1 %v558_v27, %s357_s10 }
  0x3a   :  { %162 = vrot.lane.b32.xlu0 %v567_v28, %s357_s10  ;;  %164 = vrot.lane.b32.xlu1 %v572_v29, %s357_s10 }
  0x3e   :  { %166 = vrot.lane.b32.xlu0 %v581_v30, %s357_s10  ;;  %168 = vrot.lane.b32.xlu1 %v586_v31, %s357_s10 }
  0x42   :  { %170 = vrot.lane.b32.xlu0 %v595_v32, %s357_s10  ;;  %172 = vrot.lane.b32.xlu1 %v600_v33, %s357_s10 }
  0x46   :  { %174 = vrot.lane.b32.xlu0 %v609_v34, %s357_s10  ;;  %176 = vrot.lane.b32.xlu1 %v614_v35, %s357_s10 }
  0x4a   :  { %178 = vrot.lane.b32.xlu0 %v623_v36, %s357_s10  ;;  %180 = vrot.lane.b32.xlu1 %v628_v37, %s357_s10 }
  0x4e   :  { %182 = vrot.lane.b32.xlu0 %v637_v38, %s357_s10  ;;  %184 = vrot.lane.b32.xlu1 %v642_v39, %s357_s10 }
  0x52   :  { %186 = vrot.lane.b32.xlu0 %v651_v40, %s357_s10  ;;  %188 = vrot.lane.b32.xlu1 %v656_v41, %s357_s10 }
  0x56   :  { %190 = vrot.lane.b32.xlu0 %v665_v42, %s357_s10  ;;  %192 = vrot.lane.b32.xlu1 %v670_v43, %s357_s10 }
  0x5a   :  { %194 = vrot.lane.b32.xlu0 %v679_v44, %s357_s10  ;;  %196 = vrot.lane.b32.xlu1 %v684_v45, %s357_s10 }
  0x5e   :  { %198 = vrot.lane.b32.xlu0 %v693_v46, %s357_s10  ;;  %200 = vrot.lane.b32.xlu1 %v698_v47, %s357_s10 }
  0x62   :  { %202 = vrot.lane.b32.xlu0 %v707_v48, %s357_s10 }
  0x74   :  { %v107_v49 = vpop.permute.xlu0 %106  ;;  %v111_v50 = vpop.permute.xlu1 %110 }
  0x75   :  { %v253_v51 = vmax.bf16 %v107_v49, %v371_v0  ;;  %v255_v52 = vmax.bf16 %v111_v50, %v376_v1 }
  0x77   :  { %303 = vst.msk [vmem:[%s957_s1] sm:$0xf] %vm302_vm0, %v253_v51  ;;  %305 = vst.msk [vmem:[%s957_s1 + $0x8] sm:$0xf] %vm302_vm0, %v255_v52 }
  0x78   :  { %v109_v53 = vpop.permute.xlu0 %108  ;;  %v113_v54 = vpop.permute.xlu1 %112 }
  0x79   :  { %v254_v55 = vmax.bf16 %v109_v53, %v385_v2  ;;  %v256_v56 = vmax.bf16 %v113_v54, %v390_v3 }
  0x7b   :  { %304 = vst.msk [vmem:[%s957_s1 + $0x4] sm:$0xf] %vm302_vm0, %v254_v55  ;;  %306 = vst.msk [vmem:[%s957_s1 + $0xc] sm:$0xf] %vm302_vm0, %v256_v56 }
  0x7c   :  { %v115_v57 = vpop.permute.xlu0 %114  ;;  %v117_v58 = vpop.permute.xlu1 %116 }
  0x7d   :  { %v257_v59 = vmax.bf16 %v115_v57, %v399_v4  ;;  %v258_v60 = vmax.bf16 %v117_v58, %v404_v5 }
  0x7f   :  { %307 = vst.msk [vmem:[%s957_s1 + $0x10] sm:$0xf] %vm302_vm0, %v257_v59  ;;  %308 = vst.msk [vmem:[%s957_s1 + $0x14] sm:$0xf] %vm302_vm0, %v258_v60 }
  0x80   :  { %v119_v61 = vpop.permute.xlu0 %118  ;;  %v121_v62 = vpop.permute.xlu1 %120 }
  0x81   :  { %v259_v63 = vmax.bf16 %v119_v61, %v413_v6  ;;  %v260_v0 = vmax.bf16 %v121_v62, %v418_v7 }
  0x83   :  { %309 = vst.msk [vmem:[%s957_s1 + $0x18] sm:$0xf] %vm302_vm0, %v259_v63  ;;  %310 = vst.msk [vmem:[%s957_s1 + $0x1c] sm:$0xf] %vm302_vm0, %v260_v0 }
  0x84   :  { %v123_v1 = vpop.permute.xlu0 %122  ;;  %v125_v2 = vpop.permute.xlu1 %124 }
  0x85   :  { %v261_v3 = vmax.bf16 %v123_v1, %v427_v8  ;;  %v262_v4 = vmax.bf16 %v125_v2, %v432_v9 }
  0x87   :  { %311 = vst.msk [vmem:[%s957_s1 + $0x20] sm:$0xf] %vm302_vm0, %v261_v3  ;;  %312 = vst.msk [vmem:[%s957_s1 + $0x24] sm:$0xf] %vm302_vm0, %v262_v4 }
  0x88   :  { %v127_v5 = vpop.permute.xlu0 %126  ;;  %v129_v6 = vpop.permute.xlu1 %128 }
  0x89   :  { %v263_v7 = vmax.bf16 %v127_v5, %v441_v10  ;;  %v264_v49 = vmax.bf16 %v129_v6, %v446_v11 }
  0x8b   :  { %313 = vst.msk [vmem:[%s957_s1 + $0x28] sm:$0xf] %vm302_vm0, %v263_v7  ;;  %314 = vst.msk [vmem:[%s957_s1 + $0x2c] sm:$0xf] %vm302_vm0, %v264_v49 }
  0x8c   :  { %v131_v8 = vpop.permute.xlu0 %130  ;;  %v133_v9 = vpop.permute.xlu1 %132 }
  0x8d   :  { %v265_v50 = vmax.bf16 %v131_v8, %v455_v12  ;;  %v266_v51 = vmax.bf16 %v133_v9, %v460_v13 }
  0x8f   :  { %315 = vst.msk [vmem:[%s957_s1 + $0x30] sm:$0xf] %vm302_vm0, %v265_v50  ;;  %316 = vst.msk [vmem:[%s957_s1 + $0x34] sm:$0xf] %vm302_vm0, %v266_v51 }
  0x90   :  { %v135_v10 = vpop.permute.xlu0 %134  ;;  %v137_v11 = vpop.permute.xlu1 %136 }
  0x91   :  { %v267_v52 = vmax.bf16 %v135_v10, %v469_v14  ;;  %v268_v53 = vmax.bf16 %v137_v11, %v474_v15 }
  0x93   :  { %317 = vst.msk [vmem:[%s957_s1 + $0x38] sm:$0xf] %vm302_vm0, %v267_v52  ;;  %318 = vst.msk [vmem:[%s957_s1 + $0x3c] sm:$0xf] %vm302_vm0, %v268_v53 }
  0x94   :  { %v139_v12 = vpop.permute.xlu0 %138  ;;  %v141_v13 = vpop.permute.xlu1 %140 }
  0x95   :  { %v269_v54 = vmax.bf16 %v139_v12, %v483_v16  ;;  %v270_v55 = vmax.bf16 %v141_v13, %v488_v17 }
  0x97   :  { %319 = vst.msk [vmem:[%s957_s1 + $0x40] sm:$0xf] %vm302_vm0, %v269_v54  ;;  %320 = vst.msk [vmem:[%s957_s1 + $0x44] sm:$0xf] %vm302_vm0, %v270_v55 }
  0x98   :  { %v143_v14 = vpop.permute.xlu0 %142  ;;  %v145_v15 = vpop.permute.xlu1 %144 }
  0x99   :  { %v271_v56 = vmax.bf16 %v143_v14, %v497_v18  ;;  %v272_v57 = vmax.bf16 %v145_v15, %v502_v19 }
  0x9b   :  { %321 = vst.msk [vmem:[%s957_s1 + $0x48] sm:$0xf] %vm302_vm0, %v271_v56  ;;  %322 = vst.msk [vmem:[%s957_s1 + $0x4c] sm:$0xf] %vm302_vm0, %v272_v57 }
  0x9c   :  { %v147_v16 = vpop.permute.xlu0 %146  ;;  %v149_v17 = vpop.permute.xlu1 %148 }
  0x9d   :  { %v273_v58 = vmax.bf16 %v147_v16, %v511_v20  ;;  %v274_v59 = vmax.bf16 %v149_v17, %v516_v21 }
  0x9f   :  { %323 = vst.msk [vmem:[%s957_s1 + $0x50] sm:$0xf] %vm302_vm0, %v273_v58  ;;  %324 = vst.msk [vmem:[%s957_s1 + $0x54] sm:$0xf] %vm302_vm0, %v274_v59 }
  0xa0   :  { %v151_v18 = vpop.permute.xlu0 %150  ;;  %v153_v19 = vpop.permute.xlu1 %152 }
  0xa1   :  { %v275_v60 = vmax.bf16 %v151_v18, %v525_v22  ;;  %v276_v61 = vmax.bf16 %v153_v19, %v530_v23 }
  0xa3   :  { %325 = vst.msk [vmem:[%s957_s1 + $0x58] sm:$0xf] %vm302_vm0, %v275_v60  ;;  %326 = vst.msk [vmem:[%s957_s1 + $0x5c] sm:$0xf] %vm302_vm0, %v276_v61 }
  0xa4   :  { %v155_v20 = vpop.permute.xlu0 %154  ;;  %v157_v21 = vpop.permute.xlu1 %156 }
  0xa5   :  { %v277_v62 = vmax.bf16 %v155_v20, %v539_v24  ;;  %v278_v63 = vmax.bf16 %v157_v21, %v544_v25 }
  0xa7   :  { %327 = vst.msk [vmem:[%s957_s1 + $0x60] sm:$0xf] %vm302_vm0, %v277_v62  ;;  %328 = vst.msk [vmem:[%s957_s1 + $0x64] sm:$0xf] %vm302_vm0, %v278_v63 }
  0xa8   :  { %v159_v22 = vpop.permute.xlu0 %158  ;;  %v161_v23 = vpop.permute.xlu1 %160 }
  0xa9   :  { %v279_v0 = vmax.bf16 %v159_v22, %v553_v26  ;;  %v280_v1 = vmax.bf16 %v161_v23, %v558_v27 }
  0xab   :  { %329 = vst.msk [vmem:[%s957_s1 + $0x68] sm:$0xf] %vm302_vm0, %v279_v0  ;;  %330 = vst.msk [vmem:[%s957_s1 + $0x6c] sm:$0xf] %vm302_vm0, %v280_v1 }
  0xac   :  { %v163_v24 = vpop.permute.xlu0 %162  ;;  %v165_v25 = vpop.permute.xlu1 %164 }
  0xad   :  { %v281_v2 = vmax.bf16 %v163_v24, %v567_v28  ;;  %v282_v3 = vmax.bf16 %v165_v25, %v572_v29 }
  0xaf   :  { %331 = vst.msk [vmem:[%s957_s1 + $0x70] sm:$0xf] %vm302_vm0, %v281_v2  ;;  %332 = vst.msk [vmem:[%s957_s1 + $0x74] sm:$0xf] %vm302_vm0, %v282_v3 }
  0xb0   :  { %v167_v26 = vpop.permute.xlu0 %166  ;;  %v169_v27 = vpop.permute.xlu1 %168 }
  0xb1   :  { %v283_v4 = vmax.bf16 %v167_v26, %v581_v30  ;;  %v284_v5 = vmax.bf16 %v169_v27, %v586_v31 }
  0xb3   :  { %333 = vst.msk [vmem:[%s957_s1 + $0x78] sm:$0xf] %vm302_vm0, %v283_v4  ;;  %334 = vst.msk [vmem:[%s957_s1 + $0x7c] sm:$0xf] %vm302_vm0, %v284_v5 }
  0xb4   :  { %v171_v28 = vpop.permute.xlu0 %170  ;;  %v173_v29 = vpop.permute.xlu1 %172 }
  0xb5   :  { %v285_v6 = vmax.bf16 %v171_v28, %v595_v32  ;;  %v286_v7 = vmax.bf16 %v173_v29, %v600_v33 }
  0xb7   :  { %335 = vst.msk [vmem:[%s957_s1 + $0x80] sm:$0xf] %vm302_vm0, %v285_v6  ;;  %336 = vst.msk [vmem:[%s957_s1 + $0x84] sm:$0xf] %vm302_vm0, %v286_v7 }
  0xb8   :  { %v175_v30 = vpop.permute.xlu0 %174  ;;  %v177_v31 = vpop.permute.xlu1 %176 }
  0xb9   :  { %v287_v49 = vmax.bf16 %v175_v30, %v609_v34  ;;  %v288_v8 = vmax.bf16 %v177_v31, %v614_v35 }
  0xbb   :  { %337 = vst.msk [vmem:[%s957_s1 + $0x88] sm:$0xf] %vm302_vm0, %v287_v49  ;;  %338 = vst.msk [vmem:[%s957_s1 + $0x8c] sm:$0xf] %vm302_vm0, %v288_v8 }
  0xbc   :  { %v179_v32 = vpop.permute.xlu0 %178  ;;  %v181_v33 = vpop.permute.xlu1 %180 }
  0xbd   :  { %v289_v9 = vmax.bf16 %v179_v32, %v623_v36  ;;  %v290_v50 = vmax.bf16 %v181_v33, %v628_v37 }
  0xbf   :  { %339 = vst.msk [vmem:[%s957_s1 + $0x90] sm:$0xf] %vm302_vm0, %v289_v9  ;;  %340 = vst.msk [vmem:[%s957_s1 + $0x94] sm:$0xf] %vm302_vm0, %v290_v50 }
  0xc0   :  { %v183_v34 = vpop.permute.xlu0 %182  ;;  %v185_v35 = vpop.permute.xlu1 %184 }
  0xc1   :  { %v291_v51 = vmax.bf16 %v183_v34, %v637_v38  ;;  %v292_v10 = vmax.bf16 %v185_v35, %v642_v39 }
  0xc3   :  { %341 = vst.msk [vmem:[%s957_s1 + $0x98] sm:$0xf] %vm302_vm0, %v291_v51  ;;  %342 = vst.msk [vmem:[%s957_s1 + $0x9c] sm:$0xf] %vm302_vm0, %v292_v10 }
  0xc4   :  { %v187_v36 = vpop.permute.xlu0 %186  ;;  %v189_v37 = vpop.permute.xlu1 %188 }
  0xc5   :  { %v293_v11 = vmax.bf16 %v187_v36, %v651_v40  ;;  %v294_v52 = vmax.bf16 %v189_v37, %v656_v41 }
  0xc7   :  { %343 = vst.msk [vmem:[%s957_s1 + $0xa0] sm:$0xf] %vm302_vm0, %v293_v11  ;;  %344 = vst.msk [vmem:[%s957_s1 + $0xa4] sm:$0xf] %vm302_vm0, %v294_v52 }
  0xc8   :  { %v191_v38 = vpop.permute.xlu0 %190  ;;  %v193_v39 = vpop.permute.xlu1 %192 }
  0xc9   :  { %v295_v53 = vmax.bf16 %v191_v38, %v665_v42  ;;  %v296_v12 = vmax.bf16 %v193_v39, %v670_v43 }
  0xcb   :  { %345 = vst.msk [vmem:[%s957_s1 + $0xa8] sm:$0xf] %vm302_vm0, %v295_v53  ;;  %346 = vst.msk [vmem:[%s957_s1 + $0xac] sm:$0xf] %vm302_vm0, %v296_v12 }
  0xcc   :  { %v195_v40 = vpop.permute.xlu0 %194  ;;  %v197_v41 = vpop.permute.xlu1 %196 }
  0xcd   :  { %v297_v13 = vmax.bf16 %v195_v40, %v679_v44  ;;  %v298_v54 = vmax.bf16 %v197_v41, %v684_v45 }
  0xcf   :  { %347 = vst.msk [vmem:[%s957_s1 + $0xb0] sm:$0xf] %vm302_vm0, %v297_v13  ;;  %348 = vst.msk [vmem:[%s957_s1 + $0xb4] sm:$0xf] %vm302_vm0, %v298_v54 }
  0xd0   :  { %v199_v42 = vpop.permute.xlu0 %198  ;;  %v201_v43 = vpop.permute.xlu1 %200 }
  0xd1   :  { %v299_v55 = vmax.bf16 %v199_v42, %v693_v46  ;;  %v300_v14 = vmax.bf16 %v201_v43, %v698_v47 }
  0xd3   :  { %349 = vst.msk [vmem:[%s957_s1 + $0xb8] sm:$0xf] %vm302_vm0, %v299_v55  ;;  %350 = vst.msk [vmem:[%s957_s1 + $0xbc] sm:$0xf] %vm302_vm0, %v300_v14 }
  0xd4   :  { %v203_v44 = vpop.permute.xlu0 %202 }
  0xd5   :  { %v301_v45 = vmax.bf16 %v203_v44, %v707_v48 }
  0xd7   :  { %351 = vst.msk [vmem:[%s957_s1 + $0xc0] sm:$0xf] %vm302_vm0, %v301_v45 }

// kernel: mnist_cnn_forward.12
= control target key start
LH: loop header
LB: loop body
LE: loop exit
PB: predicated region body
PF: predicated region fallthrough
CT: control target
= control target key end

     0   :  { %vm38_vm0 = vcmask 1043456   ;;  %s155_s0 = inlined_call_operand.vmem [shape: bf16[14,1792], index: 0, kind: input, shape index: {}]   ;;  %s156_s1 = inlined_call_operand.vmem [shape: bf16[14,896], index: 1, kind: output, shape index: {}]  }
   0x1   :  { %v11_v0 = vld [vmem:[%s155_s0 + $0x18] sm:$0xff]  ;;  %v12_v1 = vld [vmem:[%s155_s0 + $0x20] sm:$0xff]  ;;  %v13_v5 = vld [vmem:[%s155_s0 + $0x28] sm:$0xff] }
   0x2   :  { %v8_v2 = vld [vmem:[%s155_s0] sm:$0xff]  ;;  %v30_v3 = vrot.slane %v11_v0, 4  ;;  %v31_v4 = vrot.slane %v12_v1, 4  ;;  %v9_v6 = vld [vmem:[%s155_s0 + $0x8] sm:$0xff]  ;;  %v32_v7 = vrot.slane %v13_v5, 4  ;;  %v14_v8 = vld [vmem:[%s155_s0 + $0x30] sm:$0xff] }
   0x3   :  { %v18_v9 = vld [vmem:[%s155_s0 + $0x50] sm:$0x77]  ;;  %v33_v12 = vrot.slane %v14_v8, 4  ;;  %v19_v13 = vld [vmem:[%s155_s0 + $0x58] sm:$0x77] }
   0x4   :  { %v39_v10 = vsel %vm38_vm0, %v30_v3, %v31_v4  ;;  %v10_v11 = vld [vmem:[%s155_s0 + $0x10] sm:$0xff]  ;;  %v34_v14 = vrot.slane %v18_v9, 4  ;;  %v40_v16 = vsel %vm38_vm0, %v31_v4, %v32_v7  ;;  %v15_v17 = vld [vmem:[%s155_s0 + $0x38] sm:$0x77]  ;;  %v35_v18 = vrot.slane %v19_v13, 4 }
   0x5   :  { %v53_v15 = vmax.bf16 %v39_v10, %v8_v2  ;;  %v20_v19 = vld [vmem:[%s155_s0 + $0x60] sm:$0x77]  ;;  %v54_v20 = vmax.bf16 %v40_v16, %v9_v6  ;;  %v41_v21 = vsel %vm38_vm0, %v32_v7, %v33_v12  ;;  %v56_v22 = vmax.bf16 %v33_v12, %v11_v0  ;;  %v21_v25 = vld [vmem:[%s155_s0 + $0x68] sm:$0x77] }
   0x6   :  { %v16_v23 = vld [vmem:[%s155_s0 + $0x40] sm:$0x77]  ;;  %v36_v24 = vrot.slane %v20_v19, 4  ;;  %v55_v26 = vmax.bf16 %v41_v21, %v10_v11  ;;  %v42_v27 = vsel %vm38_vm0, %v34_v14, %v35_v18  ;;  %v17_v28 = vld [vmem:[%s155_s0 + $0x48] sm:$0x77]  ;;  %v37_v29 = vrot.slane %v21_v25, 4 }
   0x7   :  { %61 = vst [vmem:[%s156_s1] sm:$0xff] %v53_v15  ;;  %62 = vst [vmem:[%s156_s1 + $0x8] sm:$0xff] %v54_v20  ;;  %v57_v30 = vmax.bf16 %v42_v27, %v15_v17 }
   0x8   :  { %64 = vst [vmem:[%s156_s1 + $0x18] sm:$0xf] %v56_v22  ;;  %v43_v31 = vsel %vm38_vm0, %v35_v18, %v36_v24  ;;  %63 = vst [vmem:[%s156_s1 + $0x10] sm:$0xff] %v55_v26  ;;  %v44_v33 = vsel %vm38_vm0, %v36_v24, %v37_v29  ;;  %v60_v34 = vmax.bf16 %v37_v29, %v18_v9 }
   0x9   :  { %v58_v32 = vmax.bf16 %v43_v31, %v16_v23  ;;  %65 = vst [vmem:[%s156_s1 + $0x1c] sm:$0x77] %v57_v30  ;;  %v59_v35 = vmax.bf16 %v44_v33, %v17_v28 }
   0xa   :  { %68 = vst [vmem:[%s156_s1 + $0x34] sm:$0x7] %v60_v34 }
   0xb   :  { %66 = vst [vmem:[%s156_s1 + $0x24] sm:$0x77] %v58_v32  ;;  %67 = vst [vmem:[%s156_s1 + $0x2c] sm:$0x77] %v59_v35 }

// kernel: mnist_cnn_forward.13
= control target key start
LH: loop header
LB: loop body
LE: loop exit
PB: predicated region body
PF: predicated region fallthrough
CT: control target
= control target key end

     0   :  { %s106_s10 = smov 64   ;;  %vm86_vm0 = vcmask 519168   ;;  %vm99_vm1 = vcmask 516096   ;;  %s207_s0 = inlined_call_operand.vmem [shape: bf16[98,128], index: 0, kind: input, shape index: {}]   ;;  %s208_s1 = inlined_call_operand.vmem [shape: bf16[98,64], index: 1, kind: output, shape index: {}]  }
   0x1   :  { %v8_v0 = vld [vmem:[%s207_s0] sm:$0xf]  ;;  %v10_v1 = vld [vmem:[%s207_s0 + $0x8] sm:$0xf]  ;;  %v9_v2 = vld [vmem:[%s207_s0 + $0x4] sm:$0xf] }
   0x2   :  { %34 = vrot.lane.b32.xlu0 %v8_v0, %s106_s10  ;;  %38 = vrot.lane.b32.xlu1 %v10_v1, %s106_s10  ;;  %v11_v3 = vld [vmem:[%s207_s0 + $0xc] sm:$0xf]  ;;  %v12_v4 = vld [vmem:[%s207_s0 + $0x10] sm:$0xf] }
   0x3   :  { %v13_v5 = vld [vmem:[%s207_s0 + $0x14] sm:$0xf]  ;;  %v14_v6 = vld [vmem:[%s207_s0 + $0x18] sm:$0xf]  ;;  %v15_v7 = vld [vmem:[%s207_s0 + $0x1c] sm:$0xf] }
   0x4   :  { %v16_v8 = vld [vmem:[%s207_s0 + $0x20] sm:$0xf]  ;;  %v17_v9 = vld [vmem:[%s207_s0 + $0x24] sm:$0xf]  ;;  %v18_v10 = vld [vmem:[%s207_s0 + $0x28] sm:$0xf] }
   0x5   :  { %v19_v11 = vld [vmem:[%s207_s0 + $0x2c] sm:$0xf]  ;;  %v20_v12 = vld [vmem:[%s207_s0 + $0x30] sm:$0x1] }
   0x6   :  { %36 = vrot.lane.b32.xlu0 %v9_v2, %s106_s10  ;;  %40 = vrot.lane.b32.xlu1 %v11_v3, %s106_s10 }
   0xa   :  { %42 = vrot.lane.b32.xlu0 %v12_v4, %s106_s10  ;;  %44 = vrot.lane.b32.xlu1 %v13_v5, %s106_s10 }
   0xe   :  { %46 = vrot.lane.b32.xlu0 %v14_v6, %s106_s10  ;;  %48 = vrot.lane.b32.xlu1 %v15_v7, %s106_s10 }
  0x12   :  { %50 = vrot.lane.b32.xlu0 %v16_v8, %s106_s10  ;;  %52 = vrot.lane.b32.xlu1 %v17_v9, %s106_s10 }
  0x16   :  { %54 = vrot.lane.b32.xlu0 %v18_v10, %s106_s10  ;;  %56 = vrot.lane.b32.xlu1 %v19_v11, %s106_s10 }
  0x1a   :  { %58 = vrot.lane.b32.xlu0 %v20_v12, %s106_s10 }
  0x74   :  { %v35_v13 = vpop.permute.xlu0 %34  ;;  %v39_v14 = vpop.permute.xlu1 %38 }
  0x75   :  { %v73_v15 = vmax.bf16 %v35_v13, %v8_v0  ;;  %v75_v16 = vmax.bf16 %v39_v14, %v10_v1 }
  0x77   :  { %87 = vst.msk [vmem:[%s208_s1] sm:$0xf] %vm86_vm0, %v73_v15  ;;  %89 = vst.msk [vmem:[%s208_s1 + $0x8] sm:$0xf] %vm86_vm0, %v75_v16 }
  0x78   :  { %v37_v17 = vpop.permute.xlu0 %36  ;;  %v41_v18 = vpop.permute.xlu1 %40 }
  0x79   :  { %v74_v19 = vmax.bf16 %v37_v17, %v9_v2  ;;  %v76_v20 = vmax.bf16 %v41_v18, %v11_v3 }
  0x7b   :  { %88 = vst.msk [vmem:[%s208_s1 + $0x4] sm:$0xf] %vm86_vm0, %v74_v19  ;;  %90 = vst.msk [vmem:[%s208_s1 + $0xc] sm:$0xf] %vm86_vm0, %v76_v20 }
  0x7c   :  { %v43_v21 = vpop.permute.xlu0 %42  ;;  %v45_v22 = vpop.permute.xlu1 %44 }
  0x7d   :  { %v77_v23 = vmax.bf16 %v43_v21, %v12_v4  ;;  %v78_v24 = vmax.bf16 %v45_v22, %v13_v5 }
  0x7f   :  { %91 = vst.msk [vmem:[%s208_s1 + $0x10] sm:$0xf] %vm86_vm0, %v77_v23  ;;  %92 = vst.msk [vmem:[%s208_s1 + $0x14] sm:$0xf] %vm86_vm0, %v78_v24 }
  0x80   :  { %v47_v25 = vpop.permute.xlu0 %46  ;;  %v49_v26 = vpop.permute.xlu1 %48 }
  0x81   :  { %v79_v27 = vmax.bf16 %v47_v25, %v14_v6  ;;  %v80_v28 = vmax.bf16 %v49_v26, %v15_v7 }
  0x83   :  { %93 = vst.msk [vmem:[%s208_s1 + $0x18] sm:$0xf] %vm86_vm0, %v79_v27  ;;  %94 = vst.msk [vmem:[%s208_s1 + $0x1c] sm:$0xf] %vm86_vm0, %v80_v28 }
  0x84   :  { %v51_v29 = vpop.permute.xlu0 %50  ;;  %v53_v30 = vpop.permute.xlu1 %52 }
  0x85   :  { %v81_v31 = vmax.bf16 %v51_v29, %v16_v8  ;;  %v82_v32 = vmax.bf16 %v53_v30, %v17_v9 }
  0x87   :  { %95 = vst.msk [vmem:[%s208_s1 + $0x20] sm:$0xf] %vm86_vm0, %v81_v31  ;;  %96 = vst.msk [vmem:[%s208_s1 + $0x24] sm:$0xf] %vm86_vm0, %v82_v32 }
  0x88   :  { %v55_v33 = vpop.permute.xlu0 %54  ;;  %v57_v34 = vpop.permute.xlu1 %56 }
  0x89   :  { %v83_v35 = vmax.bf16 %v55_v33, %v18_v10  ;;  %v84_v36 = vmax.bf16 %v57_v34, %v19_v11 }
  0x8b   :  { %97 = vst.msk [vmem:[%s208_s1 + $0x28] sm:$0xf] %vm86_vm0, %v83_v35  ;;  %98 = vst.msk [vmem:[%s208_s1 + $0x2c] sm:$0xf] %vm86_vm0, %v84_v36 }
  0x8c   :  { %v59_v37 = vpop.permute.xlu0 %58 }
  0x8d   :  { %v85_v38 = vmax.bf16 %v59_v37, %v20_v12 }
  0x8f   :  { %100 = vst.msk [vmem:[%s208_s1 + $0x30] sm:$0x1] %vm99_vm1, %v85_v38 }

// kernel: mnist_cnn_forward.11
= control target key start
LH: loop header
LB: loop body
LE: loop exit
PB: predicated region body
PF: predicated region fallthrough
CT: control target
= control target key end

     0   :  { %v3864_v0 = vmov 0   ;;  %v3865_v40 = vmov 0.0   ;;  %vm3866_vm0 = vmmov 0   ;;  %vm1482_vm1 = vcmask 261120   ;;  %s4928_s1 = inlined_call_operand.vmem [shape: bf16[800,64], index: 1, kind: input, shape index: {}]   ;;  %s4929_s0 = inlined_call_operand.vmem [shape: bf16[392,800], index: 0, kind: input, shape index: {}]   ;;  %s4930_s2 = inlined_call_operand.vmem [shape: f32[1,64], index: 2, kind: input, shape index: {}]   ;;  %s4931_s3 = inlined_call_operand.vmem [shape: bf16[392,64], index: 3, kind: output, shape index: {}]  }
   0x1   :  { %1558 = vmatprep.subr.bf16.mxu1 %v3864_v0  ;;  %2022 = vmatprep.subr.bf16.mxu0 %v3864_v0  ;;  %v3567_v1 = vld [vmem:[%s4928_s1] sm:$0xff]   ;;  %v3569_v3 = vld [vmem:[%s4928_s1 + $0x8] sm:$0xff]   ;;  %v3571_v5 = vld [vmem:[%s4928_s1 + $0x10] sm:$0xff]   ;;  %vm2732_vm2 = vcmask 519168  }
   0x2   :  { %v3568_v2 = vld [vmem:[%s4928_s1 + $0x100] sm:$0xff]   ;;  %1559 = vmatpush1.bf16.msra.mxu1 %v3567_v1  ;;  %v3570_v4 = vld [vmem:[%s4928_s1 + $0x108] sm:$0xff]   ;;  %v3572_v6 = vld [vmem:[%s4928_s1 + $0x110] sm:$0xff]  }
   0x3   :  { %2023 = vmatpush1.bf16.msra.mxu0 %v3568_v2  ;;  %1560 = vmatprep.subr.bf16.mxu1 %v3864_v0  ;;  %v3573_v7 = vld [vmem:[%s4928_s1 + $0x18] sm:$0xff]   ;;  %v3575_v9 = vld [vmem:[%s4928_s1 + $0x20] sm:$0xff]   ;;  %v3577_v11 = vld [vmem:[%s4928_s1 + $0x28] sm:$0xff]  }
   0x4   :  { %2024 = vmatprep.subr.bf16.mxu0 %v3864_v0  ;;  %v3574_v8 = vld [vmem:[%s4928_s1 + $0x118] sm:$0xff]   ;;  %v3576_v10 = vld [vmem:[%s4928_s1 + $0x120] sm:$0xff]   ;;  %v3578_v12 = vld [vmem:[%s4928_s1 + $0x128] sm:$0xff]  }
   0x5   :  { %v3579_v13 = vld [vmem:[%s4928_s1 + $0x30] sm:$0xff]   ;;  %v3581_v15 = vld [vmem:[%s4928_s1 + $0x38] sm:$0xff]   ;;  %v3583_v17 = vld [vmem:[%s4928_s1 + $0x40] sm:$0xff]  }
   0x6   :  { %1561 = vmatpush1.bf16.msra.mxu1 %v3569_v3  ;;  %v3580_v14 = vld [vmem:[%s4928_s1 + $0x130] sm:$0xff]   ;;  %v3582_v16 = vld [vmem:[%s4928_s1 + $0x138] sm:$0xff]   ;;  %v3584_v18 = vld [vmem:[%s4928_s1 + $0x140] sm:$0xff]  }
   0x7   :  { %2025 = vmatpush1.bf16.msra.mxu0 %v3570_v4  ;;  %1562 = vmatprep.subr.bf16.mxu1 %v3864_v0  ;;  %v3601_v19 = vld [vmem:[%s4929_s0 + $0x4] ss:$28 sps:$4 sm:$0xff]   ;;  %v3585_v20 = vld [vmem:[%s4928_s1 + $0x48] sm:$0xff]   ;;  %v3604_v21 = vld [vmem:[%s4929_s0 + $0x14] ss:$28 sps:$4 sm:$0xff]  }
   0x8   :  { %2026 = vmatprep.subr.bf16.mxu0 %v3864_v0  ;;  %v3586_v22 = vld [vmem:[%s4928_s1 + $0x148] sm:$0xff]   ;;  %1590 = vmatprep.mubr.bf16.mxu1 %v3601_v19  ;;  %v3587_v23 = vld [vmem:[%s4928_s1 + $0x50] sm:$0xff]   ;;  %v3589_v25 = vld [vmem:[%s4928_s1 + $0x58] sm:$0xff]  }
   0x9   :  { %2054 = vmatprep.mubr.bf16.mxu0 %v3604_v21  ;;  %v3588_v24 = vld [vmem:[%s4928_s1 + $0x150] sm:$0xff]   ;;  %v3590_v26 = vld [vmem:[%s4928_s1 + $0x158] sm:$0xff]   ;;  %v3591_v27 = vld [vmem:[%s4928_s1 + $0x60] sm:$0xff]  }
   0xa   :  { %1563 = vmatpush1.bf16.msra.mxu1 %v3571_v5  ;;  %v3592_v28 = vld [vmem:[%s4928_s1 + $0x160] sm:$0xff]   ;;  %v3593_v29 = vld [vmem:[%s4928_s1 + $0x68] sm:$0xff]   ;;  %v3595_v31 = vld [vmem:[%s4928_s1 + $0x70] sm:$0xff]  }
   0xb   :  { %2027 = vmatpush1.bf16.msra.mxu0 %v3572_v6  ;;  %1564 = vmatprep.subr.bf16.mxu1 %v3864_v0  ;;  %v3594_v30 = vld [vmem:[%s4928_s1 + $0x168] sm:$0xff]   ;;  %v3596_v32 = vld [vmem:[%s4928_s1 + $0x170] sm:$0xff]   ;;  %v3597_v33 = vld [vmem:[%s4928_s1 + $0x78] sm:$0xff]  }
   0xc   :  { %2028 = vmatprep.subr.bf16.mxu0 %v3864_v0  ;;  %v3598_v34 = vld [vmem:[%s4928_s1 + $0x178] sm:$0xff]   ;;  %v3602_v36 = vld [vmem:[%s4929_s0 + $0x10] ss:$28 sps:$4 sm:$0xff]   ;;  %v3605_v37 = vld [vmem:[%s4928_s1 + $0x80] sm:$0xff]  }
   0xd   :  { %v3599_v35 = vld [vmem:[%s4929_s0] ss:$28 sps:$4 sm:$0xff]   ;;  %v3609_v41 = vld [vmem:[%s4929_s0 + $0x4c] ss:$28 sps:$4 sm:$0xff]   ;;  %v3611_v43 = vld [vmem:[%s4929_s0 + $0x38] ss:$28 sps:$4 sm:$0xff]  }
   0xe   :  { %1565 = vmatpush1.bf16.msra.mxu1 %v3573_v7  ;;  %v3606_v38 = vld [vmem:[%s4928_s1 + $0x180] sm:$0xff]   ;;  %v3607_v39 = vld [vmem:[%s4929_s0 + $0x3c] ss:$28 sps:$4 sm:$0xff]   ;;  %v3613_v42 = vld [vmem:[%s4928_s1 + $0x88] sm:$0xff]  }
   0xf   :  { %2029 = vmatpush1.bf16.msra.mxu0 %v3574_v8  ;;  %1566 = vmatprep.subr.bf16.mxu1 %v3864_v0  ;;  %v3612_v44 = vld [vmem:[%s4929_s0 + $0x48] ss:$28 sps:$4 sm:$0xff]   ;;  %v3614_v45 = vld [vmem:[%s4929_s0 + $0x74] ss:$28 sps:$4 sm:$0xff]   ;;  %v3635_v49 = vld [vmem:[%s4928_s1 + $0x98] sm:$0xff]  }
  0x10   :  { %2030 = vmatprep.subr.bf16.mxu0 %v3864_v0  ;;  %v3616_v46 = vld [vmem:[%s4929_s0 + $0x84] ss:$28 sps:$4 sm:$0xff]   ;;  %v3626_v47 = vld [vmem:[%s4928_s1 + $0x90] sm:$0xff]   ;;  %v3620_v51 = vld [vmem:[%s4929_s0 + $0xac] ss:$28 sps:$4 sm:$0xff]  }
  0x11   :  { %v3618_v48 = vld [vmem:[%s4929_s0 + $0x70] ss:$28 sps:$4 sm:$0xff]   ;;  %v3619_v50 = vld [vmem:[%s4929_s0 + $0x80] ss:$28 sps:$4 sm:$0xff]   ;;  %v3624_v56 = vld [vmem:[%s4929_s0 + $0xa8] ss:$28 sps:$4 sm:$0xff]  }
  0x12   :  { %1567 = vmatpush1.bf16.msra.mxu1 %v3575_v9  ;;  %v3622_v52 = vld [vmem:[%s4929_s0 + $0xbc] ss:$28 sps:$4 sm:$0xff]   ;;  %v3646_v53 = vld [vmem:[%s4928_s1 + $0xa0] sm:$0xff]   ;;  %v3691_v54 = vld [vmem:[%s4928_s1 + $0x188] sm:$0xff]  }
  0x13   :  { %2031 = vmatpush1.bf16.msra.mxu0 %v3576_v10  ;;  %1568 = vmatprep.subr.bf16.mxu1 %v3864_v0  ;;  %v3658_v55 = vld [vmem:[%s4928_s1 + $0xa8] sm:$0xff]   ;;  %v3625_v57 = vld [vmem:[%s4929_s0 + $0xb8] ss:$28 sps:$4 sm:$0xff]   ;;  %v3627_v58 = vld [vmem:[%s4929_s0 + $0xe4] ss:$28 sps:$4 sm:$0xff]  }
  0x14   :  { %2032 = vmatprep.subr.bf16.mxu0 %v3864_v0  ;;  %v3629_v59 = vld [vmem:[%s4929_s0 + $0xf4] ss:$28 sps:$4 sm:$0xff]   ;;  %v3679_v61 = vld [vmem:[%s4928_s1 + $0xb8] sm:$0xff]   ;;  %v3636_v2 = vld [vmem:[%s4929_s0 + $0x12c] ss:$28 sps:$4 sm:$0xff]  }
  0x15   :  { %v3666_v60 = vld [vmem:[%s4928_s1 + $0xb0] sm:$0xff]   ;;  %v3631_v62 = vld [vmem:[%s4929_s0 + $0xe0] ss:$28 sps:$4 sm:$0xff]   ;;  %v3700_v4 = vld [vmem:[%s4928_s1 + $0xc8] sm:$0xff]  }
  0x16   :  { %1569 = vmatpush1.bf16.msra.mxu1 %v3577_v11  ;;  %v3632_v63 = vld [vmem:[%s4929_s0 + $0xf0] ss:$28 sps:$4 sm:$0xff]   ;;  %v3633_v1 = vld [vmem:[%s4929_s0 + $0x11c] ss:$28 sps:$4 sm:$0xff]   ;;  %v3686_v3 = vld [vmem:[%s4928_s1 + $0xc0] sm:$0xff]  }
  0x17   :  { %2033 = vmatpush1.bf16.msra.mxu0 %v3578_v12  ;;  %1570 = vmatprep.subr.bf16.mxu1 %v3864_v0  ;;  %v3638_v5 = vld [vmem:[%s4929_s0 + $0x118] ss:$28 sps:$4 sm:$0xff]   ;;  %v3639_v6 = vld [vmem:[%s4929_s0 + $0x128] ss:$28 sps:$4 sm:$0xff]   ;;  %v3644_v10 = vld [vmem:[%s4929_s0 + $0x150] ss:$28 sps:$4 sm:$0xff]  }
  0x18   :  { %2034 = vmatprep.subr.bf16.mxu0 %v3864_v0  ;;  %v3640_v7 = vld [vmem:[%s4929_s0 + $0x154] ss:$28 sps:$4 sm:$0xff]   ;;  %v3642_v8 = vld [vmem:[%s4929_s0 + $0x164] ss:$28 sps:$4 sm:$0xff]   ;;  %v3720_v11 = vld [vmem:[%s4928_s1 + $0xd8] sm:$0xff]  }
  0x19   :  { %v3707_v9 = vld [vmem:[%s4928_s1 + $0xd0] sm:$0xff]   ;;  %v3645_v12 = vld [vmem:[%s4929_s0 + $0x160] ss:$28 sps:$4 sm:$0xff]  }
  0x1a   :  { %1571 = vmatpush1.bf16.msra.mxu1 %v3579_v13  ;;  %v3647_v13 = vld [vmem:[%s4929_s0 + $0x18c] ss:$28 sps:$4 sm:$0xff]   ;;  %v3653_v19 = vld [vmem:[%s4929_s0 + $0x1c4] ss:$28 sps:$4 sm:$0xff]   ;;  %v3752_v21 = vld [vmem:[%s4928_s1 + $0xf0] sm:$0xff]  }
  0x1b   :  { %2035 = vmatpush1.bf16.msra.mxu0 %v3580_v14  ;;  %1572 = vmatprep.subr.bf16.mxu1 %v3864_v0  ;;  %v3649_v14 = vld [vmem:[%s4929_s0 + $0x19c] ss:$28 sps:$4 sm:$0xff]  }
  0x1c   :  { %2036 = vmatprep.subr.bf16.mxu0 %v3864_v0 }
  0x1e   :  { %1573 = vmatpush1.bf16.msra.mxu1 %v3581_v15  ;;  %v3729_v15 = vld [vmem:[%s4928_s1 + $0xe0] sm:$0xff]  }
  0x1f   :  { %2037 = vmatpush1.bf16.msra.mxu0 %v3582_v16  ;;  %1574 = vmatprep.subr.bf16.mxu1 %v3864_v0  ;;  %v3651_v16 = vld [vmem:[%s4929_s0 + $0x188] ss:$28 sps:$4 sm:$0xff]  }
  0x20   :  { %2038 = vmatprep.subr.bf16.mxu0 %v3864_v0 }
  0x22   :  { %1575 = vmatpush1.bf16.msra.mxu1 %v3583_v17  ;;  %v3740_v17 = vld [vmem:[%s4928_s1 + $0xe8] sm:$0xff]  }
  0x23   :  { %2039 = vmatpush1.bf16.msra.mxu0 %v3584_v18  ;;  %1576 = vmatprep.subr.bf16.mxu1 %v3864_v0  ;;  %v3652_v18 = vld [vmem:[%s4929_s0 + $0x198] ss:$28 sps:$4 sm:$0xff]  }
  0x24   :  { %2040 = vmatprep.subr.bf16.mxu0 %v3864_v0 }
  0x26   :  { %1577 = vmatpush1.bf16.msra.mxu1 %v3585_v20  ;;  %v3655_v20 = vld [vmem:[%s4929_s0 + $0x1d4] ss:$28 sps:$4 sm:$0xff]  }
  0x27   :  { %2041 = vmatpush1.bf16.msra.mxu0 %v3586_v22  ;;  %1578 = vmatprep.subr.bf16.mxu1 %v3864_v0  ;;  %v3760_v22 = vld [vmem:[%s4928_s1 + $0xf8] sm:$0xff]  }
  0x28   :  { %2042 = vmatprep.subr.bf16.mxu0 %v3864_v0 }
  0x2a   :  { %1579 = vmatpush1.bf16.msra.mxu1 %v3587_v23  ;;  %v3657_v23 = vld [vmem:[%s4929_s0 + $0x1c0] ss:$28 sps:$4 sm:$0xff]  }
  0x2b   :  { %2043 = vmatpush1.bf16.msra.mxu0 %v3588_v24  ;;  %1580 = vmatprep.subr.bf16.mxu1 %v3864_v0  ;;  %v3659_v24 = vld [vmem:[%s4929_s0 + $0x1d0] ss:$28 sps:$4 sm:$0xff]  }
  0x2c   :  { %2044 = vmatprep.subr.bf16.mxu0 %v3864_v0 }
  0x2e   :  { %1581 = vmatpush1.bf16.msra.mxu1 %v3589_v25  ;;  %v3660_v25 = vld [vmem:[%s4929_s0 + $0x1fc] ss:$28 sps:$4 sm:$0xff]  }
  0x2f   :  { %2045 = vmatpush1.bf16.msra.mxu0 %v3590_v26  ;;  %1582 = vmatprep.subr.bf16.mxu1 %v3864_v0  ;;  %v3662_v26 = vld [vmem:[%s4929_s0 + $0x20c] ss:$28 sps:$4 sm:$0xff]  }
  0x30   :  { %2046 = vmatprep.subr.bf16.mxu0 %v3864_v0 }
  0x32   :  { %1583 = vmatpush1.bf16.msra.mxu1 %v3591_v27  ;;  %v3664_v27 = vld [vmem:[%s4929_s0 + $0x1f8] ss:$28 sps:$4 sm:$0xff]  }
  0x33   :  { %2047 = vmatpush1.bf16.msra.mxu0 %v3592_v28  ;;  %1584 = vmatprep.subr.bf16.mxu1 %v3864_v0  ;;  %v3665_v28 = vld [vmem:[%s4929_s0 + $0x208] ss:$28 sps:$4 sm:$0xff]  }
  0x34   :  { %2048 = vmatprep.subr.bf16.mxu0 %v3864_v0 }
  0x36   :  { %1585 = vmatpush1.bf16.msra.mxu1 %v3593_v29  ;;  %v3669_v29 = vld [vmem:[%s4929_s0 + $0x244] ss:$28 sps:$4 sm:$0xff]  }
  0x37   :  { %2049 = vmatpush1.bf16.msra.mxu0 %v3594_v30  ;;  %1586 = vmatprep.subr.bf16.mxu1 %v3864_v0  ;;  %v3671_v30 = vld [vmem:[%s4929_s0 + $0x230] ss:$28 sps:$4 sm:$0xff]  }
  0x38   :  { %2050 = vmatprep.subr.bf16.mxu0 %v3864_v0 }
  0x3a   :  { %1587 = vmatpush1.bf16.msra.mxu1 %v3595_v31  ;;  %v3672_v31 = vld [vmem:[%s4929_s0 + $0x240] ss:$28 sps:$4 sm:$0xff]  }
  0x3b   :  { %2051 = vmatpush1.bf16.msra.mxu0 %v3596_v32  ;;  %1588 = vmatprep.subr.bf16.mxu1 %v3864_v0  ;;  %v3673_v32 = vld [vmem:[%s4929_s0 + $0x26c] ss:$28 sps:$4 sm:$0xff]  }
  0x3c   :  { %2052 = vmatprep.subr.bf16.mxu0 %v3864_v0 }
  0x3e   :  { %1589 = vmatpush1.bf16.msra.mxu1 %v3597_v33  ;;  %v3675_v33 = vld [vmem:[%s4929_s0 + $0x27c] ss:$28 sps:$4 sm:$0xff]  }
  0x3f   :  { %2053 = vmatpush1.bf16.msra.mxu0 %v3598_v34  ;;  %1790 = vmatprep.subr.bf16.mxu1 %v3864_v0  ;;  %v3677_v34 = vld [vmem:[%s4929_s0 + $0x268] ss:$28 sps:$4 sm:$0xff]  }
  0x40   :  { %3162 = vmatprep.subr.bf16.mxu0 %v3865_v40 }
  0x41   :  { %1591 = vmatmul.mubr.bf16.vlgmr.msra.gmra.mrb[0].mxu1 %v3599_v35  ;;  %v3678_v35 = vld [vmem:[%s4929_s0 + $0x278] ss:$28 sps:$4 sm:$0xff]  }
  0x42   :  { %2055 = vmatmul.mubr.bf16.vlgmr.msra.gmra.mrb[0].mxu0 %v3602_v36  ;;  %1791 = vmatpush1.bf16.msra.mxu1 %v3605_v37  ;;  %v3680_v36 = vld [vmem:[%s4929_s0 + $0x2a4] ss:$28 sps:$4 sm:$0xff]   ;;  %v3682_v37 = vld [vmem:[%s4929_s0 + $0x2b4] ss:$28 sps:$4 sm:$0xff]  }
  0x43   :  { %3163 = vmatpush3.bf16.msra.mxu0 %v3606_v38  ;;  %1598 = vmatprep.mubr.bf16.mxu1 %v3607_v39  ;;  %v3684_v38 = vld [vmem:[%s4929_s0 + $0x2a0] ss:$28 sps:$4 sm:$0xff]   ;;  %v3685_v39 = vld [vmem:[%s4929_s0 + $0x2b0] ss:$28 sps:$4 sm:$0xff]  }
  0x44   :  { %2062 = vmatprep.mubr.bf16.mxu0 %v3609_v41  ;;  %1792 = vmatprep.subr.bf16.mxu1 %v3864_v0  ;;  %v3687_v41 = vld [vmem:[%s4929_s0 + $0x2dc] ss:$28 sps:$4 sm:$0xff]  }
  0x45   :  { %3164 = vmatprep.subr.bf16.mxu0 %v3865_v40 }
  0x46   :  { %1793 = vmatpush1.bf16.msra.mxu1 %v3613_v42  ;;  %v3689_v42 = vld [vmem:[%s4929_s0 + $0x2ec] ss:$28 sps:$4 sm:$0xff]  }
  0x47   :  { %1794 = vmatprep.subr.bf16.mxu1 %v3864_v0  ;;  %3165 = vmatpush3.bf16.msra.mxu0 %v3691_v54  ;;  %v3710_v54 = vld [vmem:[%s4929_s0 + $0x394] ss:$28 sps:$4 sm:$0xff]  }
  0x49   :  { %1599 = vmatmul.mubr.bf16.gmra.mrb[4].mxu1 %v3611_v43  ;;  %v3692_v43 = vld [vmem:[%s4929_s0 + $0x2d8] ss:$28 sps:$4 sm:$0xff]  }
  0x4a   :  { %2063 = vmatmul.mubr.bf16.gmra.mrb[4].mxu0 %v3612_v44  ;;  %1606 = vmatprep.mubr.bf16.mxu1 %v3614_v45  ;;  %v3693_v44 = vld [vmem:[%s4929_s0 + $0x2e8] ss:$28 sps:$4 sm:$0xff]   ;;  %v3694_v45 = vld [vmem:[%s4929_s0 + $0x314] ss:$28 sps:$4 sm:$0xff]  }
  0x4b   :  { %2070 = vmatprep.mubr.bf16.mxu0 %v3616_v46  ;;  %1795 = vmatpush1.bf16.msra.mxu1 %v3626_v47  ;;  %v3696_v46 = vld [vmem:[%s4929_s0 + $0x324] ss:$28 sps:$4 sm:$0xff]   ;;  %v3698_v47 = vld [vmem:[%s4929_s0 + $0x310] ss:$28 sps:$4 sm:$0xff]  }
  0x4c   :  { %1796 = vmatprep.subr.bf16.mxu1 %v3864_v0 }
  0x4f   :  { %1797 = vmatpush1.bf16.msra.mxu1 %v3635_v49  ;;  %v3701_v49 = vld [vmem:[%s4929_s0 + $0x34c] ss:$28 sps:$4 sm:$0xff]  }
  0x50   :  { %1798 = vmatprep.subr.bf16.mxu1 %v3864_v0 }
  0x51   :  { %1607 = vmatmul.mubr.bf16.gmra.mrb[8].mxu1 %v3618_v48  ;;  %v3699_v48 = vld [vmem:[%s4929_s0 + $0x320] ss:$28 sps:$4 sm:$0xff]  }
  0x52   :  { %2071 = vmatmul.mubr.bf16.gmra.mrb[8].mxu0 %v3619_v50  ;;  %1614 = vmatprep.mubr.bf16.mxu1 %v3620_v51  ;;  %v3703_v50 = vld [vmem:[%s4929_s0 + $0x35c] ss:$28 sps:$4 sm:$0xff]   ;;  %v3705_v51 = vld [vmem:[%s4929_s0 + $0x348] ss:$28 sps:$4 sm:$0xff]  }
  0x53   :  { %2078 = vmatprep.mubr.bf16.mxu0 %v3622_v52  ;;  %1799 = vmatpush1.bf16.msra.mxu1 %v3646_v53  ;;  %v3706_v52 = vld [vmem:[%s4929_s0 + $0x358] ss:$28 sps:$4 sm:$0xff]   ;;  %v3708_v53 = vld [vmem:[%s4929_s0 + $0x384] ss:$28 sps:$4 sm:$0xff]  }
  0x54   :  { %1800 = vmatprep.subr.bf16.mxu1 %v3864_v0 }
  0x57   :  { %1801 = vmatpush1.bf16.msra.mxu1 %v3658_v55  ;;  %v3712_v55 = vld [vmem:[%s4929_s0 + $0x380] ss:$28 sps:$4 sm:$0xff]  }
  0x58   :  { %1802 = vmatprep.subr.bf16.mxu1 %v3864_v0 }
  0x59   :  { %1615 = vmatmul.mubr.bf16.gmra.mrb[12].mxu1 %v3624_v56  ;;  %v3713_v56 = vld [vmem:[%s4929_s0 + $0x390] ss:$28 sps:$4 sm:$0xff]  }
  0x5a   :  { %2079 = vmatmul.mubr.bf16.gmra.mrb[12].mxu0 %v3625_v57  ;;  %1622 = vmatprep.mubr.bf16.mxu1 %v3627_v58  ;;  %v3714_v57 = vld [vmem:[%s4929_s0 + $0x3bc] ss:$28 sps:$4 sm:$0xff]   ;;  %v3716_v58 = vld [vmem:[%s4929_s0 + $0x3cc] ss:$28 sps:$4 sm:$0xff]  }
  0x5b   :  { %2086 = vmatprep.mubr.bf16.mxu0 %v3629_v59  ;;  %1803 = vmatpush1.bf16.msra.mxu1 %v3666_v60  ;;  %v3718_v59 = vld [vmem:[%s4929_s0 + $0x3b8] ss:$28 sps:$4 sm:$0xff]   ;;  %v3719_v60 = vld [vmem:[%s4929_s0 + $0x3c8] ss:$28 sps:$4 sm:$0xff]  }
  0x5c   :  { %1804 = vmatprep.subr.bf16.mxu1 %v3864_v0 }
  0x5f   :  { %1805 = vmatpush1.bf16.msra.mxu1 %v3679_v61  ;;  %v3721_v61 = vld [vmem:[%s4929_s0 + $0x3f4] ss:$28 sps:$4 sm:$0xff]  }
  0x60   :  { %1806 = vmatprep.subr.bf16.mxu1 %v3864_v0 }
  0x61   :  { %1623 = vmatmul.mubr.bf16.gmra.mrb[16].mxu1 %v3631_v62  ;;  %v3723_v62 = vld [vmem:[%s4929_s0 + $0x404] ss:$28 sps:$4 sm:$0xff]  }
  0x62   :  { %2087 = vmatmul.mubr.bf16.gmra.mrb[16].mxu0 %v3632_v63  ;;  %1630 = vmatprep.mubr.bf16.mxu1 %v3633_v1  ;;  %v3725_v63 = vld [vmem:[%s4929_s0 + $0x3f0] ss:$28 sps:$4 sm:$0xff]   ;;  %v3726_v1 = vld [vmem:[%s4929_s0 + $0x400] ss:$28 sps:$4 sm:$0xff]  }
  0x63   :  { %2094 = vmatprep.mubr.bf16.mxu0 %v3636_v2  ;;  %1807 = vmatpush1.bf16.msra.mxu1 %v3686_v3  ;;  %v3727_v2 = vld [vmem:[%s4929_s0 + $0x42c] ss:$28 sps:$4 sm:$0xff]   ;;  %v3730_v3 = vld [vmem:[%s4929_s0 + $0x43c] ss:$28 sps:$4 sm:$0xff]  }
  0x64   :  { %1808 = vmatprep.subr.bf16.mxu1 %v3864_v0 }
  0x67   :  { %1809 = vmatpush1.bf16.msra.mxu1 %v3700_v4  ;;  %v3732_v4 = vld [vmem:[%s4929_s0 + $0x428] ss:$28 sps:$4 sm:$0xff]  }
  0x68   :  { %1810 = vmatprep.subr.bf16.mxu1 %v3864_v0 }
  0x69   :  { %1631 = vmatmul.mubr.bf16.gmra.mrb[20].mxu1 %v3638_v5  ;;  %v3733_v5 = vld [vmem:[%s4929_s0 + $0x438] ss:$28 sps:$4 sm:$0xff]  }
  0x6a   :  { %2095 = vmatmul.mubr.bf16.gmra.mrb[20].mxu0 %v3639_v6  ;;  %1638 = vmatprep.mubr.bf16.mxu1 %v3640_v7  ;;  %v3734_v6 = vld [vmem:[%s4929_s0 + $0x464] ss:$28 sps:$4 sm:$0xff]   ;;  %v3736_v7 = vld [vmem:[%s4929_s0 + $0x474] ss:$28 sps:$4 sm:$0xff]  }
  0x6b   :  { %2102 = vmatprep.mubr.bf16.mxu0 %v3642_v8  ;;  %1811 = vmatpush1.bf16.msra.mxu1 %v3707_v9  ;;  %v3738_v8 = vld [vmem:[%s4929_s0 + $0x460] ss:$28 sps:$4 sm:$0xff]   ;;  %v3739_v9 = vld [vmem:[%s4929_s0 + $0x470] ss:$28 sps:$4 sm:$0xff]  }
  0x6c   :  { %1812 = vmatprep.subr.bf16.mxu1 %v3864_v0 }
  0x6f   :  { %1813 = vmatpush1.bf16.msra.mxu1 %v3720_v11  ;;  %v3743_v11 = vld [vmem:[%s4929_s0 + $0x4ac] ss:$28 sps:$4 sm:$0xff]  }
  0x70   :  { %1814 = vmatprep.subr.bf16.mxu1 %v3864_v0 }
  0x71   :  { %1639 = vmatmul.mubr.bf16.gmra.mrb[24].mxu1 %v3644_v10  ;;  %v3741_v10 = vld [vmem:[%s4929_s0 + $0x49c] ss:$28 sps:$4 sm:$0xff]  }
  0x72   :  { %2103 = vmatmul.mubr.bf16.gmra.mrb[24].mxu0 %v3645_v12  ;;  %1646 = vmatprep.mubr.bf16.mxu1 %v3647_v13  ;;  %v3745_v12 = vld [vmem:[%s4929_s0 + $0x498] ss:$28 sps:$4 sm:$0xff]   ;;  %v3746_v13 = vld [vmem:[%s4929_s0 + $0x4a8] ss:$28 sps:$4 sm:$0xff]  }
  0x73   :  { %2110 = vmatprep.mubr.bf16.mxu0 %v3649_v14  ;;  %1815 = vmatpush1.bf16.msra.mxu1 %v3729_v15  ;;  %v3747_v14 = vld [vmem:[%s4929_s0 + $0x4d4] ss:$28 sps:$4 sm:$0xff]   ;;  %v3749_v15 = vld [vmem:[%s4929_s0 + $0x4e4] ss:$28 sps:$4 sm:$0xff]  }
  0x74   :  { %1816 = vmatprep.subr.bf16.mxu1 %v3864_v0 }
  0x77   :  { %1817 = vmatpush1.bf16.msra.mxu1 %v3740_v17  ;;  %v3753_v17 = vld [vmem:[%s4929_s0 + $0x4e0] ss:$28 sps:$4 sm:$0xff]  }
  0x78   :  { %1818 = vmatprep.subr.bf16.mxu1 %v3864_v0 }
  0x79   :  { %1647 = vmatmul.mubr.bf16.gmra.mrb[28].mxu1 %v3651_v16  ;;  %v3751_v16 = vld [vmem:[%s4929_s0 + $0x4d0] ss:$28 sps:$4 sm:$0xff]  }
  0x7a   :  { %2111 = vmatmul.mubr.bf16.gmra.mrb[28].mxu0 %v3652_v18  ;;  %1654 = vmatprep.mubr.bf16.mxu1 %v3653_v19  ;;  %v3754_v18 = vld [vmem:[%s4929_s0 + $0x50c] ss:$28 sps:$4 sm:$0xff]   ;;  %v3756_v19 = vld [vmem:[%s4929_s0 + $0x51c] ss:$28 sps:$4 sm:$0xff]  }
  0x7b   :  { %2118 = vmatprep.mubr.bf16.mxu0 %v3655_v20  ;;  %1819 = vmatpush1.bf16.msra.mxu1 %v3752_v21  ;;  %v207_v20 = vld [vmem:[%s4929_s0 + $0x540] sm:$0xff]  ;;  %v209_v21 = vld [vmem:[%s4929_s0 + $0x550] sm:$0xff] }
  0x7c   :  { %1820 = vmatprep.subr.bf16.mxu1 %v3864_v0  ;;  %v3667_v0 = vld [vmem:[%s4929_s0 + $0x234] ss:$28 sps:$4 sm:$0xff]  }
  0x7f   :  { %1821 = vmatpush1.bf16.msra.mxu1 %v3760_v22  ;;  %v3758_v22 = vld [vmem:[%s4929_s0 + $0x508] ss:$28 sps:$4 sm:$0xff]  }
  0x81   :  { %1655 = vmatmul.mubr.bf16.gmra.mrb[32].mxu1 %v3657_v23  ;;  %v3759_v23 = vld [vmem:[%s4929_s0 + $0x518] ss:$28 sps:$4 sm:$0xff]  }
  0x82   :  { %2119 = vmatmul.mubr.bf16.gmra.mrb[32].mxu0 %v3659_v24  ;;  %1662 = vmatprep.mubr.bf16.mxu1 %v3660_v25  ;;  %v2956_v24 = vcombine.high %v207_v20, %v207_v20  ;;  %v2960_v25 = vcombine.high %v209_v21, %v209_v21 }
  0x83   :  { %2126 = vmatprep.mubr.bf16.mxu0 %v3662_v26  ;;  %v2955_v26 = vcombine.low %v207_v20, %v207_v20  ;;  %v3839_v20 = vld [vmem:[%s4929_s0 + $0x3f8] ss:$28 sps:$4 sm:$0xff]  }
  0x89   :  { %1663 = vmatmul.mubr.bf16.gmra.mrb[36].mxu1 %v3664_v27  ;;  %v2959_v27 = vcombine.low %v209_v21, %v209_v21  ;;  %v3840_v21 = vld [vmem:[%s4929_s0 + $0x408] ss:$28 sps:$4 sm:$0xff]  }
  0x8a   :  { %2127 = vmatmul.mubr.bf16.gmra.mrb[36].mxu0 %v3665_v28  ;;  %1670 = vmatprep.mubr.bf16.mxu1 %v3667_v0  ;;  %v3767_v28 = vld [vmem:[%s4929_s0 + $0xc] ss:$28 sps:$4 sm:$0xff]  }
  0x8b   :  { %2134 = vmatprep.mubr.bf16.mxu0 %v3669_v29  ;;  %v3765_v0 = vld [vmem:[%s4929_s0 + $0x8] ss:$28 sps:$4 sm:$0xff]   ;;  %v3768_v29 = vld [vmem:[%s4929_s0 + $0x18] ss:$28 sps:$4 sm:$0xff]  }
  0x91   :  { %1671 = vmatmul.mubr.bf16.gmra.mrb[40].mxu1 %v3671_v30  ;;  %v3769_v30 = vld [vmem:[%s4929_s0 + $0x44] ss:$28 sps:$4 sm:$0xff]  }
  0x92   :  { %2135 = vmatmul.mubr.bf16.gmra.mrb[40].mxu0 %v3672_v31  ;;  %1678 = vmatprep.mubr.bf16.mxu1 %v3673_v32  ;;  %v3771_v31 = vld [vmem:[%s4929_s0 + $0x40] ss:$28 sps:$4 sm:$0xff]   ;;  %v3772_v32 = vld [vmem:[%s4929_s0 + $0x50] ss:$28 sps:$4 sm:$0xff]  }
  0x93   :  { %2142 = vmatprep.mubr.bf16.mxu0 %v3675_v33  ;;  %v3773_v33 = vld [vmem:[%s4929_s0 + $0x7c] ss:$28 sps:$4 sm:$0xff]  }
  0x99   :  { %1679 = vmatmul.mubr.bf16.gmra.mrb[44].mxu1 %v3677_v34  ;;  %v3775_v34 = vld [vmem:[%s4929_s0 + $0x78] ss:$28 sps:$4 sm:$0xff]  }
  0x9a   :  { %2143 = vmatmul.mubr.bf16.gmra.mrb[44].mxu0 %v3678_v35  ;;  %1686 = vmatprep.mubr.bf16.mxu1 %v3680_v36  ;;  %v3776_v35 = vld [vmem:[%s4929_s0 + $0x88] ss:$28 sps:$4 sm:$0xff]   ;;  %v3777_v36 = vld [vmem:[%s4929_s0 + $0xb4] ss:$28 sps:$4 sm:$0xff]  }
  0x9b   :  { %2150 = vmatprep.mubr.bf16.mxu0 %v3682_v37  ;;  %v3779_v37 = vld [vmem:[%s4929_s0 + $0xb0] ss:$28 sps:$4 sm:$0xff]  }
  0xa1   :  { %1687 = vmatmul.mubr.bf16.gmra.mrb[48].mxu1 %v3684_v38  ;;  %v3780_v38 = vld [vmem:[%s4929_s0 + $0xc0] ss:$28 sps:$4 sm:$0xff]  }
  0xa2   :  { %2151 = vmatmul.mubr.bf16.gmra.mrb[48].mxu0 %v3685_v39  ;;  %1694 = vmatprep.mubr.bf16.mxu1 %v3687_v41  ;;  %v3781_v39 = vld [vmem:[%s4929_s0 + $0xec] ss:$28 sps:$4 sm:$0xff]  }
  0xa3   :  { %2158 = vmatprep.mubr.bf16.mxu0 %v3689_v42  ;;  %v3783_v41 = vld [vmem:[%s4929_s0 + $0xe8] ss:$28 sps:$4 sm:$0xff]   ;;  %v3784_v42 = vld [vmem:[%s4929_s0 + $0xf8] ss:$28 sps:$4 sm:$0xff]  }
  0xa9   :  { %1695 = vmatmul.mubr.bf16.gmra.mrb[52].mxu1 %v3692_v43  ;;  %v3785_v43 = vld [vmem:[%s4929_s0 + $0x124] ss:$28 sps:$4 sm:$0xff]  }
  0xaa   :  { %2159 = vmatmul.mubr.bf16.gmra.mrb[52].mxu0 %v3693_v44  ;;  %1702 = vmatprep.mubr.bf16.mxu1 %v3694_v45  ;;  %v3787_v44 = vld [vmem:[%s4929_s0 + $0x120] ss:$28 sps:$4 sm:$0xff]   ;;  %v3788_v45 = vld [vmem:[%s4929_s0 + $0x130] ss:$28 sps:$4 sm:$0xff]  }
  0xab   :  { %2166 = vmatprep.mubr.bf16.mxu0 %v3696_v46  ;;  %v3789_v46 = vld [vmem:[%s4929_s0 + $0x15c] ss:$28 sps:$4 sm:$0xff]  }
  0xb1   :  { %1703 = vmatmul.mubr.bf16.gmra.mrb[56].mxu1 %v3698_v47  ;;  %v3791_v47 = vld [vmem:[%s4929_s0 + $0x158] ss:$28 sps:$4 sm:$0xff]  }
  0xb2   :  { %2167 = vmatmul.mubr.bf16.gmra.mrb[56].mxu0 %v3699_v48  ;;  %1710 = vmatprep.mubr.bf16.mxu1 %v3701_v49  ;;  %v3792_v48 = vld [vmem:[%s4929_s0 + $0x168] ss:$28 sps:$4 sm:$0xff]   ;;  %v3793_v49 = vld [vmem:[%s4929_s0 + $0x194] ss:$28 sps:$4 sm:$0xff]  }
  0xb3   :  { %2174 = vmatprep.mubr.bf16.mxu0 %v3703_v50  ;;  %v3795_v50 = vld [vmem:[%s4929_s0 + $0x190] ss:$28 sps:$4 sm:$0xff]  }
  0xb9   :  { %1711 = vmatmul.mubr.bf16.gmra.mrb[60].mxu1 %v3705_v51  ;;  %v3796_v51 = vld [vmem:[%s4929_s0 + $0x1a0] ss:$28 sps:$4 sm:$0xff]  }
  0xba   :  { %2175 = vmatmul.mubr.bf16.gmra.mrb[60].mxu0 %v3706_v52  ;;  %1718 = vmatprep.mubr.bf16.mxu1 %v3708_v53  ;;  %v3797_v52 = vld [vmem:[%s4929_s0 + $0x1cc] ss:$28 sps:$4 sm:$0xff]  }
  0xbb   :  { %2182 = vmatprep.mubr.bf16.mxu0 %v3710_v54  ;;  %v3799_v53 = vld [vmem:[%s4929_s0 + $0x1c8] ss:$28 sps:$4 sm:$0xff]   ;;  %v3800_v54 = vld [vmem:[%s4929_s0 + $0x1d8] ss:$28 sps:$4 sm:$0xff]  }
  0xc1   :  { %1719 = vmatmul.mubr.bf16.gmra.mrb[64].mxu1 %v3712_v55  ;;  %v3801_v55 = vld [vmem:[%s4929_s0 + $0x204] ss:$28 sps:$4 sm:$0xff]  }
  0xc2   :  { %2183 = vmatmul.mubr.bf16.gmra.mrb[64].mxu0 %v3713_v56  ;;  %1726 = vmatprep.mubr.bf16.mxu1 %v3714_v57  ;;  %v3803_v56 = vld [vmem:[%s4929_s0 + $0x200] ss:$28 sps:$4 sm:$0xff]   ;;  %v3804_v57 = vld [vmem:[%s4929_s0 + $0x210] ss:$28 sps:$4 sm:$0xff]  }
  0xc3   :  { %2190 = vmatprep.mubr.bf16.mxu0 %v3716_v58  ;;  %v3805_v58 = vld [vmem:[%s4929_s0 + $0x23c] ss:$28 sps:$4 sm:$0xff]  }
  0xc9   :  { %1727 = vmatmul.mubr.bf16.gmra.mrb[68].mxu1 %v3718_v59  ;;  %v3807_v59 = vld [vmem:[%s4929_s0 + $0x238] ss:$28 sps:$4 sm:$0xff]  }
  0xca   :  { %2191 = vmatmul.mubr.bf16.gmra.mrb[68].mxu0 %v3719_v60  ;;  %1734 = vmatprep.mubr.bf16.mxu1 %v3721_v61  ;;  %v3808_v60 = vld [vmem:[%s4929_s0 + $0x248] ss:$28 sps:$4 sm:$0xff]   ;;  %v3809_v61 = vld [vmem:[%s4929_s0 + $0x274] ss:$28 sps:$4 sm:$0xff]  }
  0xcb   :  { %2198 = vmatprep.mubr.bf16.mxu0 %v3723_v62  ;;  %v3811_v62 = vld [vmem:[%s4929_s0 + $0x270] ss:$28 sps:$4 sm:$0xff]  }
  0xd1   :  { %1735 = vmatmul.mubr.bf16.gmra.mrb[72].mxu1 %v3725_v63  ;;  %v3812_v63 = vld [vmem:[%s4929_s0 + $0x280] ss:$28 sps:$4 sm:$0xff]  }
  0xd2   :  { %2199 = vmatmul.mubr.bf16.gmra.mrb[72].mxu0 %v3726_v1  ;;  %1742 = vmatprep.mubr.bf16.mxu1 %v3727_v2  ;;  %v3813_v1 = vld [vmem:[%s4929_s0 + $0x2ac] ss:$28 sps:$4 sm:$0xff]  }
  0xd3   :  { %2206 = vmatprep.mubr.bf16.mxu0 %v3730_v3  ;;  %v3815_v2 = vld [vmem:[%s4929_s0 + $0x2a8] ss:$28 sps:$4 sm:$0xff]   ;;  %v3816_v3 = vld [vmem:[%s4929_s0 + $0x2b8] ss:$28 sps:$4 sm:$0xff]  }
  0xd9   :  { %1743 = vmatmul.mubr.bf16.gmra.mrb[76].mxu1 %v3732_v4  ;;  %v3817_v4 = vld [vmem:[%s4929_s0 + $0x2e4] ss:$28 sps:$4 sm:$0xff]  }
  0xda   :  { %2207 = vmatmul.mubr.bf16.gmra.mrb[76].mxu0 %v3733_v5  ;;  %1750 = vmatprep.mubr.bf16.mxu1 %v3734_v6  ;;  %v3819_v5 = vld [vmem:[%s4929_s0 + $0x2e0] ss:$28 sps:$4 sm:$0xff]   ;;  %v3820_v6 = vld [vmem:[%s4929_s0 + $0x2f0] ss:$28 sps:$4 sm:$0xff]  }
  0xdb   :  { %2214 = vmatprep.mubr.bf16.mxu0 %v3736_v7  ;;  %v3821_v7 = vld [vmem:[%s4929_s0 + $0x31c] ss:$28 sps:$4 sm:$0xff]  }
  0xe1   :  { %1751 = vmatmul.mubr.bf16.gmra.mrb[80].mxu1 %v3738_v8  ;;  %v3823_v8 = vld [vmem:[%s4929_s0 + $0x318] ss:$28 sps:$4 sm:$0xff]  }
  0xe2   :  { %2215 = vmatmul.mubr.bf16.gmra.mrb[80].mxu0 %v3739_v9  ;;  %1758 = vmatprep.mubr.bf16.mxu1 %v3741_v10  ;;  %v3824_v9 = vld [vmem:[%s4929_s0 + $0x328] ss:$28 sps:$4 sm:$0xff]   ;;  %v3825_v10 = vld [vmem:[%s4929_s0 + $0x354] ss:$28 sps:$4 sm:$0xff]  }
  0xe3   :  { %2222 = vmatprep.mubr.bf16.mxu0 %v3743_v11  ;;  %v3827_v11 = vld [vmem:[%s4929_s0 + $0x350] ss:$28 sps:$4 sm:$0xff]  }
  0xe9   :  { %1759 = vmatmul.mubr.bf16.gmra.mrb[84].mxu1 %v3745_v12  ;;  %v3828_v12 = vld [vmem:[%s4929_s0 + $0x360] ss:$28 sps:$4 sm:$0xff]  }
  0xea   :  { %2223 = vmatmul.mubr.bf16.gmra.mrb[84].mxu0 %v3746_v13  ;;  %1766 = vmatprep.mubr.bf16.mxu1 %v3747_v14  ;;  %v3829_v13 = vld [vmem:[%s4929_s0 + $0x38c] ss:$28 sps:$4 sm:$0xff]  }
  0xeb   :  { %2230 = vmatprep.mubr.bf16.mxu0 %v3749_v15  ;;  %v3831_v14 = vld [vmem:[%s4929_s0 + $0x388] ss:$28 sps:$4 sm:$0xff]   ;;  %v3832_v15 = vld [vmem:[%s4929_s0 + $0x398] ss:$28 sps:$4 sm:$0xff]  }
  0xf1   :  { %1767 = vmatmul.mubr.bf16.gmra.mrb[88].mxu1 %v3751_v16  ;;  %v3833_v16 = vld [vmem:[%s4929_s0 + $0x3c4] ss:$28 sps:$4 sm:$0xff]  }
  0xf2   :  { %2231 = vmatmul.mubr.bf16.gmra.mrb[88].mxu0 %v3753_v17  ;;  %1774 = vmatprep.mubr.bf16.mxu1 %v3754_v18  ;;  %v3835_v17 = vld [vmem:[%s4929_s0 + $0x3c0] ss:$28 sps:$4 sm:$0xff]   ;;  %v3836_v18 = vld [vmem:[%s4929_s0 + $0x3d0] ss:$28 sps:$4 sm:$0xff]  }
  0xf3   :  { %2238 = vmatprep.mubr.bf16.mxu0 %v3756_v19  ;;  %v3837_v19 = vld [vmem:[%s4929_s0 + $0x3fc] ss:$28 sps:$4 sm:$0xff]  }
  0xf9   :  { %1775 = vmatmul.mubr.bf16.gmra.mrb[92].mxu1 %v3758_v22  ;;  %v3841_v22 = vld [vmem:[%s4929_s0 + $0x434] ss:$28 sps:$4 sm:$0xff]  }
  0xfa   :  { %2239 = vmatmul.mubr.bf16.gmra.mrb[92].mxu0 %v3759_v23  ;;  %1782 = vmatprep.mubr.bf16.mxu1 %v2956_v24  ;;  %v3843_v23 = vld [vmem:[%s4929_s0 + $0x430] ss:$28 sps:$4 sm:$0xff]   ;;  %v3844_v24 = vld [vmem:[%s4929_s0 + $0x440] ss:$28 sps:$4 sm:$0xff]  }
  0xfb   :  { %2246 = vmatprep.mubr.bf16.mxu0 %v2960_v25  ;;  %v3845_v25 = vld [vmem:[%s4929_s0 + $0x46c] ss:$28 sps:$4 sm:$0xff]  }
 0x101   :  { %1783 = vmatmul.mubr.bf16.gmra.mrb[96].mxu1 %v2955_v26  ;;  %v3847_v26 = vld [vmem:[%s4929_s0 + $0x468] ss:$28 sps:$4 sm:$0xff]  }
 0x102   :  { %2247 = vmatmul.mubr.bf16.gmra.mrb[96].mxu0 %v2959_v27  ;;  %1822 = vmatprep.mubr.bf16.mxu1 %v3767_v28  ;;  %v3848_v27 = vld [vmem:[%s4929_s0 + $0x478] ss:$28 sps:$4 sm:$0xff]   ;;  %v3849_v28 = vld [vmem:[%s4929_s0 + $0x4a4] ss:$28 sps:$4 sm:$0xff]  }
 0x103   :  { %3166 = vmatprep.mubr.msk.bf16.mxu0 %vm3866_vm0, %v3865_v40 }
 0x109   :  { %1823 = vmatmul.mubr.bf16.vlgmr.msra.gmra.mrb[0].mxu1 %v3765_v0  ;;  %v3851_v0 = vld [vmem:[%s4929_s0 + $0x4a0] ss:$28 sps:$4 sm:$0xff]  }
 0x10a   :  { %3167 = vmatmul.mubr.msk.bf16.vlgmr.msra.gmra.mrb[0].mxu0 %vm1482_vm1, %v3768_v29  ;;  %1830 = vmatprep.mubr.bf16.mxu1 %v3769_v30  ;;  %v3852_v29 = vld [vmem:[%s4929_s0 + $0x4b0] ss:$28 sps:$4 sm:$0xff]   ;;  %v3853_v30 = vld [vmem:[%s4929_s0 + $0x4dc] ss:$28 sps:$4 sm:$0xff]  }
 0x10b   :  { %3170 = vmatprep.mubr.msk.bf16.mxu0 %vm3866_vm0, %v3865_v40 }
 0x111   :  { %1831 = vmatmul.mubr.bf16.gmra.mrb[4].mxu1 %v3771_v31  ;;  %v3855_v31 = vld [vmem:[%s4929_s0 + $0x4d8] ss:$28 sps:$4 sm:$0xff]  }
 0x112   :  { %3171 = vmatmul.mubr.msk.bf16.gmra.mrb[4].mxu0 %vm1482_vm1, %v3772_v32  ;;  %1838 = vmatprep.mubr.bf16.mxu1 %v3773_v33  ;;  %v3856_v32 = vld [vmem:[%s4929_s0 + $0x4e8] ss:$28 sps:$4 sm:$0xff]   ;;  %v3857_v33 = vld [vmem:[%s4929_s0 + $0x514] ss:$28 sps:$4 sm:$0xff]  }
 0x113   :  { %3174 = vmatprep.mubr.msk.bf16.mxu0 %vm3866_vm0, %v3865_v40 }
 0x119   :  { %1839 = vmatmul.mubr.bf16.gmra.mrb[8].mxu1 %v3775_v34  ;;  %v208_v34 = vld [vmem:[%s4929_s0 + $0x548] sm:$0xff] }
 0x11a   :  { %3175 = vmatmul.mubr.msk.bf16.gmra.mrb[8].mxu0 %vm1482_vm1, %v3776_v35  ;;  %1846 = vmatprep.mubr.bf16.mxu1 %v3777_v36  ;;  %v3859_v35 = vld [vmem:[%s4929_s0 + $0x510] ss:$28 sps:$4 sm:$0xff]   ;;  %v3860_v36 = vld [vmem:[%s4929_s0 + $0x520] ss:$28 sps:$4 sm:$0xff]  }
 0x11b   :  { %3178 = vmatprep.mubr.msk.bf16.mxu0 %vm3866_vm0, %v3865_v40 }
 0x121   :  { %1847 = vmatmul.mubr.bf16.gmra.mrb[12].mxu1 %v3779_v37  ;;  %v2958_v37 = vcombine.high %v208_v34, %v208_v34 }
 0x122   :  { %3179 = vmatmul.mubr.msk.bf16.gmra.mrb[12].mxu0 %vm1482_vm1, %v3780_v38  ;;  %1854 = vmatprep.mubr.bf16.mxu1 %v3781_v39  ;;  %v2957_v38 = vcombine.low %v208_v34, %v208_v34  ;;  %v3863_v39 = vld [vmem:[%s4929_s0 + $0x558] ss:$0 sps:$4 sm:$0xff]  }
 0x123   :  { %3182 = vmatprep.mubr.msk.bf16.mxu0 %vm3866_vm0, %v3865_v40 }
 0x129   :  { %1855 = vmatmul.mubr.bf16.gmra.mrb[16].mxu1 %v3783_v41  ;;  %v4681_v41 = vld [vmem:[%s4930_s2] ss:$0 sm:$0xff] }
 0x12a   :  { %3183 = vmatmul.mubr.msk.bf16.gmra.mrb[16].mxu0 %vm1482_vm1, %v3784_v42  ;;  %1862 = vmatprep.mubr.bf16.mxu1 %v3785_v43 }
 0x12b   :  { %3186 = vmatprep.mubr.msk.bf16.mxu0 %vm3866_vm0, %v3865_v40 }
 0x131   :  { %1863 = vmatmul.mubr.bf16.gmra.mrb[20].mxu1 %v3787_v44 }
 0x132   :  { %3187 = vmatmul.mubr.msk.bf16.gmra.mrb[20].mxu0 %vm1482_vm1, %v3788_v45  ;;  %1870 = vmatprep.mubr.bf16.mxu1 %v3789_v46 }
 0x133   :  { %3190 = vmatprep.mubr.msk.bf16.mxu0 %vm3866_vm0, %v3865_v40 }
 0x139   :  { %1871 = vmatmul.mubr.bf16.gmra.mrb[24].mxu1 %v3791_v47 }
 0x13a   :  { %3191 = vmatmul.mubr.msk.bf16.gmra.mrb[24].mxu0 %vm1482_vm1, %v3792_v48  ;;  %1878 = vmatprep.mubr.bf16.mxu1 %v3793_v49 }
 0x13b   :  { %3194 = vmatprep.mubr.msk.bf16.mxu0 %vm3866_vm0, %v3865_v40 }
 0x141   :  { %1879 = vmatmul.mubr.bf16.gmra.mrb[28].mxu1 %v3795_v50 }
 0x142   :  { %3195 = vmatmul.mubr.msk.bf16.gmra.mrb[28].mxu0 %vm1482_vm1, %v3796_v51  ;;  %1886 = vmatprep.mubr.bf16.mxu1 %v3797_v52 }
 0x143   :  { %3198 = vmatprep.mubr.msk.bf16.mxu0 %vm3866_vm0, %v3865_v40 }
 0x149   :  { %1887 = vmatmul.mubr.bf16.gmra.mrb[32].mxu1 %v3799_v53 }
 0x14a   :  { %3199 = vmatmul.mubr.msk.bf16.gmra.mrb[32].mxu0 %vm1482_vm1, %v3800_v54  ;;  %1894 = vmatprep.mubr.bf16.mxu1 %v3801_v55 }
 0x14b   :  { %3202 = vmatprep.mubr.msk.bf16.mxu0 %vm3866_vm0, %v3865_v40 }
 0x151   :  { %1895 = vmatmul.mubr.bf16.gmra.mrb[36].mxu1 %v3803_v56 }
 0x152   :  { %3203 = vmatmul.mubr.msk.bf16.gmra.mrb[36].mxu0 %vm1482_vm1, %v3804_v57  ;;  %1902 = vmatprep.mubr.bf16.mxu1 %v3805_v58 }
 0x153   :  { %3206 = vmatprep.mubr.msk.bf16.mxu0 %vm3866_vm0, %v3865_v40 }
 0x159   :  { %1903 = vmatmul.mubr.bf16.gmra.mrb[40].mxu1 %v3807_v59 }
 0x15a   :  { %3207 = vmatmul.mubr.msk.bf16.gmra.mrb[40].mxu0 %vm1482_vm1, %v3808_v60  ;;  %1910 = vmatprep.mubr.bf16.mxu1 %v3809_v61 }
 0x15b   :  { %3210 = vmatprep.mubr.msk.bf16.mxu0 %vm3866_vm0, %v3865_v40 }
 0x161   :  { %1911 = vmatmul.mubr.bf16.gmra.mrb[44].mxu1 %v3811_v62 }
 0x162   :  { %3211 = vmatmul.mubr.msk.bf16.gmra.mrb[44].mxu0 %vm1482_vm1, %v3812_v63  ;;  %1918 = vmatprep.mubr.bf16.mxu1 %v3813_v1 }
 0x163   :  { %3214 = vmatprep.mubr.msk.bf16.mxu0 %vm3866_vm0, %v3865_v40 }
 0x169   :  { %1919 = vmatmul.mubr.bf16.gmra.mrb[48].mxu1 %v3815_v2 }
 0x16a   :  { %3215 = vmatmul.mubr.msk.bf16.gmra.mrb[48].mxu0 %vm1482_vm1, %v3816_v3  ;;  %1926 = vmatprep.mubr.bf16.mxu1 %v3817_v4 }
 0x16b   :  { %3218 = vmatprep.mubr.msk.bf16.mxu0 %vm3866_vm0, %v3865_v40 }
 0x171   :  { %1927 = vmatmul.mubr.bf16.gmra.mrb[52].mxu1 %v3819_v5 }
 0x172   :  { %3219 = vmatmul.mubr.msk.bf16.gmra.mrb[52].mxu0 %vm1482_vm1, %v3820_v6  ;;  %1934 = vmatprep.mubr.bf16.mxu1 %v3821_v7 }
 0x173   :  { %3222 = vmatprep.mubr.msk.bf16.mxu0 %vm3866_vm0, %v3865_v40 }
 0x179   :  { %1935 = vmatmul.mubr.bf16.gmra.mrb[56].mxu1 %v3823_v8 }
 0x17a   :  { %3223 = vmatmul.mubr.msk.bf16.gmra.mrb[56].mxu0 %vm1482_vm1, %v3824_v9  ;;  %1942 = vmatprep.mubr.bf16.mxu1 %v3825_v10 }
 0x17b   :  { %3226 = vmatprep.mubr.msk.bf16.mxu0 %vm3866_vm0, %v3865_v40 }
 0x181   :  { %1943 = vmatmul.mubr.bf16.gmra.mrb[60].mxu1 %v3827_v11 }
 0x182   :  { %3227 = vmatmul.mubr.msk.bf16.gmra.mrb[60].mxu0 %vm1482_vm1, %v3828_v12  ;;  %1950 = vmatprep.mubr.bf16.mxu1 %v3829_v13 }
 0x183   :  { %3230 = vmatprep.mubr.msk.bf16.mxu0 %vm3866_vm0, %v3865_v40 }
 0x189   :  { %1951 = vmatmul.mubr.bf16.gmra.mrb[64].mxu1 %v3831_v14 }
 0x18a   :  { %3231 = vmatmul.mubr.msk.bf16.gmra.mrb[64].mxu0 %vm1482_vm1, %v3832_v15  ;;  %1958 = vmatprep.mubr.bf16.mxu1 %v3833_v16 }
 0x18b   :  { %3234 = vmatprep.mubr.msk.bf16.mxu0 %vm3866_vm0, %v3865_v40 }
 0x191   :  { %1959 = vmatmul.mubr.bf16.gmra.mrb[68].mxu1 %v3835_v17 }
 0x192   :  { %3235 = vmatmul.mubr.msk.bf16.gmra.mrb[68].mxu0 %vm1482_vm1, %v3836_v18  ;;  %1966 = vmatprep.mubr.bf16.mxu1 %v3837_v19 }
 0x193   :  { %3238 = vmatprep.mubr.msk.bf16.mxu0 %vm3866_vm0, %v3865_v40 }
 0x199   :  { %1967 = vmatmul.mubr.bf16.gmra.mrb[72].mxu1 %v3839_v20 }
 0x19a   :  { %3239 = vmatmul.mubr.msk.bf16.gmra.mrb[72].mxu0 %vm1482_vm1, %v3840_v21  ;;  %1974 = vmatprep.mubr.bf16.mxu1 %v3841_v22 }
 0x19b   :  { %3242 = vmatprep.mubr.msk.bf16.mxu0 %vm3866_vm0, %v3865_v40 }
 0x1a1   :  { %1975 = vmatmul.mubr.bf16.gmra.mrb[76].mxu1 %v3843_v23 }
 0x1a2   :  { %3243 = vmatmul.mubr.msk.bf16.gmra.mrb[76].mxu0 %vm1482_vm1, %v3844_v24  ;;  %1982 = vmatprep.mubr.bf16.mxu1 %v3845_v25 }
 0x1a3   :  { %3246 = vmatprep.mubr.msk.bf16.mxu0 %vm3866_vm0, %v3865_v40 }
 0x1a9   :  { %1983 = vmatmul.mubr.bf16.gmra.mrb[80].mxu1 %v3847_v26 }
 0x1aa   :  { %3247 = vmatmul.mubr.msk.bf16.gmra.mrb[80].mxu0 %vm1482_vm1, %v3848_v27  ;;  %1990 = vmatprep.mubr.bf16.mxu1 %v3849_v28 }
 0x1ab   :  { %3250 = vmatprep.mubr.msk.bf16.mxu0 %vm3866_vm0, %v3865_v40 }
 0x1b1   :  { %1991 = vmatmul.mubr.bf16.gmra.mrb[84].mxu1 %v3851_v0 }
 0x1b2   :  { %3251 = vmatmul.mubr.msk.bf16.gmra.mrb[84].mxu0 %vm1482_vm1, %v3852_v29  ;;  %1998 = vmatprep.mubr.bf16.mxu1 %v3853_v30 }
 0x1b3   :  { %3254 = vmatprep.mubr.msk.bf16.mxu0 %vm3866_vm0, %v3865_v40 }
 0x1b9   :  { %1999 = vmatmul.mubr.bf16.gmra.mrb[88].mxu1 %v3855_v31 }
 0x1ba   :  { %3255 = vmatmul.mubr.msk.bf16.gmra.mrb[88].mxu0 %vm1482_vm1, %v3856_v32  ;;  %2006 = vmatprep.mubr.bf16.mxu1 %v3857_v33 }
 0x1bb   :  { %3258 = vmatprep.mubr.msk.bf16.mxu0 %vm3866_vm0, %v3865_v40 }
 0x1c1   :  { %2007 = vmatmul.mubr.bf16.gmra.mrb[92].mxu1 %v3859_v35 }
 0x1c2   :  { %3259 = vmatmul.mubr.msk.bf16.gmra.mrb[92].mxu0 %vm1482_vm1, %v3860_v36  ;;  %2014 = vmatprep.mubr.bf16.mxu1 %v2958_v37 }
 0x1c3   :  { %3262 = vmatprep.mubr.msk.bf16.mxu0 %vm3866_vm0, %v3865_v40 }
 0x1c9   :  { %2015 = vmatmul.mubr.bf16.gmra.mrb[96].mxu1 %v2957_v38 }
 0x1ca   :  { %3263 = vmatmul.mubr.msk.bf16.gmra.mrb[96].mxu0 %vm1482_vm1, %v3863_v39 }
 0x1dc   :  { %v1824_v42 = vpop.f32.mrb[0].mxu1 }
 0x1dd   :  { %v3266_v43 = vadd.f32 %v4681_v41, %v1824_v42  ;;  %v2288_v44 = vpop.f32.mrb[0].mxu0  ;;  %v1826_v45 = vpop.f32.mrb[1].mxu1 }
 0x1de   :  { %v3168_v46 = vpop.f32.mrb[1].mxu0  ;;  %v1827_v40 = vpop.f32.mrb[2].mxu1 }
 0x1df   :  { %v3267_v47 = vadd.f32 %v3266_v43, %v2288_v44  ;;  %v3268_v48 = vadd.f32 %v4681_v41, %v1827_v40  ;;  %v2291_v49 = vpop.f32.mrb[2].mxu0  ;;  %v1829_v50 = vpop.f32.mrb[3].mxu1 }
 0x1e0   :  { %v3169_v51 = vpop.f32.mrb[3].mxu0 }
 0x1e1   :  { %v2486_v52 = vmax.f32 %v3267_v47, 0.0  ;;  %v3269_v53 = vadd.f32 %v3268_v48, %v2291_v49 }
 0x1e3   :  { %v3086_v54 = vpack.c.bf16 %v2486_v52, %v2486_v52  ;;  %v2487_v55 = vmax.f32 %v3269_v53, 0.0 }
 0x1e4   :  { %v1832_v56 = vpop.f32.mrb[4].mxu1 }
 0x1e5   :  { %2733 = vst.msk [vmem:[%s4931_s3] sm:$0xf] %vm2732_vm2, %v3086_v54  ;;  %v3087_v57 = vpack.c.bf16 %v2487_v55, %v2487_v55  ;;  %v3270_v58 = vadd.f32 %v4681_v41, %v1832_v56  ;;  %v2296_v59 = vpop.f32.mrb[4].mxu0  ;;  %v1834_v60 = vpop.f32.mrb[5].mxu1 }
 0x1e6   :  { %v3172_v61 = vpop.f32.mrb[5].mxu0  ;;  %v1835_v62 = vpop.f32.mrb[6].mxu1 }
 0x1e7   :  { %2734 = vst.msk [vmem:[%s4931_s3 + $0x4] sm:$0xf] %vm2732_vm2, %v3087_v57  ;;  %v3271_v63 = vadd.f32 %v3270_v58, %v2296_v59  ;;  %v3272_v1 = vadd.f32 %v4681_v41, %v1835_v62  ;;  %v2299_v2 = vpop.f32.mrb[6].mxu0  ;;  %v1837_v3 = vpop.f32.mrb[7].mxu1 }
 0x1e8   :  { %v3173_v4 = vpop.f32.mrb[7].mxu0 }
 0x1e9   :  { %v2488_v5 = vmax.f32 %v3271_v63, 0.0  ;;  %v3273_v6 = vadd.f32 %v3272_v1, %v2299_v2 }
 0x1eb   :  { %v3088_v7 = vpack.c.bf16 %v2488_v5, %v2488_v5  ;;  %v2489_v8 = vmax.f32 %v3273_v6, 0.0 }
 0x1ec   :  { %v1840_v9 = vpop.f32.mrb[8].mxu1 }
 0x1ed   :  { %2735 = vst.msk [vmem:[%s4931_s3 + $0x8] sm:$0xf] %vm2732_vm2, %v3088_v7  ;;  %v3089_v10 = vpack.c.bf16 %v2489_v8, %v2489_v8  ;;  %v3274_v11 = vadd.f32 %v4681_v41, %v1840_v9  ;;  %v2304_v12 = vpop.f32.mrb[8].mxu0  ;;  %v1842_v13 = vpop.f32.mrb[9].mxu1 }
 0x1ee   :  { %v3176_v14 = vpop.f32.mrb[9].mxu0  ;;  %v1843_v15 = vpop.f32.mrb[10].mxu1 }
 0x1ef   :  { %2736 = vst.msk [vmem:[%s4931_s3 + $0xc] sm:$0xf] %vm2732_vm2, %v3089_v10  ;;  %v3275_v16 = vadd.f32 %v3274_v11, %v2304_v12  ;;  %v3276_v17 = vadd.f32 %v4681_v41, %v1843_v15  ;;  %v2307_v18 = vpop.f32.mrb[10].mxu0  ;;  %v1845_v19 = vpop.f32.mrb[11].mxu1 }
 0x1f0   :  { %v3177_v20 = vpop.f32.mrb[11].mxu0 }
 0x1f1   :  { %v2490_v21 = vmax.f32 %v3275_v16, 0.0  ;;  %v3277_v22 = vadd.f32 %v3276_v17, %v2307_v18 }
 0x1f3   :  { %v3090_v23 = vpack.c.bf16 %v2490_v21, %v2490_v21  ;;  %v2491_v24 = vmax.f32 %v3277_v22, 0.0 }
 0x1f4   :  { %v1848_v25 = vpop.f32.mrb[12].mxu1 }
 0x1f5   :  { %2737 = vst.msk [vmem:[%s4931_s3 + $0x10] sm:$0xf] %vm2732_vm2, %v3090_v23  ;;  %v3091_v26 = vpack.c.bf16 %v2491_v24, %v2491_v24  ;;  %v3278_v27 = vadd.f32 %v4681_v41, %v1848_v25  ;;  %v2312_v28 = vpop.f32.mrb[12].mxu0  ;;  %v1850_v0 = vpop.f32.mrb[13].mxu1 }
 0x1f6   :  { %v3180_v29 = vpop.f32.mrb[13].mxu0  ;;  %v1851_v30 = vpop.f32.mrb[14].mxu1 }
 0x1f7   :  { %2738 = vst.msk [vmem:[%s4931_s3 + $0x14] sm:$0xf] %vm2732_vm2, %v3091_v26  ;;  %v3279_v31 = vadd.f32 %v3278_v27, %v2312_v28  ;;  %v3280_v32 = vadd.f32 %v4681_v41, %v1851_v30  ;;  %v2315_v33 = vpop.f32.mrb[14].mxu0  ;;  %v1853_v34 = vpop.f32.mrb[15].mxu1 }
 0x1f8   :  { %v3181_v35 = vpop.f32.mrb[15].mxu0 }
 0x1f9   :  { %v2492_v36 = vmax.f32 %v3279_v31, 0.0  ;;  %v3281_v37 = vadd.f32 %v3280_v32, %v2315_v33 }
 0x1fb   :  { %v3092_v38 = vpack.c.bf16 %v2492_v36, %v2492_v36  ;;  %v2493_v39 = vmax.f32 %v3281_v37, 0.0 }
 0x1fc   :  { %v1856_v42 = vpop.f32.mrb[16].mxu1 }
 0x1fd   :  { %2739 = vst.msk [vmem:[%s4931_s3 + $0x18] sm:$0xf] %vm2732_vm2, %v3092_v38  ;;  %v3093_v43 = vpack.c.bf16 %v2493_v39, %v2493_v39  ;;  %v3282_v44 = vadd.f32 %v4681_v41, %v1856_v42  ;;  %v2320_v45 = vpop.f32.mrb[16].mxu0  ;;  %v1858_v46 = vpop.f32.mrb[17].mxu1 }
 0x1fe   :  { %v3184_v40 = vpop.f32.mrb[17].mxu0  ;;  %v1859_v47 = vpop.f32.mrb[18].mxu1 }
 0x1ff   :  { %2740 = vst.msk [vmem:[%s4931_s3 + $0x1c] sm:$0xf] %vm2732_vm2, %v3093_v43  ;;  %v3283_v48 = vadd.f32 %v3282_v44, %v2320_v45  ;;  %v3284_v49 = vadd.f32 %v4681_v41, %v1859_v47  ;;  %v2323_v50 = vpop.f32.mrb[18].mxu0  ;;  %v1861_v51 = vpop.f32.mrb[19].mxu1 }
 0x200   :  { %v3185_v52 = vpop.f32.mrb[19].mxu0 }
 0x201   :  { %v2494_v53 = vmax.f32 %v3283_v48, 0.0  ;;  %v3285_v54 = vadd.f32 %v3284_v49, %v2323_v50 }
 0x203   :  { %v3094_v55 = vpack.c.bf16 %v2494_v53, %v2494_v53  ;;  %v2495_v56 = vmax.f32 %v3285_v54, 0.0 }
 0x204   :  { %v1864_v57 = vpop.f32.mrb[20].mxu1 }
 0x205   :  { %2741 = vst.msk [vmem:[%s4931_s3 + $0x20] sm:$0xf] %vm2732_vm2, %v3094_v55  ;;  %v3095_v58 = vpack.c.bf16 %v2495_v56, %v2495_v56  ;;  %v3286_v59 = vadd.f32 %v4681_v41, %v1864_v57  ;;  %v2328_v60 = vpop.f32.mrb[20].mxu0  ;;  %v1866_v61 = vpop.f32.mrb[21].mxu1 }
 0x206   :  { %v3188_v62 = vpop.f32.mrb[21].mxu0  ;;  %v1867_v63 = vpop.f32.mrb[22].mxu1 }
 0x207   :  { %2742 = vst.msk [vmem:[%s4931_s3 + $0x24] sm:$0xf] %vm2732_vm2, %v3095_v58  ;;  %v3287_v1 = vadd.f32 %v3286_v59, %v2328_v60  ;;  %v3288_v2 = vadd.f32 %v4681_v41, %v1867_v63  ;;  %v2331_v3 = vpop.f32.mrb[22].mxu0  ;;  %v1869_v4 = vpop.f32.mrb[23].mxu1 }
 0x208   :  { %v3189_v5 = vpop.f32.mrb[23].mxu0 }
 0x209   :  { %v2496_v6 = vmax.f32 %v3287_v1, 0.0  ;;  %v3289_v7 = vadd.f32 %v3288_v2, %v2331_v3 }
 0x20b   :  { %v3096_v8 = vpack.c.bf16 %v2496_v6, %v2496_v6  ;;  %v2497_v9 = vmax.f32 %v3289_v7, 0.0 }
 0x20c   :  { %v1872_v10 = vpop.f32.mrb[24].mxu1 }
 0x20d   :  { %2743 = vst.msk [vmem:[%s4931_s3 + $0x28] sm:$0xf] %vm2732_vm2, %v3096_v8  ;;  %v3097_v11 = vpack.c.bf16 %v2497_v9, %v2497_v9  ;;  %v3290_v12 = vadd.f32 %v4681_v41, %v1872_v10  ;;  %v2336_v13 = vpop.f32.mrb[24].mxu0  ;;  %v1874_v14 = vpop.f32.mrb[25].mxu1 }
 0x20e   :  { %v3192_v15 = vpop.f32.mrb[25].mxu0  ;;  %v1875_v16 = vpop.f32.mrb[26].mxu1 }
 0x20f   :  { %2744 = vst.msk [vmem:[%s4931_s3 + $0x2c] sm:$0xf] %vm2732_vm2, %v3097_v11  ;;  %v3291_v17 = vadd.f32 %v3290_v12, %v2336_v13  ;;  %v3292_v18 = vadd.f32 %v4681_v41, %v1875_v16  ;;  %v2339_v19 = vpop.f32.mrb[26].mxu0  ;;  %v1877_v20 = vpop.f32.mrb[27].mxu1 }
 0x210   :  { %v3193_v21 = vpop.f32.mrb[27].mxu0 }
 0x211   :  { %v2498_v22 = vmax.f32 %v3291_v17, 0.0  ;;  %v3293_v23 = vadd.f32 %v3292_v18, %v2339_v19 }
 0x213   :  { %v3098_v24 = vpack.c.bf16 %v2498_v22, %v2498_v22  ;;  %v2499_v25 = vmax.f32 %v3293_v23, 0.0 }
 0x214   :  { %v1880_v26 = vpop.f32.mrb[28].mxu1 }
 0x215   :  { %2745 = vst.msk [vmem:[%s4931_s3 + $0x30] sm:$0xf] %vm2732_vm2, %v3098_v24  ;;  %v3099_v27 = vpack.c.bf16 %v2499_v25, %v2499_v25  ;;  %v3294_v28 = vadd.f32 %v4681_v41, %v1880_v26  ;;  %v2344_v0 = vpop.f32.mrb[28].mxu0  ;;  %v1882_v29 = vpop.f32.mrb[29].mxu1 }
 0x216   :  { %v3196_v30 = vpop.f32.mrb[29].mxu0  ;;  %v1883_v31 = vpop.f32.mrb[30].mxu1 }
 0x217   :  { %2746 = vst.msk [vmem:[%s4931_s3 + $0x34] sm:$0xf] %vm2732_vm2, %v3099_v27  ;;  %v3295_v32 = vadd.f32 %v3294_v28, %v2344_v0  ;;  %v3296_v33 = vadd.f32 %v4681_v41, %v1883_v31  ;;  %v2347_v34 = vpop.f32.mrb[30].mxu0  ;;  %v1885_v35 = vpop.f32.mrb[31].mxu1 }
 0x218   :  { %v3197_v36 = vpop.f32.mrb[31].mxu0 }
 0x219   :  { %v2500_v37 = vmax.f32 %v3295_v32, 0.0  ;;  %v3297_v38 = vadd.f32 %v3296_v33, %v2347_v34 }
 0x21b   :  { %v3100_v39 = vpack.c.bf16 %v2500_v37, %v2500_v37  ;;  %v2501_v42 = vmax.f32 %v3297_v38, 0.0 }
 0x21c   :  { %v1888_v43 = vpop.f32.mrb[32].mxu1 }
 0x21d   :  { %2747 = vst.msk [vmem:[%s4931_s3 + $0x38] sm:$0xf] %vm2732_vm2, %v3100_v39  ;;  %v3101_v44 = vpack.c.bf16 %v2501_v42, %v2501_v42  ;;  %v3298_v45 = vadd.f32 %v4681_v41, %v1888_v43  ;;  %v2352_v46 = vpop.f32.mrb[32].mxu0  ;;  %v1890_v40 = vpop.f32.mrb[33].mxu1 }
 0x21e   :  { %v3200_v47 = vpop.f32.mrb[33].mxu0  ;;  %v1891_v48 = vpop.f32.mrb[34].mxu1 }
 0x21f   :  { %2748 = vst.msk [vmem:[%s4931_s3 + $0x3c] sm:$0xf] %vm2732_vm2, %v3101_v44  ;;  %v3299_v49 = vadd.f32 %v3298_v45, %v2352_v46  ;;  %v3300_v50 = vadd.f32 %v4681_v41, %v1891_v48  ;;  %v2355_v51 = vpop.f32.mrb[34].mxu0  ;;  %v1893_v52 = vpop.f32.mrb[35].mxu1 }
 0x220   :  { %v3201_v53 = vpop.f32.mrb[35].mxu0 }
 0x221   :  { %v2502_v54 = vmax.f32 %v3299_v49, 0.0  ;;  %v3301_v55 = vadd.f32 %v3300_v50, %v2355_v51 }
 0x223   :  { %v3102_v56 = vpack.c.bf16 %v2502_v54, %v2502_v54  ;;  %v2503_v57 = vmax.f32 %v3301_v55, 0.0 }
 0x224   :  { %v1896_v58 = vpop.f32.mrb[36].mxu1 }
 0x225   :  { %2749 = vst.msk [vmem:[%s4931_s3 + $0x40] sm:$0xf] %vm2732_vm2, %v3102_v56  ;;  %v3103_v59 = vpack.c.bf16 %v2503_v57, %v2503_v57  ;;  %v3302_v60 = vadd.f32 %v4681_v41, %v1896_v58  ;;  %v2360_v61 = vpop.f32.mrb[36].mxu0  ;;  %v1898_v62 = vpop.f32.mrb[37].mxu1 }
 0x226   :  { %v3204_v63 = vpop.f32.mrb[37].mxu0  ;;  %v1899_v1 = vpop.f32.mrb[38].mxu1 }
 0x227   :  { %2750 = vst.msk [vmem:[%s4931_s3 + $0x44] sm:$0xf] %vm2732_vm2, %v3103_v59  ;;  %v3303_v2 = vadd.f32 %v3302_v60, %v2360_v61  ;;  %v3304_v3 = vadd.f32 %v4681_v41, %v1899_v1  ;;  %v2363_v4 = vpop.f32.mrb[38].mxu0  ;;  %v1901_v5 = vpop.f32.mrb[39].mxu1 }
 0x228   :  { %v3205_v6 = vpop.f32.mrb[39].mxu0 }
 0x229   :  { %v2504_v7 = vmax.f32 %v3303_v2, 0.0  ;;  %v3305_v8 = vadd.f32 %v3304_v3, %v2363_v4 }
 0x22b   :  { %v3104_v9 = vpack.c.bf16 %v2504_v7, %v2504_v7  ;;  %v2505_v10 = vmax.f32 %v3305_v8, 0.0 }
 0x22c   :  { %v1904_v11 = vpop.f32.mrb[40].mxu1 }
 0x22d   :  { %2751 = vst.msk [vmem:[%s4931_s3 + $0x48] sm:$0xf] %vm2732_vm2, %v3104_v9  ;;  %v3105_v12 = vpack.c.bf16 %v2505_v10, %v2505_v10  ;;  %v3306_v13 = vadd.f32 %v4681_v41, %v1904_v11  ;;  %v2368_v14 = vpop.f32.mrb[40].mxu0  ;;  %v1906_v15 = vpop.f32.mrb[41].mxu1 }
 0x22e   :  { %v3208_v16 = vpop.f32.mrb[41].mxu0  ;;  %v1907_v17 = vpop.f32.mrb[42].mxu1 }
 0x22f   :  { %2752 = vst.msk [vmem:[%s4931_s3 + $0x4c] sm:$0xf] %vm2732_vm2, %v3105_v12  ;;  %v3307_v18 = vadd.f32 %v3306_v13, %v2368_v14  ;;  %v3308_v19 = vadd.f32 %v4681_v41, %v1907_v17  ;;  %v2371_v20 = vpop.f32.mrb[42].mxu0  ;;  %v1909_v21 = vpop.f32.mrb[43].mxu1 }
 0x230   :  { %v3209_v22 = vpop.f32.mrb[43].mxu0 }
 0x231   :  { %v2506_v23 = vmax.f32 %v3307_v18, 0.0  ;;  %v3309_v24 = vadd.f32 %v3308_v19, %v2371_v20 }
 0x233   :  { %v3106_v25 = vpack.c.bf16 %v2506_v23, %v2506_v23  ;;  %v2507_v26 = vmax.f32 %v3309_v24, 0.0 }
 0x234   :  { %v1912_v27 = vpop.f32.mrb[44].mxu1 }
 0x235   :  { %2753 = vst.msk [vmem:[%s4931_s3 + $0x50] sm:$0xf] %vm2732_vm2, %v3106_v25  ;;  %v3107_v28 = vpack.c.bf16 %v2507_v26, %v2507_v26  ;;  %v3310_v0 = vadd.f32 %v4681_v41, %v1912_v27  ;;  %v2376_v29 = vpop.f32.mrb[44].mxu0  ;;  %v1914_v30 = vpop.f32.mrb[45].mxu1 }
 0x236   :  { %v3212_v31 = vpop.f32.mrb[45].mxu0  ;;  %v1915_v32 = vpop.f32.mrb[46].mxu1 }
 0x237   :  { %2754 = vst.msk [vmem:[%s4931_s3 + $0x54] sm:$0xf] %vm2732_vm2, %v3107_v28  ;;  %v3311_v33 = vadd.f32 %v3310_v0, %v2376_v29  ;;  %v3312_v34 = vadd.f32 %v4681_v41, %v1915_v32  ;;  %v2379_v35 = vpop.f32.mrb[46].mxu0  ;;  %v1917_v36 = vpop.f32.mrb[47].mxu1 }
 0x238   :  { %v3213_v37 = vpop.f32.mrb[47].mxu0 }
 0x239   :  { %v2508_v38 = vmax.f32 %v3311_v33, 0.0  ;;  %v3313_v39 = vadd.f32 %v3312_v34, %v2379_v35 }
 0x23b   :  { %v3108_v42 = vpack.c.bf16 %v2508_v38, %v2508_v38  ;;  %v2509_v43 = vmax.f32 %v3313_v39, 0.0 }
 0x23c   :  { %v1920_v44 = vpop.f32.mrb[48].mxu1 }
 0x23d   :  { %2755 = vst.msk [vmem:[%s4931_s3 + $0x58] sm:$0xf] %vm2732_vm2, %v3108_v42  ;;  %v3109_v45 = vpack.c.bf16 %v2509_v43, %v2509_v43  ;;  %v3314_v46 = vadd.f32 %v4681_v41, %v1920_v44  ;;  %v2384_v40 = vpop.f32.mrb[48].mxu0  ;;  %v1922_v47 = vpop.f32.mrb[49].mxu1 }
 0x23e   :  { %v3216_v48 = vpop.f32.mrb[49].mxu0  ;;  %v1923_v49 = vpop.f32.mrb[50].mxu1 }
 0x23f   :  { %2756 = vst.msk [vmem:[%s4931_s3 + $0x5c] sm:$0xf] %vm2732_vm2, %v3109_v45  ;;  %v3315_v50 = vadd.f32 %v3314_v46, %v2384_v40  ;;  %v3316_v51 = vadd.f32 %v4681_v41, %v1923_v49  ;;  %v2387_v52 = vpop.f32.mrb[50].mxu0  ;;  %v1925_v53 = vpop.f32.mrb[51].mxu1 }
 0x240   :  { %v3217_v54 = vpop.f32.mrb[51].mxu0 }
 0x241   :  { %v2510_v55 = vmax.f32 %v3315_v50, 0.0  ;;  %v3317_v56 = vadd.f32 %v3316_v51, %v2387_v52 }
 0x243   :  { %v3110_v57 = vpack.c.bf16 %v2510_v55, %v2510_v55  ;;  %v2511_v58 = vmax.f32 %v3317_v56, 0.0 }
 0x244   :  { %v1928_v59 = vpop.f32.mrb[52].mxu1 }
 0x245   :  { %2757 = vst.msk [vmem:[%s4931_s3 + $0x60] sm:$0xf] %vm2732_vm2, %v3110_v57  ;;  %v3111_v60 = vpack.c.bf16 %v2511_v58, %v2511_v58  ;;  %v3318_v61 = vadd.f32 %v4681_v41, %v1928_v59  ;;  %v2392_v62 = vpop.f32.mrb[52].mxu0  ;;  %v1930_v63 = vpop.f32.mrb[53].mxu1 }
 0x246   :  { %v3220_v1 = vpop.f32.mrb[53].mxu0  ;;  %v1931_v2 = vpop.f32.mrb[54].mxu1 }
 0x247   :  { %2758 = vst.msk [vmem:[%s4931_s3 + $0x64] sm:$0xf] %vm2732_vm2, %v3111_v60  ;;  %v3319_v3 = vadd.f32 %v3318_v61, %v2392_v62  ;;  %v3320_v4 = vadd.f32 %v4681_v41, %v1931_v2  ;;  %v2395_v5 = vpop.f32.mrb[54].mxu0  ;;  %v1933_v6 = vpop.f32.mrb[55].mxu1 }
 0x248   :  { %v3221_v7 = vpop.f32.mrb[55].mxu0 }
 0x249   :  { %v2512_v8 = vmax.f32 %v3319_v3, 0.0  ;;  %v3321_v9 = vadd.f32 %v3320_v4, %v2395_v5 }
 0x24b   :  { %v3112_v10 = vpack.c.bf16 %v2512_v8, %v2512_v8  ;;  %v2513_v11 = vmax.f32 %v3321_v9, 0.0 }
 0x24c   :  { %v1936_v12 = vpop.f32.mrb[56].mxu1 }
 0x24d   :  { %2759 = vst.msk [vmem:[%s4931_s3 + $0x68] sm:$0xf] %vm2732_vm2, %v3112_v10  ;;  %v3113_v13 = vpack.c.bf16 %v2513_v11, %v2513_v11  ;;  %v3322_v14 = vadd.f32 %v4681_v41, %v1936_v12  ;;  %v2400_v15 = vpop.f32.mrb[56].mxu0  ;;  %v1938_v16 = vpop.f32.mrb[57].mxu1 }
 0x24e   :  { %v3224_v17 = vpop.f32.mrb[57].mxu0  ;;  %v1939_v18 = vpop.f32.mrb[58].mxu1 }
 0x24f   :  { %2760 = vst.msk [vmem:[%s4931_s3 + $0x6c] sm:$0xf] %vm2732_vm2, %v3113_v13  ;;  %v3323_v19 = vadd.f32 %v3322_v14, %v2400_v15  ;;  %v3324_v20 = vadd.f32 %v4681_v41, %v1939_v18  ;;  %v2403_v21 = vpop.f32.mrb[58].mxu0  ;;  %v1941_v22 = vpop.f32.mrb[59].mxu1 }
 0x250   :  { %v3225_v23 = vpop.f32.mrb[59].mxu0 }
 0x251   :  { %v2514_v24 = vmax.f32 %v3323_v19, 0.0  ;;  %v3325_v25 = vadd.f32 %v3324_v20, %v2403_v21 }
 0x253   :  { %v3114_v26 = vpack.c.bf16 %v2514_v24, %v2514_v24  ;;  %v2515_v27 = vmax.f32 %v3325_v25, 0.0 }
 0x254   :  { %v1944_v28 = vpop.f32.mrb[60].mxu1 }
 0x255   :  { %2761 = vst.msk [vmem:[%s4931_s3 + $0x70] sm:$0xf] %vm2732_vm2, %v3114_v26  ;;  %v3115_v0 = vpack.c.bf16 %v2515_v27, %v2515_v27  ;;  %v3326_v29 = vadd.f32 %v4681_v41, %v1944_v28  ;;  %v2408_v30 = vpop.f32.mrb[60].mxu0  ;;  %v1946_v31 = vpop.f32.mrb[61].mxu1 }
 0x256   :  { %v3228_v32 = vpop.f32.mrb[61].mxu0  ;;  %v1947_v33 = vpop.f32.mrb[62].mxu1 }
 0x257   :  { %2762 = vst.msk [vmem:[%s4931_s3 + $0x74] sm:$0xf] %vm2732_vm2, %v3115_v0  ;;  %v3327_v34 = vadd.f32 %v3326_v29, %v2408_v30  ;;  %v3328_v35 = vadd.f32 %v4681_v41, %v1947_v33  ;;  %v2411_v36 = vpop.f32.mrb[62].mxu0  ;;  %v1949_v37 = vpop.f32.mrb[63].mxu1 }
 0x258   :  { %v3229_v38 = vpop.f32.mrb[63].mxu0 }
 0x259   :  { %v2516_v39 = vmax.f32 %v3327_v34, 0.0  ;;  %v3329_v42 = vadd.f32 %v3328_v35, %v2411_v36 }
 0x25b   :  { %v3116_v43 = vpack.c.bf16 %v2516_v39, %v2516_v39  ;;  %v2517_v44 = vmax.f32 %v3329_v42, 0.0 }
 0x25c   :  { %v1952_v45 = vpop.f32.mrb[64].mxu1 }
 0x25d   :  { %2763 = vst.msk [vmem:[%s4931_s3 + $0x78] sm:$0xf] %vm2732_vm2, %v3116_v43  ;;  %v3117_v46 = vpack.c.bf16 %v2517_v44, %v2517_v44  ;;  %v3330_v40 = vadd.f32 %v4681_v41, %v1952_v45  ;;  %v2416_v47 = vpop.f32.mrb[64].mxu0  ;;  %v1954_v48 = vpop.f32.mrb[65].mxu1 }
 0x25e   :  { %v3232_v49 = vpop.f32.mrb[65].mxu0  ;;  %v1955_v50 = vpop.f32.mrb[66].mxu1 }
 0x25f   :  { %2764 = vst.msk [vmem:[%s4931_s3 + $0x7c] sm:$0xf] %vm2732_vm2, %v3117_v46  ;;  %v3331_v51 = vadd.f32 %v3330_v40, %v2416_v47  ;;  %v3332_v52 = vadd.f32 %v4681_v41, %v1955_v50  ;;  %v2419_v53 = vpop.f32.mrb[66].mxu0  ;;  %v1957_v54 = vpop.f32.mrb[67].mxu1 }
 0x260   :  { %v3233_v55 = vpop.f32.mrb[67].mxu0 }
 0x261   :  { %v2518_v56 = vmax.f32 %v3331_v51, 0.0  ;;  %v3333_v57 = vadd.f32 %v3332_v52, %v2419_v53 }
 0x263   :  { %v3118_v58 = vpack.c.bf16 %v2518_v56, %v2518_v56  ;;  %v2519_v59 = vmax.f32 %v3333_v57, 0.0 }
 0x264   :  { %v1960_v60 = vpop.f32.mrb[68].mxu1 }
 0x265   :  { %2765 = vst.msk [vmem:[%s4931_s3 + $0x80] sm:$0xf] %vm2732_vm2, %v3118_v58  ;;  %v3119_v61 = vpack.c.bf16 %v2519_v59, %v2519_v59  ;;  %v3334_v62 = vadd.f32 %v4681_v41, %v1960_v60  ;;  %v2424_v63 = vpop.f32.mrb[68].mxu0  ;;  %v1962_v1 = vpop.f32.mrb[69].mxu1 }
 0x266   :  { %v3236_v2 = vpop.f32.mrb[69].mxu0  ;;  %v1963_v3 = vpop.f32.mrb[70].mxu1 }
 0x267   :  { %2766 = vst.msk [vmem:[%s4931_s3 + $0x84] sm:$0xf] %vm2732_vm2, %v3119_v61  ;;  %v3335_v4 = vadd.f32 %v3334_v62, %v2424_v63  ;;  %v3336_v5 = vadd.f32 %v4681_v41, %v1963_v3  ;;  %v2427_v6 = vpop.f32.mrb[70].mxu0  ;;  %v1965_v7 = vpop.f32.mrb[71].mxu1 }
 0x268   :  { %v3237_v8 = vpop.f32.mrb[71].mxu0 }
 0x269   :  { %v2520_v9 = vmax.f32 %v3335_v4, 0.0  ;;  %v3337_v10 = vadd.f32 %v3336_v5, %v2427_v6 }
 0x26b   :  { %v3120_v11 = vpack.c.bf16 %v2520_v9, %v2520_v9  ;;  %v2521_v12 = vmax.f32 %v3337_v10, 0.0 }
 0x26c   :  { %v1968_v13 = vpop.f32.mrb[72].mxu1 }
 0x26d   :  { %2767 = vst.msk [vmem:[%s4931_s3 + $0x88] sm:$0xf] %vm2732_vm2, %v3120_v11  ;;  %v3121_v14 = vpack.c.bf16 %v2521_v12, %v2521_v12  ;;  %v3338_v15 = vadd.f32 %v4681_v41, %v1968_v13  ;;  %v2432_v16 = vpop.f32.mrb[72].mxu0  ;;  %v1970_v17 = vpop.f32.mrb[73].mxu1 }
 0x26e   :  { %v3240_v18 = vpop.f32.mrb[73].mxu0  ;;  %v1971_v19 = vpop.f32.mrb[74].mxu1 }
 0x26f   :  { %2768 = vst.msk [vmem:[%s4931_s3 + $0x8c] sm:$0xf] %vm2732_vm2, %v3121_v14  ;;  %v3339_v20 = vadd.f32 %v3338_v15, %v2432_v16  ;;  %v3340_v21 = vadd.f32 %v4681_v41, %v1971_v19  ;;  %v2435_v22 = vpop.f32.mrb[74].mxu0  ;;  %v1973_v23 = vpop.f32.mrb[75].mxu1 }
 0x270   :  { %v3241_v24 = vpop.f32.mrb[75].mxu0 }
 0x271   :  { %v2522_v25 = vmax.f32 %v3339_v20, 0.0  ;;  %v3341_v26 = vadd.f32 %v3340_v21, %v2435_v22 }
 0x273   :  { %v3122_v27 = vpack.c.bf16 %v2522_v25, %v2522_v25  ;;  %v2523_v28 = vmax.f32 %v3341_v26, 0.0 }
 0x274   :  { %v1976_v0 = vpop.f32.mrb[76].mxu1 }
 0x275   :  { %2769 = vst.msk [vmem:[%s4931_s3 + $0x90] sm:$0xf] %vm2732_vm2, %v3122_v27  ;;  %v3123_v29 = vpack.c.bf16 %v2523_v28, %v2523_v28  ;;  %v3342_v30 = vadd.f32 %v4681_v41, %v1976_v0  ;;  %v2440_v31 = vpop.f32.mrb[76].mxu0  ;;  %v1978_v32 = vpop.f32.mrb[77].mxu1 }
 0x276   :  { %v3244_v33 = vpop.f32.mrb[77].mxu0  ;;  %v1979_v34 = vpop.f32.mrb[78].mxu1 }
 0x277   :  { %2770 = vst.msk [vmem:[%s4931_s3 + $0x94] sm:$0xf] %vm2732_vm2, %v3123_v29  ;;  %v3343_v35 = vadd.f32 %v3342_v30, %v2440_v31  ;;  %v3344_v36 = vadd.f32 %v4681_v41, %v1979_v34  ;;  %v2443_v37 = vpop.f32.mrb[78].mxu0  ;;  %v1981_v38 = vpop.f32.mrb[79].mxu1 }
 0x278   :  { %v3245_v39 = vpop.f32.mrb[79].mxu0 }
 0x279   :  { %v2524_v42 = vmax.f32 %v3343_v35, 0.0  ;;  %v3345_v43 = vadd.f32 %v3344_v36, %v2443_v37 }
 0x27b   :  { %v3124_v44 = vpack.c.bf16 %v2524_v42, %v2524_v42  ;;  %v2525_v45 = vmax.f32 %v3345_v43, 0.0 }
 0x27c   :  { %v1984_v46 = vpop.f32.mrb[80].mxu1 }
 0x27d   :  { %2771 = vst.msk [vmem:[%s4931_s3 + $0x98] sm:$0xf] %vm2732_vm2, %v3124_v44  ;;  %v3125_v40 = vpack.c.bf16 %v2525_v45, %v2525_v45  ;;  %v3346_v47 = vadd.f32 %v4681_v41, %v1984_v46  ;;  %v2448_v48 = vpop.f32.mrb[80].mxu0  ;;  %v1986_v49 = vpop.f32.mrb[81].mxu1 }
 0x27e   :  { %v3248_v50 = vpop.f32.mrb[81].mxu0  ;;  %v1987_v51 = vpop.f32.mrb[82].mxu1 }
 0x27f   :  { %2772 = vst.msk [vmem:[%s4931_s3 + $0x9c] sm:$0xf] %vm2732_vm2, %v3125_v40  ;;  %v3347_v52 = vadd.f32 %v3346_v47, %v2448_v48  ;;  %v3348_v53 = vadd.f32 %v4681_v41, %v1987_v51  ;;  %v2451_v54 = vpop.f32.mrb[82].mxu0  ;;  %v1989_v55 = vpop.f32.mrb[83].mxu1 }
 0x280   :  { %v3249_v56 = vpop.f32.mrb[83].mxu0 }
 0x281   :  { %v2526_v57 = vmax.f32 %v3347_v52, 0.0  ;;  %v3349_v58 = vadd.f32 %v3348_v53, %v2451_v54 }
 0x283   :  { %v3126_v59 = vpack.c.bf16 %v2526_v57, %v2526_v57  ;;  %v2527_v60 = vmax.f32 %v3349_v58, 0.0 }
 0x284   :  { %v1992_v61 = vpop.f32.mrb[84].mxu1 }
 0x285   :  { %2773 = vst.msk [vmem:[%s4931_s3 + $0xa0] sm:$0xf] %vm2732_vm2, %v3126_v59  ;;  %v3127_v62 = vpack.c.bf16 %v2527_v60, %v2527_v60  ;;  %v3350_v63 = vadd.f32 %v4681_v41, %v1992_v61  ;;  %v2456_v1 = vpop.f32.mrb[84].mxu0  ;;  %v1994_v2 = vpop.f32.mrb[85].mxu1 }
 0x286   :  { %v3252_v3 = vpop.f32.mrb[85].mxu0  ;;  %v1995_v4 = vpop.f32.mrb[86].mxu1 }
 0x287   :  { %2774 = vst.msk [vmem:[%s4931_s3 + $0xa4] sm:$0xf] %vm2732_vm2, %v3127_v62  ;;  %v3351_v5 = vadd.f32 %v3350_v63, %v2456_v1  ;;  %v3352_v6 = vadd.f32 %v4681_v41, %v1995_v4  ;;  %v2459_v7 = vpop.f32.mrb[86].mxu0  ;;  %v1997_v8 = vpop.f32.mrb[87].mxu1 }
 0x288   :  { %v3253_v9 = vpop.f32.mrb[87].mxu0 }
 0x289   :  { %v2528_v10 = vmax.f32 %v3351_v5, 0.0  ;;  %v3353_v11 = vadd.f32 %v3352_v6, %v2459_v7 }
 0x28b   :  { %v3128_v12 = vpack.c.bf16 %v2528_v10, %v2528_v10  ;;  %v2529_v13 = vmax.f32 %v3353_v11, 0.0 }
 0x28c   :  { %v2000_v14 = vpop.f32.mrb[88].mxu1 }
 0x28d   :  { %2775 = vst.msk [vmem:[%s4931_s3 + $0xa8] sm:$0xf] %vm2732_vm2, %v3128_v12  ;;  %v3129_v15 = vpack.c.bf16 %v2529_v13, %v2529_v13  ;;  %v3354_v16 = vadd.f32 %v4681_v41, %v2000_v14  ;;  %v2464_v17 = vpop.f32.mrb[88].mxu0  ;;  %v2002_v18 = vpop.f32.mrb[89].mxu1 }
 0x28e   :  { %v3256_v19 = vpop.f32.mrb[89].mxu0  ;;  %v2003_v20 = vpop.f32.mrb[90].mxu1 }
 0x28f   :  { %2776 = vst.msk [vmem:[%s4931_s3 + $0xac] sm:$0xf] %vm2732_vm2, %v3129_v15  ;;  %v3355_v21 = vadd.f32 %v3354_v16, %v2464_v17  ;;  %v3356_v22 = vadd.f32 %v4681_v41, %v2003_v20  ;;  %v2467_v23 = vpop.f32.mrb[90].mxu0  ;;  %v2005_v24 = vpop.f32.mrb[91].mxu1 }
 0x290   :  { %v3257_v25 = vpop.f32.mrb[91].mxu0 }
 0x291   :  { %v2530_v26 = vmax.f32 %v3355_v21, 0.0  ;;  %v3357_v27 = vadd.f32 %v3356_v22, %v2467_v23 }
 0x293   :  { %v3130_v28 = vpack.c.bf16 %v2530_v26, %v2530_v26  ;;  %v2531_v0 = vmax.f32 %v3357_v27, 0.0 }
 0x294   :  { %v2008_v29 = vpop.f32.mrb[92].mxu1 }
 0x295   :  { %2777 = vst.msk [vmem:[%s4931_s3 + $0xb0] sm:$0xf] %vm2732_vm2, %v3130_v28  ;;  %v3131_v30 = vpack.c.bf16 %v2531_v0, %v2531_v0  ;;  %v3358_v31 = vadd.f32 %v4681_v41, %v2008_v29  ;;  %v2472_v32 = vpop.f32.mrb[92].mxu0  ;;  %v2010_v33 = vpop.f32.mrb[93].mxu1 }
 0x296   :  { %v3260_v34 = vpop.f32.mrb[93].mxu0  ;;  %v2011_v35 = vpop.f32.mrb[94].mxu1 }
 0x297   :  { %2778 = vst.msk [vmem:[%s4931_s3 + $0xb4] sm:$0xf] %vm2732_vm2, %v3131_v30  ;;  %v3359_v36 = vadd.f32 %v3358_v31, %v2472_v32  ;;  %v3360_v37 = vadd.f32 %v4681_v41, %v2011_v35  ;;  %v2475_v38 = vpop.f32.mrb[94].mxu0  ;;  %v2013_v39 = vpop.f32.mrb[95].mxu1 }
 0x298   :  { %v3261_v42 = vpop.f32.mrb[95].mxu0 }
 0x299   :  { %v2532_v43 = vmax.f32 %v3359_v36, 0.0  ;;  %v3361_v44 = vadd.f32 %v3360_v37, %v2475_v38 }
 0x29b   :  { %v3132_v45 = vpack.c.bf16 %v2532_v43, %v2532_v43  ;;  %v2533_v46 = vmax.f32 %v3361_v44, 0.0 }
 0x29c   :  { %v2016_v40 = vpop.f32.mrb[96].mxu1 }
 0x29d   :  { %2779 = vst.msk [vmem:[%s4931_s3 + $0xb8] sm:$0xf] %vm2732_vm2, %v3132_v45  ;;  %v3133_v47 = vpack.c.bf16 %v2533_v46, %v2533_v46  ;;  %v3362_v48 = vadd.f32 %v4681_v41, %v2016_v40  ;;  %v2480_v49 = vpop.f32.mrb[96].mxu0  ;;  %v2018_v50 = vpop.f32.mrb[97].mxu1 }
 0x29e   :  { %v3264_v51 = vpop.f32.mrb[97].mxu0  ;;  %v2019_v52 = vpop.f32.mrb[98].mxu1 }
 0x29f   :  { %2780 = vst.msk [vmem:[%s4931_s3 + $0xbc] sm:$0xf] %vm2732_vm2, %v3133_v47  ;;  %v3363_v53 = vadd.f32 %v3362_v48, %v2480_v49  ;;  %v2483_v54 = vpop.f32.mrb[98].mxu0  ;;  %v2020_v55 = vpop.f32.mrb[99].mxu1 }
 0x2a0   :  { %v3265_v56 = vpop.f32.mrb[99].mxu0 }
 0x2a1   :  { %v2534_v57 = vmax.f32 %v3363_v53, 0.0 }
 0x2a3   :  { %v3134_v58 = vpack.c.bf16 %v2534_v57, %v2534_v57 }
 0x2a5   :  { %2781 = vst.msk [vmem:[%s4931_s3 + $0xc0] sm:$0xf] %vm2732_vm2, %v3134_v58 }

// kernel: mnist_cnn_forward.15
= control target key start
LH: loop header
LB: loop body
LE: loop exit
PB: predicated region body
PF: predicated region fallthrough
CT: control target
= control target key end

     0   :  { %v100_v30 = vlaneseq  ;;  %v540_v34 = vmov 1966171168   ;;  %s676_s0 = inlined_call_operand.vmem [shape: bf16[2,512], index: 0, kind: input, shape index: {}]   ;;  %s677_s1 = inlined_call_operand.vmem [shape: bf16[512,128], index: 1, kind: input, shape index: {}]   ;;  %s678_s2 = inlined_call_operand.vmem [shape: f32[1,128], index: 2, kind: input, shape index: {}]   ;;  %s679_s3 = inlined_call_operand.hbm [shape: f32[2,128], index: 3, kind: output, shape index: {}]  }
   0x1   :  { %v484_v0 = vld [vmem:[%s677_s1 + $0x40] sm:$0xff]   ;;  %v488_v4 = vld [vmem:[%s677_s1 + $0x48] sm:$0xff]   ;;  %v492_v8 = vld [vmem:[%s677_s1 + $0x50] sm:$0xff]   ;;  %v98_v35 = vunpack.c.l.s4 %v540_v34 }
   0x2   :  { %v485_v1 = vld [vmem:[%s677_s1 + $0xc0] sm:$0xff]   ;;  %438 = vmatprep.subr.bf16.mxu0 %v484_v0  ;;  %v489_v5 = vld [vmem:[%s677_s1 + $0xc8] sm:$0xff]   ;;  %v493_v9 = vld [vmem:[%s677_s1 + $0xd0] sm:$0xff]   ;;  %v101_v36 = vshrl.u32 %v100_v30, 7 }
   0x3   :  { %v486_v2 = vld [vmem:[%s677_s1] sm:$0xff]   ;;  %460 = vmatprep.subr.bf16.mxu1 %v485_v1  ;;  %v490_v6 = vld [vmem:[%s677_s1 + $0x8] sm:$0xff]   ;;  %v494_v10 = vld [vmem:[%s677_s1 + $0x10] sm:$0xff]  }
   0x4   :  { %v487_v3 = vld [vmem:[%s677_s1 + $0x80] sm:$0xff]   ;;  %439 = vmatpush3.bf16.msra.mxu0 %v486_v2  ;;  %v491_v7 = vld [vmem:[%s677_s1 + $0x88] sm:$0xff]   ;;  %v495_v11 = vld [vmem:[%s677_s1 + $0x90] sm:$0xff]  }
   0x5   :  { %461 = vmatpush3.bf16.msra.mxu1 %v487_v3  ;;  %440 = vmatprep.subr.bf16.mxu0 %v488_v4  ;;  %v496_v12 = vld [vmem:[%s677_s1 + $0x58] sm:$0xff]   ;;  %v500_v16 = vld [vmem:[%s677_s1 + $0x60] sm:$0xff]   ;;  %v504_v20 = vld [vmem:[%s677_s1 + $0x68] sm:$0xff]  }
   0x6   :  { %462 = vmatprep.subr.bf16.mxu1 %v489_v5  ;;  %v497_v13 = vld [vmem:[%s677_s1 + $0xd8] sm:$0xff]   ;;  %v501_v17 = vld [vmem:[%s677_s1 + $0xe0] sm:$0xff]   ;;  %v505_v21 = vld [vmem:[%s677_s1 + $0xe8] sm:$0xff]  }
   0x7   :  { %v498_v14 = vld [vmem:[%s677_s1 + $0x18] sm:$0xff]   ;;  %v502_v18 = vld [vmem:[%s677_s1 + $0x20] sm:$0xff]   ;;  %v506_v22 = vld [vmem:[%s677_s1 + $0x28] sm:$0xff]  }
   0x8   :  { %441 = vmatpush3.bf16.msra.mxu0 %v490_v6  ;;  %v499_v15 = vld [vmem:[%s677_s1 + $0x98] sm:$0xff]   ;;  %v503_v19 = vld [vmem:[%s677_s1 + $0xa0] sm:$0xff]   ;;  %v507_v23 = vld [vmem:[%s677_s1 + $0xa8] sm:$0xff]  }
   0x9   :  { %463 = vmatpush3.bf16.msra.mxu1 %v491_v7  ;;  %442 = vmatprep.subr.bf16.mxu0 %v492_v8  ;;  %v508_v24 = vld [vmem:[%s677_s1 + $0x70] sm:$0xff]   ;;  %v512_v28 = vld [vmem:[%s677_s1 + $0x78] sm:$0xff]   ;;  %v405_v33 = vld.sshfl [vmem:[%s676_s0] sm:$0x33 pattern:$0x75316420] }
   0xa   :  { %464 = vmatprep.subr.bf16.mxu1 %v493_v9  ;;  %v509_v25 = vld [vmem:[%s677_s1 + $0xf0] sm:$0xff]   ;;  %v513_v29 = vld [vmem:[%s677_s1 + $0xf8] sm:$0xff]  }
   0xb   :  { %v510_v26 = vld [vmem:[%s677_s1 + $0x30] sm:$0xff]   ;;  %v514_v31 = vld [vmem:[%s677_s1 + $0x38] sm:$0xff]  }
   0xc   :  { %443 = vmatpush3.bf16.msra.mxu0 %v494_v10  ;;  %v511_v27 = vld [vmem:[%s677_s1 + $0xb0] sm:$0xff]   ;;  %v515_v32 = vld [vmem:[%s677_s1 + $0xb8] sm:$0xff]  }
   0xd   :  { %465 = vmatpush3.bf16.msra.mxu1 %v495_v11  ;;  %444 = vmatprep.subr.bf16.mxu0 %v496_v12 }
   0xe   :  { %466 = vmatprep.subr.bf16.mxu1 %v497_v13 }
  0x10   :  { %445 = vmatpush3.bf16.msra.mxu0 %v498_v14 }
  0x11   :  { %467 = vmatpush3.bf16.msra.mxu1 %v499_v15  ;;  %446 = vmatprep.subr.bf16.mxu0 %v500_v16 }
  0x12   :  { %468 = vmatprep.subr.bf16.mxu1 %v501_v17 }
  0x14   :  { %447 = vmatpush3.bf16.msra.mxu0 %v502_v18 }
  0x15   :  { %469 = vmatpush3.bf16.msra.mxu1 %v503_v19  ;;  %448 = vmatprep.subr.bf16.mxu0 %v504_v20 }
  0x16   :  { %470 = vmatprep.subr.bf16.mxu1 %v505_v21 }
  0x18   :  { %449 = vmatpush3.bf16.msra.mxu0 %v506_v22 }
  0x19   :  { %471 = vmatpush3.bf16.msra.mxu1 %v507_v23  ;;  %450 = vmatprep.subr.bf16.mxu0 %v508_v24 }
  0x1a   :  { %472 = vmatprep.subr.bf16.mxu1 %v509_v25 }
  0x1c   :  { %451 = vmatpush3.bf16.msra.mxu0 %v510_v26 }
  0x1d   :  { %473 = vmatpush3.bf16.msra.mxu1 %v511_v27  ;;  %452 = vmatprep.subr.bf16.mxu0 %v512_v28 }
  0x1e   :  { %474 = vmatprep.subr.bf16.mxu1 %v513_v29 }
  0x20   :  { %453 = vmatpush3.bf16.msra.mxu0 %v514_v31 }
  0x21   :  { %475 = vmatpush3.bf16.msra.mxu1 %v515_v32 }
  0x22   :  { %8 = vsyncpa [#allocation3], 0  ;;  %v96_v37 = vcombine.high %v405_v33, %v405_v33  ;;  %v99_v38 = vunpack.c.0.s8 %v98_v35  ;;  %v404_v45 = vld [vmem:[%s678_s2] ss:$0 sm:$0xff]  ;;  %s541_s0 = smov [#allocation2]  }
  0x23   :  { %s396_s25 = sshll.u32 %s541_s0, 4  ;;  %s397_s25 = int_to_ptr.vmem [resolvable:$true] %s396_s25 }
  0x24   :  { %v102_v39 = vsub.s32 %v99_v38, %v101_v36  ;;  %s516_s26 = scalar_lea.vmem %s397_s25, 32  ;;  %p521_p1 = scmp.lt.s32.totalorder %s397_s25, %s397_s25 }
  0x25   :  { %p517_p0 = scmp.ne.s32.totalorder %s397_s25, %s516_s26  ;;  %p522_p2 = scmp.lt.s32.totalorder %s516_s26, %s516_s26 }
  0x26   :  { %v110_v40 = vrot.slane %v96_v37, %v102_v39  ;;  %v103_v41 = vrot.slane %v405_v33, %v102_v39 }
  0x27   :  { %p523_p3 = por %p522_p2, %p521_p1 }
  0x28   :  { %341 = vmatprep.mubr.bf16.mxu0 %v110_v40  ;;  %v112_v42 = vcombine.high %v110_v40, %v110_v40  ;;  %v111_v43 = vcombine.high %v103_v41, %v103_v41 }
  0x29   :  { %342 = vmatmul.mubr.bf16.vlgmr.msra.gmra.mrb[0].mxu0 %v103_v41  ;;  %p524_p4 = pnand %p523_p3, %p517_p0 }
  0x2a   :  { %381 = vmatprep.mubr.bf16.mxu1 %v112_v42 }
  0x2b   :  { %382 = vmatmul.mubr.bf16.vlgmr.msra.gmra.mrb[0].mxu1 %v111_v43 }
  0xfc   :  { %v454_v44 = vpop.f32.mrb[0].mxu0 }
  0xfd   :  { %v455_v46 = vpop.f32.mrb[1].mxu0 }
  0xfe   :  { %v476_v47 = vpop.f32.mrb[0].mxu1  ;;  %v456_v48 = vadd.f32 %v455_v46, %v454_v44  ;;  %v457_v49 = vpop.f32.mrb[2].mxu0 }
  0xff   :  { %v477_v50 = vpop.f32.mrb[1].mxu1  ;;  %v458_v51 = vpop.f32.mrb[3].mxu0 }
 0x100   :  { %v344_v52 = vadd.f32 %v456_v48, %v404_v45  ;;  %v478_v53 = vadd.f32 %v477_v50, %v476_v47  ;;  %v479_v54 = vpop.f32.mrb[2].mxu1 }
 0x101   :  { %v480_v55 = vpop.f32.mrb[3].mxu1 }
 0x102   :  { %v384_v56 = vadd.f32 %v478_v53, %v344_v52 }
 0x104   :  { %389 = vst [vmem:[#allocation2] sm:$0x3] %v384_v56 }
 0x105   :  { %527 = shalt.err (!%p524_p4)
}
 0x106   :  { %s528_s28 = scalar_lea.hbm %s679_s3, 32 }
 0x107   :  { %p529_p5 = scmp.ne.s32.totalorder %s679_s3, %s528_s28  ;;  %p532_p6 = scmp.lt.u32.totalorder %s528_s28, %s679_s3 }
 0x109   :  { %p534_p7 = pnand %p532_p6, %p529_p5 }
 0x10b   :  { %537 = shalt.err (!%p534_p7)
}
 0x10c   :  { %399 = dma.vmem_to_hbm [thread:$0]  %s397_s25, 32, %s679_s3, [#allocation3]  }
 0x10d   :  { %538 = dma.done.wait [#allocation3], 32  }
 0x10e   :  { %539 = vsyncadd [#allocation3], 4294967264 }
 0x10f   :  { %403 = vsyncpa [#allocation3], 1 }

// kernel: mnist_cnn_forward.14
= control target key start
LH: loop header
LB: loop body
LE: loop exit
PB: predicated region body
PF: predicated region fallthrough
CT: control target
= control target key end

     0   :  { %v805_v36 = vlaneseq  ;;  %v8119_v37 = vmov 1966171168   ;;  %vm4934_vm0 = vcmask 523264   ;;  %s10644_s1 = inlined_call_operand.vmem [shape: bf16[3136,512], index: 1, kind: input, shape index: {}]   ;;  %s10645_s0 = inlined_call_operand.vmem [shape: bf16[2,3136], index: 0, kind: input, shape index: {}]   ;;  %s10646_s2 = inlined_call_operand.vmem [shape: f32[1,512], index: 2, kind: input, shape index: {}]   ;;  %s10647_s3 = inlined_call_operand.vmem [shape: bf16[2,512], index: 3, kind: output, shape index: {}]  }
   0x1   :  { %v6938_v0 = vld [vmem:[%s10644_s1 + $0x4] ss:$16 sps:$4 sm:$0xff]   ;;  %v6940_v1 = vld [vmem:[%s10644_s1 + $0xc] ss:$16 sps:$4 sm:$0xff]   ;;  %v6942_v2 = vld [vmem:[%s10644_s1] ss:$16 sps:$4 sm:$0xff]   ;;  %v831_v38 = vunpack.c.l.s4 %v8119_v37 }
   0x2   :  { %4938 = vmatprep.subr.bf16.mxu0 %v6938_v0  ;;  %v6943_v3 = vld [vmem:[%s10644_s1 + $0x8] ss:$16 sps:$4 sm:$0xff]   ;;  %5471 = vmatprep.subr.bf16.mxu1 %v6940_v1  ;;  %v6944_v4 = vld [vmem:[%s10644_s1 + $0x24] ss:$16 sps:$4 sm:$0xff]   ;;  %v6946_v5 = vld [vmem:[%s10644_s1 + $0x2c] ss:$16 sps:$4 sm:$0xff]  }
   0x3   :  { %4939 = vmatpush1.bf16.msra.mxu0 %v6942_v2  ;;  %5472 = vmatpush1.bf16.msra.mxu1 %v6943_v3  ;;  %v6948_v6 = vld [vmem:[%s10644_s1 + $0x20] ss:$16 sps:$4 sm:$0xff]   ;;  %v6949_v7 = vld [vmem:[%s10644_s1 + $0x28] ss:$16 sps:$4 sm:$0xff]   ;;  %v6950_v8 = vld [vmem:[%s10644_s1 + $0x44] ss:$16 sps:$4 sm:$0xff]   ;;  %v832_v43 = vunpack.c.0.s8 %v831_v38 }
   0x4   :  { %4940 = vmatprep.subr.bf16.mxu0 %v6944_v4  ;;  %5473 = vmatprep.subr.bf16.mxu1 %v6946_v5  ;;  %v6952_v9 = vld [vmem:[%s10644_s1 + $0x4c] ss:$16 sps:$4 sm:$0xff]   ;;  %v6954_v10 = vld [vmem:[%s10644_s1 + $0x40] ss:$16 sps:$4 sm:$0xff]   ;;  %v6955_v11 = vld [vmem:[%s10644_s1 + $0x48] ss:$16 sps:$4 sm:$0xff]  }
   0x5   :  { %v6956_v12 = vld [vmem:[%s10644_s1 + $0x64] ss:$16 sps:$4 sm:$0xff]   ;;  %v6958_v13 = vld [vmem:[%s10644_s1 + $0x6c] ss:$16 sps:$4 sm:$0xff]   ;;  %v6960_v14 = vld [vmem:[%s10644_s1 + $0x60] ss:$16 sps:$4 sm:$0xff]  }
   0x6   :  { %v6961_v15 = vld [vmem:[%s10644_s1 + $0x68] ss:$16 sps:$4 sm:$0xff]   ;;  %v6962_v16 = vld [vmem:[%s10644_s1 + $0x84] ss:$16 sps:$4 sm:$0xff]   ;;  %v6964_v17 = vld [vmem:[%s10644_s1 + $0x8c] ss:$16 sps:$4 sm:$0xff]  }
   0x7   :  { %4941 = vmatpush1.bf16.msra.mxu0 %v6948_v6  ;;  %5474 = vmatpush1.bf16.msra.mxu1 %v6949_v7  ;;  %v6966_v18 = vld [vmem:[%s10644_s1 + $0x80] ss:$16 sps:$4 sm:$0xff]   ;;  %v6967_v19 = vld [vmem:[%s10644_s1 + $0x88] ss:$16 sps:$4 sm:$0xff]   ;;  %v6968_v20 = vld [vmem:[%s10644_s1 + $0xa4] ss:$16 sps:$4 sm:$0xff]  }
   0x8   :  { %4942 = vmatprep.subr.bf16.mxu0 %v6950_v8  ;;  %5475 = vmatprep.subr.bf16.mxu1 %v6952_v9  ;;  %v6970_v21 = vld [vmem:[%s10644_s1 + $0xac] ss:$16 sps:$4 sm:$0xff]   ;;  %v6972_v22 = vld [vmem:[%s10644_s1 + $0xa0] ss:$16 sps:$4 sm:$0xff]   ;;  %v6973_v23 = vld [vmem:[%s10644_s1 + $0xa8] ss:$16 sps:$4 sm:$0xff]  }
   0x9   :  { %v6974_v24 = vld [vmem:[%s10644_s1 + $0xc4] ss:$16 sps:$4 sm:$0xff]   ;;  %v6976_v25 = vld [vmem:[%s10644_s1 + $0xcc] ss:$16 sps:$4 sm:$0xff]   ;;  %v6978_v26 = vld [vmem:[%s10644_s1 + $0xc0] ss:$16 sps:$4 sm:$0xff]  }
   0xa   :  { %v6979_v27 = vld [vmem:[%s10644_s1 + $0xc8] ss:$16 sps:$4 sm:$0xff]   ;;  %v6980_v28 = vld [vmem:[%s10644_s1 + $0xe4] ss:$16 sps:$4 sm:$0xff]   ;;  %v6982_v29 = vld [vmem:[%s10644_s1 + $0xec] ss:$16 sps:$4 sm:$0xff]  }
   0xb   :  { %4943 = vmatpush1.bf16.msra.mxu0 %v6954_v10  ;;  %5476 = vmatpush1.bf16.msra.mxu1 %v6955_v11  ;;  %v6984_v30 = vld [vmem:[%s10644_s1 + $0xe0] ss:$16 sps:$4 sm:$0xff]   ;;  %v6985_v31 = vld [vmem:[%s10644_s1 + $0xe8] ss:$16 sps:$4 sm:$0xff]   ;;  %v6986_v32 = vld [vmem:[%s10644_s1 + $0x104] ss:$16 sps:$4 sm:$0xff]  }
   0xc   :  { %4944 = vmatprep.subr.bf16.mxu0 %v6956_v12  ;;  %5477 = vmatprep.subr.bf16.mxu1 %v6958_v13  ;;  %v6988_v33 = vld [vmem:[%s10644_s1 + $0x10c] ss:$16 sps:$4 sm:$0xff]   ;;  %v6990_v34 = vld [vmem:[%s10644_s1 + $0x100] ss:$16 sps:$4 sm:$0xff]   ;;  %v6991_v35 = vld [vmem:[%s10644_s1 + $0x108] ss:$16 sps:$4 sm:$0xff]  }
   0xd   :  { %v6992_v39 = vld [vmem:[%s10644_s1 + $0x124] ss:$16 sps:$4 sm:$0xff]   ;;  %v6994_v40 = vld [vmem:[%s10644_s1 + $0x12c] ss:$16 sps:$4 sm:$0xff]   ;;  %v6996_v41 = vld [vmem:[%s10644_s1 + $0x120] ss:$16 sps:$4 sm:$0xff]  }
   0xe   :  { %v8258_v42 = vshrl.u32 %v805_v36, 7  ;;  %v6997_v44 = vld [vmem:[%s10644_s1 + $0x128] ss:$16 sps:$4 sm:$0xff]   ;;  %v6998_v45 = vld [vmem:[%s10644_s1 + $0x144] ss:$16 sps:$4 sm:$0xff]  }
   0xf   :  { %4945 = vmatpush1.bf16.msra.mxu0 %v6960_v14  ;;  %5478 = vmatpush1.bf16.msra.mxu1 %v6961_v15  ;;  %v7000_v46 = vld [vmem:[%s10644_s1 + $0x14c] ss:$16 sps:$4 sm:$0xff]   ;;  %v7002_v47 = vld [vmem:[%s10644_s1 + $0x140] ss:$16 sps:$4 sm:$0xff]   ;;  %v7003_v48 = vld [vmem:[%s10644_s1 + $0x148] ss:$16 sps:$4 sm:$0xff]  }
  0x10   :  { %4946 = vmatprep.subr.bf16.mxu0 %v6962_v16  ;;  %5479 = vmatprep.subr.bf16.mxu1 %v6964_v17  ;;  %v8276_v49 = vsub.s32 %v832_v43, %v8258_v42  ;;  %v7004_v50 = vld [vmem:[%s10644_s1 + $0x164] ss:$16 sps:$4 sm:$0xff]   ;;  %v7006_v51 = vld [vmem:[%s10644_s1 + $0x16c] ss:$16 sps:$4 sm:$0xff]   ;;  %v7008_v53 = vld [vmem:[%s10644_s1 + $0x160] ss:$16 sps:$4 sm:$0xff]  }
  0x11   :  { %v8287_v52 = vld [vmem:[%s10645_s0] sm:$0xff]  ;;  %v7009_v55 = vld [vmem:[%s10644_s1 + $0x168] ss:$16 sps:$4 sm:$0xff]   ;;  %v7012_v57 = vld [vmem:[%s10644_s1 + $0x18c] ss:$16 sps:$4 sm:$0xff]  }
  0x12   :  { %v836_v54 = vrot.slane %v8287_v52, %v8276_v49  ;;  %v7010_v56 = vld [vmem:[%s10644_s1 + $0x184] ss:$16 sps:$4 sm:$0xff]   ;;  %v7014_v59 = vld [vmem:[%s10644_s1 + $0x180] ss:$16 sps:$4 sm:$0xff]   ;;  %v7015_v61 = vld [vmem:[%s10644_s1 + $0x188] ss:$16 sps:$4 sm:$0xff]  }
  0x13   :  { %4947 = vmatpush1.bf16.msra.mxu0 %v6966_v18  ;;  %5480 = vmatpush1.bf16.msra.mxu1 %v6967_v19  ;;  %v7016_v62 = vld [vmem:[%s10644_s1 + $0x1a4] ss:$16 sps:$4 sm:$0xff]   ;;  %v7018_v63 = vld [vmem:[%s10644_s1 + $0x1ac] ss:$16 sps:$4 sm:$0xff]   ;;  %v7020_v0 = vld [vmem:[%s10644_s1 + $0x1a0] ss:$16 sps:$4 sm:$0xff]  }
  0x14   :  { %4948 = vmatprep.subr.bf16.mxu0 %v6968_v20  ;;  %5481 = vmatprep.subr.bf16.mxu1 %v6970_v21  ;;  %v844_v58 = vcombine.high %v836_v54, %v836_v54  ;;  %v7021_v1 = vld [vmem:[%s10644_s1 + $0x1a8] ss:$16 sps:$4 sm:$0xff]   ;;  %v7022_v2 = vld [vmem:[%s10644_s1 + $0x1c4] ss:$16 sps:$4 sm:$0xff]   ;;  %v7024_v3 = vld [vmem:[%s10644_s1 + $0x1cc] ss:$16 sps:$4 sm:$0xff]   ;;  %v8356_v13 = vrot.slane %v836_v54, %v8276_v49 }
  0x15   :  { %v7026_v4 = vld [vmem:[%s10644_s1 + $0x1c0] ss:$16 sps:$4 sm:$0xff]   ;;  %v7027_v5 = vld [vmem:[%s10644_s1 + $0x1c8] ss:$16 sps:$4 sm:$0xff]   ;;  %v7028_v6 = vld [vmem:[%s10644_s1 + $0x1e4] ss:$16 sps:$4 sm:$0xff]  }
  0x16   :  { %v866_v60 = vrot.slane %v844_v58, %v8276_v49  ;;  %v7030_v7 = vld [vmem:[%s10644_s1 + $0x1ec] ss:$16 sps:$4 sm:$0xff]   ;;  %v7032_v8 = vld [vmem:[%s10644_s1 + $0x1e0] ss:$16 sps:$4 sm:$0xff]   ;;  %v7033_v9 = vld [vmem:[%s10644_s1 + $0x1e8] ss:$16 sps:$4 sm:$0xff]  }
  0x17   :  { %4949 = vmatpush1.bf16.msra.mxu0 %v6972_v22  ;;  %5482 = vmatpush1.bf16.msra.mxu1 %v6973_v23  ;;  %v7036_v10 = vld [vmem:[%s10644_s1 + $0x204] ss:$16 sps:$4 sm:$0xff]   ;;  %v7039_v11 = vld [vmem:[%s10644_s1 + $0x20c] ss:$16 sps:$4 sm:$0xff]   ;;  %v7034_v12 = vld [vmem:[%s10644_s1 + $0x200] ss:$16 sps:$4 sm:$0xff]  }
  0x18   :  { %4950 = vmatprep.subr.bf16.mxu0 %v6974_v24  ;;  %5483 = vmatprep.subr.bf16.mxu1 %v6976_v25  ;;  %v7037_v14 = vld [vmem:[%s10644_s1 + $0x208] ss:$16 sps:$4 sm:$0xff]   ;;  %v7042_v15 = vld [vmem:[%s10644_s1 + $0x224] ss:$16 sps:$4 sm:$0xff]   ;;  %v7045_v16 = vld [vmem:[%s10644_s1 + $0x22c] ss:$16 sps:$4 sm:$0xff]   ;;  %v876_v17 = vcombine.high %v866_v60, %v866_v60 }
  0x19   :  { %4970 = vmatprep.mubr.bf16.mxu0 %v866_v60  ;;  %5503 = vmatprep.mubr.bf16.mxu1 %v866_v60  ;;  %v7040_v18 = vld [vmem:[%s10644_s1 + $0x220] ss:$16 sps:$4 sm:$0xff]   ;;  %v7043_v19 = vld [vmem:[%s10644_s1 + $0x228] ss:$16 sps:$4 sm:$0xff]   ;;  %v7048_v20 = vld [vmem:[%s10644_s1 + $0x244] ss:$16 sps:$4 sm:$0xff]  }
  0x1a   :  { %v7051_v21 = vld [vmem:[%s10644_s1 + $0x24c] ss:$16 sps:$4 sm:$0xff]   ;;  %v7046_v22 = vld [vmem:[%s10644_s1 + $0x240] ss:$16 sps:$4 sm:$0xff]   ;;  %v7049_v23 = vld [vmem:[%s10644_s1 + $0x248] ss:$16 sps:$4 sm:$0xff]  }
  0x1b   :  { %4951 = vmatpush1.bf16.msra.mxu0 %v6978_v26  ;;  %5484 = vmatpush1.bf16.msra.mxu1 %v6979_v27  ;;  %v7054_v24 = vld [vmem:[%s10644_s1 + $0x264] ss:$16 sps:$4 sm:$0xff]   ;;  %v7057_v25 = vld [vmem:[%s10644_s1 + $0x26c] ss:$16 sps:$4 sm:$0xff]   ;;  %v7052_v26 = vld [vmem:[%s10644_s1 + $0x260] ss:$16 sps:$4 sm:$0xff]  }
  0x1c   :  { %4952 = vmatprep.subr.bf16.mxu0 %v6980_v28  ;;  %5485 = vmatprep.subr.bf16.mxu1 %v6982_v29  ;;  %v7055_v27 = vld [vmem:[%s10644_s1 + $0x268] ss:$16 sps:$4 sm:$0xff]   ;;  %v7060_v28 = vld [vmem:[%s10644_s1 + $0x284] ss:$16 sps:$4 sm:$0xff]   ;;  %v7063_v29 = vld [vmem:[%s10644_s1 + $0x28c] ss:$16 sps:$4 sm:$0xff]  }
  0x1d   :  { %v7072_v36 = vld [vmem:[%s10644_s1 + $0x2c4] ss:$16 sps:$4 sm:$0xff]   ;;  %v7075_v37 = vld [vmem:[%s10644_s1 + $0x2cc] ss:$16 sps:$4 sm:$0xff]   ;;  %v7070_v38 = vld [vmem:[%s10644_s1 + $0x2c0] ss:$16 sps:$4 sm:$0xff]  }
  0x1e   :  { %v7076_v43 = vld [vmem:[%s10644_s1 + $0x2e0] ss:$16 sps:$4 sm:$0xff]   ;;  %v7091_v54 = vld [vmem:[%s10644_s1 + $0x328] ss:$16 sps:$4 sm:$0xff]   ;;  %v7105_v60 = vld [vmem:[%s10644_s1 + $0x36c] ss:$16 sps:$4 sm:$0xff]  }
  0x1f   :  { %4953 = vmatpush1.bf16.msra.mxu0 %v6984_v30  ;;  %5486 = vmatpush1.bf16.msra.mxu1 %v6985_v31  ;;  %v7058_v30 = vld [vmem:[%s10644_s1 + $0x280] ss:$16 sps:$4 sm:$0xff]   ;;  %v7061_v31 = vld [vmem:[%s10644_s1 + $0x288] ss:$16 sps:$4 sm:$0xff]  }
  0x20   :  { %4954 = vmatprep.subr.bf16.mxu0 %v6986_v32  ;;  %5487 = vmatprep.subr.bf16.mxu1 %v6988_v33  ;;  %v7066_v32 = vld [vmem:[%s10644_s1 + $0x2a4] ss:$16 sps:$4 sm:$0xff]   ;;  %v7069_v33 = vld [vmem:[%s10644_s1 + $0x2ac] ss:$16 sps:$4 sm:$0xff]   ;;  %v7097_v58 = vld [vmem:[%s10644_s1 + $0x348] ss:$16 sps:$4 sm:$0xff]  }
  0x23   :  { %4955 = vmatpush1.bf16.msra.mxu0 %v6990_v34  ;;  %5488 = vmatpush1.bf16.msra.mxu1 %v6991_v35  ;;  %v7064_v34 = vld [vmem:[%s10644_s1 + $0x2a0] ss:$16 sps:$4 sm:$0xff]   ;;  %v7067_v35 = vld [vmem:[%s10644_s1 + $0x2a8] ss:$16 sps:$4 sm:$0xff]  }
  0x24   :  { %4956 = vmatprep.subr.bf16.mxu0 %v6992_v39  ;;  %5489 = vmatprep.subr.bf16.mxu1 %v6994_v40  ;;  %v7073_v39 = vld [vmem:[%s10644_s1 + $0x2c8] ss:$16 sps:$4 sm:$0xff]   ;;  %v7078_v40 = vld [vmem:[%s10644_s1 + $0x2e4] ss:$16 sps:$4 sm:$0xff]  }
  0x27   :  { %4957 = vmatpush1.bf16.msra.mxu0 %v6996_v41  ;;  %5490 = vmatpush1.bf16.msra.mxu1 %v6997_v44  ;;  %v7081_v41 = vld [vmem:[%s10644_s1 + $0x2ec] ss:$16 sps:$4 sm:$0xff]   ;;  %v7079_v44 = vld [vmem:[%s10644_s1 + $0x2e8] ss:$16 sps:$4 sm:$0xff]  }
  0x28   :  { %4958 = vmatprep.subr.bf16.mxu0 %v6998_v45  ;;  %5491 = vmatprep.subr.bf16.mxu1 %v7000_v46  ;;  %v7084_v45 = vld [vmem:[%s10644_s1 + $0x304] ss:$16 sps:$4 sm:$0xff]   ;;  %v7087_v46 = vld [vmem:[%s10644_s1 + $0x30c] ss:$16 sps:$4 sm:$0xff]  }
  0x2b   :  { %4959 = vmatpush1.bf16.msra.mxu0 %v7002_v47  ;;  %5492 = vmatpush1.bf16.msra.mxu1 %v7003_v48  ;;  %v7082_v47 = vld [vmem:[%s10644_s1 + $0x300] ss:$16 sps:$4 sm:$0xff]   ;;  %v7085_v48 = vld [vmem:[%s10644_s1 + $0x308] ss:$16 sps:$4 sm:$0xff]  }
  0x2c   :  { %4960 = vmatprep.subr.bf16.mxu0 %v7004_v50  ;;  %5493 = vmatprep.subr.bf16.mxu1 %v7006_v51  ;;  %v7090_v50 = vld [vmem:[%s10644_s1 + $0x324] ss:$16 sps:$4 sm:$0xff]   ;;  %v7093_v51 = vld [vmem:[%s10644_s1 + $0x32c] ss:$16 sps:$4 sm:$0xff]  }
  0x2f   :  { %4961 = vmatpush1.bf16.msra.mxu0 %v7008_v53  ;;  %5494 = vmatpush1.bf16.msra.mxu1 %v7009_v55  ;;  %v7088_v53 = vld [vmem:[%s10644_s1 + $0x320] ss:$16 sps:$4 sm:$0xff]   ;;  %v7096_v55 = vld [vmem:[%s10644_s1 + $0x344] ss:$16 sps:$4 sm:$0xff]  }
  0x30   :  { %4962 = vmatprep.subr.bf16.mxu0 %v7010_v56  ;;  %5495 = vmatprep.subr.bf16.mxu1 %v7012_v57  ;;  %v7099_v56 = vld [vmem:[%s10644_s1 + $0x34c] ss:$16 sps:$4 sm:$0xff]   ;;  %v7094_v57 = vld [vmem:[%s10644_s1 + $0x340] ss:$16 sps:$4 sm:$0xff]  }
  0x33   :  { %4963 = vmatpush1.bf16.msra.mxu0 %v7014_v59  ;;  %5496 = vmatpush1.bf16.msra.mxu1 %v7015_v61  ;;  %v7102_v59 = vld [vmem:[%s10644_s1 + $0x364] ss:$16 sps:$4 sm:$0xff]   ;;  %v7100_v61 = vld [vmem:[%s10644_s1 + $0x360] ss:$16 sps:$4 sm:$0xff]  }
  0x34   :  { %4964 = vmatprep.subr.bf16.mxu0 %v7016_v62  ;;  %5497 = vmatprep.subr.bf16.mxu1 %v7018_v63  ;;  %v7103_v62 = vld [vmem:[%s10644_s1 + $0x368] ss:$16 sps:$4 sm:$0xff]   ;;  %v7108_v63 = vld [vmem:[%s10644_s1 + $0x384] ss:$16 sps:$4 sm:$0xff]  }
  0x37   :  { %4965 = vmatpush1.bf16.msra.mxu0 %v7020_v0  ;;  %5498 = vmatpush1.bf16.msra.mxu1 %v7021_v1  ;;  %v7111_v0 = vld [vmem:[%s10644_s1 + $0x38c] ss:$16 sps:$4 sm:$0xff]   ;;  %v7106_v1 = vld [vmem:[%s10644_s1 + $0x380] ss:$16 sps:$4 sm:$0xff]  }
  0x38   :  { %4966 = vmatprep.subr.bf16.mxu0 %v7022_v2  ;;  %5499 = vmatprep.subr.bf16.mxu1 %v7024_v3  ;;  %v7109_v2 = vld [vmem:[%s10644_s1 + $0x388] ss:$16 sps:$4 sm:$0xff]   ;;  %v7114_v3 = vld [vmem:[%s10644_s1 + $0x3a4] ss:$16 sps:$4 sm:$0xff]  }
  0x3b   :  { %4967 = vmatpush1.bf16.msra.mxu0 %v7026_v4  ;;  %5500 = vmatpush1.bf16.msra.mxu1 %v7027_v5  ;;  %v7117_v4 = vld [vmem:[%s10644_s1 + $0x3ac] ss:$16 sps:$4 sm:$0xff]   ;;  %v7112_v5 = vld [vmem:[%s10644_s1 + $0x3a0] ss:$16 sps:$4 sm:$0xff]  }
  0x3c   :  { %4968 = vmatprep.subr.bf16.mxu0 %v7028_v6  ;;  %5501 = vmatprep.subr.bf16.mxu1 %v7030_v7  ;;  %v7115_v6 = vld [vmem:[%s10644_s1 + $0x3a8] ss:$16 sps:$4 sm:$0xff]   ;;  %v7120_v7 = vld [vmem:[%s10644_s1 + $0x3c4] ss:$16 sps:$4 sm:$0xff]  }
  0x3f   :  { %4969 = vmatpush1.bf16.msra.mxu0 %v7032_v8  ;;  %5502 = vmatpush1.bf16.msra.mxu1 %v7033_v9  ;;  %v7123_v8 = vld [vmem:[%s10644_s1 + $0x3cc] ss:$16 sps:$4 sm:$0xff]   ;;  %v829_v9 = vcombine.high %v8287_v52, %v8287_v52 }
  0x40   :  { %4979 = vmatprep.subr.bf16.mxu0 %v7036_v10  ;;  %5512 = vmatprep.subr.bf16.mxu1 %v7039_v11  ;;  %v7118_v10 = vld [vmem:[%s10644_s1 + $0x3c0] ss:$16 sps:$4 sm:$0xff]   ;;  %v7121_v11 = vld [vmem:[%s10644_s1 + $0x3c8] ss:$16 sps:$4 sm:$0xff]   ;;  %v7129_v52 = vld [vmem:[%s10644_s1 + $0x3ec] ss:$16 sps:$4 sm:$0xff]  }
  0x42   :  { %4971 = vmatmul.mubr.bf16.vlgmr.msra.gmra.mrb[0].mxu0 %v8356_v13  ;;  %5504 = vmatmul.mubr.bf16.vlgmr.msra.gmra.mrb[0].mxu1 %v8356_v13 }
  0x43   :  { %4980 = vmatpush1.bf16.msra.mxu0 %v7034_v12  ;;  %5513 = vmatpush1.bf16.msra.mxu1 %v7037_v14  ;;  %v7126_v12 = vld [vmem:[%s10644_s1 + $0x3e4] ss:$16 sps:$4 sm:$0xff]   ;;  %v8540_v14 = vrot.slane %v829_v9, %v8276_v49  ;;  %v7205_v9 = vld [vmem:[%s10644_s1 + $0x588] ss:$16 sps:$4 sm:$0xff]  }
  0x44   :  { %4981 = vmatprep.subr.bf16.mxu0 %v7042_v15  ;;  %5514 = vmatprep.subr.bf16.mxu1 %v7045_v16  ;;  %v7124_v15 = vld [vmem:[%s10644_s1 + $0x3e0] ss:$16 sps:$4 sm:$0xff]   ;;  %v7127_v16 = vld [vmem:[%s10644_s1 + $0x3e8] ss:$16 sps:$4 sm:$0xff]  }
  0x45   :  { %5011 = vmatprep.mubr.bf16.mxu0 %v876_v17  ;;  %5544 = vmatprep.mubr.bf16.mxu1 %v876_v17  ;;  %v7132_v17 = vld [vmem:[%s10644_s1 + $0x404] ss:$16 sps:$4 sm:$0xff]  }
  0x47   :  { %4982 = vmatpush1.bf16.msra.mxu0 %v7040_v18  ;;  %5515 = vmatpush1.bf16.msra.mxu1 %v7043_v19  ;;  %v7135_v18 = vld [vmem:[%s10644_s1 + $0x40c] ss:$16 sps:$4 sm:$0xff]   ;;  %v845_v19 = vcombine.high %v8540_v14, %v8540_v14 }
  0x48   :  { %4983 = vmatprep.subr.bf16.mxu0 %v7048_v20  ;;  %5516 = vmatprep.subr.bf16.mxu1 %v7051_v21  ;;  %v7130_v20 = vld [vmem:[%s10644_s1 + $0x400] ss:$16 sps:$4 sm:$0xff]   ;;  %v874_v21 = vcombine.high %v8356_v13, %v8356_v13 }
  0x49   :  { %v7136_v13 = vld [vmem:[%s10644_s1 + $0x420] ss:$16 sps:$4 sm:$0xff]  }
  0x4b   :  { %4984 = vmatpush1.bf16.msra.mxu0 %v7046_v22  ;;  %5517 = vmatpush1.bf16.msra.mxu1 %v7049_v23  ;;  %v7133_v22 = vld [vmem:[%s10644_s1 + $0x408] ss:$16 sps:$4 sm:$0xff]   ;;  %v7138_v23 = vld [vmem:[%s10644_s1 + $0x424] ss:$16 sps:$4 sm:$0xff]  }
  0x4c   :  { %4985 = vmatprep.subr.bf16.mxu0 %v7054_v24  ;;  %5518 = vmatprep.subr.bf16.mxu1 %v7057_v25  ;;  %v7141_v24 = vld [vmem:[%s10644_s1 + $0x42c] ss:$16 sps:$4 sm:$0xff]   ;;  %v8571_v25 = vrot.slane %v845_v19, %v8276_v49  ;;  %v7222_v19 = vld [vmem:[%s10644_s1 + $0x5e4] ss:$16 sps:$4 sm:$0xff]  }
  0x4f   :  { %4986 = vmatpush1.bf16.msra.mxu0 %v7052_v26  ;;  %5519 = vmatpush1.bf16.msra.mxu1 %v7055_v27  ;;  %v7139_v26 = vld [vmem:[%s10644_s1 + $0x428] ss:$16 sps:$4 sm:$0xff]   ;;  %v7144_v27 = vld [vmem:[%s10644_s1 + $0x444] ss:$16 sps:$4 sm:$0xff]  }
  0x50   :  { %4987 = vmatprep.subr.bf16.mxu0 %v7060_v28  ;;  %5520 = vmatprep.subr.bf16.mxu1 %v7063_v29  ;;  %v7147_v28 = vld [vmem:[%s10644_s1 + $0x44c] ss:$16 sps:$4 sm:$0xff]   ;;  %v7142_v29 = vld [vmem:[%s10644_s1 + $0x440] ss:$16 sps:$4 sm:$0xff]  }
  0x53   :  { %4988 = vmatpush1.bf16.msra.mxu0 %v7058_v30  ;;  %5521 = vmatpush1.bf16.msra.mxu1 %v7061_v31  ;;  %v7145_v30 = vld [vmem:[%s10644_s1 + $0x448] ss:$16 sps:$4 sm:$0xff]   ;;  %v7150_v31 = vld [vmem:[%s10644_s1 + $0x464] ss:$16 sps:$4 sm:$0xff]  }
  0x54   :  { %4989 = vmatprep.subr.bf16.mxu0 %v7066_v32  ;;  %5522 = vmatprep.subr.bf16.mxu1 %v7069_v33  ;;  %v7153_v32 = vld [vmem:[%s10644_s1 + $0x46c] ss:$16 sps:$4 sm:$0xff]   ;;  %v7148_v33 = vld [vmem:[%s10644_s1 + $0x460] ss:$16 sps:$4 sm:$0xff]  }
  0x57   :  { %4990 = vmatpush1.bf16.msra.mxu0 %v7064_v34  ;;  %5523 = vmatpush1.bf16.msra.mxu1 %v7067_v35  ;;  %v7151_v34 = vld [vmem:[%s10644_s1 + $0x468] ss:$16 sps:$4 sm:$0xff]   ;;  %v7156_v35 = vld [vmem:[%s10644_s1 + $0x484] ss:$16 sps:$4 sm:$0xff]  }
  0x58   :  { %4991 = vmatprep.subr.bf16.mxu0 %v7072_v36  ;;  %5524 = vmatprep.subr.bf16.mxu1 %v7075_v37  ;;  %v7159_v36 = vld [vmem:[%s10644_s1 + $0x48c] ss:$16 sps:$4 sm:$0xff]   ;;  %v7154_v37 = vld [vmem:[%s10644_s1 + $0x480] ss:$16 sps:$4 sm:$0xff]  }
  0x5b   :  { %4992 = vmatpush1.bf16.msra.mxu0 %v7070_v38  ;;  %5525 = vmatpush1.bf16.msra.mxu1 %v7073_v39  ;;  %v7157_v38 = vld [vmem:[%s10644_s1 + $0x488] ss:$16 sps:$4 sm:$0xff]   ;;  %v7162_v39 = vld [vmem:[%s10644_s1 + $0x4a4] ss:$16 sps:$4 sm:$0xff]  }
  0x5c   :  { %4993 = vmatprep.subr.bf16.mxu0 %v7078_v40  ;;  %5526 = vmatprep.subr.bf16.mxu1 %v7081_v41  ;;  %v7165_v40 = vld [vmem:[%s10644_s1 + $0x4ac] ss:$16 sps:$4 sm:$0xff]   ;;  %v7160_v41 = vld [vmem:[%s10644_s1 + $0x4a0] ss:$16 sps:$4 sm:$0xff]  }
  0x5f   :  { %4994 = vmatpush1.bf16.msra.mxu0 %v7076_v43  ;;  %5527 = vmatpush1.bf16.msra.mxu1 %v7079_v44  ;;  %v7163_v43 = vld [vmem:[%s10644_s1 + $0x4a8] ss:$16 sps:$4 sm:$0xff]   ;;  %v7168_v44 = vld [vmem:[%s10644_s1 + $0x4c4] ss:$16 sps:$4 sm:$0xff]  }
  0x60   :  { %4995 = vmatprep.subr.bf16.mxu0 %v7084_v45  ;;  %5528 = vmatprep.subr.bf16.mxu1 %v7087_v46  ;;  %v7171_v45 = vld [vmem:[%s10644_s1 + $0x4cc] ss:$16 sps:$4 sm:$0xff]   ;;  %v7166_v46 = vld [vmem:[%s10644_s1 + $0x4c0] ss:$16 sps:$4 sm:$0xff]  }
  0x63   :  { %4996 = vmatpush1.bf16.msra.mxu0 %v7082_v47  ;;  %5529 = vmatpush1.bf16.msra.mxu1 %v7085_v48  ;;  %v7169_v47 = vld [vmem:[%s10644_s1 + $0x4c8] ss:$16 sps:$4 sm:$0xff]   ;;  %v7174_v48 = vld [vmem:[%s10644_s1 + $0x4e4] ss:$16 sps:$4 sm:$0xff]  }
  0x64   :  { %4997 = vmatprep.subr.bf16.mxu0 %v7090_v50  ;;  %5530 = vmatprep.subr.bf16.mxu1 %v7093_v51  ;;  %v7177_v50 = vld [vmem:[%s10644_s1 + $0x4ec] ss:$16 sps:$4 sm:$0xff]   ;;  %v7172_v51 = vld [vmem:[%s10644_s1 + $0x4e0] ss:$16 sps:$4 sm:$0xff]  }
  0x67   :  { %4998 = vmatpush1.bf16.msra.mxu0 %v7088_v53  ;;  %5531 = vmatpush1.bf16.msra.mxu1 %v7091_v54  ;;  %v7175_v53 = vld [vmem:[%s10644_s1 + $0x4e8] ss:$16 sps:$4 sm:$0xff]   ;;  %v7180_v54 = vld [vmem:[%s10644_s1 + $0x504] ss:$16 sps:$4 sm:$0xff]  }
  0x68   :  { %4999 = vmatprep.subr.bf16.mxu0 %v7096_v55  ;;  %5532 = vmatprep.subr.bf16.mxu1 %v7099_v56  ;;  %v7183_v55 = vld [vmem:[%s10644_s1 + $0x50c] ss:$16 sps:$4 sm:$0xff]   ;;  %v7178_v56 = vld [vmem:[%s10644_s1 + $0x500] ss:$16 sps:$4 sm:$0xff]  }
  0x6b   :  { %5000 = vmatpush1.bf16.msra.mxu0 %v7094_v57  ;;  %5533 = vmatpush1.bf16.msra.mxu1 %v7097_v58  ;;  %v7181_v57 = vld [vmem:[%s10644_s1 + $0x508] ss:$16 sps:$4 sm:$0xff]   ;;  %v7186_v58 = vld [vmem:[%s10644_s1 + $0x524] ss:$16 sps:$4 sm:$0xff]  }
  0x6c   :  { %5001 = vmatprep.subr.bf16.mxu0 %v7102_v59  ;;  %5534 = vmatprep.subr.bf16.mxu1 %v7105_v60  ;;  %v7189_v59 = vld [vmem:[%s10644_s1 + $0x52c] ss:$16 sps:$4 sm:$0xff]   ;;  %v7184_v60 = vld [vmem:[%s10644_s1 + $0x520] ss:$16 sps:$4 sm:$0xff]  }
  0x6f   :  { %5002 = vmatpush1.bf16.msra.mxu0 %v7100_v61  ;;  %5535 = vmatpush1.bf16.msra.mxu1 %v7103_v62  ;;  %v7187_v61 = vld [vmem:[%s10644_s1 + $0x528] ss:$16 sps:$4 sm:$0xff]   ;;  %v7192_v62 = vld [vmem:[%s10644_s1 + $0x544] ss:$16 sps:$4 sm:$0xff]  }
  0x70   :  { %5003 = vmatprep.subr.bf16.mxu0 %v7108_v63  ;;  %5536 = vmatprep.subr.bf16.mxu1 %v7111_v0  ;;  %v7195_v63 = vld [vmem:[%s10644_s1 + $0x54c] ss:$16 sps:$4 sm:$0xff]   ;;  %v7190_v0 = vld [vmem:[%s10644_s1 + $0x540] ss:$16 sps:$4 sm:$0xff]  }
  0x73   :  { %5004 = vmatpush1.bf16.msra.mxu0 %v7106_v1  ;;  %5537 = vmatpush1.bf16.msra.mxu1 %v7109_v2  ;;  %v7193_v1 = vld [vmem:[%s10644_s1 + $0x548] ss:$16 sps:$4 sm:$0xff]   ;;  %v7198_v2 = vld [vmem:[%s10644_s1 + $0x564] ss:$16 sps:$4 sm:$0xff]  }
  0x74   :  { %5005 = vmatprep.subr.bf16.mxu0 %v7114_v3  ;;  %5538 = vmatprep.subr.bf16.mxu1 %v7117_v4  ;;  %v7201_v3 = vld [vmem:[%s10644_s1 + $0x56c] ss:$16 sps:$4 sm:$0xff]   ;;  %v7196_v4 = vld [vmem:[%s10644_s1 + $0x560] ss:$16 sps:$4 sm:$0xff]  }
  0x77   :  { %5006 = vmatpush1.bf16.msra.mxu0 %v7112_v5  ;;  %5539 = vmatpush1.bf16.msra.mxu1 %v7115_v6  ;;  %v7199_v5 = vld [vmem:[%s10644_s1 + $0x568] ss:$16 sps:$4 sm:$0xff]   ;;  %v7204_v6 = vld [vmem:[%s10644_s1 + $0x584] ss:$16 sps:$4 sm:$0xff]  }
  0x78   :  { %5007 = vmatprep.subr.bf16.mxu0 %v7120_v7  ;;  %5540 = vmatprep.subr.bf16.mxu1 %v7123_v8  ;;  %v7207_v7 = vld [vmem:[%s10644_s1 + $0x58c] ss:$16 sps:$4 sm:$0xff]   ;;  %v7202_v8 = vld [vmem:[%s10644_s1 + $0x580] ss:$16 sps:$4 sm:$0xff]  }
  0x7b   :  { %5008 = vmatpush1.bf16.msra.mxu0 %v7118_v10  ;;  %5541 = vmatpush1.bf16.msra.mxu1 %v7121_v11  ;;  %v7210_v10 = vld [vmem:[%s10644_s1 + $0x5a4] ss:$16 sps:$4 sm:$0xff]   ;;  %v7213_v11 = vld [vmem:[%s10644_s1 + $0x5ac] ss:$16 sps:$4 sm:$0xff]  }
  0x7c   :  { %5009 = vmatprep.subr.bf16.mxu0 %v7126_v12  ;;  %5542 = vmatprep.subr.bf16.mxu1 %v7129_v52  ;;  %v7208_v12 = vld [vmem:[%s10644_s1 + $0x5a0] ss:$16 sps:$4 sm:$0xff]   ;;  %v7211_v52 = vld [vmem:[%s10644_s1 + $0x5a8] ss:$16 sps:$4 sm:$0xff]  }
  0x7f   :  { %5010 = vmatpush1.bf16.msra.mxu0 %v7124_v15  ;;  %5543 = vmatpush1.bf16.msra.mxu1 %v7127_v16  ;;  %v7216_v15 = vld [vmem:[%s10644_s1 + $0x5c4] ss:$16 sps:$4 sm:$0xff]   ;;  %v7219_v16 = vld [vmem:[%s10644_s1 + $0x5cc] ss:$16 sps:$4 sm:$0xff]  }
  0x80   :  { %5020 = vmatprep.subr.bf16.mxu0 %v7132_v17  ;;  %5553 = vmatprep.subr.bf16.mxu1 %v7135_v18  ;;  %v7214_v17 = vld [vmem:[%s10644_s1 + $0x5c0] ss:$16 sps:$4 sm:$0xff]   ;;  %v7217_v18 = vld [vmem:[%s10644_s1 + $0x5c8] ss:$16 sps:$4 sm:$0xff]  }
  0x82   :  { %5012 = vmatmul.mubr.bf16.vlgmr.msra.gmra.mrb[0].mxu0 %v874_v21  ;;  %5545 = vmatmul.mubr.bf16.vlgmr.msra.gmra.mrb[0].mxu1 %v874_v21  ;;  %v7220_v21 = vld [vmem:[%s10644_s1 + $0x5e0] ss:$16 sps:$4 sm:$0xff]  }
  0x83   :  { %5021 = vmatpush1.bf16.msra.mxu0 %v7130_v20  ;;  %5554 = vmatpush1.bf16.msra.mxu1 %v7133_v22  ;;  %v7225_v20 = vld [vmem:[%s10644_s1 + $0x5ec] ss:$16 sps:$4 sm:$0xff]   ;;  %v7223_v22 = vld [vmem:[%s10644_s1 + $0x5e8] ss:$16 sps:$4 sm:$0xff]  }
  0x84   :  { %5022 = vmatprep.subr.bf16.mxu0 %v7138_v23  ;;  %5555 = vmatprep.subr.bf16.mxu1 %v7141_v24  ;;  %v7229_v23 = vld [vmem:[%s10644_s1 + $0x604] ss:$16 sps:$4 sm:$0xff]   ;;  %v7232_v24 = vld [vmem:[%s10644_s1 + $0x60c] ss:$16 sps:$4 sm:$0xff]  }
  0x85   :  { %5052 = vmatprep.mubr.bf16.mxu0 %v8571_v25  ;;  %5585 = vmatprep.mubr.bf16.mxu1 %v8571_v25 }
  0x87   :  { %5023 = vmatpush1.bf16.msra.mxu0 %v7136_v13  ;;  %5556 = vmatpush1.bf16.msra.mxu1 %v7139_v26  ;;  %v7227_v13 = vld [vmem:[%s10644_s1 + $0x600] ss:$16 sps:$4 sm:$0xff]   ;;  %v8760_v26 = vrot.slane %v8540_v14, %v8276_v49  ;;  %v877_v14 = vcombine.high %v8571_v25, %v8571_v25  ;;  %v7241_v25 = vld [vmem:[%s10644_s1 + $0x644] ss:$16 sps:$4 sm:$0xff]  }
  0x88   :  { %5024 = vmatprep.subr.bf16.mxu0 %v7144_v27  ;;  %5557 = vmatprep.subr.bf16.mxu1 %v7147_v28  ;;  %v7230_v27 = vld [vmem:[%s10644_s1 + $0x608] ss:$16 sps:$4 sm:$0xff]   ;;  %v7235_v28 = vld [vmem:[%s10644_s1 + $0x624] ss:$16 sps:$4 sm:$0xff]  }
  0x8b   :  { %5025 = vmatpush1.bf16.msra.mxu0 %v7142_v29  ;;  %5558 = vmatpush1.bf16.msra.mxu1 %v7145_v30  ;;  %v7238_v29 = vld [vmem:[%s10644_s1 + $0x62c] ss:$16 sps:$4 sm:$0xff]   ;;  %v7233_v30 = vld [vmem:[%s10644_s1 + $0x620] ss:$16 sps:$4 sm:$0xff]  }
  0x8c   :  { %5026 = vmatprep.subr.bf16.mxu0 %v7150_v31  ;;  %5559 = vmatprep.subr.bf16.mxu1 %v7153_v32  ;;  %v7236_v31 = vld [vmem:[%s10644_s1 + $0x628] ss:$16 sps:$4 sm:$0xff]   ;;  %v7244_v32 = vld [vmem:[%s10644_s1 + $0x64c] ss:$16 sps:$4 sm:$0xff]  }
  0x8f   :  { %5027 = vmatpush1.bf16.msra.mxu0 %v7148_v33  ;;  %5560 = vmatpush1.bf16.msra.mxu1 %v7151_v34  ;;  %v7239_v33 = vld [vmem:[%s10644_s1 + $0x640] ss:$16 sps:$4 sm:$0xff]   ;;  %v7242_v34 = vld [vmem:[%s10644_s1 + $0x648] ss:$16 sps:$4 sm:$0xff]  }
  0x90   :  { %5028 = vmatprep.subr.bf16.mxu0 %v7156_v35  ;;  %5561 = vmatprep.subr.bf16.mxu1 %v7159_v36  ;;  %v7247_v35 = vld [vmem:[%s10644_s1 + $0x664] ss:$16 sps:$4 sm:$0xff]   ;;  %v7250_v36 = vld [vmem:[%s10644_s1 + $0x66c] ss:$16 sps:$4 sm:$0xff]  }
  0x93   :  { %5029 = vmatpush1.bf16.msra.mxu0 %v7154_v37  ;;  %5562 = vmatpush1.bf16.msra.mxu1 %v7157_v38  ;;  %v7245_v37 = vld [vmem:[%s10644_s1 + $0x660] ss:$16 sps:$4 sm:$0xff]   ;;  %v7248_v38 = vld [vmem:[%s10644_s1 + $0x668] ss:$16 sps:$4 sm:$0xff]  }
  0x94   :  { %5030 = vmatprep.subr.bf16.mxu0 %v7162_v39  ;;  %5563 = vmatprep.subr.bf16.mxu1 %v7165_v40  ;;  %v7253_v39 = vld [vmem:[%s10644_s1 + $0x684] ss:$16 sps:$4 sm:$0xff]   ;;  %v7256_v40 = vld [vmem:[%s10644_s1 + $0x68c] ss:$16 sps:$4 sm:$0xff]  }
  0x97   :  { %5031 = vmatpush1.bf16.msra.mxu0 %v7160_v41  ;;  %5564 = vmatpush1.bf16.msra.mxu1 %v7163_v43  ;;  %v7251_v41 = vld [vmem:[%s10644_s1 + $0x680] ss:$16 sps:$4 sm:$0xff]   ;;  %v7254_v43 = vld [vmem:[%s10644_s1 + $0x688] ss:$16 sps:$4 sm:$0xff]  }
  0x98   :  { %5032 = vmatprep.subr.bf16.mxu0 %v7168_v44  ;;  %5565 = vmatprep.subr.bf16.mxu1 %v7171_v45  ;;  %v7259_v44 = vld [vmem:[%s10644_s1 + $0x6a4] ss:$16 sps:$4 sm:$0xff]   ;;  %v7262_v45 = vld [vmem:[%s10644_s1 + $0x6ac] ss:$16 sps:$4 sm:$0xff]  }
  0x9b   :  { %5033 = vmatpush1.bf16.msra.mxu0 %v7166_v46  ;;  %5566 = vmatpush1.bf16.msra.mxu1 %v7169_v47  ;;  %v7257_v46 = vld [vmem:[%s10644_s1 + $0x6a0] ss:$16 sps:$4 sm:$0xff]   ;;  %v7260_v47 = vld [vmem:[%s10644_s1 + $0x6a8] ss:$16 sps:$4 sm:$0xff]  }
  0x9c   :  { %5034 = vmatprep.subr.bf16.mxu0 %v7174_v48  ;;  %5567 = vmatprep.subr.bf16.mxu1 %v7177_v50  ;;  %v7265_v48 = vld [vmem:[%s10644_s1 + $0x6c4] ss:$16 sps:$4 sm:$0xff]   ;;  %v7268_v50 = vld [vmem:[%s10644_s1 + $0x6cc] ss:$16 sps:$4 sm:$0xff]  }
  0x9f   :  { %5035 = vmatpush1.bf16.msra.mxu0 %v7172_v51  ;;  %5568 = vmatpush1.bf16.msra.mxu1 %v7175_v53  ;;  %v7263_v51 = vld [vmem:[%s10644_s1 + $0x6c0] ss:$16 sps:$4 sm:$0xff]   ;;  %v7266_v53 = vld [vmem:[%s10644_s1 + $0x6c8] ss:$16 sps:$4 sm:$0xff]  }
  0xa0   :  { %5036 = vmatprep.subr.bf16.mxu0 %v7180_v54  ;;  %5569 = vmatprep.subr.bf16.mxu1 %v7183_v55  ;;  %v7271_v54 = vld [vmem:[%s10644_s1 + $0x6e4] ss:$16 sps:$4 sm:$0xff]   ;;  %v7274_v55 = vld [vmem:[%s10644_s1 + $0x6ec] ss:$16 sps:$4 sm:$0xff]  }
  0xa3   :  { %5037 = vmatpush1.bf16.msra.mxu0 %v7178_v56  ;;  %5570 = vmatpush1.bf16.msra.mxu1 %v7181_v57  ;;  %v7269_v56 = vld [vmem:[%s10644_s1 + $0x6e0] ss:$16 sps:$4 sm:$0xff]   ;;  %v7272_v57 = vld [vmem:[%s10644_s1 + $0x6e8] ss:$16 sps:$4 sm:$0xff]  }
  0xa4   :  { %5038 = vmatprep.subr.bf16.mxu0 %v7186_v58  ;;  %5571 = vmatprep.subr.bf16.mxu1 %v7189_v59  ;;  %v7277_v58 = vld [vmem:[%s10644_s1 + $0x704] ss:$16 sps:$4 sm:$0xff]   ;;  %v7280_v59 = vld [vmem:[%s10644_s1 + $0x70c] ss:$16 sps:$4 sm:$0xff]  }
  0xa7   :  { %5039 = vmatpush1.bf16.msra.mxu0 %v7184_v60  ;;  %5572 = vmatpush1.bf16.msra.mxu1 %v7187_v61  ;;  %v7275_v60 = vld [vmem:[%s10644_s1 + $0x700] ss:$16 sps:$4 sm:$0xff]   ;;  %v7278_v61 = vld [vmem:[%s10644_s1 + $0x708] ss:$16 sps:$4 sm:$0xff]  }
  0xa8   :  { %5040 = vmatprep.subr.bf16.mxu0 %v7192_v62  ;;  %5573 = vmatprep.subr.bf16.mxu1 %v7195_v63  ;;  %v7283_v62 = vld [vmem:[%s10644_s1 + $0x724] ss:$16 sps:$4 sm:$0xff]   ;;  %v7286_v63 = vld [vmem:[%s10644_s1 + $0x72c] ss:$16 sps:$4 sm:$0xff]  }
  0xab   :  { %5041 = vmatpush1.bf16.msra.mxu0 %v7190_v0  ;;  %5574 = vmatpush1.bf16.msra.mxu1 %v7193_v1  ;;  %v7281_v0 = vld [vmem:[%s10644_s1 + $0x720] ss:$16 sps:$4 sm:$0xff]   ;;  %v7284_v1 = vld [vmem:[%s10644_s1 + $0x728] ss:$16 sps:$4 sm:$0xff]  }
  0xac   :  { %5042 = vmatprep.subr.bf16.mxu0 %v7198_v2  ;;  %5575 = vmatprep.subr.bf16.mxu1 %v7201_v3  ;;  %v7289_v2 = vld [vmem:[%s10644_s1 + $0x744] ss:$16 sps:$4 sm:$0xff]   ;;  %v7292_v3 = vld [vmem:[%s10644_s1 + $0x74c] ss:$16 sps:$4 sm:$0xff]  }
  0xaf   :  { %5043 = vmatpush1.bf16.msra.mxu0 %v7196_v4  ;;  %5576 = vmatpush1.bf16.msra.mxu1 %v7199_v5  ;;  %v7287_v4 = vld [vmem:[%s10644_s1 + $0x740] ss:$16 sps:$4 sm:$0xff]   ;;  %v7290_v5 = vld [vmem:[%s10644_s1 + $0x748] ss:$16 sps:$4 sm:$0xff]  }
  0xb0   :  { %5044 = vmatprep.subr.bf16.mxu0 %v7204_v6  ;;  %5577 = vmatprep.subr.bf16.mxu1 %v7207_v7  ;;  %v7295_v6 = vld [vmem:[%s10644_s1 + $0x764] ss:$16 sps:$4 sm:$0xff]   ;;  %v7298_v7 = vld [vmem:[%s10644_s1 + $0x76c] ss:$16 sps:$4 sm:$0xff]  }
  0xb3   :  { %5045 = vmatpush1.bf16.msra.mxu0 %v7202_v8  ;;  %5578 = vmatpush1.bf16.msra.mxu1 %v7205_v9  ;;  %v7293_v8 = vld [vmem:[%s10644_s1 + $0x760] ss:$16 sps:$4 sm:$0xff]   ;;  %v7296_v9 = vld [vmem:[%s10644_s1 + $0x768] ss:$16 sps:$4 sm:$0xff]  }
  0xb4   :  { %5046 = vmatprep.subr.bf16.mxu0 %v7210_v10  ;;  %5579 = vmatprep.subr.bf16.mxu1 %v7213_v11  ;;  %v7301_v10 = vld [vmem:[%s10644_s1 + $0x784] ss:$16 sps:$4 sm:$0xff]   ;;  %v7304_v11 = vld [vmem:[%s10644_s1 + $0x78c] ss:$16 sps:$4 sm:$0xff]  }
  0xb7   :  { %5047 = vmatpush1.bf16.msra.mxu0 %v7208_v12  ;;  %5580 = vmatpush1.bf16.msra.mxu1 %v7211_v52  ;;  %v7299_v12 = vld [vmem:[%s10644_s1 + $0x780] ss:$16 sps:$4 sm:$0xff]   ;;  %v7302_v52 = vld [vmem:[%s10644_s1 + $0x788] ss:$16 sps:$4 sm:$0xff]  }
  0xb8   :  { %5048 = vmatprep.subr.bf16.mxu0 %v7216_v15  ;;  %5581 = vmatprep.subr.bf16.mxu1 %v7219_v16  ;;  %v7307_v15 = vld [vmem:[%s10644_s1 + $0x7a4] ss:$16 sps:$4 sm:$0xff]   ;;  %v7310_v16 = vld [vmem:[%s10644_s1 + $0x7ac] ss:$16 sps:$4 sm:$0xff]  }
  0xbb   :  { %5049 = vmatpush1.bf16.msra.mxu0 %v7214_v17  ;;  %5582 = vmatpush1.bf16.msra.mxu1 %v7217_v18  ;;  %v7305_v17 = vld [vmem:[%s10644_s1 + $0x7a0] ss:$16 sps:$4 sm:$0xff]   ;;  %v7308_v18 = vld [vmem:[%s10644_s1 + $0x7a8] ss:$16 sps:$4 sm:$0xff]  }
  0xbc   :  { %5050 = vmatprep.subr.bf16.mxu0 %v7222_v19  ;;  %5583 = vmatprep.subr.bf16.mxu1 %v7225_v20  ;;  %v7313_v19 = vld [vmem:[%s10644_s1 + $0x7c4] ss:$16 sps:$4 sm:$0xff]   ;;  %v7316_v20 = vld [vmem:[%s10644_s1 + $0x7cc] ss:$16 sps:$4 sm:$0xff]  }
  0xbf   :  { %5051 = vmatpush1.bf16.msra.mxu0 %v7220_v21  ;;  %5584 = vmatpush1.bf16.msra.mxu1 %v7223_v22  ;;  %v8934_v21 = vld.sshfl [vmem:[%s10645_s0 + $0x8] sm:$0xff pattern:$0x75316420]  ;;  %v7311_v22 = vld [vmem:[%s10644_s1 + $0x7c0] ss:$16 sps:$4 sm:$0xff]  }
  0xc0   :  { %5061 = vmatprep.subr.bf16.mxu0 %v7229_v23  ;;  %5594 = vmatprep.subr.bf16.mxu1 %v7232_v24  ;;  %v7314_v23 = vld [vmem:[%s10644_s1 + $0x7c8] ss:$16 sps:$4 sm:$0xff]   ;;  %v7319_v24 = vld [vmem:[%s10644_s1 + $0x7e4] ss:$16 sps:$4 sm:$0xff]  }
  0xc2   :  { %5053 = vmatmul.mubr.bf16.vlgmr.msra.gmra.mrb[0].mxu0 %v8760_v26  ;;  %5586 = vmatmul.mubr.bf16.vlgmr.msra.gmra.mrb[0].mxu1 %v8760_v26 }
  0xc3   :  { %5062 = vmatpush1.bf16.msra.mxu0 %v7227_v13  ;;  %5595 = vmatpush1.bf16.msra.mxu1 %v7230_v27  ;;  %v7322_v13 = vld [vmem:[%s10644_s1 + $0x7ec] ss:$16 sps:$4 sm:$0xff]   ;;  %v7317_v27 = vld [vmem:[%s10644_s1 + $0x7e0] ss:$16 sps:$4 sm:$0xff]  }
  0xc4   :  { %5063 = vmatprep.subr.bf16.mxu0 %v7235_v28  ;;  %5596 = vmatprep.subr.bf16.mxu1 %v7238_v29  ;;  %v7320_v28 = vld [vmem:[%s10644_s1 + $0x7e8] ss:$16 sps:$4 sm:$0xff]   ;;  %v7325_v29 = vld [vmem:[%s10644_s1 + $0x804] ss:$16 sps:$4 sm:$0xff]  }
  0xc5   :  { %5093 = vmatprep.mubr.bf16.mxu0 %v877_v14  ;;  %5626 = vmatprep.mubr.bf16.mxu1 %v877_v14  ;;  %v7328_v14 = vld [vmem:[%s10644_s1 + $0x80c] ss:$16 sps:$4 sm:$0xff]  }
  0xc7   :  { %5064 = vmatpush1.bf16.msra.mxu0 %v7233_v30  ;;  %5597 = vmatpush1.bf16.msra.mxu1 %v7236_v31  ;;  %v893_v30 = vcombine.high %v8934_v21, %v8934_v21  ;;  %v875_v31 = vcombine.high %v8760_v26, %v8760_v26  ;;  %v7334_v26 = vld [vmem:[%s10644_s1 + $0x82c] ss:$16 sps:$4 sm:$0xff]  }
  0xc8   :  { %5065 = vmatprep.subr.bf16.mxu0 %v7241_v25  ;;  %5598 = vmatprep.subr.bf16.mxu1 %v7244_v32  ;;  %v7323_v25 = vld [vmem:[%s10644_s1 + $0x800] ss:$16 sps:$4 sm:$0xff]   ;;  %v7326_v32 = vld [vmem:[%s10644_s1 + $0x808] ss:$16 sps:$4 sm:$0xff]  }
  0xcb   :  { %5066 = vmatpush1.bf16.msra.mxu0 %v7239_v33  ;;  %5599 = vmatpush1.bf16.msra.mxu1 %v7242_v34  ;;  %v7331_v33 = vld [vmem:[%s10644_s1 + $0x824] ss:$16 sps:$4 sm:$0xff]   ;;  %v8977_v34 = vrot.slane %v893_v30, %v8276_v49 }
  0xcc   :  { %5067 = vmatprep.subr.bf16.mxu0 %v7247_v35  ;;  %5600 = vmatprep.subr.bf16.mxu1 %v7250_v36  ;;  %v7329_v35 = vld [vmem:[%s10644_s1 + $0x820] ss:$16 sps:$4 sm:$0xff]   ;;  %v7332_v36 = vld [vmem:[%s10644_s1 + $0x828] ss:$16 sps:$4 sm:$0xff]   ;;  %v7415_v30 = vld [vmem:[%s10644_s1 + $0x9e4] ss:$16 sps:$4 sm:$0xff]  }
  0xcf   :  { %5068 = vmatpush1.bf16.msra.mxu0 %v7245_v37  ;;  %5601 = vmatpush1.bf16.msra.mxu1 %v7248_v38  ;;  %v7337_v37 = vld [vmem:[%s10644_s1 + $0x844] ss:$16 sps:$4 sm:$0xff]   ;;  %v7340_v38 = vld [vmem:[%s10644_s1 + $0x84c] ss:$16 sps:$4 sm:$0xff]  }
  0xd0   :  { %5069 = vmatprep.subr.bf16.mxu0 %v7253_v39  ;;  %5602 = vmatprep.subr.bf16.mxu1 %v7256_v40  ;;  %v7335_v39 = vld [vmem:[%s10644_s1 + $0x840] ss:$16 sps:$4 sm:$0xff]   ;;  %v7338_v40 = vld [vmem:[%s10644_s1 + $0x848] ss:$16 sps:$4 sm:$0xff]  }
  0xd3   :  { %5070 = vmatpush1.bf16.msra.mxu0 %v7251_v41  ;;  %5603 = vmatpush1.bf16.msra.mxu1 %v7254_v43  ;;  %v7343_v41 = vld [vmem:[%s10644_s1 + $0x864] ss:$16 sps:$4 sm:$0xff]   ;;  %v7346_v43 = vld [vmem:[%s10644_s1 + $0x86c] ss:$16 sps:$4 sm:$0xff]  }
  0xd4   :  { %5071 = vmatprep.subr.bf16.mxu0 %v7259_v44  ;;  %5604 = vmatprep.subr.bf16.mxu1 %v7262_v45  ;;  %v7341_v44 = vld [vmem:[%s10644_s1 + $0x860] ss:$16 sps:$4 sm:$0xff]   ;;  %v7344_v45 = vld [vmem:[%s10644_s1 + $0x868] ss:$16 sps:$4 sm:$0xff]  }
  0xd7   :  { %5072 = vmatpush1.bf16.msra.mxu0 %v7257_v46  ;;  %5605 = vmatpush1.bf16.msra.mxu1 %v7260_v47  ;;  %v7349_v46 = vld [vmem:[%s10644_s1 + $0x884] ss:$16 sps:$4 sm:$0xff]   ;;  %v7352_v47 = vld [vmem:[%s10644_s1 + $0x88c] ss:$16 sps:$4 sm:$0xff]  }
  0xd8   :  { %5073 = vmatprep.subr.bf16.mxu0 %v7265_v48  ;;  %5606 = vmatprep.subr.bf16.mxu1 %v7268_v50  ;;  %v7347_v48 = vld [vmem:[%s10644_s1 + $0x880] ss:$16 sps:$4 sm:$0xff]   ;;  %v7350_v50 = vld [vmem:[%s10644_s1 + $0x888] ss:$16 sps:$4 sm:$0xff]  }
  0xdb   :  { %5074 = vmatpush1.bf16.msra.mxu0 %v7263_v51  ;;  %5607 = vmatpush1.bf16.msra.mxu1 %v7266_v53  ;;  %v7355_v51 = vld [vmem:[%s10644_s1 + $0x8a4] ss:$16 sps:$4 sm:$0xff]   ;;  %v7358_v53 = vld [vmem:[%s10644_s1 + $0x8ac] ss:$16 sps:$4 sm:$0xff]  }
  0xdc   :  { %5075 = vmatprep.subr.bf16.mxu0 %v7271_v54  ;;  %5608 = vmatprep.subr.bf16.mxu1 %v7274_v55  ;;  %v7353_v54 = vld [vmem:[%s10644_s1 + $0x8a0] ss:$16 sps:$4 sm:$0xff]   ;;  %v7356_v55 = vld [vmem:[%s10644_s1 + $0x8a8] ss:$16 sps:$4 sm:$0xff]  }
  0xdf   :  { %5076 = vmatpush1.bf16.msra.mxu0 %v7269_v56  ;;  %5609 = vmatpush1.bf16.msra.mxu1 %v7272_v57  ;;  %v7361_v56 = vld [vmem:[%s10644_s1 + $0x8c4] ss:$16 sps:$4 sm:$0xff]   ;;  %v7364_v57 = vld [vmem:[%s10644_s1 + $0x8cc] ss:$16 sps:$4 sm:$0xff]  }
  0xe0   :  { %5077 = vmatprep.subr.bf16.mxu0 %v7277_v58  ;;  %5610 = vmatprep.subr.bf16.mxu1 %v7280_v59  ;;  %v7359_v58 = vld [vmem:[%s10644_s1 + $0x8c0] ss:$16 sps:$4 sm:$0xff]   ;;  %v7362_v59 = vld [vmem:[%s10644_s1 + $0x8c8] ss:$16 sps:$4 sm:$0xff]  }
  0xe3   :  { %5078 = vmatpush1.bf16.msra.mxu0 %v7275_v60  ;;  %5611 = vmatpush1.bf16.msra.mxu1 %v7278_v61  ;;  %v7367_v60 = vld [vmem:[%s10644_s1 + $0x8e4] ss:$16 sps:$4 sm:$0xff]   ;;  %v7370_v61 = vld [vmem:[%s10644_s1 + $0x8ec] ss:$16 sps:$4 sm:$0xff]  }
  0xe4   :  { %5079 = vmatprep.subr.bf16.mxu0 %v7283_v62  ;;  %5612 = vmatprep.subr.bf16.mxu1 %v7286_v63  ;;  %v7365_v62 = vld [vmem:[%s10644_s1 + $0x8e0] ss:$16 sps:$4 sm:$0xff]   ;;  %v7368_v63 = vld [vmem:[%s10644_s1 + $0x8e8] ss:$16 sps:$4 sm:$0xff]  }
  0xe7   :  { %5080 = vmatpush1.bf16.msra.mxu0 %v7281_v0  ;;  %5613 = vmatpush1.bf16.msra.mxu1 %v7284_v1  ;;  %v7373_v0 = vld [vmem:[%s10644_s1 + $0x904] ss:$16 sps:$4 sm:$0xff]   ;;  %v7376_v1 = vld [vmem:[%s10644_s1 + $0x90c] ss:$16 sps:$4 sm:$0xff]  }
  0xe8   :  { %5081 = vmatprep.subr.bf16.mxu0 %v7289_v2  ;;  %5614 = vmatprep.subr.bf16.mxu1 %v7292_v3  ;;  %v7371_v2 = vld [vmem:[%s10644_s1 + $0x900] ss:$16 sps:$4 sm:$0xff]   ;;  %v7374_v3 = vld [vmem:[%s10644_s1 + $0x908] ss:$16 sps:$4 sm:$0xff]  }
  0xeb   :  { %5082 = vmatpush1.bf16.msra.mxu0 %v7287_v4  ;;  %5615 = vmatpush1.bf16.msra.mxu1 %v7290_v5  ;;  %v7379_v4 = vld [vmem:[%s10644_s1 + $0x924] ss:$16 sps:$4 sm:$0xff]   ;;  %v7382_v5 = vld [vmem:[%s10644_s1 + $0x92c] ss:$16 sps:$4 sm:$0xff]  }
  0xec   :  { %5083 = vmatprep.subr.bf16.mxu0 %v7295_v6  ;;  %5616 = vmatprep.subr.bf16.mxu1 %v7298_v7  ;;  %v7377_v6 = vld [vmem:[%s10644_s1 + $0x920] ss:$16 sps:$4 sm:$0xff]   ;;  %v7380_v7 = vld [vmem:[%s10644_s1 + $0x928] ss:$16 sps:$4 sm:$0xff]  }
  0xef   :  { %5084 = vmatpush1.bf16.msra.mxu0 %v7293_v8  ;;  %5617 = vmatpush1.bf16.msra.mxu1 %v7296_v9  ;;  %v7385_v8 = vld [vmem:[%s10644_s1 + $0x944] ss:$16 sps:$4 sm:$0xff]   ;;  %v7388_v9 = vld [vmem:[%s10644_s1 + $0x94c] ss:$16 sps:$4 sm:$0xff]  }
  0xf0   :  { %5085 = vmatprep.subr.bf16.mxu0 %v7301_v10  ;;  %5618 = vmatprep.subr.bf16.mxu1 %v7304_v11  ;;  %v7383_v10 = vld [vmem:[%s10644_s1 + $0x940] ss:$16 sps:$4 sm:$0xff]   ;;  %v7386_v11 = vld [vmem:[%s10644_s1 + $0x948] ss:$16 sps:$4 sm:$0xff]  }
  0xf3   :  { %5086 = vmatpush1.bf16.msra.mxu0 %v7299_v12  ;;  %5619 = vmatpush1.bf16.msra.mxu1 %v7302_v52  ;;  %v7391_v12 = vld [vmem:[%s10644_s1 + $0x964] ss:$16 sps:$4 sm:$0xff]   ;;  %v7394_v52 = vld [vmem:[%s10644_s1 + $0x96c] ss:$16 sps:$4 sm:$0xff]  }
  0xf4   :  { %5087 = vmatprep.subr.bf16.mxu0 %v7307_v15  ;;  %5620 = vmatprep.subr.bf16.mxu1 %v7310_v16  ;;  %v7389_v15 = vld [vmem:[%s10644_s1 + $0x960] ss:$16 sps:$4 sm:$0xff]   ;;  %v7392_v16 = vld [vmem:[%s10644_s1 + $0x968] ss:$16 sps:$4 sm:$0xff]  }
  0xf7   :  { %5088 = vmatpush1.bf16.msra.mxu0 %v7305_v17  ;;  %5621 = vmatpush1.bf16.msra.mxu1 %v7308_v18  ;;  %v7397_v17 = vld [vmem:[%s10644_s1 + $0x984] ss:$16 sps:$4 sm:$0xff]   ;;  %v7400_v18 = vld [vmem:[%s10644_s1 + $0x98c] ss:$16 sps:$4 sm:$0xff]  }
  0xf8   :  { %5089 = vmatprep.subr.bf16.mxu0 %v7313_v19  ;;  %5622 = vmatprep.subr.bf16.mxu1 %v7316_v20  ;;  %v7395_v19 = vld [vmem:[%s10644_s1 + $0x980] ss:$16 sps:$4 sm:$0xff]   ;;  %v7398_v20 = vld [vmem:[%s10644_s1 + $0x988] ss:$16 sps:$4 sm:$0xff]  }
  0xfb   :  { %5090 = vmatpush1.bf16.msra.mxu0 %v7311_v22  ;;  %5623 = vmatpush1.bf16.msra.mxu1 %v7314_v23  ;;  %v7403_v22 = vld [vmem:[%s10644_s1 + $0x9a4] ss:$16 sps:$4 sm:$0xff]   ;;  %v7406_v23 = vld [vmem:[%s10644_s1 + $0x9ac] ss:$16 sps:$4 sm:$0xff]  }
  0xfc   :  { %5091 = vmatprep.subr.bf16.mxu0 %v7319_v24  ;;  %5624 = vmatprep.subr.bf16.mxu1 %v7322_v13  ;;  %v7401_v24 = vld [vmem:[%s10644_s1 + $0x9a0] ss:$16 sps:$4 sm:$0xff]   ;;  %v7404_v13 = vld [vmem:[%s10644_s1 + $0x9a8] ss:$16 sps:$4 sm:$0xff]  }
  0xff   :  { %5092 = vmatpush1.bf16.msra.mxu0 %v7317_v27  ;;  %5625 = vmatpush1.bf16.msra.mxu1 %v7320_v28  ;;  %v7409_v27 = vld [vmem:[%s10644_s1 + $0x9c4] ss:$16 sps:$4 sm:$0xff]   ;;  %v7412_v28 = vld [vmem:[%s10644_s1 + $0x9cc] ss:$16 sps:$4 sm:$0xff]  }
 0x100   :  { %5102 = vmatprep.subr.bf16.mxu0 %v7325_v29  ;;  %5635 = vmatprep.subr.bf16.mxu1 %v7328_v14  ;;  %v7407_v29 = vld [vmem:[%s10644_s1 + $0x9c0] ss:$16 sps:$4 sm:$0xff]   ;;  %v7410_v14 = vld [vmem:[%s10644_s1 + $0x9c8] ss:$16 sps:$4 sm:$0xff]  }
 0x102   :  { %5094 = vmatmul.mubr.bf16.vlgmr.msra.gmra.mrb[0].mxu0 %v875_v31  ;;  %5627 = vmatmul.mubr.bf16.vlgmr.msra.gmra.mrb[0].mxu1 %v875_v31  ;;  %v7418_v31 = vld [vmem:[%s10644_s1 + $0x9ec] ss:$16 sps:$4 sm:$0xff]  }
 0x103   :  { %5103 = vmatpush1.bf16.msra.mxu0 %v7323_v25  ;;  %5636 = vmatpush1.bf16.msra.mxu1 %v7326_v32  ;;  %v7413_v25 = vld [vmem:[%s10644_s1 + $0x9e0] ss:$16 sps:$4 sm:$0xff]   ;;  %v7416_v32 = vld [vmem:[%s10644_s1 + $0x9e8] ss:$16 sps:$4 sm:$0xff]  }
 0x104   :  { %5104 = vmatprep.subr.bf16.mxu0 %v7331_v33  ;;  %5637 = vmatprep.subr.bf16.mxu1 %v7334_v26  ;;  %v7421_v33 = vld [vmem:[%s10644_s1 + $0xa04] ss:$16 sps:$4 sm:$0xff]   ;;  %v7424_v26 = vld [vmem:[%s10644_s1 + $0xa0c] ss:$16 sps:$4 sm:$0xff]  }
 0x105   :  { %5134 = vmatprep.mubr.bf16.mxu0 %v8977_v34  ;;  %5667 = vmatprep.mubr.bf16.mxu1 %v8977_v34 }
 0x107   :  { %5105 = vmatpush1.bf16.msra.mxu0 %v7329_v35  ;;  %5638 = vmatpush1.bf16.msra.mxu1 %v7332_v36  ;;  %v9163_v35 = vrot.slane %v8934_v21, %v8276_v49  ;;  %v7419_v36 = vld [vmem:[%s10644_s1 + $0xa00] ss:$16 sps:$4 sm:$0xff]   ;;  %v7430_v21 = vld [vmem:[%s10644_s1 + $0xa2c] ss:$16 sps:$4 sm:$0xff]  }
 0x108   :  { %5106 = vmatprep.subr.bf16.mxu0 %v7337_v37  ;;  %5639 = vmatprep.subr.bf16.mxu1 %v7340_v38  ;;  %v7422_v37 = vld [vmem:[%s10644_s1 + $0xa08] ss:$16 sps:$4 sm:$0xff]   ;;  %v7427_v38 = vld [vmem:[%s10644_s1 + $0xa24] ss:$16 sps:$4 sm:$0xff]  }
 0x10b   :  { %5107 = vmatpush1.bf16.msra.mxu0 %v7335_v39  ;;  %5640 = vmatpush1.bf16.msra.mxu1 %v7338_v40  ;;  %v925_v39 = vcombine.high %v8977_v34, %v8977_v34  ;;  %v7425_v40 = vld [vmem:[%s10644_s1 + $0xa20] ss:$16 sps:$4 sm:$0xff]   ;;  %v7433_v34 = vld [vmem:[%s10644_s1 + $0xa44] ss:$16 sps:$4 sm:$0xff]  }
 0x10c   :  { %5108 = vmatprep.subr.bf16.mxu0 %v7343_v41  ;;  %5641 = vmatprep.subr.bf16.mxu1 %v7346_v43  ;;  %v7428_v41 = vld [vmem:[%s10644_s1 + $0xa28] ss:$16 sps:$4 sm:$0xff]   ;;  %v7436_v43 = vld [vmem:[%s10644_s1 + $0xa4c] ss:$16 sps:$4 sm:$0xff]  }
 0x10f   :  { %5109 = vmatpush1.bf16.msra.mxu0 %v7341_v44  ;;  %5642 = vmatpush1.bf16.msra.mxu1 %v7344_v45  ;;  %v7431_v44 = vld [vmem:[%s10644_s1 + $0xa40] ss:$16 sps:$4 sm:$0xff]   ;;  %v7434_v45 = vld [vmem:[%s10644_s1 + $0xa48] ss:$16 sps:$4 sm:$0xff]  }
 0x110   :  { %5110 = vmatprep.subr.bf16.mxu0 %v7349_v46  ;;  %5643 = vmatprep.subr.bf16.mxu1 %v7352_v47  ;;  %v7439_v46 = vld [vmem:[%s10644_s1 + $0xa64] ss:$16 sps:$4 sm:$0xff]   ;;  %v7442_v47 = vld [vmem:[%s10644_s1 + $0xa6c] ss:$16 sps:$4 sm:$0xff]  }
 0x113   :  { %5111 = vmatpush1.bf16.msra.mxu0 %v7347_v48  ;;  %5644 = vmatpush1.bf16.msra.mxu1 %v7350_v50  ;;  %v7437_v48 = vld [vmem:[%s10644_s1 + $0xa60] ss:$16 sps:$4 sm:$0xff]   ;;  %v7440_v50 = vld [vmem:[%s10644_s1 + $0xa68] ss:$16 sps:$4 sm:$0xff]  }
 0x114   :  { %5112 = vmatprep.subr.bf16.mxu0 %v7355_v51  ;;  %5645 = vmatprep.subr.bf16.mxu1 %v7358_v53  ;;  %v7445_v51 = vld [vmem:[%s10644_s1 + $0xa84] ss:$16 sps:$4 sm:$0xff]   ;;  %v7448_v53 = vld [vmem:[%s10644_s1 + $0xa8c] ss:$16 sps:$4 sm:$0xff]  }
 0x117   :  { %5113 = vmatpush1.bf16.msra.mxu0 %v7353_v54  ;;  %5646 = vmatpush1.bf16.msra.mxu1 %v7356_v55  ;;  %v7443_v54 = vld [vmem:[%s10644_s1 + $0xa80] ss:$16 sps:$4 sm:$0xff]   ;;  %v7446_v55 = vld [vmem:[%s10644_s1 + $0xa88] ss:$16 sps:$4 sm:$0xff]  }
 0x118   :  { %5114 = vmatprep.subr.bf16.mxu0 %v7361_v56  ;;  %5647 = vmatprep.subr.bf16.mxu1 %v7364_v57  ;;  %v7451_v56 = vld [vmem:[%s10644_s1 + $0xaa4] ss:$16 sps:$4 sm:$0xff]   ;;  %v7454_v57 = vld [vmem:[%s10644_s1 + $0xaac] ss:$16 sps:$4 sm:$0xff]  }
 0x11b   :  { %5115 = vmatpush1.bf16.msra.mxu0 %v7359_v58  ;;  %5648 = vmatpush1.bf16.msra.mxu1 %v7362_v59  ;;  %v7449_v58 = vld [vmem:[%s10644_s1 + $0xaa0] ss:$16 sps:$4 sm:$0xff]   ;;  %v7452_v59 = vld [vmem:[%s10644_s1 + $0xaa8] ss:$16 sps:$4 sm:$0xff]  }
 0x11c   :  { %5116 = vmatprep.subr.bf16.mxu0 %v7367_v60  ;;  %5649 = vmatprep.subr.bf16.mxu1 %v7370_v61  ;;  %v7457_v60 = vld [vmem:[%s10644_s1 + $0xac4] ss:$16 sps:$4 sm:$0xff]   ;;  %v7460_v61 = vld [vmem:[%s10644_s1 + $0xacc] ss:$16 sps:$4 sm:$0xff]  }
 0x11f   :  { %5117 = vmatpush1.bf16.msra.mxu0 %v7365_v62  ;;  %5650 = vmatpush1.bf16.msra.mxu1 %v7368_v63  ;;  %v7455_v62 = vld [vmem:[%s10644_s1 + $0xac0] ss:$16 sps:$4 sm:$0xff]   ;;  %v7458_v63 = vld [vmem:[%s10644_s1 + $0xac8] ss:$16 sps:$4 sm:$0xff]  }
 0x120   :  { %5118 = vmatprep.subr.bf16.mxu0 %v7373_v0  ;;  %5651 = vmatprep.subr.bf16.mxu1 %v7376_v1  ;;  %v7463_v0 = vld [vmem:[%s10644_s1 + $0xae4] ss:$16 sps:$4 sm:$0xff]   ;;  %v7466_v1 = vld [vmem:[%s10644_s1 + $0xaec] ss:$16 sps:$4 sm:$0xff]  }
 0x123   :  { %5119 = vmatpush1.bf16.msra.mxu0 %v7371_v2  ;;  %5652 = vmatpush1.bf16.msra.mxu1 %v7374_v3  ;;  %v7461_v2 = vld [vmem:[%s10644_s1 + $0xae0] ss:$16 sps:$4 sm:$0xff]   ;;  %v7464_v3 = vld [vmem:[%s10644_s1 + $0xae8] ss:$16 sps:$4 sm:$0xff]  }
 0x124   :  { %5120 = vmatprep.subr.bf16.mxu0 %v7379_v4  ;;  %5653 = vmatprep.subr.bf16.mxu1 %v7382_v5  ;;  %v7469_v4 = vld [vmem:[%s10644_s1 + $0xb04] ss:$16 sps:$4 sm:$0xff]   ;;  %v7472_v5 = vld [vmem:[%s10644_s1 + $0xb0c] ss:$16 sps:$4 sm:$0xff]  }
 0x127   :  { %5121 = vmatpush1.bf16.msra.mxu0 %v7377_v6  ;;  %5654 = vmatpush1.bf16.msra.mxu1 %v7380_v7  ;;  %v7467_v6 = vld [vmem:[%s10644_s1 + $0xb00] ss:$16 sps:$4 sm:$0xff]   ;;  %v7470_v7 = vld [vmem:[%s10644_s1 + $0xb08] ss:$16 sps:$4 sm:$0xff]  }
 0x128   :  { %5122 = vmatprep.subr.bf16.mxu0 %v7385_v8  ;;  %5655 = vmatprep.subr.bf16.mxu1 %v7388_v9  ;;  %v7475_v8 = vld [vmem:[%s10644_s1 + $0xb24] ss:$16 sps:$4 sm:$0xff]   ;;  %v7478_v9 = vld [vmem:[%s10644_s1 + $0xb2c] ss:$16 sps:$4 sm:$0xff]  }
 0x12b   :  { %5123 = vmatpush1.bf16.msra.mxu0 %v7383_v10  ;;  %5656 = vmatpush1.bf16.msra.mxu1 %v7386_v11  ;;  %v7473_v10 = vld [vmem:[%s10644_s1 + $0xb20] ss:$16 sps:$4 sm:$0xff]   ;;  %v7476_v11 = vld [vmem:[%s10644_s1 + $0xb28] ss:$16 sps:$4 sm:$0xff]  }
 0x12c   :  { %5124 = vmatprep.subr.bf16.mxu0 %v7391_v12  ;;  %5657 = vmatprep.subr.bf16.mxu1 %v7394_v52  ;;  %v7481_v12 = vld [vmem:[%s10644_s1 + $0xb44] ss:$16 sps:$4 sm:$0xff]   ;;  %v7484_v52 = vld [vmem:[%s10644_s1 + $0xb4c] ss:$16 sps:$4 sm:$0xff]  }
 0x12f   :  { %5125 = vmatpush1.bf16.msra.mxu0 %v7389_v15  ;;  %5658 = vmatpush1.bf16.msra.mxu1 %v7392_v16  ;;  %v7479_v15 = vld [vmem:[%s10644_s1 + $0xb40] ss:$16 sps:$4 sm:$0xff]   ;;  %v7482_v16 = vld [vmem:[%s10644_s1 + $0xb48] ss:$16 sps:$4 sm:$0xff]  }
 0x130   :  { %5126 = vmatprep.subr.bf16.mxu0 %v7397_v17  ;;  %5659 = vmatprep.subr.bf16.mxu1 %v7400_v18  ;;  %v7487_v17 = vld [vmem:[%s10644_s1 + $0xb64] ss:$16 sps:$4 sm:$0xff]   ;;  %v7490_v18 = vld [vmem:[%s10644_s1 + $0xb6c] ss:$16 sps:$4 sm:$0xff]  }
 0x133   :  { %5127 = vmatpush1.bf16.msra.mxu0 %v7395_v19  ;;  %5660 = vmatpush1.bf16.msra.mxu1 %v7398_v20  ;;  %v7485_v19 = vld [vmem:[%s10644_s1 + $0xb60] ss:$16 sps:$4 sm:$0xff]   ;;  %v7488_v20 = vld [vmem:[%s10644_s1 + $0xb68] ss:$16 sps:$4 sm:$0xff]  }
 0x134   :  { %5128 = vmatprep.subr.bf16.mxu0 %v7403_v22  ;;  %5661 = vmatprep.subr.bf16.mxu1 %v7406_v23  ;;  %v7493_v22 = vld [vmem:[%s10644_s1 + $0xb84] ss:$16 sps:$4 sm:$0xff]   ;;  %v7496_v23 = vld [vmem:[%s10644_s1 + $0xb8c] ss:$16 sps:$4 sm:$0xff]  }
 0x137   :  { %5129 = vmatpush1.bf16.msra.mxu0 %v7401_v24  ;;  %5662 = vmatpush1.bf16.msra.mxu1 %v7404_v13  ;;  %v7491_v24 = vld [vmem:[%s10644_s1 + $0xb80] ss:$16 sps:$4 sm:$0xff]   ;;  %v7494_v13 = vld [vmem:[%s10644_s1 + $0xb88] ss:$16 sps:$4 sm:$0xff]  }
 0x138   :  { %5130 = vmatprep.subr.bf16.mxu0 %v7409_v27  ;;  %5663 = vmatprep.subr.bf16.mxu1 %v7412_v28  ;;  %v7499_v27 = vld [vmem:[%s10644_s1 + $0xba4] ss:$16 sps:$4 sm:$0xff]   ;;  %v7502_v28 = vld [vmem:[%s10644_s1 + $0xbac] ss:$16 sps:$4 sm:$0xff]  }
 0x13b   :  { %5131 = vmatpush1.bf16.msra.mxu0 %v7407_v29  ;;  %5664 = vmatpush1.bf16.msra.mxu1 %v7410_v14  ;;  %v7497_v29 = vld [vmem:[%s10644_s1 + $0xba0] ss:$16 sps:$4 sm:$0xff]   ;;  %v7500_v14 = vld [vmem:[%s10644_s1 + $0xba8] ss:$16 sps:$4 sm:$0xff]  }
 0x13c   :  { %5132 = vmatprep.subr.bf16.mxu0 %v7415_v30  ;;  %5665 = vmatprep.subr.bf16.mxu1 %v7418_v31  ;;  %v7505_v30 = vld [vmem:[%s10644_s1 + $0xbc4] ss:$16 sps:$4 sm:$0xff]   ;;  %v7508_v31 = vld [vmem:[%s10644_s1 + $0xbcc] ss:$16 sps:$4 sm:$0xff]  }
 0x13f   :  { %5133 = vmatpush1.bf16.msra.mxu0 %v7413_v25  ;;  %5666 = vmatpush1.bf16.msra.mxu1 %v7416_v32  ;;  %v8117_v25 = vld [vmem:[%s10645_s0 + $0x8] sm:$0xff] }
 0x140   :  { %5143 = vmatprep.subr.bf16.mxu0 %v7421_v33  ;;  %5676 = vmatprep.subr.bf16.mxu1 %v7424_v26  ;;  %v878_v32 = vcombine.high %v8117_v25, %v8117_v25  ;;  %v7503_v33 = vld [vmem:[%s10644_s1 + $0xbc0] ss:$16 sps:$4 sm:$0xff]   ;;  %v7506_v26 = vld [vmem:[%s10644_s1 + $0xbc8] ss:$16 sps:$4 sm:$0xff]  }
 0x141   :  { %v7587_v25 = vld [vmem:[%s10644_s1 + $0xd80] ss:$16 sps:$4 sm:$0xff]  }
 0x142   :  { %5135 = vmatmul.mubr.bf16.vlgmr.msra.gmra.mrb[0].mxu0 %v9163_v35  ;;  %5668 = vmatmul.mubr.bf16.vlgmr.msra.gmra.mrb[0].mxu1 %v9163_v35 }
 0x143   :  { %5144 = vmatpush1.bf16.msra.mxu0 %v7419_v36  ;;  %5677 = vmatpush1.bf16.msra.mxu1 %v7422_v37  ;;  %v7511_v36 = vld [vmem:[%s10644_s1 + $0xbe4] ss:$16 sps:$4 sm:$0xff]   ;;  %v7514_v37 = vld [vmem:[%s10644_s1 + $0xbec] ss:$16 sps:$4 sm:$0xff]  }
 0x144   :  { %5145 = vmatprep.subr.bf16.mxu0 %v7427_v38  ;;  %5678 = vmatprep.subr.bf16.mxu1 %v7430_v21  ;;  %v9353_v38 = vrot.slane %v878_v32, %v8276_v49  ;;  %v7509_v21 = vld [vmem:[%s10644_s1 + $0xbe0] ss:$16 sps:$4 sm:$0xff]   ;;  %v7590_v32 = vld [vmem:[%s10644_s1 + $0xd88] ss:$16 sps:$4 sm:$0xff]  }
 0x145   :  { %5175 = vmatprep.mubr.bf16.mxu0 %v925_v39  ;;  %5708 = vmatprep.mubr.bf16.mxu1 %v925_v39  ;;  %v7512_v39 = vld [vmem:[%s10644_s1 + $0xbe8] ss:$16 sps:$4 sm:$0xff]  }
 0x147   :  { %5146 = vmatpush1.bf16.msra.mxu0 %v7425_v40  ;;  %5679 = vmatpush1.bf16.msra.mxu1 %v7428_v41  ;;  %v7517_v40 = vld [vmem:[%s10644_s1 + $0xc04] ss:$16 sps:$4 sm:$0xff]   ;;  %v7520_v41 = vld [vmem:[%s10644_s1 + $0xc0c] ss:$16 sps:$4 sm:$0xff]  }
 0x148   :  { %5147 = vmatprep.subr.bf16.mxu0 %v7433_v34  ;;  %5680 = vmatprep.subr.bf16.mxu1 %v7436_v43  ;;  %v894_v34 = vcombine.high %v9353_v38, %v9353_v38  ;;  %v923_v43 = vcombine.high %v9163_v35, %v9163_v35  ;;  %v7526_v35 = vld [vmem:[%s10644_s1 + $0xc2c] ss:$16 sps:$4 sm:$0xff]  }
 0x14b   :  { %5148 = vmatpush1.bf16.msra.mxu0 %v7431_v44  ;;  %5681 = vmatpush1.bf16.msra.mxu1 %v7434_v45  ;;  %v7515_v44 = vld [vmem:[%s10644_s1 + $0xc00] ss:$16 sps:$4 sm:$0xff]   ;;  %v7518_v45 = vld [vmem:[%s10644_s1 + $0xc08] ss:$16 sps:$4 sm:$0xff]  }
 0x14c   :  { %5149 = vmatprep.subr.bf16.mxu0 %v7439_v46  ;;  %5682 = vmatprep.subr.bf16.mxu1 %v7442_v47  ;;  %v7523_v46 = vld [vmem:[%s10644_s1 + $0xc24] ss:$16 sps:$4 sm:$0xff]   ;;  %v9384_v47 = vrot.slane %v894_v34, %v8276_v49 }
 0x14d   :  { %v7607_v34 = vld [vmem:[%s10644_s1 + $0xde4] ss:$16 sps:$4 sm:$0xff]  }
 0x14f   :  { %5150 = vmatpush1.bf16.msra.mxu0 %v7437_v48  ;;  %5683 = vmatpush1.bf16.msra.mxu1 %v7440_v50  ;;  %v7521_v48 = vld [vmem:[%s10644_s1 + $0xc20] ss:$16 sps:$4 sm:$0xff]   ;;  %v7524_v50 = vld [vmem:[%s10644_s1 + $0xc28] ss:$16 sps:$4 sm:$0xff]  }
 0x150   :  { %5151 = vmatprep.subr.bf16.mxu0 %v7445_v51  ;;  %5684 = vmatprep.subr.bf16.mxu1 %v7448_v53  ;;  %v7529_v51 = vld [vmem:[%s10644_s1 + $0xc44] ss:$16 sps:$4 sm:$0xff]   ;;  %v7532_v53 = vld [vmem:[%s10644_s1 + $0xc4c] ss:$16 sps:$4 sm:$0xff]  }
 0x153   :  { %5152 = vmatpush1.bf16.msra.mxu0 %v7443_v54  ;;  %5685 = vmatpush1.bf16.msra.mxu1 %v7446_v55  ;;  %v7527_v54 = vld [vmem:[%s10644_s1 + $0xc40] ss:$16 sps:$4 sm:$0xff]   ;;  %v7530_v55 = vld [vmem:[%s10644_s1 + $0xc48] ss:$16 sps:$4 sm:$0xff]  }
 0x154   :  { %5153 = vmatprep.subr.bf16.mxu0 %v7451_v56  ;;  %5686 = vmatprep.subr.bf16.mxu1 %v7454_v57  ;;  %v7535_v56 = vld [vmem:[%s10644_s1 + $0xc64] ss:$16 sps:$4 sm:$0xff]   ;;  %v7538_v57 = vld [vmem:[%s10644_s1 + $0xc6c] ss:$16 sps:$4 sm:$0xff]  }
 0x157   :  { %5154 = vmatpush1.bf16.msra.mxu0 %v7449_v58  ;;  %5687 = vmatpush1.bf16.msra.mxu1 %v7452_v59  ;;  %v7533_v58 = vld [vmem:[%s10644_s1 + $0xc60] ss:$16 sps:$4 sm:$0xff]   ;;  %v7536_v59 = vld [vmem:[%s10644_s1 + $0xc68] ss:$16 sps:$4 sm:$0xff]  }
 0x158   :  { %5155 = vmatprep.subr.bf16.mxu0 %v7457_v60  ;;  %5688 = vmatprep.subr.bf16.mxu1 %v7460_v61  ;;  %v7541_v60 = vld [vmem:[%s10644_s1 + $0xc84] ss:$16 sps:$4 sm:$0xff]   ;;  %v7544_v61 = vld [vmem:[%s10644_s1 + $0xc8c] ss:$16 sps:$4 sm:$0xff]  }
 0x15b   :  { %5156 = vmatpush1.bf16.msra.mxu0 %v7455_v62  ;;  %5689 = vmatpush1.bf16.msra.mxu1 %v7458_v63  ;;  %v7539_v62 = vld [vmem:[%s10644_s1 + $0xc80] ss:$16 sps:$4 sm:$0xff]   ;;  %v7542_v63 = vld [vmem:[%s10644_s1 + $0xc88] ss:$16 sps:$4 sm:$0xff]  }
 0x15c   :  { %5157 = vmatprep.subr.bf16.mxu0 %v7463_v0  ;;  %5690 = vmatprep.subr.bf16.mxu1 %v7466_v1  ;;  %v7547_v0 = vld [vmem:[%s10644_s1 + $0xca4] ss:$16 sps:$4 sm:$0xff]   ;;  %v7550_v1 = vld [vmem:[%s10644_s1 + $0xcac] ss:$16 sps:$4 sm:$0xff]  }
 0x15f   :  { %5158 = vmatpush1.bf16.msra.mxu0 %v7461_v2  ;;  %5691 = vmatpush1.bf16.msra.mxu1 %v7464_v3  ;;  %v7545_v2 = vld [vmem:[%s10644_s1 + $0xca0] ss:$16 sps:$4 sm:$0xff]   ;;  %v7548_v3 = vld [vmem:[%s10644_s1 + $0xca8] ss:$16 sps:$4 sm:$0xff]  }
 0x160   :  { %5159 = vmatprep.subr.bf16.mxu0 %v7469_v4  ;;  %5692 = vmatprep.subr.bf16.mxu1 %v7472_v5  ;;  %v7553_v4 = vld [vmem:[%s10644_s1 + $0xcc4] ss:$16 sps:$4 sm:$0xff]   ;;  %v7556_v5 = vld [vmem:[%s10644_s1 + $0xccc] ss:$16 sps:$4 sm:$0xff]  }
 0x163   :  { %5160 = vmatpush1.bf16.msra.mxu0 %v7467_v6  ;;  %5693 = vmatpush1.bf16.msra.mxu1 %v7470_v7  ;;  %v7551_v6 = vld [vmem:[%s10644_s1 + $0xcc0] ss:$16 sps:$4 sm:$0xff]   ;;  %v7554_v7 = vld [vmem:[%s10644_s1 + $0xcc8] ss:$16 sps:$4 sm:$0xff]  }
 0x164   :  { %5161 = vmatprep.subr.bf16.mxu0 %v7475_v8  ;;  %5694 = vmatprep.subr.bf16.mxu1 %v7478_v9  ;;  %v7559_v8 = vld [vmem:[%s10644_s1 + $0xce4] ss:$16 sps:$4 sm:$0xff]   ;;  %v7562_v9 = vld [vmem:[%s10644_s1 + $0xcec] ss:$16 sps:$4 sm:$0xff]  }
 0x167   :  { %5162 = vmatpush1.bf16.msra.mxu0 %v7473_v10  ;;  %5695 = vmatpush1.bf16.msra.mxu1 %v7476_v11  ;;  %v7557_v10 = vld [vmem:[%s10644_s1 + $0xce0] ss:$16 sps:$4 sm:$0xff]   ;;  %v7560_v11 = vld [vmem:[%s10644_s1 + $0xce8] ss:$16 sps:$4 sm:$0xff]  }
 0x168   :  { %5163 = vmatprep.subr.bf16.mxu0 %v7481_v12  ;;  %5696 = vmatprep.subr.bf16.mxu1 %v7484_v52  ;;  %v7565_v12 = vld [vmem:[%s10644_s1 + $0xd04] ss:$16 sps:$4 sm:$0xff]   ;;  %v7568_v52 = vld [vmem:[%s10644_s1 + $0xd0c] ss:$16 sps:$4 sm:$0xff]  }
 0x16b   :  { %5164 = vmatpush1.bf16.msra.mxu0 %v7479_v15  ;;  %5697 = vmatpush1.bf16.msra.mxu1 %v7482_v16  ;;  %v7563_v15 = vld [vmem:[%s10644_s1 + $0xd00] ss:$16 sps:$4 sm:$0xff]   ;;  %v7566_v16 = vld [vmem:[%s10644_s1 + $0xd08] ss:$16 sps:$4 sm:$0xff]  }
 0x16c   :  { %5165 = vmatprep.subr.bf16.mxu0 %v7487_v17  ;;  %5698 = vmatprep.subr.bf16.mxu1 %v7490_v18  ;;  %v7571_v17 = vld [vmem:[%s10644_s1 + $0xd24] ss:$16 sps:$4 sm:$0xff]   ;;  %v7574_v18 = vld [vmem:[%s10644_s1 + $0xd2c] ss:$16 sps:$4 sm:$0xff]  }
 0x16f   :  { %5166 = vmatpush1.bf16.msra.mxu0 %v7485_v19  ;;  %5699 = vmatpush1.bf16.msra.mxu1 %v7488_v20  ;;  %v7569_v19 = vld [vmem:[%s10644_s1 + $0xd20] ss:$16 sps:$4 sm:$0xff]   ;;  %v7572_v20 = vld [vmem:[%s10644_s1 + $0xd28] ss:$16 sps:$4 sm:$0xff]  }
 0x170   :  { %5167 = vmatprep.subr.bf16.mxu0 %v7493_v22  ;;  %5700 = vmatprep.subr.bf16.mxu1 %v7496_v23  ;;  %v7577_v22 = vld [vmem:[%s10644_s1 + $0xd44] ss:$16 sps:$4 sm:$0xff]   ;;  %v7580_v23 = vld [vmem:[%s10644_s1 + $0xd4c] ss:$16 sps:$4 sm:$0xff]  }
 0x173   :  { %5168 = vmatpush1.bf16.msra.mxu0 %v7491_v24  ;;  %5701 = vmatpush1.bf16.msra.mxu1 %v7494_v13  ;;  %v7575_v24 = vld [vmem:[%s10644_s1 + $0xd40] ss:$16 sps:$4 sm:$0xff]   ;;  %v7578_v13 = vld [vmem:[%s10644_s1 + $0xd48] ss:$16 sps:$4 sm:$0xff]  }
 0x174   :  { %5169 = vmatprep.subr.bf16.mxu0 %v7499_v27  ;;  %5702 = vmatprep.subr.bf16.mxu1 %v7502_v28  ;;  %v7583_v27 = vld [vmem:[%s10644_s1 + $0xd64] ss:$16 sps:$4 sm:$0xff]   ;;  %v7586_v28 = vld [vmem:[%s10644_s1 + $0xd6c] ss:$16 sps:$4 sm:$0xff]  }
 0x177   :  { %5170 = vmatpush1.bf16.msra.mxu0 %v7497_v29  ;;  %5703 = vmatpush1.bf16.msra.mxu1 %v7500_v14  ;;  %v7581_v29 = vld [vmem:[%s10644_s1 + $0xd60] ss:$16 sps:$4 sm:$0xff]   ;;  %v7584_v14 = vld [vmem:[%s10644_s1 + $0xd68] ss:$16 sps:$4 sm:$0xff]  }
 0x178   :  { %5171 = vmatprep.subr.bf16.mxu0 %v7505_v30  ;;  %5704 = vmatprep.subr.bf16.mxu1 %v7508_v31  ;;  %v7589_v30 = vld [vmem:[%s10644_s1 + $0xd84] ss:$16 sps:$4 sm:$0xff]   ;;  %v7592_v31 = vld [vmem:[%s10644_s1 + $0xd8c] ss:$16 sps:$4 sm:$0xff]  }
 0x17b   :  { %5172 = vmatpush1.bf16.msra.mxu0 %v7503_v33  ;;  %5705 = vmatpush1.bf16.msra.mxu1 %v7506_v26  ;;  %v7595_v33 = vld [vmem:[%s10644_s1 + $0xda4] ss:$16 sps:$4 sm:$0xff]   ;;  %v7598_v26 = vld [vmem:[%s10644_s1 + $0xdac] ss:$16 sps:$4 sm:$0xff]  }
 0x17c   :  { %5173 = vmatprep.subr.bf16.mxu0 %v7511_v36  ;;  %5706 = vmatprep.subr.bf16.mxu1 %v7514_v37  ;;  %v7593_v36 = vld [vmem:[%s10644_s1 + $0xda0] ss:$16 sps:$4 sm:$0xff]   ;;  %v7596_v37 = vld [vmem:[%s10644_s1 + $0xda8] ss:$16 sps:$4 sm:$0xff]  }
 0x17f   :  { %5174 = vmatpush1.bf16.msra.mxu0 %v7509_v21  ;;  %5707 = vmatpush1.bf16.msra.mxu1 %v7512_v39  ;;  %v7601_v21 = vld [vmem:[%s10644_s1 + $0xdc4] ss:$16 sps:$4 sm:$0xff]   ;;  %v7604_v39 = vld [vmem:[%s10644_s1 + $0xdcc] ss:$16 sps:$4 sm:$0xff]  }
 0x180   :  { %5184 = vmatprep.subr.bf16.mxu0 %v7517_v40  ;;  %5717 = vmatprep.subr.bf16.mxu1 %v7520_v41  ;;  %v7599_v40 = vld [vmem:[%s10644_s1 + $0xdc0] ss:$16 sps:$4 sm:$0xff]   ;;  %v7602_v41 = vld [vmem:[%s10644_s1 + $0xdc8] ss:$16 sps:$4 sm:$0xff]  }
 0x182   :  { %5176 = vmatmul.mubr.bf16.vlgmr.msra.gmra.mrb[0].mxu0 %v923_v43  ;;  %5709 = vmatmul.mubr.bf16.vlgmr.msra.gmra.mrb[0].mxu1 %v923_v43  ;;  %v7610_v43 = vld [vmem:[%s10644_s1 + $0xdec] ss:$16 sps:$4 sm:$0xff]  }
 0x183   :  { %5185 = vmatpush1.bf16.msra.mxu0 %v7515_v44  ;;  %5718 = vmatpush1.bf16.msra.mxu1 %v7518_v45  ;;  %v7605_v44 = vld [vmem:[%s10644_s1 + $0xde0] ss:$16 sps:$4 sm:$0xff]   ;;  %v7608_v45 = vld [vmem:[%s10644_s1 + $0xde8] ss:$16 sps:$4 sm:$0xff]  }
 0x184   :  { %5186 = vmatprep.subr.bf16.mxu0 %v7523_v46  ;;  %5719 = vmatprep.subr.bf16.mxu1 %v7526_v35  ;;  %v7614_v46 = vld [vmem:[%s10644_s1 + $0xe04] ss:$16 sps:$4 sm:$0xff]   ;;  %v7617_v35 = vld [vmem:[%s10644_s1 + $0xe0c] ss:$16 sps:$4 sm:$0xff]  }
 0x185   :  { %5216 = vmatprep.mubr.bf16.mxu0 %v9384_v47  ;;  %5749 = vmatprep.mubr.bf16.mxu1 %v9384_v47 }
 0x187   :  { %5187 = vmatpush1.bf16.msra.mxu0 %v7521_v48  ;;  %5720 = vmatpush1.bf16.msra.mxu1 %v7524_v50  ;;  %v9570_v48 = vrot.slane %v9353_v38, %v8276_v49  ;;  %v7612_v50 = vld [vmem:[%s10644_s1 + $0xe00] ss:$16 sps:$4 sm:$0xff]   ;;  %v7623_v38 = vld [vmem:[%s10644_s1 + $0xe2c] ss:$16 sps:$4 sm:$0xff]  }
 0x188   :  { %5188 = vmatprep.subr.bf16.mxu0 %v7529_v51  ;;  %5721 = vmatprep.subr.bf16.mxu1 %v7532_v53  ;;  %v7615_v51 = vld [vmem:[%s10644_s1 + $0xe08] ss:$16 sps:$4 sm:$0xff]   ;;  %v7620_v53 = vld [vmem:[%s10644_s1 + $0xe24] ss:$16 sps:$4 sm:$0xff]  }
 0x18b   :  { %5189 = vmatpush1.bf16.msra.mxu0 %v7527_v54  ;;  %5722 = vmatpush1.bf16.msra.mxu1 %v7530_v55  ;;  %v926_v54 = vcombine.high %v9384_v47, %v9384_v47  ;;  %v7618_v55 = vld [vmem:[%s10644_s1 + $0xe20] ss:$16 sps:$4 sm:$0xff]   ;;  %v7626_v47 = vld [vmem:[%s10644_s1 + $0xe44] ss:$16 sps:$4 sm:$0xff]  }
 0x18c   :  { %5190 = vmatprep.subr.bf16.mxu0 %v7535_v56  ;;  %5723 = vmatprep.subr.bf16.mxu1 %v7538_v57  ;;  %v7621_v56 = vld [vmem:[%s10644_s1 + $0xe28] ss:$16 sps:$4 sm:$0xff]   ;;  %v7629_v57 = vld [vmem:[%s10644_s1 + $0xe4c] ss:$16 sps:$4 sm:$0xff]  }
 0x18f   :  { %5191 = vmatpush1.bf16.msra.mxu0 %v7533_v58  ;;  %5724 = vmatpush1.bf16.msra.mxu1 %v7536_v59  ;;  %v7624_v58 = vld [vmem:[%s10644_s1 + $0xe40] ss:$16 sps:$4 sm:$0xff]   ;;  %v7627_v59 = vld [vmem:[%s10644_s1 + $0xe48] ss:$16 sps:$4 sm:$0xff]  }
 0x190   :  { %5192 = vmatprep.subr.bf16.mxu0 %v7541_v60  ;;  %5725 = vmatprep.subr.bf16.mxu1 %v7544_v61  ;;  %v7632_v60 = vld [vmem:[%s10644_s1 + $0xe64] ss:$16 sps:$4 sm:$0xff]   ;;  %v7635_v61 = vld [vmem:[%s10644_s1 + $0xe6c] ss:$16 sps:$4 sm:$0xff]  }
 0x193   :  { %5193 = vmatpush1.bf16.msra.mxu0 %v7539_v62  ;;  %5726 = vmatpush1.bf16.msra.mxu1 %v7542_v63  ;;  %v7630_v62 = vld [vmem:[%s10644_s1 + $0xe60] ss:$16 sps:$4 sm:$0xff]   ;;  %v7633_v63 = vld [vmem:[%s10644_s1 + $0xe68] ss:$16 sps:$4 sm:$0xff]  }
 0x194   :  { %5194 = vmatprep.subr.bf16.mxu0 %v7547_v0  ;;  %5727 = vmatprep.subr.bf16.mxu1 %v7550_v1  ;;  %v7638_v0 = vld [vmem:[%s10644_s1 + $0xe84] ss:$16 sps:$4 sm:$0xff]   ;;  %v7641_v1 = vld [vmem:[%s10644_s1 + $0xe8c] ss:$16 sps:$4 sm:$0xff]  }
 0x197   :  { %5195 = vmatpush1.bf16.msra.mxu0 %v7545_v2  ;;  %5728 = vmatpush1.bf16.msra.mxu1 %v7548_v3  ;;  %v7636_v2 = vld [vmem:[%s10644_s1 + $0xe80] ss:$16 sps:$4 sm:$0xff]   ;;  %v7639_v3 = vld [vmem:[%s10644_s1 + $0xe88] ss:$16 sps:$4 sm:$0xff]  }
 0x198   :  { %5196 = vmatprep.subr.bf16.mxu0 %v7553_v4  ;;  %5729 = vmatprep.subr.bf16.mxu1 %v7556_v5  ;;  %v7644_v4 = vld [vmem:[%s10644_s1 + $0xea4] ss:$16 sps:$4 sm:$0xff]   ;;  %v7647_v5 = vld [vmem:[%s10644_s1 + $0xeac] ss:$16 sps:$4 sm:$0xff]  }
 0x19b   :  { %5197 = vmatpush1.bf16.msra.mxu0 %v7551_v6  ;;  %5730 = vmatpush1.bf16.msra.mxu1 %v7554_v7  ;;  %v7642_v6 = vld [vmem:[%s10644_s1 + $0xea0] ss:$16 sps:$4 sm:$0xff]   ;;  %v7645_v7 = vld [vmem:[%s10644_s1 + $0xea8] ss:$16 sps:$4 sm:$0xff]  }
 0x19c   :  { %5198 = vmatprep.subr.bf16.mxu0 %v7559_v8  ;;  %5731 = vmatprep.subr.bf16.mxu1 %v7562_v9  ;;  %v7650_v8 = vld [vmem:[%s10644_s1 + $0xec4] ss:$16 sps:$4 sm:$0xff]   ;;  %v7653_v9 = vld [vmem:[%s10644_s1 + $0xecc] ss:$16 sps:$4 sm:$0xff]  }
 0x19f   :  { %5199 = vmatpush1.bf16.msra.mxu0 %v7557_v10  ;;  %5732 = vmatpush1.bf16.msra.mxu1 %v7560_v11  ;;  %v7648_v10 = vld [vmem:[%s10644_s1 + $0xec0] ss:$16 sps:$4 sm:$0xff]   ;;  %v7651_v11 = vld [vmem:[%s10644_s1 + $0xec8] ss:$16 sps:$4 sm:$0xff]  }
 0x1a0   :  { %5200 = vmatprep.subr.bf16.mxu0 %v7565_v12  ;;  %5733 = vmatprep.subr.bf16.mxu1 %v7568_v52  ;;  %v7656_v12 = vld [vmem:[%s10644_s1 + $0xee4] ss:$16 sps:$4 sm:$0xff]   ;;  %v7659_v52 = vld [vmem:[%s10644_s1 + $0xeec] ss:$16 sps:$4 sm:$0xff]  }
 0x1a3   :  { %5201 = vmatpush1.bf16.msra.mxu0 %v7563_v15  ;;  %5734 = vmatpush1.bf16.msra.mxu1 %v7566_v16  ;;  %v7654_v15 = vld [vmem:[%s10644_s1 + $0xee0] ss:$16 sps:$4 sm:$0xff]   ;;  %v7657_v16 = vld [vmem:[%s10644_s1 + $0xee8] ss:$16 sps:$4 sm:$0xff]  }
 0x1a4   :  { %5202 = vmatprep.subr.bf16.mxu0 %v7571_v17  ;;  %5735 = vmatprep.subr.bf16.mxu1 %v7574_v18  ;;  %v7662_v17 = vld [vmem:[%s10644_s1 + $0xf04] ss:$16 sps:$4 sm:$0xff]   ;;  %v7665_v18 = vld [vmem:[%s10644_s1 + $0xf0c] ss:$16 sps:$4 sm:$0xff]  }
 0x1a7   :  { %5203 = vmatpush1.bf16.msra.mxu0 %v7569_v19  ;;  %5736 = vmatpush1.bf16.msra.mxu1 %v7572_v20  ;;  %v7660_v19 = vld [vmem:[%s10644_s1 + $0xf00] ss:$16 sps:$4 sm:$0xff]   ;;  %v7663_v20 = vld [vmem:[%s10644_s1 + $0xf08] ss:$16 sps:$4 sm:$0xff]  }
 0x1a8   :  { %5204 = vmatprep.subr.bf16.mxu0 %v7577_v22  ;;  %5737 = vmatprep.subr.bf16.mxu1 %v7580_v23  ;;  %v7668_v22 = vld [vmem:[%s10644_s1 + $0xf24] ss:$16 sps:$4 sm:$0xff]   ;;  %v7671_v23 = vld [vmem:[%s10644_s1 + $0xf2c] ss:$16 sps:$4 sm:$0xff]  }
 0x1ab   :  { %5205 = vmatpush1.bf16.msra.mxu0 %v7575_v24  ;;  %5738 = vmatpush1.bf16.msra.mxu1 %v7578_v13  ;;  %v7666_v24 = vld [vmem:[%s10644_s1 + $0xf20] ss:$16 sps:$4 sm:$0xff]   ;;  %v7669_v13 = vld [vmem:[%s10644_s1 + $0xf28] ss:$16 sps:$4 sm:$0xff]  }
 0x1ac   :  { %5206 = vmatprep.subr.bf16.mxu0 %v7583_v27  ;;  %5739 = vmatprep.subr.bf16.mxu1 %v7586_v28  ;;  %v7674_v27 = vld [vmem:[%s10644_s1 + $0xf44] ss:$16 sps:$4 sm:$0xff]   ;;  %v7677_v28 = vld [vmem:[%s10644_s1 + $0xf4c] ss:$16 sps:$4 sm:$0xff]  }
 0x1af   :  { %5207 = vmatpush1.bf16.msra.mxu0 %v7581_v29  ;;  %5740 = vmatpush1.bf16.msra.mxu1 %v7584_v14  ;;  %v7672_v29 = vld [vmem:[%s10644_s1 + $0xf40] ss:$16 sps:$4 sm:$0xff]   ;;  %v7675_v14 = vld [vmem:[%s10644_s1 + $0xf48] ss:$16 sps:$4 sm:$0xff]  }
 0x1b0   :  { %5208 = vmatprep.subr.bf16.mxu0 %v7589_v30  ;;  %5741 = vmatprep.subr.bf16.mxu1 %v7592_v31  ;;  %v7680_v30 = vld [vmem:[%s10644_s1 + $0xf64] ss:$16 sps:$4 sm:$0xff]   ;;  %v7683_v31 = vld [vmem:[%s10644_s1 + $0xf6c] ss:$16 sps:$4 sm:$0xff]  }
 0x1b3   :  { %5209 = vmatpush1.bf16.msra.mxu0 %v7587_v25  ;;  %5742 = vmatpush1.bf16.msra.mxu1 %v7590_v32  ;;  %v7678_v25 = vld [vmem:[%s10644_s1 + $0xf60] ss:$16 sps:$4 sm:$0xff]   ;;  %v7681_v32 = vld [vmem:[%s10644_s1 + $0xf68] ss:$16 sps:$4 sm:$0xff]  }
 0x1b4   :  { %5210 = vmatprep.subr.bf16.mxu0 %v7595_v33  ;;  %5743 = vmatprep.subr.bf16.mxu1 %v7598_v26  ;;  %v7686_v33 = vld [vmem:[%s10644_s1 + $0xf84] ss:$16 sps:$4 sm:$0xff]   ;;  %v7689_v26 = vld [vmem:[%s10644_s1 + $0xf8c] ss:$16 sps:$4 sm:$0xff]  }
 0x1b7   :  { %5211 = vmatpush1.bf16.msra.mxu0 %v7593_v36  ;;  %5744 = vmatpush1.bf16.msra.mxu1 %v7596_v37  ;;  %v7684_v36 = vld [vmem:[%s10644_s1 + $0xf80] ss:$16 sps:$4 sm:$0xff]   ;;  %v7687_v37 = vld [vmem:[%s10644_s1 + $0xf88] ss:$16 sps:$4 sm:$0xff]  }
 0x1b8   :  { %5212 = vmatprep.subr.bf16.mxu0 %v7601_v21  ;;  %5745 = vmatprep.subr.bf16.mxu1 %v7604_v39  ;;  %v7692_v21 = vld [vmem:[%s10644_s1 + $0xfa4] ss:$16 sps:$4 sm:$0xff]   ;;  %v7695_v39 = vld [vmem:[%s10644_s1 + $0xfac] ss:$16 sps:$4 sm:$0xff]  }
 0x1bb   :  { %5213 = vmatpush1.bf16.msra.mxu0 %v7599_v40  ;;  %5746 = vmatpush1.bf16.msra.mxu1 %v7602_v41  ;;  %v7690_v40 = vld [vmem:[%s10644_s1 + $0xfa0] ss:$16 sps:$4 sm:$0xff]   ;;  %v7693_v41 = vld [vmem:[%s10644_s1 + $0xfa8] ss:$16 sps:$4 sm:$0xff]  }
 0x1bc   :  { %5214 = vmatprep.subr.bf16.mxu0 %v7607_v34  ;;  %5747 = vmatprep.subr.bf16.mxu1 %v7610_v43  ;;  %v7698_v34 = vld [vmem:[%s10644_s1 + $0xfc4] ss:$16 sps:$4 sm:$0xff]   ;;  %v7701_v43 = vld [vmem:[%s10644_s1 + $0xfcc] ss:$16 sps:$4 sm:$0xff]  }
 0x1bf   :  { %5215 = vmatpush1.bf16.msra.mxu0 %v7605_v44  ;;  %5748 = vmatpush1.bf16.msra.mxu1 %v7608_v45  ;;  %v9747_v44 = vld [vmem:[%s10645_s0 + $0x10] sm:$0xff] }
 0x1c0   :  { %5225 = vmatprep.subr.bf16.mxu0 %v7614_v46  ;;  %5758 = vmatprep.subr.bf16.mxu1 %v7617_v35  ;;  %v7696_v45 = vld [vmem:[%s10644_s1 + $0xfc0] ss:$16 sps:$4 sm:$0xff]   ;;  %v7699_v46 = vld [vmem:[%s10644_s1 + $0xfc8] ss:$16 sps:$4 sm:$0xff]   ;;  %v7704_v35 = vld [vmem:[%s10644_s1 + $0xfe4] ss:$16 sps:$4 sm:$0xff]  }
 0x1c2   :  { %5217 = vmatmul.mubr.bf16.vlgmr.msra.gmra.mrb[0].mxu0 %v9570_v48  ;;  %5750 = vmatmul.mubr.bf16.vlgmr.msra.gmra.mrb[0].mxu1 %v9570_v48 }
 0x1c3   :  { %5226 = vmatpush1.bf16.msra.mxu0 %v7612_v50  ;;  %5759 = vmatpush1.bf16.msra.mxu1 %v7615_v51  ;;  %v7707_v50 = vld [vmem:[%s10644_s1 + $0xfec] ss:$16 sps:$4 sm:$0xff]   ;;  %v9763_v51 = vrot.slane %v9747_v44, %v8276_v49 }
 0x1c4   :  { %5227 = vmatprep.subr.bf16.mxu0 %v7620_v53  ;;  %5760 = vmatprep.subr.bf16.mxu1 %v7623_v38  ;;  %v7702_v53 = vld [vmem:[%s10644_s1 + $0xfe0] ss:$16 sps:$4 sm:$0xff]   ;;  %v7705_v38 = vld [vmem:[%s10644_s1 + $0xfe8] ss:$16 sps:$4 sm:$0xff]  }
 0x1c5   :  { %5257 = vmatprep.mubr.bf16.mxu0 %v926_v54  ;;  %5790 = vmatprep.mubr.bf16.mxu1 %v926_v54  ;;  %v7710_v54 = vld [vmem:[%s10644_s1 + $0x1004] ss:$16 sps:$4 sm:$0xff]  }
 0x1c7   :  { %5228 = vmatpush1.bf16.msra.mxu0 %v7618_v55  ;;  %5761 = vmatpush1.bf16.msra.mxu1 %v7621_v56  ;;  %v7713_v55 = vld [vmem:[%s10644_s1 + $0x100c] ss:$16 sps:$4 sm:$0xff]   ;;  %v942_v56 = vcombine.high %v9763_v51, %v9763_v51 }
 0x1c8   :  { %5229 = vmatprep.subr.bf16.mxu0 %v7626_v47  ;;  %5762 = vmatprep.subr.bf16.mxu1 %v7629_v57  ;;  %v924_v47 = vcombine.high %v9570_v48, %v9570_v48  ;;  %v7708_v57 = vld [vmem:[%s10644_s1 + $0x1000] ss:$16 sps:$4 sm:$0xff]   ;;  %v7719_v48 = vld [vmem:[%s10644_s1 + $0x102c] ss:$16 sps:$4 sm:$0xff]  }
 0x1cb   :  { %5230 = vmatpush1.bf16.msra.mxu0 %v7624_v58  ;;  %5763 = vmatpush1.bf16.msra.mxu1 %v7627_v59  ;;  %v7711_v58 = vld [vmem:[%s10644_s1 + $0x1008] ss:$16 sps:$4 sm:$0xff]   ;;  %v7716_v59 = vld [vmem:[%s10644_s1 + $0x1024] ss:$16 sps:$4 sm:$0xff]  }
 0x1cc   :  { %5231 = vmatprep.subr.bf16.mxu0 %v7632_v60  ;;  %5764 = vmatprep.subr.bf16.mxu1 %v7635_v61  ;;  %v9794_v60 = vrot.slane %v942_v56, %v8276_v49  ;;  %v7714_v61 = vld [vmem:[%s10644_s1 + $0x1020] ss:$16 sps:$4 sm:$0xff]   ;;  %v7795_v56 = vld [vmem:[%s10644_s1 + $0x11c8] ss:$16 sps:$4 sm:$0xff]  }
 0x1cf   :  { %5232 = vmatpush1.bf16.msra.mxu0 %v7630_v62  ;;  %5765 = vmatpush1.bf16.msra.mxu1 %v7633_v63  ;;  %v7717_v62 = vld [vmem:[%s10644_s1 + $0x1028] ss:$16 sps:$4 sm:$0xff]   ;;  %v7722_v63 = vld [vmem:[%s10644_s1 + $0x1044] ss:$16 sps:$4 sm:$0xff]  }
 0x1d0   :  { %5233 = vmatprep.subr.bf16.mxu0 %v7638_v0  ;;  %5766 = vmatprep.subr.bf16.mxu1 %v7641_v1  ;;  %v7725_v0 = vld [vmem:[%s10644_s1 + $0x104c] ss:$16 sps:$4 sm:$0xff]   ;;  %v7720_v1 = vld [vmem:[%s10644_s1 + $0x1040] ss:$16 sps:$4 sm:$0xff]  }
 0x1d3   :  { %5234 = vmatpush1.bf16.msra.mxu0 %v7636_v2  ;;  %5767 = vmatpush1.bf16.msra.mxu1 %v7639_v3  ;;  %v7723_v2 = vld [vmem:[%s10644_s1 + $0x1048] ss:$16 sps:$4 sm:$0xff]   ;;  %v7728_v3 = vld [vmem:[%s10644_s1 + $0x1064] ss:$16 sps:$4 sm:$0xff]  }
 0x1d4   :  { %5235 = vmatprep.subr.bf16.mxu0 %v7644_v4  ;;  %5768 = vmatprep.subr.bf16.mxu1 %v7647_v5  ;;  %v7731_v4 = vld [vmem:[%s10644_s1 + $0x106c] ss:$16 sps:$4 sm:$0xff]   ;;  %v7726_v5 = vld [vmem:[%s10644_s1 + $0x1060] ss:$16 sps:$4 sm:$0xff]  }
 0x1d7   :  { %5236 = vmatpush1.bf16.msra.mxu0 %v7642_v6  ;;  %5769 = vmatpush1.bf16.msra.mxu1 %v7645_v7  ;;  %v7729_v6 = vld [vmem:[%s10644_s1 + $0x1068] ss:$16 sps:$4 sm:$0xff]   ;;  %v7734_v7 = vld [vmem:[%s10644_s1 + $0x1084] ss:$16 sps:$4 sm:$0xff]  }
 0x1d8   :  { %5237 = vmatprep.subr.bf16.mxu0 %v7650_v8  ;;  %5770 = vmatprep.subr.bf16.mxu1 %v7653_v9  ;;  %v7737_v8 = vld [vmem:[%s10644_s1 + $0x108c] ss:$16 sps:$4 sm:$0xff]   ;;  %v7732_v9 = vld [vmem:[%s10644_s1 + $0x1080] ss:$16 sps:$4 sm:$0xff]  }
 0x1db   :  { %5238 = vmatpush1.bf16.msra.mxu0 %v7648_v10  ;;  %5771 = vmatpush1.bf16.msra.mxu1 %v7651_v11  ;;  %v7735_v10 = vld [vmem:[%s10644_s1 + $0x1088] ss:$16 sps:$4 sm:$0xff]   ;;  %v7740_v11 = vld [vmem:[%s10644_s1 + $0x10a4] ss:$16 sps:$4 sm:$0xff]  }
 0x1dc   :  { %5239 = vmatprep.subr.bf16.mxu0 %v7656_v12  ;;  %5772 = vmatprep.subr.bf16.mxu1 %v7659_v52  ;;  %v7743_v12 = vld [vmem:[%s10644_s1 + $0x10ac] ss:$16 sps:$4 sm:$0xff]   ;;  %v7738_v52 = vld [vmem:[%s10644_s1 + $0x10a0] ss:$16 sps:$4 sm:$0xff]  }
 0x1df   :  { %5240 = vmatpush1.bf16.msra.mxu0 %v7654_v15  ;;  %5773 = vmatpush1.bf16.msra.mxu1 %v7657_v16  ;;  %v7741_v15 = vld [vmem:[%s10644_s1 + $0x10a8] ss:$16 sps:$4 sm:$0xff]   ;;  %v7746_v16 = vld [vmem:[%s10644_s1 + $0x10c4] ss:$16 sps:$4 sm:$0xff]  }
 0x1e0   :  { %5241 = vmatprep.subr.bf16.mxu0 %v7662_v17  ;;  %5774 = vmatprep.subr.bf16.mxu1 %v7665_v18  ;;  %v7749_v17 = vld [vmem:[%s10644_s1 + $0x10cc] ss:$16 sps:$4 sm:$0xff]   ;;  %v7744_v18 = vld [vmem:[%s10644_s1 + $0x10c0] ss:$16 sps:$4 sm:$0xff]  }
 0x1e3   :  { %5242 = vmatpush1.bf16.msra.mxu0 %v7660_v19  ;;  %5775 = vmatpush1.bf16.msra.mxu1 %v7663_v20  ;;  %v7747_v19 = vld [vmem:[%s10644_s1 + $0x10c8] ss:$16 sps:$4 sm:$0xff]   ;;  %v7752_v20 = vld [vmem:[%s10644_s1 + $0x10e4] ss:$16 sps:$4 sm:$0xff]  }
 0x1e4   :  { %5243 = vmatprep.subr.bf16.mxu0 %v7668_v22  ;;  %5776 = vmatprep.subr.bf16.mxu1 %v7671_v23  ;;  %v7755_v22 = vld [vmem:[%s10644_s1 + $0x10ec] ss:$16 sps:$4 sm:$0xff]   ;;  %v7750_v23 = vld [vmem:[%s10644_s1 + $0x10e0] ss:$16 sps:$4 sm:$0xff]  }
 0x1e7   :  { %5244 = vmatpush1.bf16.msra.mxu0 %v7666_v24  ;;  %5777 = vmatpush1.bf16.msra.mxu1 %v7669_v13  ;;  %v7753_v24 = vld [vmem:[%s10644_s1 + $0x10e8] ss:$16 sps:$4 sm:$0xff]   ;;  %v7758_v13 = vld [vmem:[%s10644_s1 + $0x1104] ss:$16 sps:$4 sm:$0xff]  }
 0x1e8   :  { %5245 = vmatprep.subr.bf16.mxu0 %v7674_v27  ;;  %5778 = vmatprep.subr.bf16.mxu1 %v7677_v28  ;;  %v7761_v27 = vld [vmem:[%s10644_s1 + $0x110c] ss:$16 sps:$4 sm:$0xff]   ;;  %v7756_v28 = vld [vmem:[%s10644_s1 + $0x1100] ss:$16 sps:$4 sm:$0xff]  }
 0x1eb   :  { %5246 = vmatpush1.bf16.msra.mxu0 %v7672_v29  ;;  %5779 = vmatpush1.bf16.msra.mxu1 %v7675_v14  ;;  %v7759_v29 = vld [vmem:[%s10644_s1 + $0x1108] ss:$16 sps:$4 sm:$0xff]   ;;  %v7764_v14 = vld [vmem:[%s10644_s1 + $0x1124] ss:$16 sps:$4 sm:$0xff]  }
 0x1ec   :  { %5247 = vmatprep.subr.bf16.mxu0 %v7680_v30  ;;  %5780 = vmatprep.subr.bf16.mxu1 %v7683_v31  ;;  %v7767_v30 = vld [vmem:[%s10644_s1 + $0x112c] ss:$16 sps:$4 sm:$0xff]   ;;  %v7762_v31 = vld [vmem:[%s10644_s1 + $0x1120] ss:$16 sps:$4 sm:$0xff]  }
 0x1ef   :  { %5248 = vmatpush1.bf16.msra.mxu0 %v7678_v25  ;;  %5781 = vmatpush1.bf16.msra.mxu1 %v7681_v32  ;;  %v7765_v25 = vld [vmem:[%s10644_s1 + $0x1128] ss:$16 sps:$4 sm:$0xff]   ;;  %v7770_v32 = vld [vmem:[%s10644_s1 + $0x1144] ss:$16 sps:$4 sm:$0xff]  }
 0x1f0   :  { %5249 = vmatprep.subr.bf16.mxu0 %v7686_v33  ;;  %5782 = vmatprep.subr.bf16.mxu1 %v7689_v26  ;;  %v7773_v33 = vld [vmem:[%s10644_s1 + $0x114c] ss:$16 sps:$4 sm:$0xff]   ;;  %v7768_v26 = vld [vmem:[%s10644_s1 + $0x1140] ss:$16 sps:$4 sm:$0xff]  }
 0x1f3   :  { %5250 = vmatpush1.bf16.msra.mxu0 %v7684_v36  ;;  %5783 = vmatpush1.bf16.msra.mxu1 %v7687_v37  ;;  %v7771_v36 = vld [vmem:[%s10644_s1 + $0x1148] ss:$16 sps:$4 sm:$0xff]   ;;  %v7776_v37 = vld [vmem:[%s10644_s1 + $0x1164] ss:$16 sps:$4 sm:$0xff]  }
 0x1f4   :  { %5251 = vmatprep.subr.bf16.mxu0 %v7692_v21  ;;  %5784 = vmatprep.subr.bf16.mxu1 %v7695_v39  ;;  %v7779_v21 = vld [vmem:[%s10644_s1 + $0x116c] ss:$16 sps:$4 sm:$0xff]   ;;  %v7774_v39 = vld [vmem:[%s10644_s1 + $0x1160] ss:$16 sps:$4 sm:$0xff]  }
 0x1f7   :  { %5252 = vmatpush1.bf16.msra.mxu0 %v7690_v40  ;;  %5785 = vmatpush1.bf16.msra.mxu1 %v7693_v41  ;;  %v7777_v40 = vld [vmem:[%s10644_s1 + $0x1168] ss:$16 sps:$4 sm:$0xff]   ;;  %v7782_v41 = vld [vmem:[%s10644_s1 + $0x1184] ss:$16 sps:$4 sm:$0xff]  }
 0x1f8   :  { %5253 = vmatprep.subr.bf16.mxu0 %v7698_v34  ;;  %5786 = vmatprep.subr.bf16.mxu1 %v7701_v43  ;;  %v7785_v34 = vld [vmem:[%s10644_s1 + $0x118c] ss:$16 sps:$4 sm:$0xff]   ;;  %v7780_v43 = vld [vmem:[%s10644_s1 + $0x1180] ss:$16 sps:$4 sm:$0xff]  }
 0x1fb   :  { %5254 = vmatpush1.bf16.msra.mxu0 %v7696_v45  ;;  %5787 = vmatpush1.bf16.msra.mxu1 %v7699_v46  ;;  %v7783_v45 = vld [vmem:[%s10644_s1 + $0x1188] ss:$16 sps:$4 sm:$0xff]   ;;  %v7788_v46 = vld [vmem:[%s10644_s1 + $0x11a4] ss:$16 sps:$4 sm:$0xff]  }
 0x1fc   :  { %5255 = vmatprep.subr.bf16.mxu0 %v7704_v35  ;;  %5788 = vmatprep.subr.bf16.mxu1 %v7707_v50  ;;  %v7791_v35 = vld [vmem:[%s10644_s1 + $0x11ac] ss:$16 sps:$4 sm:$0xff]   ;;  %v7786_v50 = vld [vmem:[%s10644_s1 + $0x11a0] ss:$16 sps:$4 sm:$0xff]  }
 0x1ff   :  { %5256 = vmatpush1.bf16.msra.mxu0 %v7702_v53  ;;  %5789 = vmatpush1.bf16.msra.mxu1 %v7705_v38  ;;  %v7789_v53 = vld [vmem:[%s10644_s1 + $0x11a8] ss:$16 sps:$4 sm:$0xff]   ;;  %v7794_v38 = vld [vmem:[%s10644_s1 + $0x11c4] ss:$16 sps:$4 sm:$0xff]  }
 0x200   :  { %5266 = vmatprep.subr.bf16.mxu0 %v7710_v54  ;;  %5799 = vmatprep.subr.bf16.mxu1 %v7713_v55  ;;  %v7797_v54 = vld [vmem:[%s10644_s1 + $0x11cc] ss:$16 sps:$4 sm:$0xff]   ;;  %v7792_v55 = vld [vmem:[%s10644_s1 + $0x11c0] ss:$16 sps:$4 sm:$0xff]  }
 0x202   :  { %5258 = vmatmul.mubr.bf16.vlgmr.msra.gmra.mrb[0].mxu0 %v924_v47  ;;  %5791 = vmatmul.mubr.bf16.vlgmr.msra.gmra.mrb[0].mxu1 %v924_v47  ;;  %v7800_v47 = vld [vmem:[%s10644_s1 + $0x11e4] ss:$16 sps:$4 sm:$0xff]  }
 0x203   :  { %5267 = vmatpush1.bf16.msra.mxu0 %v7708_v57  ;;  %5800 = vmatpush1.bf16.msra.mxu1 %v7711_v58  ;;  %v7803_v57 = vld [vmem:[%s10644_s1 + $0x11ec] ss:$16 sps:$4 sm:$0xff]   ;;  %v7798_v58 = vld [vmem:[%s10644_s1 + $0x11e0] ss:$16 sps:$4 sm:$0xff]  }
 0x204   :  { %5268 = vmatprep.subr.bf16.mxu0 %v7716_v59  ;;  %5801 = vmatprep.subr.bf16.mxu1 %v7719_v48  ;;  %v7801_v59 = vld [vmem:[%s10644_s1 + $0x11e8] ss:$16 sps:$4 sm:$0xff]   ;;  %v7806_v48 = vld [vmem:[%s10644_s1 + $0x1204] ss:$16 sps:$4 sm:$0xff]  }
 0x205   :  { %5298 = vmatprep.mubr.bf16.mxu0 %v9794_v60  ;;  %5831 = vmatprep.mubr.bf16.mxu1 %v9794_v60 }
 0x207   :  { %5269 = vmatpush1.bf16.msra.mxu0 %v7714_v61  ;;  %5802 = vmatpush1.bf16.msra.mxu1 %v7717_v62  ;;  %v7809_v61 = vld [vmem:[%s10644_s1 + $0x120c] ss:$16 sps:$4 sm:$0xff]   ;;  %v9980_v62 = vrot.slane %v9763_v51, %v8276_v49 }
 0x208   :  { %5270 = vmatprep.subr.bf16.mxu0 %v7722_v63  ;;  %5803 = vmatprep.subr.bf16.mxu1 %v7725_v0  ;;  %v7804_v63 = vld [vmem:[%s10644_s1 + $0x1200] ss:$16 sps:$4 sm:$0xff]   ;;  %v7807_v0 = vld [vmem:[%s10644_s1 + $0x1208] ss:$16 sps:$4 sm:$0xff]   ;;  %v7815_v51 = vld [vmem:[%s10644_s1 + $0x122c] ss:$16 sps:$4 sm:$0xff]  }
 0x20b   :  { %5271 = vmatpush1.bf16.msra.mxu0 %v7720_v1  ;;  %5804 = vmatpush1.bf16.msra.mxu1 %v7723_v2  ;;  %v7812_v1 = vld [vmem:[%s10644_s1 + $0x1224] ss:$16 sps:$4 sm:$0xff]   ;;  %v974_v2 = vcombine.high %v9794_v60, %v9794_v60 }
 0x20c   :  { %5272 = vmatprep.subr.bf16.mxu0 %v7728_v3  ;;  %5805 = vmatprep.subr.bf16.mxu1 %v7731_v4  ;;  %v7810_v3 = vld [vmem:[%s10644_s1 + $0x1220] ss:$16 sps:$4 sm:$0xff]   ;;  %v7813_v4 = vld [vmem:[%s10644_s1 + $0x1228] ss:$16 sps:$4 sm:$0xff]   ;;  %v7818_v60 = vld [vmem:[%s10644_s1 + $0x1244] ss:$16 sps:$4 sm:$0xff]  }
 0x20f   :  { %5273 = vmatpush1.bf16.msra.mxu0 %v7726_v5  ;;  %5806 = vmatpush1.bf16.msra.mxu1 %v7729_v6  ;;  %v7821_v5 = vld [vmem:[%s10644_s1 + $0x124c] ss:$16 sps:$4 sm:$0xff]   ;;  %v7816_v6 = vld [vmem:[%s10644_s1 + $0x1240] ss:$16 sps:$4 sm:$0xff]  }
 0x210   :  { %5274 = vmatprep.subr.bf16.mxu0 %v7734_v7  ;;  %5807 = vmatprep.subr.bf16.mxu1 %v7737_v8  ;;  %v7819_v7 = vld [vmem:[%s10644_s1 + $0x1248] ss:$16 sps:$4 sm:$0xff]   ;;  %v7824_v8 = vld [vmem:[%s10644_s1 + $0x1264] ss:$16 sps:$4 sm:$0xff]  }
 0x213   :  { %5275 = vmatpush1.bf16.msra.mxu0 %v7732_v9  ;;  %5808 = vmatpush1.bf16.msra.mxu1 %v7735_v10  ;;  %v7827_v9 = vld [vmem:[%s10644_s1 + $0x126c] ss:$16 sps:$4 sm:$0xff]   ;;  %v7822_v10 = vld [vmem:[%s10644_s1 + $0x1260] ss:$16 sps:$4 sm:$0xff]  }
 0x214   :  { %5276 = vmatprep.subr.bf16.mxu0 %v7740_v11  ;;  %5809 = vmatprep.subr.bf16.mxu1 %v7743_v12  ;;  %v7825_v11 = vld [vmem:[%s10644_s1 + $0x1268] ss:$16 sps:$4 sm:$0xff]   ;;  %v7830_v12 = vld [vmem:[%s10644_s1 + $0x1284] ss:$16 sps:$4 sm:$0xff]  }
 0x217   :  { %5277 = vmatpush1.bf16.msra.mxu0 %v7738_v52  ;;  %5810 = vmatpush1.bf16.msra.mxu1 %v7741_v15  ;;  %v7833_v52 = vld [vmem:[%s10644_s1 + $0x128c] ss:$16 sps:$4 sm:$0xff]   ;;  %v7828_v15 = vld [vmem:[%s10644_s1 + $0x1280] ss:$16 sps:$4 sm:$0xff]  }
 0x218   :  { %5278 = vmatprep.subr.bf16.mxu0 %v7746_v16  ;;  %5811 = vmatprep.subr.bf16.mxu1 %v7749_v17  ;;  %v7831_v16 = vld [vmem:[%s10644_s1 + $0x1288] ss:$16 sps:$4 sm:$0xff]   ;;  %v7836_v17 = vld [vmem:[%s10644_s1 + $0x12a4] ss:$16 sps:$4 sm:$0xff]  }
 0x21b   :  { %5279 = vmatpush1.bf16.msra.mxu0 %v7744_v18  ;;  %5812 = vmatpush1.bf16.msra.mxu1 %v7747_v19  ;;  %v7839_v18 = vld [vmem:[%s10644_s1 + $0x12ac] ss:$16 sps:$4 sm:$0xff]   ;;  %v7834_v19 = vld [vmem:[%s10644_s1 + $0x12a0] ss:$16 sps:$4 sm:$0xff]  }
 0x21c   :  { %5280 = vmatprep.subr.bf16.mxu0 %v7752_v20  ;;  %5813 = vmatprep.subr.bf16.mxu1 %v7755_v22  ;;  %v7837_v20 = vld [vmem:[%s10644_s1 + $0x12a8] ss:$16 sps:$4 sm:$0xff]   ;;  %v7842_v22 = vld [vmem:[%s10644_s1 + $0x12c4] ss:$16 sps:$4 sm:$0xff]  }
 0x21f   :  { %5281 = vmatpush1.bf16.msra.mxu0 %v7750_v23  ;;  %5814 = vmatpush1.bf16.msra.mxu1 %v7753_v24  ;;  %v7845_v23 = vld [vmem:[%s10644_s1 + $0x12cc] ss:$16 sps:$4 sm:$0xff]   ;;  %v7840_v24 = vld [vmem:[%s10644_s1 + $0x12c0] ss:$16 sps:$4 sm:$0xff]  }
 0x220   :  { %5282 = vmatprep.subr.bf16.mxu0 %v7758_v13  ;;  %5815 = vmatprep.subr.bf16.mxu1 %v7761_v27  ;;  %v7843_v13 = vld [vmem:[%s10644_s1 + $0x12c8] ss:$16 sps:$4 sm:$0xff]   ;;  %v7848_v27 = vld [vmem:[%s10644_s1 + $0x12e4] ss:$16 sps:$4 sm:$0xff]  }
 0x223   :  { %5283 = vmatpush1.bf16.msra.mxu0 %v7756_v28  ;;  %5816 = vmatpush1.bf16.msra.mxu1 %v7759_v29  ;;  %v7851_v28 = vld [vmem:[%s10644_s1 + $0x12ec] ss:$16 sps:$4 sm:$0xff]   ;;  %v7846_v29 = vld [vmem:[%s10644_s1 + $0x12e0] ss:$16 sps:$4 sm:$0xff]  }
 0x224   :  { %5284 = vmatprep.subr.bf16.mxu0 %v7764_v14  ;;  %5817 = vmatprep.subr.bf16.mxu1 %v7767_v30  ;;  %v7849_v14 = vld [vmem:[%s10644_s1 + $0x12e8] ss:$16 sps:$4 sm:$0xff]   ;;  %v7854_v30 = vld [vmem:[%s10644_s1 + $0x1304] ss:$16 sps:$4 sm:$0xff]  }
 0x227   :  { %5285 = vmatpush1.bf16.msra.mxu0 %v7762_v31  ;;  %5818 = vmatpush1.bf16.msra.mxu1 %v7765_v25  ;;  %v7857_v31 = vld [vmem:[%s10644_s1 + $0x130c] ss:$16 sps:$4 sm:$0xff]   ;;  %v7852_v25 = vld [vmem:[%s10644_s1 + $0x1300] ss:$16 sps:$4 sm:$0xff]  }
 0x228   :  { %5286 = vmatprep.subr.bf16.mxu0 %v7770_v32  ;;  %5819 = vmatprep.subr.bf16.mxu1 %v7773_v33  ;;  %v7855_v32 = vld [vmem:[%s10644_s1 + $0x1308] ss:$16 sps:$4 sm:$0xff]   ;;  %v7860_v33 = vld [vmem:[%s10644_s1 + $0x1324] ss:$16 sps:$4 sm:$0xff]  }
 0x22b   :  { %5287 = vmatpush1.bf16.msra.mxu0 %v7768_v26  ;;  %5820 = vmatpush1.bf16.msra.mxu1 %v7771_v36  ;;  %v7863_v26 = vld [vmem:[%s10644_s1 + $0x132c] ss:$16 sps:$4 sm:$0xff]   ;;  %v7858_v36 = vld [vmem:[%s10644_s1 + $0x1320] ss:$16 sps:$4 sm:$0xff]  }
 0x22c   :  { %5288 = vmatprep.subr.bf16.mxu0 %v7776_v37  ;;  %5821 = vmatprep.subr.bf16.mxu1 %v7779_v21  ;;  %v7861_v37 = vld [vmem:[%s10644_s1 + $0x1328] ss:$16 sps:$4 sm:$0xff]   ;;  %v7866_v21 = vld [vmem:[%s10644_s1 + $0x1344] ss:$16 sps:$4 sm:$0xff]  }
 0x22f   :  { %5289 = vmatpush1.bf16.msra.mxu0 %v7774_v39  ;;  %5822 = vmatpush1.bf16.msra.mxu1 %v7777_v40  ;;  %v7869_v39 = vld [vmem:[%s10644_s1 + $0x134c] ss:$16 sps:$4 sm:$0xff]   ;;  %v7864_v40 = vld [vmem:[%s10644_s1 + $0x1340] ss:$16 sps:$4 sm:$0xff]  }
 0x230   :  { %5290 = vmatprep.subr.bf16.mxu0 %v7782_v41  ;;  %5823 = vmatprep.subr.bf16.mxu1 %v7785_v34  ;;  %v7867_v41 = vld [vmem:[%s10644_s1 + $0x1348] ss:$16 sps:$4 sm:$0xff]   ;;  %v7872_v34 = vld [vmem:[%s10644_s1 + $0x1364] ss:$16 sps:$4 sm:$0xff]  }
 0x233   :  { %5291 = vmatpush1.bf16.msra.mxu0 %v7780_v43  ;;  %5824 = vmatpush1.bf16.msra.mxu1 %v7783_v45  ;;  %v7875_v43 = vld [vmem:[%s10644_s1 + $0x136c] ss:$16 sps:$4 sm:$0xff]   ;;  %v7870_v45 = vld [vmem:[%s10644_s1 + $0x1360] ss:$16 sps:$4 sm:$0xff]  }
 0x234   :  { %5292 = vmatprep.subr.bf16.mxu0 %v7788_v46  ;;  %5825 = vmatprep.subr.bf16.mxu1 %v7791_v35  ;;  %v7873_v46 = vld [vmem:[%s10644_s1 + $0x1368] ss:$16 sps:$4 sm:$0xff]   ;;  %v7878_v35 = vld [vmem:[%s10644_s1 + $0x1384] ss:$16 sps:$4 sm:$0xff]  }
 0x237   :  { %5293 = vmatpush1.bf16.msra.mxu0 %v7786_v50  ;;  %5826 = vmatpush1.bf16.msra.mxu1 %v7789_v53  ;;  %v7881_v50 = vld [vmem:[%s10644_s1 + $0x138c] ss:$16 sps:$4 sm:$0xff]   ;;  %v7876_v53 = vld [vmem:[%s10644_s1 + $0x1380] ss:$16 sps:$4 sm:$0xff]  }
 0x238   :  { %5294 = vmatprep.subr.bf16.mxu0 %v7794_v38  ;;  %5827 = vmatprep.subr.bf16.mxu1 %v7797_v54  ;;  %v7879_v38 = vld [vmem:[%s10644_s1 + $0x1388] ss:$16 sps:$4 sm:$0xff]   ;;  %v7884_v54 = vld [vmem:[%s10644_s1 + $0x13a4] ss:$16 sps:$4 sm:$0xff]  }
 0x23b   :  { %5295 = vmatpush1.bf16.msra.mxu0 %v7792_v55  ;;  %5828 = vmatpush1.bf16.msra.mxu1 %v7795_v56  ;;  %v7887_v55 = vld [vmem:[%s10644_s1 + $0x13ac] ss:$16 sps:$4 sm:$0xff]   ;;  %v7882_v56 = vld [vmem:[%s10644_s1 + $0x13a0] ss:$16 sps:$4 sm:$0xff]  }
 0x23c   :  { %5296 = vmatprep.subr.bf16.mxu0 %v7800_v47  ;;  %5829 = vmatprep.subr.bf16.mxu1 %v7803_v57  ;;  %v7885_v47 = vld [vmem:[%s10644_s1 + $0x13a8] ss:$16 sps:$4 sm:$0xff]   ;;  %v7890_v57 = vld [vmem:[%s10644_s1 + $0x13c4] ss:$16 sps:$4 sm:$0xff]  }
 0x23f   :  { %5297 = vmatpush1.bf16.msra.mxu0 %v7798_v58  ;;  %5830 = vmatpush1.bf16.msra.mxu1 %v7801_v59  ;;  %v7893_v58 = vld [vmem:[%s10644_s1 + $0x13cc] ss:$16 sps:$4 sm:$0xff]   ;;  %v927_v59 = vcombine.high %v9747_v44, %v9747_v44 }
 0x240   :  { %5307 = vmatprep.subr.bf16.mxu0 %v7806_v48  ;;  %5840 = vmatprep.subr.bf16.mxu1 %v7809_v61  ;;  %v7888_v48 = vld [vmem:[%s10644_s1 + $0x13c0] ss:$16 sps:$4 sm:$0xff]   ;;  %v7891_v61 = vld [vmem:[%s10644_s1 + $0x13c8] ss:$16 sps:$4 sm:$0xff]   ;;  %v7899_v44 = vld [vmem:[%s10644_s1 + $0x13ec] ss:$16 sps:$4 sm:$0xff]  }
 0x242   :  { %5299 = vmatmul.mubr.bf16.vlgmr.msra.gmra.mrb[0].mxu0 %v9980_v62  ;;  %5832 = vmatmul.mubr.bf16.vlgmr.msra.gmra.mrb[0].mxu1 %v9980_v62 }
 0x243   :  { %5308 = vmatpush1.bf16.msra.mxu0 %v7804_v63  ;;  %5841 = vmatpush1.bf16.msra.mxu1 %v7807_v0  ;;  %v7896_v63 = vld [vmem:[%s10644_s1 + $0x13e4] ss:$16 sps:$4 sm:$0xff]   ;;  %v10169_v0 = vrot.slane %v927_v59, %v8276_v49  ;;  %v7975_v59 = vld [vmem:[%s10644_s1 + $0x1588] ss:$16 sps:$4 sm:$0xff]  }
 0x244   :  { %5309 = vmatprep.subr.bf16.mxu0 %v7812_v1  ;;  %5842 = vmatprep.subr.bf16.mxu1 %v7815_v51  ;;  %v7894_v1 = vld [vmem:[%s10644_s1 + $0x13e0] ss:$16 sps:$4 sm:$0xff]   ;;  %v7897_v51 = vld [vmem:[%s10644_s1 + $0x13e8] ss:$16 sps:$4 sm:$0xff]  }
 0x245   :  { %5339 = vmatprep.mubr.bf16.mxu0 %v974_v2  ;;  %5872 = vmatprep.mubr.bf16.mxu1 %v974_v2  ;;  %v7902_v2 = vld [vmem:[%s10644_s1 + $0x1404] ss:$16 sps:$4 sm:$0xff]  }
 0x247   :  { %5310 = vmatpush1.bf16.msra.mxu0 %v7810_v3  ;;  %5843 = vmatpush1.bf16.msra.mxu1 %v7813_v4  ;;  %v7905_v3 = vld [vmem:[%s10644_s1 + $0x140c] ss:$16 sps:$4 sm:$0xff]   ;;  %v943_v4 = vcombine.high %v10169_v0, %v10169_v0 }
 0x248   :  { %5311 = vmatprep.subr.bf16.mxu0 %v7818_v60  ;;  %5844 = vmatprep.subr.bf16.mxu1 %v7821_v5  ;;  %v972_v60 = vcombine.high %v9980_v62, %v9980_v62  ;;  %v7900_v5 = vld [vmem:[%s10644_s1 + $0x1400] ss:$16 sps:$4 sm:$0xff]   ;;  %v7911_v62 = vld [vmem:[%s10644_s1 + $0x142c] ss:$16 sps:$4 sm:$0xff]  }
 0x24b   :  { %5312 = vmatpush1.bf16.msra.mxu0 %v7816_v6  ;;  %5845 = vmatpush1.bf16.msra.mxu1 %v7819_v7  ;;  %v7903_v6 = vld [vmem:[%s10644_s1 + $0x1408] ss:$16 sps:$4 sm:$0xff]   ;;  %v7908_v7 = vld [vmem:[%s10644_s1 + $0x1424] ss:$16 sps:$4 sm:$0xff]  }
 0x24c   :  { %5313 = vmatprep.subr.bf16.mxu0 %v7824_v8  ;;  %5846 = vmatprep.subr.bf16.mxu1 %v7827_v9  ;;  %v10200_v8 = vrot.slane %v943_v4, %v8276_v49  ;;  %v7906_v9 = vld [vmem:[%s10644_s1 + $0x1420] ss:$16 sps:$4 sm:$0xff]   ;;  %v7992_v4 = vld [vmem:[%s10644_s1 + $0x15e4] ss:$16 sps:$4 sm:$0xff]  }
 0x24f   :  { %5314 = vmatpush1.bf16.msra.mxu0 %v7822_v10  ;;  %5847 = vmatpush1.bf16.msra.mxu1 %v7825_v11  ;;  %v7909_v10 = vld [vmem:[%s10644_s1 + $0x1428] ss:$16 sps:$4 sm:$0xff]   ;;  %v7914_v11 = vld [vmem:[%s10644_s1 + $0x1444] ss:$16 sps:$4 sm:$0xff]  }
 0x250   :  { %5315 = vmatprep.subr.bf16.mxu0 %v7830_v12  ;;  %5848 = vmatprep.subr.bf16.mxu1 %v7833_v52  ;;  %v7917_v12 = vld [vmem:[%s10644_s1 + $0x144c] ss:$16 sps:$4 sm:$0xff]   ;;  %v7912_v52 = vld [vmem:[%s10644_s1 + $0x1440] ss:$16 sps:$4 sm:$0xff]  }
 0x253   :  { %5316 = vmatpush1.bf16.msra.mxu0 %v7828_v15  ;;  %5849 = vmatpush1.bf16.msra.mxu1 %v7831_v16  ;;  %v7915_v15 = vld [vmem:[%s10644_s1 + $0x1448] ss:$16 sps:$4 sm:$0xff]   ;;  %v7920_v16 = vld [vmem:[%s10644_s1 + $0x1464] ss:$16 sps:$4 sm:$0xff]  }
 0x254   :  { %5317 = vmatprep.subr.bf16.mxu0 %v7836_v17  ;;  %5850 = vmatprep.subr.bf16.mxu1 %v7839_v18  ;;  %v7923_v17 = vld [vmem:[%s10644_s1 + $0x146c] ss:$16 sps:$4 sm:$0xff]   ;;  %v7918_v18 = vld [vmem:[%s10644_s1 + $0x1460] ss:$16 sps:$4 sm:$0xff]  }
 0x257   :  { %5318 = vmatpush1.bf16.msra.mxu0 %v7834_v19  ;;  %5851 = vmatpush1.bf16.msra.mxu1 %v7837_v20  ;;  %v7921_v19 = vld [vmem:[%s10644_s1 + $0x1468] ss:$16 sps:$4 sm:$0xff]   ;;  %v7926_v20 = vld [vmem:[%s10644_s1 + $0x1484] ss:$16 sps:$4 sm:$0xff]  }
 0x258   :  { %5319 = vmatprep.subr.bf16.mxu0 %v7842_v22  ;;  %5852 = vmatprep.subr.bf16.mxu1 %v7845_v23  ;;  %v7929_v22 = vld [vmem:[%s10644_s1 + $0x148c] ss:$16 sps:$4 sm:$0xff]   ;;  %v7924_v23 = vld [vmem:[%s10644_s1 + $0x1480] ss:$16 sps:$4 sm:$0xff]  }
 0x25b   :  { %5320 = vmatpush1.bf16.msra.mxu0 %v7840_v24  ;;  %5853 = vmatpush1.bf16.msra.mxu1 %v7843_v13  ;;  %v7927_v24 = vld [vmem:[%s10644_s1 + $0x1488] ss:$16 sps:$4 sm:$0xff]   ;;  %v7932_v13 = vld [vmem:[%s10644_s1 + $0x14a4] ss:$16 sps:$4 sm:$0xff]  }
 0x25c   :  { %5321 = vmatprep.subr.bf16.mxu0 %v7848_v27  ;;  %5854 = vmatprep.subr.bf16.mxu1 %v7851_v28  ;;  %v7935_v27 = vld [vmem:[%s10644_s1 + $0x14ac] ss:$16 sps:$4 sm:$0xff]   ;;  %v7930_v28 = vld [vmem:[%s10644_s1 + $0x14a0] ss:$16 sps:$4 sm:$0xff]  }
 0x25f   :  { %5322 = vmatpush1.bf16.msra.mxu0 %v7846_v29  ;;  %5855 = vmatpush1.bf16.msra.mxu1 %v7849_v14  ;;  %v7933_v29 = vld [vmem:[%s10644_s1 + $0x14a8] ss:$16 sps:$4 sm:$0xff]   ;;  %v7938_v14 = vld [vmem:[%s10644_s1 + $0x14c4] ss:$16 sps:$4 sm:$0xff]  }
 0x260   :  { %5323 = vmatprep.subr.bf16.mxu0 %v7854_v30  ;;  %5856 = vmatprep.subr.bf16.mxu1 %v7857_v31  ;;  %v7941_v30 = vld [vmem:[%s10644_s1 + $0x14cc] ss:$16 sps:$4 sm:$0xff]   ;;  %v7936_v31 = vld [vmem:[%s10644_s1 + $0x14c0] ss:$16 sps:$4 sm:$0xff]  }
 0x263   :  { %5324 = vmatpush1.bf16.msra.mxu0 %v7852_v25  ;;  %5857 = vmatpush1.bf16.msra.mxu1 %v7855_v32  ;;  %v7939_v25 = vld [vmem:[%s10644_s1 + $0x14c8] ss:$16 sps:$4 sm:$0xff]   ;;  %v7944_v32 = vld [vmem:[%s10644_s1 + $0x14e4] ss:$16 sps:$4 sm:$0xff]  }
 0x264   :  { %5325 = vmatprep.subr.bf16.mxu0 %v7860_v33  ;;  %5858 = vmatprep.subr.bf16.mxu1 %v7863_v26  ;;  %v7947_v33 = vld [vmem:[%s10644_s1 + $0x14ec] ss:$16 sps:$4 sm:$0xff]   ;;  %v7942_v26 = vld [vmem:[%s10644_s1 + $0x14e0] ss:$16 sps:$4 sm:$0xff]  }
 0x267   :  { %5326 = vmatpush1.bf16.msra.mxu0 %v7858_v36  ;;  %5859 = vmatpush1.bf16.msra.mxu1 %v7861_v37  ;;  %v7945_v36 = vld [vmem:[%s10644_s1 + $0x14e8] ss:$16 sps:$4 sm:$0xff]   ;;  %v7950_v37 = vld [vmem:[%s10644_s1 + $0x1504] ss:$16 sps:$4 sm:$0xff]  }
 0x268   :  { %5327 = vmatprep.subr.bf16.mxu0 %v7866_v21  ;;  %5860 = vmatprep.subr.bf16.mxu1 %v7869_v39  ;;  %v7953_v21 = vld [vmem:[%s10644_s1 + $0x150c] ss:$16 sps:$4 sm:$0xff]   ;;  %v7948_v39 = vld [vmem:[%s10644_s1 + $0x1500] ss:$16 sps:$4 sm:$0xff]  }
 0x26b   :  { %5328 = vmatpush1.bf16.msra.mxu0 %v7864_v40  ;;  %5861 = vmatpush1.bf16.msra.mxu1 %v7867_v41  ;;  %v7951_v40 = vld [vmem:[%s10644_s1 + $0x1508] ss:$16 sps:$4 sm:$0xff]   ;;  %v7956_v41 = vld [vmem:[%s10644_s1 + $0x1524] ss:$16 sps:$4 sm:$0xff]  }
 0x26c   :  { %5329 = vmatprep.subr.bf16.mxu0 %v7872_v34  ;;  %5862 = vmatprep.subr.bf16.mxu1 %v7875_v43  ;;  %v7959_v34 = vld [vmem:[%s10644_s1 + $0x152c] ss:$16 sps:$4 sm:$0xff]   ;;  %v7954_v43 = vld [vmem:[%s10644_s1 + $0x1520] ss:$16 sps:$4 sm:$0xff]  }
 0x26f   :  { %5330 = vmatpush1.bf16.msra.mxu0 %v7870_v45  ;;  %5863 = vmatpush1.bf16.msra.mxu1 %v7873_v46  ;;  %v7957_v45 = vld [vmem:[%s10644_s1 + $0x1528] ss:$16 sps:$4 sm:$0xff]   ;;  %v7962_v46 = vld [vmem:[%s10644_s1 + $0x1544] ss:$16 sps:$4 sm:$0xff]  }
 0x270   :  { %5331 = vmatprep.subr.bf16.mxu0 %v7878_v35  ;;  %5864 = vmatprep.subr.bf16.mxu1 %v7881_v50  ;;  %v7965_v35 = vld [vmem:[%s10644_s1 + $0x154c] ss:$16 sps:$4 sm:$0xff]   ;;  %v7960_v50 = vld [vmem:[%s10644_s1 + $0x1540] ss:$16 sps:$4 sm:$0xff]  }
 0x273   :  { %5332 = vmatpush1.bf16.msra.mxu0 %v7876_v53  ;;  %5865 = vmatpush1.bf16.msra.mxu1 %v7879_v38  ;;  %v7963_v53 = vld [vmem:[%s10644_s1 + $0x1548] ss:$16 sps:$4 sm:$0xff]   ;;  %v7968_v38 = vld [vmem:[%s10644_s1 + $0x1564] ss:$16 sps:$4 sm:$0xff]  }
 0x274   :  { %5333 = vmatprep.subr.bf16.mxu0 %v7884_v54  ;;  %5866 = vmatprep.subr.bf16.mxu1 %v7887_v55  ;;  %v7971_v54 = vld [vmem:[%s10644_s1 + $0x156c] ss:$16 sps:$4 sm:$0xff]   ;;  %v7966_v55 = vld [vmem:[%s10644_s1 + $0x1560] ss:$16 sps:$4 sm:$0xff]  }
 0x277   :  { %5334 = vmatpush1.bf16.msra.mxu0 %v7882_v56  ;;  %5867 = vmatpush1.bf16.msra.mxu1 %v7885_v47  ;;  %v7969_v56 = vld [vmem:[%s10644_s1 + $0x1568] ss:$16 sps:$4 sm:$0xff]   ;;  %v7974_v47 = vld [vmem:[%s10644_s1 + $0x1584] ss:$16 sps:$4 sm:$0xff]  }
 0x278   :  { %5335 = vmatprep.subr.bf16.mxu0 %v7890_v57  ;;  %5868 = vmatprep.subr.bf16.mxu1 %v7893_v58  ;;  %v7977_v57 = vld [vmem:[%s10644_s1 + $0x158c] ss:$16 sps:$4 sm:$0xff]   ;;  %v7972_v58 = vld [vmem:[%s10644_s1 + $0x1580] ss:$16 sps:$4 sm:$0xff]  }
 0x27b   :  { %5336 = vmatpush1.bf16.msra.mxu0 %v7888_v48  ;;  %5869 = vmatpush1.bf16.msra.mxu1 %v7891_v61  ;;  %v7980_v48 = vld [vmem:[%s10644_s1 + $0x15a4] ss:$16 sps:$4 sm:$0xff]   ;;  %v7983_v61 = vld [vmem:[%s10644_s1 + $0x15ac] ss:$16 sps:$4 sm:$0xff]  }
 0x27c   :  { %5337 = vmatprep.subr.bf16.mxu0 %v7896_v63  ;;  %5870 = vmatprep.subr.bf16.mxu1 %v7899_v44  ;;  %v7978_v63 = vld [vmem:[%s10644_s1 + $0x15a0] ss:$16 sps:$4 sm:$0xff]   ;;  %v7981_v44 = vld [vmem:[%s10644_s1 + $0x15a8] ss:$16 sps:$4 sm:$0xff]  }
 0x27f   :  { %5338 = vmatpush1.bf16.msra.mxu0 %v7894_v1  ;;  %5871 = vmatpush1.bf16.msra.mxu1 %v7897_v51  ;;  %v7986_v1 = vld [vmem:[%s10644_s1 + $0x15c4] ss:$16 sps:$4 sm:$0xff]   ;;  %v7989_v51 = vld [vmem:[%s10644_s1 + $0x15cc] ss:$16 sps:$4 sm:$0xff]  }
 0x280   :  { %5348 = vmatprep.subr.bf16.mxu0 %v7902_v2  ;;  %5881 = vmatprep.subr.bf16.mxu1 %v7905_v3  ;;  %v7984_v2 = vld [vmem:[%s10644_s1 + $0x15c0] ss:$16 sps:$4 sm:$0xff]   ;;  %v7987_v3 = vld [vmem:[%s10644_s1 + $0x15c8] ss:$16 sps:$4 sm:$0xff]  }
 0x282   :  { %5340 = vmatmul.mubr.bf16.vlgmr.msra.gmra.mrb[0].mxu0 %v972_v60  ;;  %5873 = vmatmul.mubr.bf16.vlgmr.msra.gmra.mrb[0].mxu1 %v972_v60  ;;  %v7995_v60 = vld [vmem:[%s10644_s1 + $0x15ec] ss:$16 sps:$4 sm:$0xff]  }
 0x283   :  { %5349 = vmatpush1.bf16.msra.mxu0 %v7900_v5  ;;  %5882 = vmatpush1.bf16.msra.mxu1 %v7903_v6  ;;  %v7990_v5 = vld [vmem:[%s10644_s1 + $0x15e0] ss:$16 sps:$4 sm:$0xff]   ;;  %v7993_v6 = vld [vmem:[%s10644_s1 + $0x15e8] ss:$16 sps:$4 sm:$0xff]  }
 0x284   :  { %5350 = vmatprep.subr.bf16.mxu0 %v7908_v7  ;;  %5883 = vmatprep.subr.bf16.mxu1 %v7911_v62  ;;  %v7999_v7 = vld [vmem:[%s10644_s1 + $0x1604] ss:$16 sps:$4 sm:$0xff]   ;;  %v8002_v62 = vld [vmem:[%s10644_s1 + $0x160c] ss:$16 sps:$4 sm:$0xff]  }
 0x285   :  { %5380 = vmatprep.mubr.bf16.mxu0 %v10200_v8  ;;  %5913 = vmatprep.mubr.bf16.mxu1 %v10200_v8 }
 0x287   :  { %5351 = vmatpush1.bf16.msra.mxu0 %v7906_v9  ;;  %5884 = vmatpush1.bf16.msra.mxu1 %v7909_v10  ;;  %v10386_v9 = vrot.slane %v10169_v0, %v8276_v49  ;;  %v7997_v10 = vld [vmem:[%s10644_s1 + $0x1600] ss:$16 sps:$4 sm:$0xff]   ;;  %v8008_v0 = vld [vmem:[%s10644_s1 + $0x162c] ss:$16 sps:$4 sm:$0xff]  }
 0x288   :  { %5352 = vmatprep.subr.bf16.mxu0 %v7914_v11  ;;  %5885 = vmatprep.subr.bf16.mxu1 %v7917_v12  ;;  %v8000_v11 = vld [vmem:[%s10644_s1 + $0x1608] ss:$16 sps:$4 sm:$0xff]   ;;  %v8005_v12 = vld [vmem:[%s10644_s1 + $0x1624] ss:$16 sps:$4 sm:$0xff]  }
 0x28b   :  { %5353 = vmatpush1.bf16.msra.mxu0 %v7912_v52  ;;  %5886 = vmatpush1.bf16.msra.mxu1 %v7915_v15  ;;  %v975_v52 = vcombine.high %v10200_v8, %v10200_v8  ;;  %v8003_v15 = vld [vmem:[%s10644_s1 + $0x1620] ss:$16 sps:$4 sm:$0xff]   ;;  %v8011_v8 = vld [vmem:[%s10644_s1 + $0x1644] ss:$16 sps:$4 sm:$0xff]  }
 0x28c   :  { %5354 = vmatprep.subr.bf16.mxu0 %v7920_v16  ;;  %5887 = vmatprep.subr.bf16.mxu1 %v7923_v17  ;;  %v8006_v16 = vld [vmem:[%s10644_s1 + $0x1628] ss:$16 sps:$4 sm:$0xff]   ;;  %v8014_v17 = vld [vmem:[%s10644_s1 + $0x164c] ss:$16 sps:$4 sm:$0xff]  }
 0x28f   :  { %5355 = vmatpush1.bf16.msra.mxu0 %v7918_v18  ;;  %5888 = vmatpush1.bf16.msra.mxu1 %v7921_v19  ;;  %v8009_v18 = vld [vmem:[%s10644_s1 + $0x1640] ss:$16 sps:$4 sm:$0xff]   ;;  %v8012_v19 = vld [vmem:[%s10644_s1 + $0x1648] ss:$16 sps:$4 sm:$0xff]  }
 0x290   :  { %5356 = vmatprep.subr.bf16.mxu0 %v7926_v20  ;;  %5889 = vmatprep.subr.bf16.mxu1 %v7929_v22  ;;  %v8017_v20 = vld [vmem:[%s10644_s1 + $0x1664] ss:$16 sps:$4 sm:$0xff]   ;;  %v8020_v22 = vld [vmem:[%s10644_s1 + $0x166c] ss:$16 sps:$4 sm:$0xff]  }
 0x293   :  { %5357 = vmatpush1.bf16.msra.mxu0 %v7924_v23  ;;  %5890 = vmatpush1.bf16.msra.mxu1 %v7927_v24  ;;  %v8015_v23 = vld [vmem:[%s10644_s1 + $0x1660] ss:$16 sps:$4 sm:$0xff]   ;;  %v8018_v24 = vld [vmem:[%s10644_s1 + $0x1668] ss:$16 sps:$4 sm:$0xff]  }
 0x294   :  { %5358 = vmatprep.subr.bf16.mxu0 %v7932_v13  ;;  %5891 = vmatprep.subr.bf16.mxu1 %v7935_v27  ;;  %v8023_v13 = vld [vmem:[%s10644_s1 + $0x1684] ss:$16 sps:$4 sm:$0xff]   ;;  %v8026_v27 = vld [vmem:[%s10644_s1 + $0x168c] ss:$16 sps:$4 sm:$0xff]  }
 0x297   :  { %5359 = vmatpush1.bf16.msra.mxu0 %v7930_v28  ;;  %5892 = vmatpush1.bf16.msra.mxu1 %v7933_v29  ;;  %v8021_v28 = vld [vmem:[%s10644_s1 + $0x1680] ss:$16 sps:$4 sm:$0xff]   ;;  %v8024_v29 = vld [vmem:[%s10644_s1 + $0x1688] ss:$16 sps:$4 sm:$0xff]  }
 0x298   :  { %5360 = vmatprep.subr.bf16.mxu0 %v7938_v14  ;;  %5893 = vmatprep.subr.bf16.mxu1 %v7941_v30  ;;  %v8029_v14 = vld [vmem:[%s10644_s1 + $0x16a4] ss:$16 sps:$4 sm:$0xff]   ;;  %v8032_v30 = vld [vmem:[%s10644_s1 + $0x16ac] ss:$16 sps:$4 sm:$0xff]  }
 0x29b   :  { %5361 = vmatpush1.bf16.msra.mxu0 %v7936_v31  ;;  %5894 = vmatpush1.bf16.msra.mxu1 %v7939_v25  ;;  %v8027_v31 = vld [vmem:[%s10644_s1 + $0x16a0] ss:$16 sps:$4 sm:$0xff]   ;;  %v8030_v25 = vld [vmem:[%s10644_s1 + $0x16a8] ss:$16 sps:$4 sm:$0xff]  }
 0x29c   :  { %5362 = vmatprep.subr.bf16.mxu0 %v7944_v32  ;;  %5895 = vmatprep.subr.bf16.mxu1 %v7947_v33  ;;  %v8035_v32 = vld [vmem:[%s10644_s1 + $0x16c4] ss:$16 sps:$4 sm:$0xff]   ;;  %v8038_v33 = vld [vmem:[%s10644_s1 + $0x16cc] ss:$16 sps:$4 sm:$0xff]  }
 0x29f   :  { %5363 = vmatpush1.bf16.msra.mxu0 %v7942_v26  ;;  %5896 = vmatpush1.bf16.msra.mxu1 %v7945_v36  ;;  %v8033_v26 = vld [vmem:[%s10644_s1 + $0x16c0] ss:$16 sps:$4 sm:$0xff]   ;;  %v8036_v36 = vld [vmem:[%s10644_s1 + $0x16c8] ss:$16 sps:$4 sm:$0xff]  }
 0x2a0   :  { %5364 = vmatprep.subr.bf16.mxu0 %v7950_v37  ;;  %5897 = vmatprep.subr.bf16.mxu1 %v7953_v21  ;;  %v8041_v37 = vld [vmem:[%s10644_s1 + $0x16e4] ss:$16 sps:$4 sm:$0xff]   ;;  %v8044_v21 = vld [vmem:[%s10644_s1 + $0x16ec] ss:$16 sps:$4 sm:$0xff]  }
 0x2a3   :  { %5365 = vmatpush1.bf16.msra.mxu0 %v7948_v39  ;;  %5898 = vmatpush1.bf16.msra.mxu1 %v7951_v40  ;;  %v8039_v39 = vld [vmem:[%s10644_s1 + $0x16e0] ss:$16 sps:$4 sm:$0xff]   ;;  %v8042_v40 = vld [vmem:[%s10644_s1 + $0x16e8] ss:$16 sps:$4 sm:$0xff]  }
 0x2a4   :  { %5366 = vmatprep.subr.bf16.mxu0 %v7956_v41  ;;  %5899 = vmatprep.subr.bf16.mxu1 %v7959_v34  ;;  %v8047_v41 = vld [vmem:[%s10644_s1 + $0x1704] ss:$16 sps:$4 sm:$0xff]   ;;  %v8050_v34 = vld [vmem:[%s10644_s1 + $0x170c] ss:$16 sps:$4 sm:$0xff]  }
 0x2a7   :  { %5367 = vmatpush1.bf16.msra.mxu0 %v7954_v43  ;;  %5900 = vmatpush1.bf16.msra.mxu1 %v7957_v45  ;;  %v8045_v43 = vld [vmem:[%s10644_s1 + $0x1700] ss:$16 sps:$4 sm:$0xff]   ;;  %v8048_v45 = vld [vmem:[%s10644_s1 + $0x1708] ss:$16 sps:$4 sm:$0xff]  }
 0x2a8   :  { %5368 = vmatprep.subr.bf16.mxu0 %v7962_v46  ;;  %5901 = vmatprep.subr.bf16.mxu1 %v7965_v35  ;;  %v8053_v46 = vld [vmem:[%s10644_s1 + $0x1724] ss:$16 sps:$4 sm:$0xff]   ;;  %v8056_v35 = vld [vmem:[%s10644_s1 + $0x172c] ss:$16 sps:$4 sm:$0xff]  }
 0x2ab   :  { %5369 = vmatpush1.bf16.msra.mxu0 %v7960_v50  ;;  %5902 = vmatpush1.bf16.msra.mxu1 %v7963_v53  ;;  %v8051_v50 = vld [vmem:[%s10644_s1 + $0x1720] ss:$16 sps:$4 sm:$0xff]   ;;  %v8054_v53 = vld [vmem:[%s10644_s1 + $0x1728] ss:$16 sps:$4 sm:$0xff]  }
 0x2ac   :  { %5370 = vmatprep.subr.bf16.mxu0 %v7968_v38  ;;  %5903 = vmatprep.subr.bf16.mxu1 %v7971_v54  ;;  %v8059_v38 = vld [vmem:[%s10644_s1 + $0x1744] ss:$16 sps:$4 sm:$0xff]   ;;  %v8062_v54 = vld [vmem:[%s10644_s1 + $0x174c] ss:$16 sps:$4 sm:$0xff]  }
 0x2af   :  { %5371 = vmatpush1.bf16.msra.mxu0 %v7966_v55  ;;  %5904 = vmatpush1.bf16.msra.mxu1 %v7969_v56  ;;  %v8057_v55 = vld [vmem:[%s10644_s1 + $0x1740] ss:$16 sps:$4 sm:$0xff]   ;;  %v8060_v56 = vld [vmem:[%s10644_s1 + $0x1748] ss:$16 sps:$4 sm:$0xff]  }
 0x2b0   :  { %5372 = vmatprep.subr.bf16.mxu0 %v7974_v47  ;;  %5905 = vmatprep.subr.bf16.mxu1 %v7977_v57  ;;  %v8065_v47 = vld [vmem:[%s10644_s1 + $0x1764] ss:$16 sps:$4 sm:$0xff]   ;;  %v8068_v57 = vld [vmem:[%s10644_s1 + $0x176c] ss:$16 sps:$4 sm:$0xff]  }
 0x2b3   :  { %5373 = vmatpush1.bf16.msra.mxu0 %v7972_v58  ;;  %5906 = vmatpush1.bf16.msra.mxu1 %v7975_v59  ;;  %v8063_v58 = vld [vmem:[%s10644_s1 + $0x1760] ss:$16 sps:$4 sm:$0xff]   ;;  %v8066_v59 = vld [vmem:[%s10644_s1 + $0x1768] ss:$16 sps:$4 sm:$0xff]  }
 0x2b4   :  { %5374 = vmatprep.subr.bf16.mxu0 %v7980_v48  ;;  %5907 = vmatprep.subr.bf16.mxu1 %v7983_v61  ;;  %v8071_v48 = vld [vmem:[%s10644_s1 + $0x1784] ss:$16 sps:$4 sm:$0xff]   ;;  %v8074_v61 = vld [vmem:[%s10644_s1 + $0x178c] ss:$16 sps:$4 sm:$0xff]  }
 0x2b7   :  { %5375 = vmatpush1.bf16.msra.mxu0 %v7978_v63  ;;  %5908 = vmatpush1.bf16.msra.mxu1 %v7981_v44  ;;  %v8069_v63 = vld [vmem:[%s10644_s1 + $0x1780] ss:$16 sps:$4 sm:$0xff]   ;;  %v8072_v44 = vld [vmem:[%s10644_s1 + $0x1788] ss:$16 sps:$4 sm:$0xff]  }
 0x2b8   :  { %5376 = vmatprep.subr.bf16.mxu0 %v7986_v1  ;;  %5909 = vmatprep.subr.bf16.mxu1 %v7989_v51  ;;  %v8077_v1 = vld [vmem:[%s10644_s1 + $0x17a4] ss:$16 sps:$4 sm:$0xff]   ;;  %v8080_v51 = vld [vmem:[%s10644_s1 + $0x17ac] ss:$16 sps:$4 sm:$0xff]  }
 0x2bb   :  { %5377 = vmatpush1.bf16.msra.mxu0 %v7984_v2  ;;  %5910 = vmatpush1.bf16.msra.mxu1 %v7987_v3  ;;  %v8075_v2 = vld [vmem:[%s10644_s1 + $0x17a0] ss:$16 sps:$4 sm:$0xff]   ;;  %v8078_v3 = vld [vmem:[%s10644_s1 + $0x17a8] ss:$16 sps:$4 sm:$0xff]  }
 0x2bc   :  { %5378 = vmatprep.subr.bf16.mxu0 %v7992_v4  ;;  %5911 = vmatprep.subr.bf16.mxu1 %v7995_v60  ;;  %v8083_v4 = vld [vmem:[%s10644_s1 + $0x17c4] ss:$16 sps:$4 sm:$0xff]   ;;  %v8086_v60 = vld [vmem:[%s10644_s1 + $0x17cc] ss:$16 sps:$4 sm:$0xff]  }
 0x2bf   :  { %5379 = vmatpush1.bf16.msra.mxu0 %v7990_v5  ;;  %5912 = vmatpush1.bf16.msra.mxu1 %v7993_v6  ;;  %v8081_v5 = vld [vmem:[%s10644_s1 + $0x17c0] ss:$16 sps:$4 sm:$0xff]   ;;  %v8084_v6 = vld [vmem:[%s10644_s1 + $0x17c8] ss:$16 sps:$4 sm:$0xff]  }
 0x2c0   :  { %5389 = vmatprep.subr.bf16.mxu0 %v7999_v7  ;;  %5922 = vmatprep.subr.bf16.mxu1 %v8002_v62  ;;  %v8089_v7 = vld [vmem:[%s10644_s1 + $0x17e4] ss:$16 sps:$4 sm:$0xff]   ;;  %v8092_v62 = vld [vmem:[%s10644_s1 + $0x17ec] ss:$16 sps:$4 sm:$0xff]  }
 0x2c2   :  { %5381 = vmatmul.mubr.bf16.vlgmr.msra.gmra.mrb[0].mxu0 %v10386_v9  ;;  %5914 = vmatmul.mubr.bf16.vlgmr.msra.gmra.mrb[0].mxu1 %v10386_v9 }
 0x2c3   :  { %5390 = vmatpush1.bf16.msra.mxu0 %v7997_v10  ;;  %5923 = vmatpush1.bf16.msra.mxu1 %v8000_v11  ;;  %v8087_v10 = vld [vmem:[%s10644_s1 + $0x17e0] ss:$16 sps:$4 sm:$0xff]   ;;  %v8090_v11 = vld [vmem:[%s10644_s1 + $0x17e8] ss:$16 sps:$4 sm:$0xff]  }
 0x2c4   :  { %5391 = vmatprep.subr.bf16.mxu0 %v8005_v12  ;;  %5924 = vmatprep.subr.bf16.mxu1 %v8008_v0  ;;  %v8095_v12 = vld [vmem:[%s10644_s1 + $0x1804] ss:$16 sps:$4 sm:$0xff]   ;;  %v8098_v0 = vld [vmem:[%s10644_s1 + $0x180c] ss:$16 sps:$4 sm:$0xff]  }
 0x2c5   :  { %5421 = vmatprep.mubr.bf16.mxu0 %v975_v52  ;;  %5954 = vmatprep.mubr.bf16.mxu1 %v975_v52  ;;  %v973_v52 = vcombine.high %v10386_v9, %v10386_v9  ;;  %v8104_v9 = vld [vmem:[%s10644_s1 + $0x182c] ss:$16 sps:$4 sm:$0xff]  }
 0x2c7   :  { %5392 = vmatpush1.bf16.msra.mxu0 %v8003_v15  ;;  %5925 = vmatpush1.bf16.msra.mxu1 %v8006_v16  ;;  %v8093_v15 = vld [vmem:[%s10644_s1 + $0x1800] ss:$16 sps:$4 sm:$0xff]   ;;  %v8096_v16 = vld [vmem:[%s10644_s1 + $0x1808] ss:$16 sps:$4 sm:$0xff]  }
 0x2c8   :  { %5393 = vmatprep.subr.bf16.mxu0 %v8011_v8  ;;  %5926 = vmatprep.subr.bf16.mxu1 %v8014_v17  ;;  %v8101_v8 = vld [vmem:[%s10644_s1 + $0x1824] ss:$16 sps:$4 sm:$0xff]   ;;  %v8099_v17 = vld [vmem:[%s10644_s1 + $0x1820] ss:$16 sps:$4 sm:$0xff]  }
 0x2cb   :  { %5394 = vmatpush1.bf16.msra.mxu0 %v8009_v18  ;;  %5927 = vmatpush1.bf16.msra.mxu1 %v8012_v19  ;;  %v8102_v18 = vld [vmem:[%s10644_s1 + $0x1828] ss:$16 sps:$4 sm:$0xff]   ;;  %v8107_v19 = vld [vmem:[%s10644_s1 + $0x1844] ss:$16 sps:$4 sm:$0xff]  }
 0x2cc   :  { %5395 = vmatprep.subr.bf16.mxu0 %v8017_v20  ;;  %5928 = vmatprep.subr.bf16.mxu1 %v8020_v22  ;;  %v8110_v20 = vld [vmem:[%s10644_s1 + $0x184c] ss:$16 sps:$4 sm:$0xff]   ;;  %v8120_v22 = vmov 0  }
 0x2cf   :  { %5396 = vmatpush1.bf16.msra.mxu0 %v8015_v23  ;;  %5929 = vmatpush1.bf16.msra.mxu1 %v8018_v24  ;;  %v8105_v23 = vld [vmem:[%s10644_s1 + $0x1840] ss:$16 sps:$4 sm:$0xff]   ;;  %v8108_v24 = vld [vmem:[%s10644_s1 + $0x1848] ss:$16 sps:$4 sm:$0xff]  }
 0x2d0   :  { %5397 = vmatprep.subr.bf16.mxu0 %v8023_v13  ;;  %5930 = vmatprep.subr.bf16.mxu1 %v8026_v27  ;;  %v8113_v13 = vld [vmem:[%s10644_s1 + $0x1864] ss:$16 sps:$4 sm:$0xff]   ;;  %v8116_v27 = vld [vmem:[%s10644_s1 + $0x186c] ss:$16 sps:$4 sm:$0xff]  }
 0x2d3   :  { %5398 = vmatpush1.bf16.msra.mxu0 %v8021_v28  ;;  %5931 = vmatpush1.bf16.msra.mxu1 %v8024_v29  ;;  %v8111_v28 = vld [vmem:[%s10644_s1 + $0x1860] ss:$16 sps:$4 sm:$0xff]   ;;  %v8114_v29 = vld [vmem:[%s10644_s1 + $0x1868] ss:$16 sps:$4 sm:$0xff]  }
 0x2d4   :  { %5399 = vmatprep.subr.bf16.mxu0 %v8029_v14  ;;  %5932 = vmatprep.subr.bf16.mxu1 %v8032_v30  ;;  %v6046_v14 = vld.sshfl [vmem:[%s10645_s0 + $0x18] sm:$0x1 pattern:$0x75316420] }
 0x2d5   :  { %v989_v30 = vrot.slane %v6046_v14, %v8276_v49 }
 0x2d7   :  { %5400 = vmatpush1.bf16.msra.mxu0 %v8027_v31  ;;  %5933 = vmatpush1.bf16.msra.mxu1 %v8030_v25  ;;  %v807_v31 = vsub.s32 0, %v8258_v42  ;;  %v815_v25 = vsub.s32 2, %v8258_v42 }
 0x2d8   :  { %5401 = vmatprep.subr.bf16.mxu0 %v8035_v32  ;;  %5934 = vmatprep.subr.bf16.mxu1 %v8038_v33  ;;  %v803_v32 = vld [vmem:[%s10646_s2] sm:$0xf]  ;;  %v811_v33 = vsub.s32 1, %v8258_v42 }
 0x2db   :  { %5402 = vmatpush1.bf16.msra.mxu0 %v8033_v26  ;;  %5935 = vmatpush1.bf16.msra.mxu1 %v8036_v36  ;;  %v819_v26 = vsub.s32 3, %v8258_v42  ;;  %v808_v36 = vrot.slane %v803_v32, %v807_v31 }
 0x2dc   :  { %5403 = vmatprep.subr.bf16.mxu0 %v8041_v37  ;;  %5936 = vmatprep.subr.bf16.mxu1 %v8044_v21  ;;  %v816_v37 = vrot.slane %v803_v32, %v815_v25  ;;  %v812_v21 = vrot.slane %v803_v32, %v811_v33 }
 0x2df   :  { %5404 = vmatpush1.bf16.msra.mxu0 %v8039_v39  ;;  %5937 = vmatpush1.bf16.msra.mxu1 %v8042_v40  ;;  %v820_v39 = vrot.slane %v803_v32, %v819_v26 }
 0x2e0   :  { %5405 = vmatprep.subr.bf16.mxu0 %v8047_v41  ;;  %5938 = vmatprep.subr.bf16.mxu1 %v8050_v34 }
 0x2e3   :  { %5406 = vmatpush1.bf16.msra.mxu0 %v8045_v43  ;;  %5939 = vmatpush1.bf16.msra.mxu1 %v8048_v45 }
 0x2e4   :  { %5407 = vmatprep.subr.bf16.mxu0 %v8053_v46  ;;  %5940 = vmatprep.subr.bf16.mxu1 %v8056_v35 }
 0x2e7   :  { %5408 = vmatpush1.bf16.msra.mxu0 %v8051_v50  ;;  %5941 = vmatpush1.bf16.msra.mxu1 %v8054_v53 }
 0x2e8   :  { %5409 = vmatprep.subr.bf16.mxu0 %v8059_v38  ;;  %5942 = vmatprep.subr.bf16.mxu1 %v8062_v54 }
 0x2eb   :  { %5410 = vmatpush1.bf16.msra.mxu0 %v8057_v55  ;;  %5943 = vmatpush1.bf16.msra.mxu1 %v8060_v56 }
 0x2ec   :  { %5411 = vmatprep.subr.bf16.mxu0 %v8065_v47  ;;  %5944 = vmatprep.subr.bf16.mxu1 %v8068_v57 }
 0x2ef   :  { %5412 = vmatpush1.bf16.msra.mxu0 %v8063_v58  ;;  %5945 = vmatpush1.bf16.msra.mxu1 %v8066_v59 }
 0x2f0   :  { %5413 = vmatprep.subr.bf16.mxu0 %v8071_v48  ;;  %5946 = vmatprep.subr.bf16.mxu1 %v8074_v61 }
 0x2f3   :  { %5414 = vmatpush1.bf16.msra.mxu0 %v8069_v63  ;;  %5947 = vmatpush1.bf16.msra.mxu1 %v8072_v44 }
 0x2f4   :  { %5415 = vmatprep.subr.bf16.mxu0 %v8077_v1  ;;  %5948 = vmatprep.subr.bf16.mxu1 %v8080_v51 }
 0x2f7   :  { %5416 = vmatpush1.bf16.msra.mxu0 %v8075_v2  ;;  %5949 = vmatpush1.bf16.msra.mxu1 %v8078_v3 }
 0x2f8   :  { %5417 = vmatprep.subr.bf16.mxu0 %v8083_v4  ;;  %5950 = vmatprep.subr.bf16.mxu1 %v8086_v60 }
 0x2fb   :  { %5418 = vmatpush1.bf16.msra.mxu0 %v8081_v5  ;;  %5951 = vmatpush1.bf16.msra.mxu1 %v8084_v6 }
 0x2fc   :  { %5419 = vmatprep.subr.bf16.mxu0 %v8089_v7  ;;  %5952 = vmatprep.subr.bf16.mxu1 %v8092_v62 }
 0x2ff   :  { %5420 = vmatpush1.bf16.msra.mxu0 %v8087_v10  ;;  %5953 = vmatpush1.bf16.msra.mxu1 %v8090_v11 }
 0x300   :  { %5430 = vmatprep.subr.bf16.mxu0 %v8095_v12  ;;  %5963 = vmatprep.subr.bf16.mxu1 %v8098_v0 }
 0x302   :  { %5422 = vmatmul.mubr.bf16.vlgmr.msra.gmra.mrb[0].mxu0 %v973_v52  ;;  %5955 = vmatmul.mubr.bf16.vlgmr.msra.gmra.mrb[0].mxu1 %v973_v52 }
 0x303   :  { %5431 = vmatpush1.bf16.msra.mxu0 %v8093_v15  ;;  %5964 = vmatpush1.bf16.msra.mxu1 %v8096_v16 }
 0x304   :  { %5432 = vmatprep.subr.bf16.mxu0 %v8101_v8  ;;  %5965 = vmatprep.subr.bf16.mxu1 %v8104_v9 }
 0x305   :  { %5462 = vmatprep.mubr.bf16.mxu0 %v8120_v22  ;;  %5995 = vmatprep.mubr.bf16.mxu1 %v8120_v22 }
 0x307   :  { %5433 = vmatpush1.bf16.msra.mxu0 %v8099_v17  ;;  %5966 = vmatpush1.bf16.msra.mxu1 %v8102_v18 }
 0x308   :  { %5434 = vmatprep.subr.bf16.mxu0 %v8107_v19  ;;  %5967 = vmatprep.subr.bf16.mxu1 %v8110_v20 }
 0x30b   :  { %5435 = vmatpush1.bf16.msra.mxu0 %v8105_v23  ;;  %5968 = vmatpush1.bf16.msra.mxu1 %v8108_v24 }
 0x30c   :  { %5436 = vmatprep.subr.bf16.mxu0 %v8113_v13  ;;  %5969 = vmatprep.subr.bf16.mxu1 %v8116_v27 }
 0x30f   :  { %5437 = vmatpush1.bf16.msra.mxu0 %v8111_v28  ;;  %5970 = vmatpush1.bf16.msra.mxu1 %v8114_v29 }
 0x312   :  { %6831 = vmatmul.mubr.msk.bf16.vlgmr.msra.gmra.mrb[0].mxu0 %vm4934_vm0, %v989_v30  ;;  %6832 = vmatmul.mubr.msk.bf16.vlgmr.msra.gmra.mrb[0].mxu1 %vm4934_vm0, %v989_v30 }
 0x3e5   :  { %v5464_v40 = vpop.f32.mrb[0].mxu0  ;;  %v5997_v41 = vpop.f32.mrb[0].mxu1 }
 0x3e6   :  { %v6836_v34 = vadd.f32 %v5464_v40, %v808_v36  ;;  %v6838_v43 = vadd.f32 %v5997_v41, %v816_v37  ;;  %v5466_v45 = vpop.f32.mrb[1].mxu0  ;;  %v5999_v46 = vpop.f32.mrb[1].mxu1 }
 0x3e7   :  { %v6837_v35 = vadd.f32 %v5466_v45, %v812_v21  ;;  %v6839_v50 = vadd.f32 %v5999_v46, %v820_v39  ;;  %v5468_v53 = vpop.f32.mrb[2].mxu0  ;;  %v6001_v38 = vpop.f32.mrb[2].mxu1 }
 0x3e8   :  { %v6004_v54 = vmax.f32 %v6836_v34, 0.0  ;;  %v6006_v55 = vmax.f32 %v6838_v43, 0.0  ;;  %v5469_v56 = vpop.f32.mrb[3].mxu0  ;;  %v6002_v47 = vpop.f32.mrb[3].mxu1 }
 0x3e9   :  { %v6005_v57 = vmax.f32 %v6837_v35, 0.0  ;;  %v6007_v42 = vmax.f32 %v6839_v50, 0.0 }
 0x3eb   :  { %v6833_v58 = vpack.c.bf16 %v6005_v57, %v6004_v54  ;;  %v6834_v59 = vpack.c.bf16 %v6007_v42, %v6006_v55 }
 0x3ed   :  { %v6024_v48 = vrot.slane %v6833_v58, %v8276_v49  ;;  %v6031_v61 = vrot.slane %v6834_v59, %v8276_v49 }
 0x3ef   :  { %v6032_v63 = vcombine.low %v6024_v48, %v6031_v61 }
 0x3f1   :  { %6835 = vst.sshfl [vmem:[%s10647_s3] sm:$0x55 pattern:$0x73625140] %v6032_v63 }

</bundles_post_ra>
